<compile_context>
chip_gen: v6e
topology: v6e:2x2x1
jax: 0.10.0
libtpu: 0.0.40
codegen_flags: <defaults>
</compile_context>

<pallas_src>
import jax
import jax.numpy as jnp
from jax.experimental import pallas as pl
from jax.experimental.pallas import tpu as pltpu

K = 7           # conv kernel size
P = K // 2      # padding (3)


def spatial_attention_mtf(curr, weight, *, block_bytes_budget=2 * 1024 * 1024):
    """curr: (B, C, H, W); weight: (1, 2, K, K) from nn.Conv2d(2, 1, K, bias=False)."""
    B, C, H, W = curr.shape
    HW = H * W
    Hp, Wp = H + 2 * P, W + 2 * P

    # Fold the 1/C of the channel mean into the channel-0 weights and flatten to
    # 1D (avoids 2D SMEM padding waste + one full-map multiply in the kernel).
    w2 = weight.astype(jnp.float32).reshape(2, K * K)
    w_flat = jnp.concatenate([w2[0] * (1.0 / C), w2[1]], axis=0)       # (2*K*K,)

    # Lane-dense view for the reduce / gate / store path (contiguous reshape).
    curr2 = curr.reshape(B, C, HW)

    # Largest batch tile dividing B whose input block stays under budget, so
    # double-buffered in+out fit comfortably in scoped VMEM on all generations
    # (v5e 16 MiB default scoped, v7x 64 MiB physical / 32 MiB scoped).
    itemsize = jnp.dtype(curr.dtype).itemsize
    tb = 1
    for cand in range(1, B + 1):
        if B % cand == 0 and cand * C * HW * itemsize <= block_bytes_budget:
            tb = cand
    # TODO(synk): for very large C*H*W (single-batch block over budget) add a C
    # grid axis with pl.when init/finalize instead of loading the full channel dim.

    def kernel(w_ref, curr_ref, out_ref, pad_ref, att_ref):
        # w_ref   : SMEM (2*K*K,) f32, channel-0 block pre-scaled by 1/C
        # curr_ref: VMEM (tb, C, HW)   input dtype
        # out_ref : VMEM (tb, C, HW)
        # pad_ref : VMEM (2, tb, Hp, Wp) f32   zero-padded [sum; max] maps
        # att_ref : VMEM (tb, HW) f32          lane-dense attention map

        # ---- channel sum / max over lane-dense slabs (no full f32 block copy) ----
        v0 = curr_ref[:, 0, :].astype(jnp.float32)                     # (tb, HW)
        s, m = v0, v0
        for c in range(1, C):
            v = curr_ref[:, c, :].astype(jnp.float32)
            s = s + v
            m = jnp.maximum(m, v)

        # ---- zero only the 3-wide border (interior fully overwritten below) ----
        pad_ref[:, :, 0:P, :] = jnp.zeros((2, tb, P, Wp), jnp.float32)
        pad_ref[:, :, P + H:Hp, :] = jnp.zeros((2, tb, P, Wp), jnp.float32)
        pad_ref[:, :, :, 0:P] = jnp.zeros((2, tb, Hp, P), jnp.float32)
        pad_ref[:, :, :, P + W:Wp] = jnp.zeros((2, tb, Hp, P), jnp.float32)

        # ---- scatter flattened maps into the padded spatial scratch, row-wise ----
        for y in range(H):
            row = slice(y * W, (y + 1) * W)
            pad_ref[0, :, P + y, P:P + W] = s[:, row]
            pad_ref[1, :, P + y, P:P + W] = m[:, row]

        # ---- 7x7 conv: one lane-offset slice per (channel, kx), 7 sublane taps ----
        acc = jnp.zeros((tb, H, W), jnp.float32)
        for c in range(2):
            for kx in range(K):
                slab = pad_ref[c, :, :, kx:kx + W]                     # (tb, Hp, W)
                for ky in range(K):
                    w = w_ref[c * K * K + ky * K + kx]
                    acc = acc + w * slab[:, ky:ky + H, :]

        # ---- gather conv result back to the lane-dense layout, sigmoid once ----
        for y in range(H):
            att_ref[:, y * W:(y + 1) * W] = acc[:, y, :]
        att = jax.nn.sigmoid(att_ref[...]).astype(curr_ref.dtype)      # (tb, HW)

        # ---- gating: lane-dense multiply + full-lane stores, per channel slab ----
        for c in range(C):
            out_ref[:, c, :] = (curr_ref[:, c, :] * att).astype(out_ref.dtype)

    grid_spec = pltpu.PrefetchScalarGridSpec(
        num_scalar_prefetch=0,
        grid=(B // tb,),
        in_specs=[
            pl.BlockSpec(memory_space=pltpu.MemorySpace.SMEM),          # weights
            pl.BlockSpec((tb, C, HW), lambda b: (b, 0, 0)),             # curr (lane-dense)
        ],
        out_specs=pl.BlockSpec((tb, C, HW), lambda b: (b, 0, 0)),
        scratch_shapes=[
            pltpu.VMEM((2, tb, Hp, Wp), jnp.float32),                   # padded maps
            pltpu.VMEM((tb, HW), jnp.float32),                          # attention map
        ],
    )
    out2 = pl.pallas_call(
        kernel,
        out_shape=jax.ShapeDtypeStruct((B, C, HW), curr.dtype),
        grid_spec=grid_spec,
        compiler_params=pltpu.CompilerParams(
            dimension_semantics=("parallel",),
            vmem_limit_bytes=32 * 1024 * 1024,
        ),
    )(w_flat, curr2)
    return out2.reshape(B, C, H, W)


def reference_spatial_attention(curr, weight):
    """Pure-JAX reference mirroring the PyTorch forward."""
    avg = jnp.mean(curr, axis=1, keepdims=True)
    mx = jnp.max(curr, axis=1, keepdims=True)
    y = jnp.concatenate([avg, mx], axis=1)
    y = jax.lax.conv_general_dilated(
        y, weight, window_strides=(1, 1), padding=[(P, P), (P, P)],
        dimension_numbers=("NCHW", "OIHW", "NCHW"))
    return jax.nn.sigmoid(y) * curr


if __name__ == "__main__":
    key = jax.random.PRNGKey(0)
    k_x, k_w = jax.random.split(key)

    B, C, H, W = 2, 4, 16, 16
    curr = jax.random.normal(k_x, (B, C, H, W), dtype=jnp.float32)

    # Deterministic conv1 weight init (Kaiming-uniform-like, as nn.Conv2d would).
    fan_in = 2 * K * K
    bound = 1.0 / jnp.sqrt(float(fan_in))
    weight = jax.random.uniform(k_w, (1, 2, K, K), jnp.float32, -bound, bound)

    out = spatial_attention_mtf(curr, weight)
    out = jax.block_until_ready(out)

    ref = reference_spatial_attention(curr, weight)
    assert out.shape == curr.shape and out.dtype == curr.dtype
    assert jnp.allclose(out, ref, rtol=1e-5, atol=1e-5), "mismatch vs reference"

    print("KERNEL_OK")
</pallas_src>

<mosaic_0001>
module attributes {stable_mosaic.version = 11 : i64} {
  func.func @kernel(%arg0: i32, %arg1: memref<98xf32, #tpu.memory_space<smem>>, %arg2: memref<2x4x256xf32, #tpu.memory_space<vmem>>, %arg3: memref<2x4x256xf32, #tpu.memory_space<vmem>>, %arg4: memref<2x2x22x22xf32, #tpu.memory_space<vmem>>, %arg5: memref<2x256xf32, #tpu.memory_space<vmem>>) attributes {dimension_semantics = [#tpu.dimension_semantics<parallel>], iteration_bounds = array<i64: 1>, scalar_prefetch = 0 : i64, scratch_operands = 2 : i64, tpu.core_type = #tpu.core_type<tc>, window_params = [{transform_indices = @transform_0, window_bounds = array<i64: 98>}, {transform_indices = @transform_1, window_bounds = array<i64: 2, 4, 256>}, {transform_indices = @transform_2, window_bounds = array<i64: 2, 4, 256>}]} {
    %c0 = arith.constant 0 : index
    %c0_0 = arith.constant 0 : index
    %c0_1 = arith.constant 0 : index
    %0 = vector.load %arg2[%c0, %c0_0, %c0_1] : memref<2x4x256xf32, #tpu.memory_space<vmem>>, vector<2x1x256xf32>
    %1 = vector.shape_cast %0 : vector<2x1x256xf32> to vector<2x256xf32>
    %c0_2 = arith.constant 0 : index
    %c1 = arith.constant 1 : index
    %c0_3 = arith.constant 0 : index
    %2 = vector.load %arg2[%c0_2, %c1, %c0_3] : memref<2x4x256xf32, #tpu.memory_space<vmem>>, vector<2x1x256xf32>
    %3 = vector.shape_cast %2 : vector<2x1x256xf32> to vector<2x256xf32>
    %4 = arith.addf %1, %3 : vector<2x256xf32>
    %5 = arith.maximumf %1, %3 : vector<2x256xf32>
    %c0_4 = arith.constant 0 : index
    %c2 = arith.constant 2 : index
    %c0_5 = arith.constant 0 : index
    %6 = vector.load %arg2[%c0_4, %c2, %c0_5] : memref<2x4x256xf32, #tpu.memory_space<vmem>>, vector<2x1x256xf32>
    %7 = vector.shape_cast %6 : vector<2x1x256xf32> to vector<2x256xf32>
    %8 = arith.addf %4, %7 : vector<2x256xf32>
    %9 = arith.maximumf %5, %7 : vector<2x256xf32>
    %c0_6 = arith.constant 0 : index
    %c3 = arith.constant 3 : index
    %c0_7 = arith.constant 0 : index
    %10 = vector.load %arg2[%c0_6, %c3, %c0_7] : memref<2x4x256xf32, #tpu.memory_space<vmem>>, vector<2x1x256xf32>
    %11 = vector.shape_cast %10 : vector<2x1x256xf32> to vector<2x256xf32>
    %12 = arith.addf %8, %11 : vector<2x256xf32>
    %13 = arith.maximumf %9, %11 : vector<2x256xf32>
    %cst = arith.constant 0.000000e+00 : f32
    %14 = vector.broadcast %cst : f32 to vector<2x2x3x22xf32>
    %c0_8 = arith.constant 0 : index
    %c0_9 = arith.constant 0 : index
    %c0_10 = arith.constant 0 : index
    %c0_11 = arith.constant 0 : index
    %15 = vector.load %arg4[%c0_8, %c0_9, %c0_10, %c0_11] : memref<2x2x22x22xf32, #tpu.memory_space<vmem>>, vector<2x2x3x22xf32>
    tpu.vector_store %arg4[%c0_8, %c0_9, %c0_10, %c0_11], %14 {strides = array<i32>} : memref<2x2x22x22xf32, #tpu.memory_space<vmem>>, vector<2x2x3x22xf32>,
    %cst_12 = arith.constant 0.000000e+00 : f32
    %16 = vector.broadcast %cst_12 : f32 to vector<2x2x3x22xf32>
    %c0_13 = arith.constant 0 : index
    %c0_14 = arith.constant 0 : index
    %c19 = arith.constant 19 : index
    %c0_15 = arith.constant 0 : index
    %17 = vector.load %arg4[%c0_13, %c0_14, %c19, %c0_15] : memref<2x2x22x22xf32, #tpu.memory_space<vmem>>, vector<2x2x3x22xf32>
    tpu.vector_store %arg4[%c0_13, %c0_14, %c19, %c0_15], %16 {strides = array<i32>} : memref<2x2x22x22xf32, #tpu.memory_space<vmem>>, vector<2x2x3x22xf32>,
    %cst_16 = arith.constant 0.000000e+00 : f32
    %18 = vector.broadcast %cst_16 : f32 to vector<2x2x22x3xf32>
    %c0_17 = arith.constant 0 : index
    %c0_18 = arith.constant 0 : index
    %c0_19 = arith.constant 0 : index
    %c0_20 = arith.constant 0 : index
    %19 = vector.load %arg4[%c0_17, %c0_18, %c0_19, %c0_20] : memref<2x2x22x22xf32, #tpu.memory_space<vmem>>, vector<2x2x22x3xf32>
    tpu.vector_store %arg4[%c0_17, %c0_18, %c0_19, %c0_20], %18 {strides = array<i32>} : memref<2x2x22x22xf32, #tpu.memory_space<vmem>>, vector<2x2x22x3xf32>,
    %cst_21 = arith.constant 0.000000e+00 : f32
    %20 = vector.broadcast %cst_21 : f32 to vector<2x2x22x3xf32>
    %c0_22 = arith.constant 0 : index
    %c0_23 = arith.constant 0 : index
    %c0_24 = arith.constant 0 : index
    %c19_25 = arith.constant 19 : index
    %21 = vector.load %arg4[%c0_22, %c0_23, %c0_24, %c19_25] : memref<2x2x22x22xf32, #tpu.memory_space<vmem>>, vector<2x2x22x3xf32>
    tpu.vector_store %arg4[%c0_22, %c0_23, %c0_24, %c19_25], %20 {strides = array<i32>} : memref<2x2x22x22xf32, #tpu.memory_space<vmem>>, vector<2x2x22x3xf32>,
    %22 = vector.extract_strided_slice %12 {offsets = [0, 0], sizes = [2, 16], strides = [1, 1]} : vector<2x256xf32> to vector<2x16xf32>
    %c0_26 = arith.constant 0 : index
    %c0_27 = arith.constant 0 : index
    %c3_28 = arith.constant 3 : index
    %c3_29 = arith.constant 3 : index
    %23 = vector.load %arg4[%c0_26, %c0_27, %c3_28, %c3_29] : memref<2x2x22x22xf32, #tpu.memory_space<vmem>>, vector<1x2x1x16xf32>
    %24 = vector.shape_cast %23 : vector<1x2x1x16xf32> to vector<2x16xf32>
    %25 = vector.shape_cast %22 : vector<2x16xf32> to vector<1x2x1x16xf32>
    tpu.vector_store %arg4[%c0_26, %c0_27, %c3_28, %c3_29], %25 {strides = array<i32>} : memref<2x2x22x22xf32, #tpu.memory_space<vmem>>, vector<1x2x1x16xf32>,
    %26 = vector.extract_strided_slice %13 {offsets = [0, 0], sizes = [2, 16], strides = [1, 1]} : vector<2x256xf32> to vector<2x16xf32>
    %c1_30 = arith.constant 1 : index
    %c0_31 = arith.constant 0 : index
    %c3_32 = arith.constant 3 : index
    %c3_33 = arith.constant 3 : index
    %27 = vector.load %arg4[%c1_30, %c0_31, %c3_32, %c3_33] : memref<2x2x22x22xf32, #tpu.memory_space<vmem>>, vector<1x2x1x16xf32>
    %28 = vector.shape_cast %27 : vector<1x2x1x16xf32> to vector<2x16xf32>
    %29 = vector.shape_cast %26 : vector<2x16xf32> to vector<1x2x1x16xf32>
    tpu.vector_store %arg4[%c1_30, %c0_31, %c3_32, %c3_33], %29 {strides = array<i32>} : memref<2x2x22x22xf32, #tpu.memory_space<vmem>>, vector<1x2x1x16xf32>,
    %30 = vector.extract_strided_slice %12 {offsets = [0, 16], sizes = [2, 16], strides = [1, 1]} : vector<2x256xf32> to vector<2x16xf32>
    %c0_34 = arith.constant 0 : index
    %c0_35 = arith.constant 0 : index
    %c4 = arith.constant 4 : index
    %c3_36 = arith.constant 3 : index
    %31 = vector.load %arg4[%c0_34, %c0_35, %c4, %c3_36] : memref<2x2x22x22xf32, #tpu.memory_space<vmem>>, vector<1x2x1x16xf32>
    %32 = vector.shape_cast %31 : vector<1x2x1x16xf32> to vector<2x16xf32>
    %33 = vector.shape_cast %30 : vector<2x16xf32> to vector<1x2x1x16xf32>
    tpu.vector_store %arg4[%c0_34, %c0_35, %c4, %c3_36], %33 {strides = array<i32>} : memref<2x2x22x22xf32, #tpu.memory_space<vmem>>, vector<1x2x1x16xf32>,
    %34 = vector.extract_strided_slice %13 {offsets = [0, 16], sizes = [2, 16], strides = [1, 1]} : vector<2x256xf32> to vector<2x16xf32>
    %c1_37 = arith.constant 1 : index
    %c0_38 = arith.constant 0 : index
    %c4_39 = arith.constant 4 : index
    %c3_40 = arith.constant 3 : index
    %35 = vector.load %arg4[%c1_37, %c0_38, %c4_39, %c3_40] : memref<2x2x22x22xf32, #tpu.memory_space<vmem>>, vector<1x2x1x16xf32>
    %36 = vector.shape_cast %35 : vector<1x2x1x16xf32> to vector<2x16xf32>
    %37 = vector.shape_cast %34 : vector<2x16xf32> to vector<1x2x1x16xf32>
    tpu.vector_store %arg4[%c1_37, %c0_38, %c4_39, %c3_40], %37 {strides = array<i32>} : memref<2x2x22x22xf32, #tpu.memory_space<vmem>>, vector<1x2x1x16xf32>,
    %38 = vector.extract_strided_slice %12 {offsets = [0, 32], sizes = [2, 16], strides = [1, 1]} : vector<2x256xf32> to vector<2x16xf32>
    %c0_41 = arith.constant 0 : index
    %c0_42 = arith.constant 0 : index
    %c5 = arith.constant 5 : index
    %c3_43 = arith.constant 3 : index
    %39 = vector.load %arg4[%c0_41, %c0_42, %c5, %c3_43] : memref<2x2x22x22xf32, #tpu.memory_space<vmem>>, vector<1x2x1x16xf32>
    %40 = vector.shape_cast %39 : vector<1x2x1x16xf32> to vector<2x16xf32>
    %41 = vector.shape_cast %38 : vector<2x16xf32> to vector<1x2x1x16xf32>
    tpu.vector_store %arg4[%c0_41, %c0_42, %c5, %c3_43], %41 {strides = array<i32>} : memref<2x2x22x22xf32, #tpu.memory_space<vmem>>, vector<1x2x1x16xf32>,
    %42 = vector.extract_strided_slice %13 {offsets = [0, 32], sizes = [2, 16], strides = [1, 1]} : vector<2x256xf32> to vector<2x16xf32>
    %c1_44 = arith.constant 1 : index
    %c0_45 = arith.constant 0 : index
    %c5_46 = arith.constant 5 : index
    %c3_47 = arith.constant 3 : index
    %43 = vector.load %arg4[%c1_44, %c0_45, %c5_46, %c3_47] : memref<2x2x22x22xf32, #tpu.memory_space<vmem>>, vector<1x2x1x16xf32>
    %44 = vector.shape_cast %43 : vector<1x2x1x16xf32> to vector<2x16xf32>
    %45 = vector.shape_cast %42 : vector<2x16xf32> to vector<1x2x1x16xf32>
    tpu.vector_store %arg4[%c1_44, %c0_45, %c5_46, %c3_47], %45 {strides = array<i32>} : memref<2x2x22x22xf32, #tpu.memory_space<vmem>>, vector<1x2x1x16xf32>,
    %46 = vector.extract_strided_slice %12 {offsets = [0, 48], sizes = [2, 16], strides = [1, 1]} : vector<2x256xf32> to vector<2x16xf32>
    %c0_48 = arith.constant 0 : index
    %c0_49 = arith.constant 0 : index
    %c6 = arith.constant 6 : index
    %c3_50 = arith.constant 3 : index
    %47 = vector.load %arg4[%c0_48, %c0_49, %c6, %c3_50] : memref<2x2x22x22xf32, #tpu.memory_space<vmem>>, vector<1x2x1x16xf32>
    %48 = vector.shape_cast %47 : vector<1x2x1x16xf32> to vector<2x16xf32>
    %49 = vector.shape_cast %46 : vector<2x16xf32> to vector<1x2x1x16xf32>
    tpu.vector_store %arg4[%c0_48, %c0_49, %c6, %c3_50], %49 {strides = array<i32>} : memref<2x2x22x22xf32, #tpu.memory_space<vmem>>, vector<1x2x1x16xf32>,
    %50 = vector.extract_strided_slice %13 {offsets = [0, 48], sizes = [2, 16], strides = [1, 1]} : vector<2x256xf32> to vector<2x16xf32>
    %c1_51 = arith.constant 1 : index
    %c0_52 = arith.constant 0 : index
    %c6_53 = arith.constant 6 : index
    %c3_54 = arith.constant 3 : index
    %51 = vector.load %arg4[%c1_51, %c0_52, %c6_53, %c3_54] : memref<2x2x22x22xf32, #tpu.memory_space<vmem>>, vector<1x2x1x16xf32>
    %52 = vector.shape_cast %51 : vector<1x2x1x16xf32> to vector<2x16xf32>
    %53 = vector.shape_cast %50 : vector<2x16xf32> to vector<1x2x1x16xf32>
    tpu.vector_store %arg4[%c1_51, %c0_52, %c6_53, %c3_54], %53 {strides = array<i32>} : memref<2x2x22x22xf32, #tpu.memory_space<vmem>>, vector<1x2x1x16xf32>,
    %54 = vector.extract_strided_slice %12 {offsets = [0, 64], sizes = [2, 16], strides = [1, 1]} : vector<2x256xf32> to vector<2x16xf32>
    %c0_55 = arith.constant 0 : index
    %c0_56 = arith.constant 0 : index
    %c7 = arith.constant 7 : index
    %c3_57 = arith.constant 3 : index
    %55 = vector.load %arg4[%c0_55, %c0_56, %c7, %c3_57] : memref<2x2x22x22xf32, #tpu.memory_space<vmem>>, vector<1x2x1x16xf32>
    %56 = vector.shape_cast %55 : vector<1x2x1x16xf32> to vector<2x16xf32>
    %57 = vector.shape_cast %54 : vector<2x16xf32> to vector<1x2x1x16xf32>
    tpu.vector_store %arg4[%c0_55, %c0_56, %c7, %c3_57], %57 {strides = array<i32>} : memref<2x2x22x22xf32, #tpu.memory_space<vmem>>, vector<1x2x1x16xf32>,
    %58 = vector.extract_strided_slice %13 {offsets = [0, 64], sizes = [2, 16], strides = [1, 1]} : vector<2x256xf32> to vector<2x16xf32>
    %c1_58 = arith.constant 1 : index
    %c0_59 = arith.constant 0 : index
    %c7_60 = arith.constant 7 : index
    %c3_61 = arith.constant 3 : index
    %59 = vector.load %arg4[%c1_58, %c0_59, %c7_60, %c3_61] : memref<2x2x22x22xf32, #tpu.memory_space<vmem>>, vector<1x2x1x16xf32>
    %60 = vector.shape_cast %59 : vector<1x2x1x16xf32> to vector<2x16xf32>
    %61 = vector.shape_cast %58 : vector<2x16xf32> to vector<1x2x1x16xf32>
    tpu.vector_store %arg4[%c1_58, %c0_59, %c7_60, %c3_61], %61 {strides = array<i32>} : memref<2x2x22x22xf32, #tpu.memory_space<vmem>>, vector<1x2x1x16xf32>,
    %62 = vector.extract_strided_slice %12 {offsets = [0, 80], sizes = [2, 16], strides = [1, 1]} : vector<2x256xf32> to vector<2x16xf32>
    %c0_62 = arith.constant 0 : index
    %c0_63 = arith.constant 0 : index
    %c8 = arith.constant 8 : index
    %c3_64 = arith.constant 3 : index
    %63 = vector.load %arg4[%c0_62, %c0_63, %c8, %c3_64] : memref<2x2x22x22xf32, #tpu.memory_space<vmem>>, vector<1x2x1x16xf32>
    %64 = vector.shape_cast %63 : vector<1x2x1x16xf32> to vector<2x16xf32>
    %65 = vector.shape_cast %62 : vector<2x16xf32> to vector<1x2x1x16xf32>
    tpu.vector_store %arg4[%c0_62, %c0_63, %c8, %c3_64], %65 {strides = array<i32>} : memref<2x2x22x22xf32, #tpu.memory_space<vmem>>, vector<1x2x1x16xf32>,
    %66 = vector.extract_strided_slice %13 {offsets = [0, 80], sizes = [2, 16], strides = [1, 1]} : vector<2x256xf32> to vector<2x16xf32>
    %c1_65 = arith.constant 1 : index
    %c0_66 = arith.constant 0 : index
    %c8_67 = arith.constant 8 : index
    %c3_68 = arith.constant 3 : index
    %67 = vector.load %arg4[%c1_65, %c0_66, %c8_67, %c3_68] : memref<2x2x22x22xf32, #tpu.memory_space<vmem>>, vector<1x2x1x16xf32>
    %68 = vector.shape_cast %67 : vector<1x2x1x16xf32> to vector<2x16xf32>
    %69 = vector.shape_cast %66 : vector<2x16xf32> to vector<1x2x1x16xf32>
    tpu.vector_store %arg4[%c1_65, %c0_66, %c8_67, %c3_68], %69 {strides = array<i32>} : memref<2x2x22x22xf32, #tpu.memory_space<vmem>>, vector<1x2x1x16xf32>,
    %70 = vector.extract_strided_slice %12 {offsets = [0, 96], sizes = [2, 16], strides = [1, 1]} : vector<2x256xf32> to vector<2x16xf32>
    %c0_69 = arith.constant 0 : index
    %c0_70 = arith.constant 0 : index
    %c9 = arith.constant 9 : index
    %c3_71 = arith.constant 3 : index
    %71 = vector.load %arg4[%c0_69, %c0_70, %c9, %c3_71] : memref<2x2x22x22xf32, #tpu.memory_space<vmem>>, vector<1x2x1x16xf32>
    %72 = vector.shape_cast %71 : vector<1x2x1x16xf32> to vector<2x16xf32>
    %73 = vector.shape_cast %70 : vector<2x16xf32> to vector<1x2x1x16xf32>
    tpu.vector_store %arg4[%c0_69, %c0_70, %c9, %c3_71], %73 {strides = array<i32>} : memref<2x2x22x22xf32, #tpu.memory_space<vmem>>, vector<1x2x1x16xf32>,
    %74 = vector.extract_strided_slice %13 {offsets = [0, 96], sizes = [2, 16], strides = [1, 1]} : vector<2x256xf32> to vector<2x16xf32>
    %c1_72 = arith.constant 1 : index
    %c0_73 = arith.constant 0 : index
    %c9_74 = arith.constant 9 : index
    %c3_75 = arith.constant 3 : index
    %75 = vector.load %arg4[%c1_72, %c0_73, %c9_74, %c3_75] : memref<2x2x22x22xf32, #tpu.memory_space<vmem>>, vector<1x2x1x16xf32>
    %76 = vector.shape_cast %75 : vector<1x2x1x16xf32> to vector<2x16xf32>
    %77 = vector.shape_cast %74 : vector<2x16xf32> to vector<1x2x1x16xf32>
    tpu.vector_store %arg4[%c1_72, %c0_73, %c9_74, %c3_75], %77 {strides = array<i32>} : memref<2x2x22x22xf32, #tpu.memory_space<vmem>>, vector<1x2x1x16xf32>,
    %78 = vector.extract_strided_slice %12 {offsets = [0, 112], sizes = [2, 16], strides = [1, 1]} : vector<2x256xf32> to vector<2x16xf32>
    %c0_76 = arith.constant 0 : index
    %c0_77 = arith.constant 0 : index
    %c10 = arith.constant 10 : index
    %c3_78 = arith.constant 3 : index
    %79 = vector.load %arg4[%c0_76, %c0_77, %c10, %c3_78] : memref<2x2x22x22xf32, #tpu.memory_space<vmem>>, vector<1x2x1x16xf32>
    %80 = vector.shape_cast %79 : vector<1x2x1x16xf32> to vector<2x16xf32>
    %81 = vector.shape_cast %78 : vector<2x16xf32> to vector<1x2x1x16xf32>
    tpu.vector_store %arg4[%c0_76, %c0_77, %c10, %c3_78], %81 {strides = array<i32>} : memref<2x2x22x22xf32, #tpu.memory_space<vmem>>, vector<1x2x1x16xf32>,
    %82 = vector.extract_strided_slice %13 {offsets = [0, 112], sizes = [2, 16], strides = [1, 1]} : vector<2x256xf32> to vector<2x16xf32>
    %c1_79 = arith.constant 1 : index
    %c0_80 = arith.constant 0 : index
    %c10_81 = arith.constant 10 : index
    %c3_82 = arith.constant 3 : index
    %83 = vector.load %arg4[%c1_79, %c0_80, %c10_81, %c3_82] : memref<2x2x22x22xf32, #tpu.memory_space<vmem>>, vector<1x2x1x16xf32>
    %84 = vector.shape_cast %83 : vector<1x2x1x16xf32> to vector<2x16xf32>
    %85 = vector.shape_cast %82 : vector<2x16xf32> to vector<1x2x1x16xf32>
    tpu.vector_store %arg4[%c1_79, %c0_80, %c10_81, %c3_82], %85 {strides = array<i32>} : memref<2x2x22x22xf32, #tpu.memory_space<vmem>>, vector<1x2x1x16xf32>,
    %86 = vector.extract_strided_slice %12 {offsets = [0, 128], sizes = [2, 16], strides = [1, 1]} : vector<2x256xf32> to vector<2x16xf32>
    %c0_83 = arith.constant 0 : index
    %c0_84 = arith.constant 0 : index
    %c11 = arith.constant 11 : index
    %c3_85 = arith.constant 3 : index
    %87 = vector.load %arg4[%c0_83, %c0_84, %c11, %c3_85] : memref<2x2x22x22xf32, #tpu.memory_space<vmem>>, vector<1x2x1x16xf32>
    %88 = vector.shape_cast %87 : vector<1x2x1x16xf32> to vector<2x16xf32>
    %89 = vector.shape_cast %86 : vector<2x16xf32> to vector<1x2x1x16xf32>
    tpu.vector_store %arg4[%c0_83, %c0_84, %c11, %c3_85], %89 {strides = array<i32>} : memref<2x2x22x22xf32, #tpu.memory_space<vmem>>, vector<1x2x1x16xf32>,
    %90 = vector.extract_strided_slice %13 {offsets = [0, 128], sizes = [2, 16], strides = [1, 1]} : vector<2x256xf32> to vector<2x16xf32>
    %c1_86 = arith.constant 1 : index
    %c0_87 = arith.constant 0 : index
    %c11_88 = arith.constant 11 : index
    %c3_89 = arith.constant 3 : index
    %91 = vector.load %arg4[%c1_86, %c0_87, %c11_88, %c3_89] : memref<2x2x22x22xf32, #tpu.memory_space<vmem>>, vector<1x2x1x16xf32>
    %92 = vector.shape_cast %91 : vector<1x2x1x16xf32> to vector<2x16xf32>
    %93 = vector.shape_cast %90 : vector<2x16xf32> to vector<1x2x1x16xf32>
    tpu.vector_store %arg4[%c1_86, %c0_87, %c11_88, %c3_89], %93 {strides = array<i32>} : memref<2x2x22x22xf32, #tpu.memory_space<vmem>>, vector<1x2x1x16xf32>,
    %94 = vector.extract_strided_slice %12 {offsets = [0, 144], sizes = [2, 16], strides = [1, 1]} : vector<2x256xf32> to vector<2x16xf32>
    %c0_90 = arith.constant 0 : index
    %c0_91 = arith.constant 0 : index
    %c12 = arith.constant 12 : index
    %c3_92 = arith.constant 3 : index
    %95 = vector.load %arg4[%c0_90, %c0_91, %c12, %c3_92] : memref<2x2x22x22xf32, #tpu.memory_space<vmem>>, vector<1x2x1x16xf32>
    %96 = vector.shape_cast %95 : vector<1x2x1x16xf32> to vector<2x16xf32>
    %97 = vector.shape_cast %94 : vector<2x16xf32> to vector<1x2x1x16xf32>
    tpu.vector_store %arg4[%c0_90, %c0_91, %c12, %c3_92], %97 {strides = array<i32>} : memref<2x2x22x22xf32, #tpu.memory_space<vmem>>, vector<1x2x1x16xf32>,
    %98 = vector.extract_strided_slice %13 {offsets = [0, 144], sizes = [2, 16], strides = [1, 1]} : vector<2x256xf32> to vector<2x16xf32>
    %c1_93 = arith.constant 1 : index
    %c0_94 = arith.constant 0 : index
    %c12_95 = arith.constant 12 : index
    %c3_96 = arith.constant 3 : index
    %99 = vector.load %arg4[%c1_93, %c0_94, %c12_95, %c3_96] : memref<2x2x22x22xf32, #tpu.memory_space<vmem>>, vector<1x2x1x16xf32>
    %100 = vector.shape_cast %99 : vector<1x2x1x16xf32> to vector<2x16xf32>
    %101 = vector.shape_cast %98 : vector<2x16xf32> to vector<1x2x1x16xf32>
    tpu.vector_store %arg4[%c1_93, %c0_94, %c12_95, %c3_96], %101 {strides = array<i32>} : memref<2x2x22x22xf32, #tpu.memory_space<vmem>>, vector<1x2x1x16xf32>,
    %102 = vector.extract_strided_slice %12 {offsets = [0, 160], sizes = [2, 16], strides = [1, 1]} : vector<2x256xf32> to vector<2x16xf32>
    %c0_97 = arith.constant 0 : index
    %c0_98 = arith.constant 0 : index
    %c13 = arith.constant 13 : index
    %c3_99 = arith.constant 3 : index
    %103 = vector.load %arg4[%c0_97, %c0_98, %c13, %c3_99] : memref<2x2x22x22xf32, #tpu.memory_space<vmem>>, vector<1x2x1x16xf32>
    %104 = vector.shape_cast %103 : vector<1x2x1x16xf32> to vector<2x16xf32>
    %105 = vector.shape_cast %102 : vector<2x16xf32> to vector<1x2x1x16xf32>
    tpu.vector_store %arg4[%c0_97, %c0_98, %c13, %c3_99], %105 {strides = array<i32>} : memref<2x2x22x22xf32, #tpu.memory_space<vmem>>, vector<1x2x1x16xf32>,
    %106 = vector.extract_strided_slice %13 {offsets = [0, 160], sizes = [2, 16], strides = [1, 1]} : vector<2x256xf32> to vector<2x16xf32>
    %c1_100 = arith.constant 1 : index
    %c0_101 = arith.constant 0 : index
    %c13_102 = arith.constant 13 : index
    %c3_103 = arith.constant 3 : index
    %107 = vector.load %arg4[%c1_100, %c0_101, %c13_102, %c3_103] : memref<2x2x22x22xf32, #tpu.memory_space<vmem>>, vector<1x2x1x16xf32>
    %108 = vector.shape_cast %107 : vector<1x2x1x16xf32> to vector<2x16xf32>
    %109 = vector.shape_cast %106 : vector<2x16xf32> to vector<1x2x1x16xf32>
    tpu.vector_store %arg4[%c1_100, %c0_101, %c13_102, %c3_103], %109 {strides = array<i32>} : memref<2x2x22x22xf32, #tpu.memory_space<vmem>>, vector<1x2x1x16xf32>,
    %110 = vector.extract_strided_slice %12 {offsets = [0, 176], sizes = [2, 16], strides = [1, 1]} : vector<2x256xf32> to vector<2x16xf32>
    %c0_104 = arith.constant 0 : index
    %c0_105 = arith.constant 0 : index
    %c14 = arith.constant 14 : index
    %c3_106 = arith.constant 3 : index
    %111 = vector.load %arg4[%c0_104, %c0_105, %c14, %c3_106] : memref<2x2x22x22xf32, #tpu.memory_space<vmem>>, vector<1x2x1x16xf32>
    %112 = vector.shape_cast %111 : vector<1x2x1x16xf32> to vector<2x16xf32>
    %113 = vector.shape_cast %110 : vector<2x16xf32> to vector<1x2x1x16xf32>
    tpu.vector_store %arg4[%c0_104, %c0_105, %c14, %c3_106], %113 {strides = array<i32>} : memref<2x2x22x22xf32, #tpu.memory_space<vmem>>, vector<1x2x1x16xf32>,
    %114 = vector.extract_strided_slice %13 {offsets = [0, 176], sizes = [2, 16], strides = [1, 1]} : vector<2x256xf32> to vector<2x16xf32>
    %c1_107 = arith.constant 1 : index
    %c0_108 = arith.constant 0 : index
    %c14_109 = arith.constant 14 : index
    %c3_110 = arith.constant 3 : index
    %115 = vector.load %arg4[%c1_107, %c0_108, %c14_109, %c3_110] : memref<2x2x22x22xf32, #tpu.memory_space<vmem>>, vector<1x2x1x16xf32>
    %116 = vector.shape_cast %115 : vector<1x2x1x16xf32> to vector<2x16xf32>
    %117 = vector.shape_cast %114 : vector<2x16xf32> to vector<1x2x1x16xf32>
    tpu.vector_store %arg4[%c1_107, %c0_108, %c14_109, %c3_110], %117 {strides = array<i32>} : memref<2x2x22x22xf32, #tpu.memory_space<vmem>>, vector<1x2x1x16xf32>,
    %118 = vector.extract_strided_slice %12 {offsets = [0, 192], sizes = [2, 16], strides = [1, 1]} : vector<2x256xf32> to vector<2x16xf32>
    %c0_111 = arith.constant 0 : index
    %c0_112 = arith.constant 0 : index
    %c15 = arith.constant 15 : index
    %c3_113 = arith.constant 3 : index
    %119 = vector.load %arg4[%c0_111, %c0_112, %c15, %c3_113] : memref<2x2x22x22xf32, #tpu.memory_space<vmem>>, vector<1x2x1x16xf32>
    %120 = vector.shape_cast %119 : vector<1x2x1x16xf32> to vector<2x16xf32>
    %121 = vector.shape_cast %118 : vector<2x16xf32> to vector<1x2x1x16xf32>
    tpu.vector_store %arg4[%c0_111, %c0_112, %c15, %c3_113], %121 {strides = array<i32>} : memref<2x2x22x22xf32, #tpu.memory_space<vmem>>, vector<1x2x1x16xf32>,
    %122 = vector.extract_strided_slice %13 {offsets = [0, 192], sizes = [2, 16], strides = [1, 1]} : vector<2x256xf32> to vector<2x16xf32>
    %c1_114 = arith.constant 1 : index
    %c0_115 = arith.constant 0 : index
    %c15_116 = arith.constant 15 : index
    %c3_117 = arith.constant 3 : index
    %123 = vector.load %arg4[%c1_114, %c0_115, %c15_116, %c3_117] : memref<2x2x22x22xf32, #tpu.memory_space<vmem>>, vector<1x2x1x16xf32>
    %124 = vector.shape_cast %123 : vector<1x2x1x16xf32> to vector<2x16xf32>
    %125 = vector.shape_cast %122 : vector<2x16xf32> to vector<1x2x1x16xf32>
    tpu.vector_store %arg4[%c1_114, %c0_115, %c15_116, %c3_117], %125 {strides = array<i32>} : memref<2x2x22x22xf32, #tpu.memory_space<vmem>>, vector<1x2x1x16xf32>,
    %126 = vector.extract_strided_slice %12 {offsets = [0, 208], sizes = [2, 16], strides = [1, 1]} : vector<2x256xf32> to vector<2x16xf32>
    %c0_118 = arith.constant 0 : index
    %c0_119 = arith.constant 0 : index
    %c16 = arith.constant 16 : index
    %c3_120 = arith.constant 3 : index
    %127 = vector.load %arg4[%c0_118, %c0_119, %c16, %c3_120] : memref<2x2x22x22xf32, #tpu.memory_space<vmem>>, vector<1x2x1x16xf32>
    %128 = vector.shape_cast %127 : vector<1x2x1x16xf32> to vector<2x16xf32>
    %129 = vector.shape_cast %126 : vector<2x16xf32> to vector<1x2x1x16xf32>
    tpu.vector_store %arg4[%c0_118, %c0_119, %c16, %c3_120], %129 {strides = array<i32>} : memref<2x2x22x22xf32, #tpu.memory_space<vmem>>, vector<1x2x1x16xf32>,
    %130 = vector.extract_strided_slice %13 {offsets = [0, 208], sizes = [2, 16], strides = [1, 1]} : vector<2x256xf32> to vector<2x16xf32>
    %c1_121 = arith.constant 1 : index
    %c0_122 = arith.constant 0 : index
    %c16_123 = arith.constant 16 : index
    %c3_124 = arith.constant 3 : index
    %131 = vector.load %arg4[%c1_121, %c0_122, %c16_123, %c3_124] : memref<2x2x22x22xf32, #tpu.memory_space<vmem>>, vector<1x2x1x16xf32>
    %132 = vector.shape_cast %131 : vector<1x2x1x16xf32> to vector<2x16xf32>
    %133 = vector.shape_cast %130 : vector<2x16xf32> to vector<1x2x1x16xf32>
    tpu.vector_store %arg4[%c1_121, %c0_122, %c16_123, %c3_124], %133 {strides = array<i32>} : memref<2x2x22x22xf32, #tpu.memory_space<vmem>>, vector<1x2x1x16xf32>,
    %134 = vector.extract_strided_slice %12 {offsets = [0, 224], sizes = [2, 16], strides = [1, 1]} : vector<2x256xf32> to vector<2x16xf32>
    %c0_125 = arith.constant 0 : index
    %c0_126 = arith.constant 0 : index
    %c17 = arith.constant 17 : index
    %c3_127 = arith.constant 3 : index
    %135 = vector.load %arg4[%c0_125, %c0_126, %c17, %c3_127] : memref<2x2x22x22xf32, #tpu.memory_space<vmem>>, vector<1x2x1x16xf32>
    %136 = vector.shape_cast %135 : vector<1x2x1x16xf32> to vector<2x16xf32>
    %137 = vector.shape_cast %134 : vector<2x16xf32> to vector<1x2x1x16xf32>
    tpu.vector_store %arg4[%c0_125, %c0_126, %c17, %c3_127], %137 {strides = array<i32>} : memref<2x2x22x22xf32, #tpu.memory_space<vmem>>, vector<1x2x1x16xf32>,
    %138 = vector.extract_strided_slice %13 {offsets = [0, 224], sizes = [2, 16], strides = [1, 1]} : vector<2x256xf32> to vector<2x16xf32>
    %c1_128 = arith.constant 1 : index
    %c0_129 = arith.constant 0 : index
    %c17_130 = arith.constant 17 : index
    %c3_131 = arith.constant 3 : index
    %139 = vector.load %arg4[%c1_128, %c0_129, %c17_130, %c3_131] : memref<2x2x22x22xf32, #tpu.memory_space<vmem>>, vector<1x2x1x16xf32>
    %140 = vector.shape_cast %139 : vector<1x2x1x16xf32> to vector<2x16xf32>
    %141 = vector.shape_cast %138 : vector<2x16xf32> to vector<1x2x1x16xf32>
    tpu.vector_store %arg4[%c1_128, %c0_129, %c17_130, %c3_131], %141 {strides = array<i32>} : memref<2x2x22x22xf32, #tpu.memory_space<vmem>>, vector<1x2x1x16xf32>,
    %142 = vector.extract_strided_slice %12 {offsets = [0, 240], sizes = [2, 16], strides = [1, 1]} : vector<2x256xf32> to vector<2x16xf32>
    %c0_132 = arith.constant 0 : index
    %c0_133 = arith.constant 0 : index
    %c18 = arith.constant 18 : index
    %c3_134 = arith.constant 3 : index
    %143 = vector.load %arg4[%c0_132, %c0_133, %c18, %c3_134] : memref<2x2x22x22xf32, #tpu.memory_space<vmem>>, vector<1x2x1x16xf32>
    %144 = vector.shape_cast %143 : vector<1x2x1x16xf32> to vector<2x16xf32>
    %145 = vector.shape_cast %142 : vector<2x16xf32> to vector<1x2x1x16xf32>
    tpu.vector_store %arg4[%c0_132, %c0_133, %c18, %c3_134], %145 {strides = array<i32>} : memref<2x2x22x22xf32, #tpu.memory_space<vmem>>, vector<1x2x1x16xf32>,
    %146 = vector.extract_strided_slice %13 {offsets = [0, 240], sizes = [2, 16], strides = [1, 1]} : vector<2x256xf32> to vector<2x16xf32>
    %c1_135 = arith.constant 1 : index
    %c0_136 = arith.constant 0 : index
    %c18_137 = arith.constant 18 : index
    %c3_138 = arith.constant 3 : index
    %147 = vector.load %arg4[%c1_135, %c0_136, %c18_137, %c3_138] : memref<2x2x22x22xf32, #tpu.memory_space<vmem>>, vector<1x2x1x16xf32>
    %148 = vector.shape_cast %147 : vector<1x2x1x16xf32> to vector<2x16xf32>
    %149 = vector.shape_cast %146 : vector<2x16xf32> to vector<1x2x1x16xf32>
    tpu.vector_store %arg4[%c1_135, %c0_136, %c18_137, %c3_138], %149 {strides = array<i32>} : memref<2x2x22x22xf32, #tpu.memory_space<vmem>>, vector<1x2x1x16xf32>,
    %cst_139 = arith.constant 0.000000e+00 : f32
    %150 = vector.broadcast %cst_139 : f32 to vector<2x16x16xf32>
    %c0_140 = arith.constant 0 : index
    %c0_141 = arith.constant 0 : index
    %c0_142 = arith.constant 0 : index
    %c0_143 = arith.constant 0 : index
    %151 = vector.load %arg4[%c0_140, %c0_141, %c0_142, %c0_143] : memref<2x2x22x22xf32, #tpu.memory_space<vmem>>, vector<1x2x22x16xf32>
    %152 = vector.shape_cast %151 : vector<1x2x22x16xf32> to vector<2x22x16xf32>
    %c0_144 = arith.constant 0 : index
    %153 = memref.load %arg1[%c0_144] : memref<98xf32, #tpu.memory_space<smem>>
    %154 = vector.extract_strided_slice %152 {offsets = [0, 0, 0], sizes = [2, 16, 16], strides = [1, 1, 1]} : vector<2x22x16xf32> to vector<2x16x16xf32>
    %155 = vector.broadcast %153 : f32 to vector<2x16x16xf32>
    %156 = arith.mulf %155, %154 : vector<2x16x16xf32>
    %157 = arith.addf %150, %156 : vector<2x16x16xf32>
    %c7_145 = arith.constant 7 : index
    %158 = memref.load %arg1[%c7_145] : memref<98xf32, #tpu.memory_space<smem>>
    %159 = vector.extract_strided_slice %152 {offsets = [0, 1, 0], sizes = [2, 16, 16], strides = [1, 1, 1]} : vector<2x22x16xf32> to vector<2x16x16xf32>
    %160 = vector.broadcast %158 : f32 to vector<2x16x16xf32>
    %161 = arith.mulf %160, %159 : vector<2x16x16xf32>
    %162 = arith.addf %157, %161 : vector<2x16x16xf32>
    %c14_146 = arith.constant 14 : index
    %163 = memref.load %arg1[%c14_146] : memref<98xf32, #tpu.memory_space<smem>>
    %164 = vector.extract_strided_slice %152 {offsets = [0, 2, 0], sizes = [2, 16, 16], strides = [1, 1, 1]} : vector<2x22x16xf32> to vector<2x16x16xf32>
    %165 = vector.broadcast %163 : f32 to vector<2x16x16xf32>
    %166 = arith.mulf %165, %164 : vector<2x16x16xf32>
    %167 = arith.addf %162, %166 : vector<2x16x16xf32>
    %c21 = arith.constant 21 : index
    %168 = memref.load %arg1[%c21] : memref<98xf32, #tpu.memory_space<smem>>
    %169 = vector.extract_strided_slice %152 {offsets = [0, 3, 0], sizes = [2, 16, 16], strides = [1, 1, 1]} : vector<2x22x16xf32> to vector<2x16x16xf32>
    %170 = vector.broadcast %168 : f32 to vector<2x16x16xf32>
    %171 = arith.mulf %170, %169 : vector<2x16x16xf32>
    %172 = arith.addf %167, %171 : vector<2x16x16xf32>
    %c28 = arith.constant 28 : index
    %173 = memref.load %arg1[%c28] : memref<98xf32, #tpu.memory_space<smem>>
    %174 = vector.extract_strided_slice %152 {offsets = [0, 4, 0], sizes = [2, 16, 16], strides = [1, 1, 1]} : vector<2x22x16xf32> to vector<2x16x16xf32>
    %175 = vector.broadcast %173 : f32 to vector<2x16x16xf32>
    %176 = arith.mulf %175, %174 : vector<2x16x16xf32>
    %177 = arith.addf %172, %176 : vector<2x16x16xf32>
    %c35 = arith.constant 35 : index
    %178 = memref.load %arg1[%c35] : memref<98xf32, #tpu.memory_space<smem>>
    %179 = vector.extract_strided_slice %152 {offsets = [0, 5, 0], sizes = [2, 16, 16], strides = [1, 1, 1]} : vector<2x22x16xf32> to vector<2x16x16xf32>
    %180 = vector.broadcast %178 : f32 to vector<2x16x16xf32>
    %181 = arith.mulf %180, %179 : vector<2x16x16xf32>
    %182 = arith.addf %177, %181 : vector<2x16x16xf32>
    %c42 = arith.constant 42 : index
    %183 = memref.load %arg1[%c42] : memref<98xf32, #tpu.memory_space<smem>>
    %184 = vector.extract_strided_slice %152 {offsets = [0, 6, 0], sizes = [2, 16, 16], strides = [1, 1, 1]} : vector<2x22x16xf32> to vector<2x16x16xf32>
    %185 = vector.broadcast %183 : f32 to vector<2x16x16xf32>
    %186 = arith.mulf %185, %184 : vector<2x16x16xf32>
    %187 = arith.addf %182, %186 : vector<2x16x16xf32>
    %c0_147 = arith.constant 0 : index
    %c0_148 = arith.constant 0 : index
    %c0_149 = arith.constant 0 : index
    %c1_150 = arith.constant 1 : index
    %188 = vector.load %arg4[%c0_147, %c0_148, %c0_149, %c1_150] : memref<2x2x22x22xf32, #tpu.memory_space<vmem>>, vector<1x2x22x16xf32>
    %189 = vector.shape_cast %188 : vector<1x2x22x16xf32> to vector<2x22x16xf32>
    %c1_151 = arith.constant 1 : index
    %190 = memref.load %arg1[%c1_151] : memref<98xf32, #tpu.memory_space<smem>>
    %191 = vector.extract_strided_slice %189 {offsets = [0, 0, 0], sizes = [2, 16, 16], strides = [1, 1, 1]} : vector<2x22x16xf32> to vector<2x16x16xf32>
    %192 = vector.broadcast %190 : f32 to vector<2x16x16xf32>
    %193 = arith.mulf %192, %191 : vector<2x16x16xf32>
    %194 = arith.addf %187, %193 : vector<2x16x16xf32>
    %c8_152 = arith.constant 8 : index
    %195 = memref.load %arg1[%c8_152] : memref<98xf32, #tpu.memory_space<smem>>
    %196 = vector.extract_strided_slice %189 {offsets = [0, 1, 0], sizes = [2, 16, 16], strides = [1, 1, 1]} : vector<2x22x16xf32> to vector<2x16x16xf32>
    %197 = vector.broadcast %195 : f32 to vector<2x16x16xf32>
    %198 = arith.mulf %197, %196 : vector<2x16x16xf32>
    %199 = arith.addf %194, %198 : vector<2x16x16xf32>
    %c15_153 = arith.constant 15 : index
    %200 = memref.load %arg1[%c15_153] : memref<98xf32, #tpu.memory_space<smem>>
    %201 = vector.extract_strided_slice %189 {offsets = [0, 2, 0], sizes = [2, 16, 16], strides = [1, 1, 1]} : vector<2x22x16xf32> to vector<2x16x16xf32>
    %202 = vector.broadcast %200 : f32 to vector<2x16x16xf32>
    %203 = arith.mulf %202, %201 : vector<2x16x16xf32>
    %204 = arith.addf %199, %203 : vector<2x16x16xf32>
    %c22 = arith.constant 22 : index
    %205 = memref.load %arg1[%c22] : memref<98xf32, #tpu.memory_space<smem>>
    %206 = vector.extract_strided_slice %189 {offsets = [0, 3, 0], sizes = [2, 16, 16], strides = [1, 1, 1]} : vector<2x22x16xf32> to vector<2x16x16xf32>
    %207 = vector.broadcast %205 : f32 to vector<2x16x16xf32>
    %208 = arith.mulf %207, %206 : vector<2x16x16xf32>
    %209 = arith.addf %204, %208 : vector<2x16x16xf32>
    %c29 = arith.constant 29 : index
    %210 = memref.load %arg1[%c29] : memref<98xf32, #tpu.memory_space<smem>>
    %211 = vector.extract_strided_slice %189 {offsets = [0, 4, 0], sizes = [2, 16, 16], strides = [1, 1, 1]} : vector<2x22x16xf32> to vector<2x16x16xf32>
    %212 = vector.broadcast %210 : f32 to vector<2x16x16xf32>
    %213 = arith.mulf %212, %211 : vector<2x16x16xf32>
    %214 = arith.addf %209, %213 : vector<2x16x16xf32>
    %c36 = arith.constant 36 : index
    %215 = memref.load %arg1[%c36] : memref<98xf32, #tpu.memory_space<smem>>
    %216 = vector.extract_strided_slice %189 {offsets = [0, 5, 0], sizes = [2, 16, 16], strides = [1, 1, 1]} : vector<2x22x16xf32> to vector<2x16x16xf32>
    %217 = vector.broadcast %215 : f32 to vector<2x16x16xf32>
    %218 = arith.mulf %217, %216 : vector<2x16x16xf32>
    %219 = arith.addf %214, %218 : vector<2x16x16xf32>
    %c43 = arith.constant 43 : index
    %220 = memref.load %arg1[%c43] : memref<98xf32, #tpu.memory_space<smem>>
    %221 = vector.extract_strided_slice %189 {offsets = [0, 6, 0], sizes = [2, 16, 16], strides = [1, 1, 1]} : vector<2x22x16xf32> to vector<2x16x16xf32>
    %222 = vector.broadcast %220 : f32 to vector<2x16x16xf32>
    %223 = arith.mulf %222, %221 : vector<2x16x16xf32>
    %224 = arith.addf %219, %223 : vector<2x16x16xf32>
    %c0_154 = arith.constant 0 : index
    %c0_155 = arith.constant 0 : index
    %c0_156 = arith.constant 0 : index
    %c2_157 = arith.constant 2 : index
    %225 = vector.load %arg4[%c0_154, %c0_155, %c0_156, %c2_157] : memref<2x2x22x22xf32, #tpu.memory_space<vmem>>, vector<1x2x22x16xf32>
    %226 = vector.shape_cast %225 : vector<1x2x22x16xf32> to vector<2x22x16xf32>
    %c2_158 = arith.constant 2 : index
    %227 = memref.load %arg1[%c2_158] : memref<98xf32, #tpu.memory_space<smem>>
    %228 = vector.extract_strided_slice %226 {offsets = [0, 0, 0], sizes = [2, 16, 16], strides = [1, 1, 1]} : vector<2x22x16xf32> to vector<2x16x16xf32>
    %229 = vector.broadcast %227 : f32 to vector<2x16x16xf32>
    %230 = arith.mulf %229, %228 : vector<2x16x16xf32>
    %231 = arith.addf %224, %230 : vector<2x16x16xf32>
    %c9_159 = arith.constant 9 : index
    %232 = memref.load %arg1[%c9_159] : memref<98xf32, #tpu.memory_space<smem>>
    %233 = vector.extract_strided_slice %226 {offsets = [0, 1, 0], sizes = [2, 16, 16], strides = [1, 1, 1]} : vector<2x22x16xf32> to vector<2x16x16xf32>
    %234 = vector.broadcast %232 : f32 to vector<2x16x16xf32>
    %235 = arith.mulf %234, %233 : vector<2x16x16xf32>
    %236 = arith.addf %231, %235 : vector<2x16x16xf32>
    %c16_160 = arith.constant 16 : index
    %237 = memref.load %arg1[%c16_160] : memref<98xf32, #tpu.memory_space<smem>>
    %238 = vector.extract_strided_slice %226 {offsets = [0, 2, 0], sizes = [2, 16, 16], strides = [1, 1, 1]} : vector<2x22x16xf32> to vector<2x16x16xf32>
    %239 = vector.broadcast %237 : f32 to vector<2x16x16xf32>
    %240 = arith.mulf %239, %238 : vector<2x16x16xf32>
    %241 = arith.addf %236, %240 : vector<2x16x16xf32>
    %c23 = arith.constant 23 : index
    %242 = memref.load %arg1[%c23] : memref<98xf32, #tpu.memory_space<smem>>
    %243 = vector.extract_strided_slice %226 {offsets = [0, 3, 0], sizes = [2, 16, 16], strides = [1, 1, 1]} : vector<2x22x16xf32> to vector<2x16x16xf32>
    %244 = vector.broadcast %242 : f32 to vector<2x16x16xf32>
    %245 = arith.mulf %244, %243 : vector<2x16x16xf32>
    %246 = arith.addf %241, %245 : vector<2x16x16xf32>
    %c30 = arith.constant 30 : index
    %247 = memref.load %arg1[%c30] : memref<98xf32, #tpu.memory_space<smem>>
    %248 = vector.extract_strided_slice %226 {offsets = [0, 4, 0], sizes = [2, 16, 16], strides = [1, 1, 1]} : vector<2x22x16xf32> to vector<2x16x16xf32>
    %249 = vector.broadcast %247 : f32 to vector<2x16x16xf32>
    %250 = arith.mulf %249, %248 : vector<2x16x16xf32>
    %251 = arith.addf %246, %250 : vector<2x16x16xf32>
    %c37 = arith.constant 37 : index
    %252 = memref.load %arg1[%c37] : memref<98xf32, #tpu.memory_space<smem>>
    %253 = vector.extract_strided_slice %226 {offsets = [0, 5, 0], sizes = [2, 16, 16], strides = [1, 1, 1]} : vector<2x22x16xf32> to vector<2x16x16xf32>
    %254 = vector.broadcast %252 : f32 to vector<2x16x16xf32>
    %255 = arith.mulf %254, %253 : vector<2x16x16xf32>
    %256 = arith.addf %251, %255 : vector<2x16x16xf32>
    %c44 = arith.constant 44 : index
    %257 = memref.load %arg1[%c44] : memref<98xf32, #tpu.memory_space<smem>>
    %258 = vector.extract_strided_slice %226 {offsets = [0, 6, 0], sizes = [2, 16, 16], strides = [1, 1, 1]} : vector<2x22x16xf32> to vector<2x16x16xf32>
    %259 = vector.broadcast %257 : f32 to vector<2x16x16xf32>
    %260 = arith.mulf %259, %258 : vector<2x16x16xf32>
    %261 = arith.addf %256, %260 : vector<2x16x16xf32>
    %c0_161 = arith.constant 0 : index
    %c0_162 = arith.constant 0 : index
    %c0_163 = arith.constant 0 : index
    %c3_164 = arith.constant 3 : index
    %262 = vector.load %arg4[%c0_161, %c0_162, %c0_163, %c3_164] : memref<2x2x22x22xf32, #tpu.memory_space<vmem>>, vector<1x2x22x16xf32>
    %263 = vector.shape_cast %262 : vector<1x2x22x16xf32> to vector<2x22x16xf32>
    %c3_165 = arith.constant 3 : index
    %264 = memref.load %arg1[%c3_165] : memref<98xf32, #tpu.memory_space<smem>>
    %265 = vector.extract_strided_slice %263 {offsets = [0, 0, 0], sizes = [2, 16, 16], strides = [1, 1, 1]} : vector<2x22x16xf32> to vector<2x16x16xf32>
    %266 = vector.broadcast %264 : f32 to vector<2x16x16xf32>
    %267 = arith.mulf %266, %265 : vector<2x16x16xf32>
    %268 = arith.addf %261, %267 : vector<2x16x16xf32>
    %c10_166 = arith.constant 10 : index
    %269 = memref.load %arg1[%c10_166] : memref<98xf32, #tpu.memory_space<smem>>
    %270 = vector.extract_strided_slice %263 {offsets = [0, 1, 0], sizes = [2, 16, 16], strides = [1, 1, 1]} : vector<2x22x16xf32> to vector<2x16x16xf32>
    %271 = vector.broadcast %269 : f32 to vector<2x16x16xf32>
    %272 = arith.mulf %271, %270 : vector<2x16x16xf32>
    %273 = arith.addf %268, %272 : vector<2x16x16xf32>
    %c17_167 = arith.constant 17 : index
    %274 = memref.load %arg1[%c17_167] : memref<98xf32, #tpu.memory_space<smem>>
    %275 = vector.extract_strided_slice %263 {offsets = [0, 2, 0], sizes = [2, 16, 16], strides = [1, 1, 1]} : vector<2x22x16xf32> to vector<2x16x16xf32>
    %276 = vector.broadcast %274 : f32 to vector<2x16x16xf32>
    %277 = arith.mulf %276, %275 : vector<2x16x16xf32>
    %278 = arith.addf %273, %277 : vector<2x16x16xf32>
    %c24 = arith.constant 24 : index
    %279 = memref.load %arg1[%c24] : memref<98xf32, #tpu.memory_space<smem>>
    %280 = vector.extract_strided_slice %263 {offsets = [0, 3, 0], sizes = [2, 16, 16], strides = [1, 1, 1]} : vector<2x22x16xf32> to vector<2x16x16xf32>
    %281 = vector.broadcast %279 : f32 to vector<2x16x16xf32>
    %282 = arith.mulf %281, %280 : vector<2x16x16xf32>
    %283 = arith.addf %278, %282 : vector<2x16x16xf32>
    %c31 = arith.constant 31 : index
    %284 = memref.load %arg1[%c31] : memref<98xf32, #tpu.memory_space<smem>>
    %285 = vector.extract_strided_slice %263 {offsets = [0, 4, 0], sizes = [2, 16, 16], strides = [1, 1, 1]} : vector<2x22x16xf32> to vector<2x16x16xf32>
    %286 = vector.broadcast %284 : f32 to vector<2x16x16xf32>
    %287 = arith.mulf %286, %285 : vector<2x16x16xf32>
    %288 = arith.addf %283, %287 : vector<2x16x16xf32>
    %c38 = arith.constant 38 : index
    %289 = memref.load %arg1[%c38] : memref<98xf32, #tpu.memory_space<smem>>
    %290 = vector.extract_strided_slice %263 {offsets = [0, 5, 0], sizes = [2, 16, 16], strides = [1, 1, 1]} : vector<2x22x16xf32> to vector<2x16x16xf32>
    %291 = vector.broadcast %289 : f32 to vector<2x16x16xf32>
    %292 = arith.mulf %291, %290 : vector<2x16x16xf32>
    %293 = arith.addf %288, %292 : vector<2x16x16xf32>
    %c45 = arith.constant 45 : index
    %294 = memref.load %arg1[%c45] : memref<98xf32, #tpu.memory_space<smem>>
    %295 = vector.extract_strided_slice %263 {offsets = [0, 6, 0], sizes = [2, 16, 16], strides = [1, 1, 1]} : vector<2x22x16xf32> to vector<2x16x16xf32>
    %296 = vector.broadcast %294 : f32 to vector<2x16x16xf32>
    %297 = arith.mulf %296, %295 : vector<2x16x16xf32>
    %298 = arith.addf %293, %297 : vector<2x16x16xf32>
    %c0_168 = arith.constant 0 : index
    %c0_169 = arith.constant 0 : index
    %c0_170 = arith.constant 0 : index
    %c4_171 = arith.constant 4 : index
    %299 = vector.load %arg4[%c0_168, %c0_169, %c0_170, %c4_171] : memref<2x2x22x22xf32, #tpu.memory_space<vmem>>, vector<1x2x22x16xf32>
    %300 = vector.shape_cast %299 : vector<1x2x22x16xf32> to vector<2x22x16xf32>
    %c4_172 = arith.constant 4 : index
    %301 = memref.load %arg1[%c4_172] : memref<98xf32, #tpu.memory_space<smem>>
    %302 = vector.extract_strided_slice %300 {offsets = [0, 0, 0], sizes = [2, 16, 16], strides = [1, 1, 1]} : vector<2x22x16xf32> to vector<2x16x16xf32>
    %303 = vector.broadcast %301 : f32 to vector<2x16x16xf32>
    %304 = arith.mulf %303, %302 : vector<2x16x16xf32>
    %305 = arith.addf %298, %304 : vector<2x16x16xf32>
    %c11_173 = arith.constant 11 : index
    %306 = memref.load %arg1[%c11_173] : memref<98xf32, #tpu.memory_space<smem>>
    %307 = vector.extract_strided_slice %300 {offsets = [0, 1, 0], sizes = [2, 16, 16], strides = [1, 1, 1]} : vector<2x22x16xf32> to vector<2x16x16xf32>
    %308 = vector.broadcast %306 : f32 to vector<2x16x16xf32>
    %309 = arith.mulf %308, %307 : vector<2x16x16xf32>
    %310 = arith.addf %305, %309 : vector<2x16x16xf32>
    %c18_174 = arith.constant 18 : index
    %311 = memref.load %arg1[%c18_174] : memref<98xf32, #tpu.memory_space<smem>>
    %312 = vector.extract_strided_slice %300 {offsets = [0, 2, 0], sizes = [2, 16, 16], strides = [1, 1, 1]} : vector<2x22x16xf32> to vector<2x16x16xf32>
    %313 = vector.broadcast %311 : f32 to vector<2x16x16xf32>
    %314 = arith.mulf %313, %312 : vector<2x16x16xf32>
    %315 = arith.addf %310, %314 : vector<2x16x16xf32>
    %c25 = arith.constant 25 : index
    %316 = memref.load %arg1[%c25] : memref<98xf32, #tpu.memory_space<smem>>
    %317 = vector.extract_strided_slice %300 {offsets = [0, 3, 0], sizes = [2, 16, 16], strides = [1, 1, 1]} : vector<2x22x16xf32> to vector<2x16x16xf32>
    %318 = vector.broadcast %316 : f32 to vector<2x16x16xf32>
    %319 = arith.mulf %318, %317 : vector<2x16x16xf32>
    %320 = arith.addf %315, %319 : vector<2x16x16xf32>
    %c32 = arith.constant 32 : index
    %321 = memref.load %arg1[%c32] : memref<98xf32, #tpu.memory_space<smem>>
    %322 = vector.extract_strided_slice %300 {offsets = [0, 4, 0], sizes = [2, 16, 16], strides = [1, 1, 1]} : vector<2x22x16xf32> to vector<2x16x16xf32>
    %323 = vector.broadcast %321 : f32 to vector<2x16x16xf32>
    %324 = arith.mulf %323, %322 : vector<2x16x16xf32>
    %325 = arith.addf %320, %324 : vector<2x16x16xf32>
    %c39 = arith.constant 39 : index
    %326 = memref.load %arg1[%c39] : memref<98xf32, #tpu.memory_space<smem>>
    %327 = vector.extract_strided_slice %300 {offsets = [0, 5, 0], sizes = [2, 16, 16], strides = [1, 1, 1]} : vector<2x22x16xf32> to vector<2x16x16xf32>
    %328 = vector.broadcast %326 : f32 to vector<2x16x16xf32>
    %329 = arith.mulf %328, %327 : vector<2x16x16xf32>
    %330 = arith.addf %325, %329 : vector<2x16x16xf32>
    %c46 = arith.constant 46 : index
    %331 = memref.load %arg1[%c46] : memref<98xf32, #tpu.memory_space<smem>>
    %332 = vector.extract_strided_slice %300 {offsets = [0, 6, 0], sizes = [2, 16, 16], strides = [1, 1, 1]} : vector<2x22x16xf32> to vector<2x16x16xf32>
    %333 = vector.broadcast %331 : f32 to vector<2x16x16xf32>
    %334 = arith.mulf %333, %332 : vector<2x16x16xf32>
    %335 = arith.addf %330, %334 : vector<2x16x16xf32>
    %c0_175 = arith.constant 0 : index
    %c0_176 = arith.constant 0 : index
    %c0_177 = arith.constant 0 : index
    %c5_178 = arith.constant 5 : index
    %336 = vector.load %arg4[%c0_175, %c0_176, %c0_177, %c5_178] : memref<2x2x22x22xf32, #tpu.memory_space<vmem>>, vector<1x2x22x16xf32>
    %337 = vector.shape_cast %336 : vector<1x2x22x16xf32> to vector<2x22x16xf32>
    %c5_179 = arith.constant 5 : index
    %338 = memref.load %arg1[%c5_179] : memref<98xf32, #tpu.memory_space<smem>>
    %339 = vector.extract_strided_slice %337 {offsets = [0, 0, 0], sizes = [2, 16, 16], strides = [1, 1, 1]} : vector<2x22x16xf32> to vector<2x16x16xf32>
    %340 = vector.broadcast %338 : f32 to vector<2x16x16xf32>
    %341 = arith.mulf %340, %339 : vector<2x16x16xf32>
    %342 = arith.addf %335, %341 : vector<2x16x16xf32>
    %c12_180 = arith.constant 12 : index
    %343 = memref.load %arg1[%c12_180] : memref<98xf32, #tpu.memory_space<smem>>
    %344 = vector.extract_strided_slice %337 {offsets = [0, 1, 0], sizes = [2, 16, 16], strides = [1, 1, 1]} : vector<2x22x16xf32> to vector<2x16x16xf32>
    %345 = vector.broadcast %343 : f32 to vector<2x16x16xf32>
    %346 = arith.mulf %345, %344 : vector<2x16x16xf32>
    %347 = arith.addf %342, %346 : vector<2x16x16xf32>
    %c19_181 = arith.constant 19 : index
    %348 = memref.load %arg1[%c19_181] : memref<98xf32, #tpu.memory_space<smem>>
    %349 = vector.extract_strided_slice %337 {offsets = [0, 2, 0], sizes = [2, 16, 16], strides = [1, 1, 1]} : vector<2x22x16xf32> to vector<2x16x16xf32>
    %350 = vector.broadcast %348 : f32 to vector<2x16x16xf32>
    %351 = arith.mulf %350, %349 : vector<2x16x16xf32>
    %352 = arith.addf %347, %351 : vector<2x16x16xf32>
    %c26 = arith.constant 26 : index
    %353 = memref.load %arg1[%c26] : memref<98xf32, #tpu.memory_space<smem>>
    %354 = vector.extract_strided_slice %337 {offsets = [0, 3, 0], sizes = [2, 16, 16], strides = [1, 1, 1]} : vector<2x22x16xf32> to vector<2x16x16xf32>
    %355 = vector.broadcast %353 : f32 to vector<2x16x16xf32>
    %356 = arith.mulf %355, %354 : vector<2x16x16xf32>
    %357 = arith.addf %352, %356 : vector<2x16x16xf32>
    %c33 = arith.constant 33 : index
    %358 = memref.load %arg1[%c33] : memref<98xf32, #tpu.memory_space<smem>>
    %359 = vector.extract_strided_slice %337 {offsets = [0, 4, 0], sizes = [2, 16, 16], strides = [1, 1, 1]} : vector<2x22x16xf32> to vector<2x16x16xf32>
    %360 = vector.broadcast %358 : f32 to vector<2x16x16xf32>
    %361 = arith.mulf %360, %359 : vector<2x16x16xf32>
    %362 = arith.addf %357, %361 : vector<2x16x16xf32>
    %c40 = arith.constant 40 : index
    %363 = memref.load %arg1[%c40] : memref<98xf32, #tpu.memory_space<smem>>
    %364 = vector.extract_strided_slice %337 {offsets = [0, 5, 0], sizes = [2, 16, 16], strides = [1, 1, 1]} : vector<2x22x16xf32> to vector<2x16x16xf32>
    %365 = vector.broadcast %363 : f32 to vector<2x16x16xf32>
    %366 = arith.mulf %365, %364 : vector<2x16x16xf32>
    %367 = arith.addf %362, %366 : vector<2x16x16xf32>
    %c47 = arith.constant 47 : index
    %368 = memref.load %arg1[%c47] : memref<98xf32, #tpu.memory_space<smem>>
    %369 = vector.extract_strided_slice %337 {offsets = [0, 6, 0], sizes = [2, 16, 16], strides = [1, 1, 1]} : vector<2x22x16xf32> to vector<2x16x16xf32>
    %370 = vector.broadcast %368 : f32 to vector<2x16x16xf32>
    %371 = arith.mulf %370, %369 : vector<2x16x16xf32>
    %372 = arith.addf %367, %371 : vector<2x16x16xf32>
    %c0_182 = arith.constant 0 : index
    %c0_183 = arith.constant 0 : index
    %c0_184 = arith.constant 0 : index
    %c6_185 = arith.constant 6 : index
    %373 = vector.load %arg4[%c0_182, %c0_183, %c0_184, %c6_185] : memref<2x2x22x22xf32, #tpu.memory_space<vmem>>, vector<1x2x22x16xf32>
    %374 = vector.shape_cast %373 : vector<1x2x22x16xf32> to vector<2x22x16xf32>
    %c6_186 = arith.constant 6 : index
    %375 = memref.load %arg1[%c6_186] : memref<98xf32, #tpu.memory_space<smem>>
    %376 = vector.extract_strided_slice %374 {offsets = [0, 0, 0], sizes = [2, 16, 16], strides = [1, 1, 1]} : vector<2x22x16xf32> to vector<2x16x16xf32>
    %377 = vector.broadcast %375 : f32 to vector<2x16x16xf32>
    %378 = arith.mulf %377, %376 : vector<2x16x16xf32>
    %379 = arith.addf %372, %378 : vector<2x16x16xf32>
    %c13_187 = arith.constant 13 : index
    %380 = memref.load %arg1[%c13_187] : memref<98xf32, #tpu.memory_space<smem>>
    %381 = vector.extract_strided_slice %374 {offsets = [0, 1, 0], sizes = [2, 16, 16], strides = [1, 1, 1]} : vector<2x22x16xf32> to vector<2x16x16xf32>
    %382 = vector.broadcast %380 : f32 to vector<2x16x16xf32>
    %383 = arith.mulf %382, %381 : vector<2x16x16xf32>
    %384 = arith.addf %379, %383 : vector<2x16x16xf32>
    %c20 = arith.constant 20 : index
    %385 = memref.load %arg1[%c20] : memref<98xf32, #tpu.memory_space<smem>>
    %386 = vector.extract_strided_slice %374 {offsets = [0, 2, 0], sizes = [2, 16, 16], strides = [1, 1, 1]} : vector<2x22x16xf32> to vector<2x16x16xf32>
    %387 = vector.broadcast %385 : f32 to vector<2x16x16xf32>
    %388 = arith.mulf %387, %386 : vector<2x16x16xf32>
    %389 = arith.addf %384, %388 : vector<2x16x16xf32>
    %c27 = arith.constant 27 : index
    %390 = memref.load %arg1[%c27] : memref<98xf32, #tpu.memory_space<smem>>
    %391 = vector.extract_strided_slice %374 {offsets = [0, 3, 0], sizes = [2, 16, 16], strides = [1, 1, 1]} : vector<2x22x16xf32> to vector<2x16x16xf32>
    %392 = vector.broadcast %390 : f32 to vector<2x16x16xf32>
    %393 = arith.mulf %392, %391 : vector<2x16x16xf32>
    %394 = arith.addf %389, %393 : vector<2x16x16xf32>
    %c34 = arith.constant 34 : index
    %395 = memref.load %arg1[%c34] : memref<98xf32, #tpu.memory_space<smem>>
    %396 = vector.extract_strided_slice %374 {offsets = [0, 4, 0], sizes = [2, 16, 16], strides = [1, 1, 1]} : vector<2x22x16xf32> to vector<2x16x16xf32>
    %397 = vector.broadcast %395 : f32 to vector<2x16x16xf32>
    %398 = arith.mulf %397, %396 : vector<2x16x16xf32>
    %399 = arith.addf %394, %398 : vector<2x16x16xf32>
    %c41 = arith.constant 41 : index
    %400 = memref.load %arg1[%c41] : memref<98xf32, #tpu.memory_space<smem>>
    %401 = vector.extract_strided_slice %374 {offsets = [0, 5, 0], sizes = [2, 16, 16], strides = [1, 1, 1]} : vector<2x22x16xf32> to vector<2x16x16xf32>
    %402 = vector.broadcast %400 : f32 to vector<2x16x16xf32>
    %403 = arith.mulf %402, %401 : vector<2x16x16xf32>
    %404 = arith.addf %399, %403 : vector<2x16x16xf32>
    %c48 = arith.constant 48 : index
    %405 = memref.load %arg1[%c48] : memref<98xf32, #tpu.memory_space<smem>>
    %406 = vector.extract_strided_slice %374 {offsets = [0, 6, 0], sizes = [2, 16, 16], strides = [1, 1, 1]} : vector<2x22x16xf32> to vector<2x16x16xf32>
    %407 = vector.broadcast %405 : f32 to vector<2x16x16xf32>
    %408 = arith.mulf %407, %406 : vector<2x16x16xf32>
    %409 = arith.addf %404, %408 : vector<2x16x16xf32>
    %c1_188 = arith.constant 1 : index
    %c0_189 = arith.constant 0 : index
    %c0_190 = arith.constant 0 : index
    %c0_191 = arith.constant 0 : index
    %410 = vector.load %arg4[%c1_188, %c0_189, %c0_190, %c0_191] : memref<2x2x22x22xf32, #tpu.memory_space<vmem>>, vector<1x2x22x16xf32>
    %411 = vector.shape_cast %410 : vector<1x2x22x16xf32> to vector<2x22x16xf32>
    %c49 = arith.constant 49 : index
    %412 = memref.load %arg1[%c49] : memref<98xf32, #tpu.memory_space<smem>>
    %413 = vector.extract_strided_slice %411 {offsets = [0, 0, 0], sizes = [2, 16, 16], strides = [1, 1, 1]} : vector<2x22x16xf32> to vector<2x16x16xf32>
    %414 = vector.broadcast %412 : f32 to vector<2x16x16xf32>
    %415 = arith.mulf %414, %413 : vector<2x16x16xf32>
    %416 = arith.addf %409, %415 : vector<2x16x16xf32>
    %c56 = arith.constant 56 : index
    %417 = memref.load %arg1[%c56] : memref<98xf32, #tpu.memory_space<smem>>
    %418 = vector.extract_strided_slice %411 {offsets = [0, 1, 0], sizes = [2, 16, 16], strides = [1, 1, 1]} : vector<2x22x16xf32> to vector<2x16x16xf32>
    %419 = vector.broadcast %417 : f32 to vector<2x16x16xf32>
    %420 = arith.mulf %419, %418 : vector<2x16x16xf32>
    %421 = arith.addf %416, %420 : vector<2x16x16xf32>
    %c63 = arith.constant 63 : index
    %422 = memref.load %arg1[%c63] : memref<98xf32, #tpu.memory_space<smem>>
    %423 = vector.extract_strided_slice %411 {offsets = [0, 2, 0], sizes = [2, 16, 16], strides = [1, 1, 1]} : vector<2x22x16xf32> to vector<2x16x16xf32>
    %424 = vector.broadcast %422 : f32 to vector<2x16x16xf32>
    %425 = arith.mulf %424, %423 : vector<2x16x16xf32>
    %426 = arith.addf %421, %425 : vector<2x16x16xf32>
    %c70 = arith.constant 70 : index
    %427 = memref.load %arg1[%c70] : memref<98xf32, #tpu.memory_space<smem>>
    %428 = vector.extract_strided_slice %411 {offsets = [0, 3, 0], sizes = [2, 16, 16], strides = [1, 1, 1]} : vector<2x22x16xf32> to vector<2x16x16xf32>
    %429 = vector.broadcast %427 : f32 to vector<2x16x16xf32>
    %430 = arith.mulf %429, %428 : vector<2x16x16xf32>
    %431 = arith.addf %426, %430 : vector<2x16x16xf32>
    %c77 = arith.constant 77 : index
    %432 = memref.load %arg1[%c77] : memref<98xf32, #tpu.memory_space<smem>>
    %433 = vector.extract_strided_slice %411 {offsets = [0, 4, 0], sizes = [2, 16, 16], strides = [1, 1, 1]} : vector<2x22x16xf32> to vector<2x16x16xf32>
    %434 = vector.broadcast %432 : f32 to vector<2x16x16xf32>
    %435 = arith.mulf %434, %433 : vector<2x16x16xf32>
    %436 = arith.addf %431, %435 : vector<2x16x16xf32>
    %c84 = arith.constant 84 : index
    %437 = memref.load %arg1[%c84] : memref<98xf32, #tpu.memory_space<smem>>
    %438 = vector.extract_strided_slice %411 {offsets = [0, 5, 0], sizes = [2, 16, 16], strides = [1, 1, 1]} : vector<2x22x16xf32> to vector<2x16x16xf32>
    %439 = vector.broadcast %437 : f32 to vector<2x16x16xf32>
    %440 = arith.mulf %439, %438 : vector<2x16x16xf32>
    %441 = arith.addf %436, %440 : vector<2x16x16xf32>
    %c91 = arith.constant 91 : index
    %442 = memref.load %arg1[%c91] : memref<98xf32, #tpu.memory_space<smem>>
    %443 = vector.extract_strided_slice %411 {offsets = [0, 6, 0], sizes = [2, 16, 16], strides = [1, 1, 1]} : vector<2x22x16xf32> to vector<2x16x16xf32>
    %444 = vector.broadcast %442 : f32 to vector<2x16x16xf32>
    %445 = arith.mulf %444, %443 : vector<2x16x16xf32>
    %446 = arith.addf %441, %445 : vector<2x16x16xf32>
    %c1_192 = arith.constant 1 : index
    %c0_193 = arith.constant 0 : index
    %c0_194 = arith.constant 0 : index
    %c1_195 = arith.constant 1 : index
    %447 = vector.load %arg4[%c1_192, %c0_193, %c0_194, %c1_195] : memref<2x2x22x22xf32, #tpu.memory_space<vmem>>, vector<1x2x22x16xf32>
    %448 = vector.shape_cast %447 : vector<1x2x22x16xf32> to vector<2x22x16xf32>
    %c50 = arith.constant 50 : index
    %449 = memref.load %arg1[%c50] : memref<98xf32, #tpu.memory_space<smem>>
    %450 = vector.extract_strided_slice %448 {offsets = [0, 0, 0], sizes = [2, 16, 16], strides = [1, 1, 1]} : vector<2x22x16xf32> to vector<2x16x16xf32>
    %451 = vector.broadcast %449 : f32 to vector<2x16x16xf32>
    %452 = arith.mulf %451, %450 : vector<2x16x16xf32>
    %453 = arith.addf %446, %452 : vector<2x16x16xf32>
    %c57 = arith.constant 57 : index
    %454 = memref.load %arg1[%c57] : memref<98xf32, #tpu.memory_space<smem>>
    %455 = vector.extract_strided_slice %448 {offsets = [0, 1, 0], sizes = [2, 16, 16], strides = [1, 1, 1]} : vector<2x22x16xf32> to vector<2x16x16xf32>
    %456 = vector.broadcast %454 : f32 to vector<2x16x16xf32>
    %457 = arith.mulf %456, %455 : vector<2x16x16xf32>
    %458 = arith.addf %453, %457 : vector<2x16x16xf32>
    %c64 = arith.constant 64 : index
    %459 = memref.load %arg1[%c64] : memref<98xf32, #tpu.memory_space<smem>>
    %460 = vector.extract_strided_slice %448 {offsets = [0, 2, 0], sizes = [2, 16, 16], strides = [1, 1, 1]} : vector<2x22x16xf32> to vector<2x16x16xf32>
    %461 = vector.broadcast %459 : f32 to vector<2x16x16xf32>
    %462 = arith.mulf %461, %460 : vector<2x16x16xf32>
    %463 = arith.addf %458, %462 : vector<2x16x16xf32>
    %c71 = arith.constant 71 : index
    %464 = memref.load %arg1[%c71] : memref<98xf32, #tpu.memory_space<smem>>
    %465 = vector.extract_strided_slice %448 {offsets = [0, 3, 0], sizes = [2, 16, 16], strides = [1, 1, 1]} : vector<2x22x16xf32> to vector<2x16x16xf32>
    %466 = vector.broadcast %464 : f32 to vector<2x16x16xf32>
    %467 = arith.mulf %466, %465 : vector<2x16x16xf32>
    %468 = arith.addf %463, %467 : vector<2x16x16xf32>
    %c78 = arith.constant 78 : index
    %469 = memref.load %arg1[%c78] : memref<98xf32, #tpu.memory_space<smem>>
    %470 = vector.extract_strided_slice %448 {offsets = [0, 4, 0], sizes = [2, 16, 16], strides = [1, 1, 1]} : vector<2x22x16xf32> to vector<2x16x16xf32>
    %471 = vector.broadcast %469 : f32 to vector<2x16x16xf32>
    %472 = arith.mulf %471, %470 : vector<2x16x16xf32>
    %473 = arith.addf %468, %472 : vector<2x16x16xf32>
    %c85 = arith.constant 85 : index
    %474 = memref.load %arg1[%c85] : memref<98xf32, #tpu.memory_space<smem>>
    %475 = vector.extract_strided_slice %448 {offsets = [0, 5, 0], sizes = [2, 16, 16], strides = [1, 1, 1]} : vector<2x22x16xf32> to vector<2x16x16xf32>
    %476 = vector.broadcast %474 : f32 to vector<2x16x16xf32>
    %477 = arith.mulf %476, %475 : vector<2x16x16xf32>
    %478 = arith.addf %473, %477 : vector<2x16x16xf32>
    %c92 = arith.constant 92 : index
    %479 = memref.load %arg1[%c92] : memref<98xf32, #tpu.memory_space<smem>>
    %480 = vector.extract_strided_slice %448 {offsets = [0, 6, 0], sizes = [2, 16, 16], strides = [1, 1, 1]} : vector<2x22x16xf32> to vector<2x16x16xf32>
    %481 = vector.broadcast %479 : f32 to vector<2x16x16xf32>
    %482 = arith.mulf %481, %480 : vector<2x16x16xf32>
    %483 = arith.addf %478, %482 : vector<2x16x16xf32>
    %c1_196 = arith.constant 1 : index
    %c0_197 = arith.constant 0 : index
    %c0_198 = arith.constant 0 : index
    %c2_199 = arith.constant 2 : index
    %484 = vector.load %arg4[%c1_196, %c0_197, %c0_198, %c2_199] : memref<2x2x22x22xf32, #tpu.memory_space<vmem>>, vector<1x2x22x16xf32>
    %485 = vector.shape_cast %484 : vector<1x2x22x16xf32> to vector<2x22x16xf32>
    %c51 = arith.constant 51 : index
    %486 = memref.load %arg1[%c51] : memref<98xf32, #tpu.memory_space<smem>>
    %487 = vector.extract_strided_slice %485 {offsets = [0, 0, 0], sizes = [2, 16, 16], strides = [1, 1, 1]} : vector<2x22x16xf32> to vector<2x16x16xf32>
    %488 = vector.broadcast %486 : f32 to vector<2x16x16xf32>
    %489 = arith.mulf %488, %487 : vector<2x16x16xf32>
    %490 = arith.addf %483, %489 : vector<2x16x16xf32>
    %c58 = arith.constant 58 : index
    %491 = memref.load %arg1[%c58] : memref<98xf32, #tpu.memory_space<smem>>
    %492 = vector.extract_strided_slice %485 {offsets = [0, 1, 0], sizes = [2, 16, 16], strides = [1, 1, 1]} : vector<2x22x16xf32> to vector<2x16x16xf32>
    %493 = vector.broadcast %491 : f32 to vector<2x16x16xf32>
    %494 = arith.mulf %493, %492 : vector<2x16x16xf32>
    %495 = arith.addf %490, %494 : vector<2x16x16xf32>
    %c65 = arith.constant 65 : index
    %496 = memref.load %arg1[%c65] : memref<98xf32, #tpu.memory_space<smem>>
    %497 = vector.extract_strided_slice %485 {offsets = [0, 2, 0], sizes = [2, 16, 16], strides = [1, 1, 1]} : vector<2x22x16xf32> to vector<2x16x16xf32>
    %498 = vector.broadcast %496 : f32 to vector<2x16x16xf32>
    %499 = arith.mulf %498, %497 : vector<2x16x16xf32>
    %500 = arith.addf %495, %499 : vector<2x16x16xf32>
    %c72 = arith.constant 72 : index
    %501 = memref.load %arg1[%c72] : memref<98xf32, #tpu.memory_space<smem>>
    %502 = vector.extract_strided_slice %485 {offsets = [0, 3, 0], sizes = [2, 16, 16], strides = [1, 1, 1]} : vector<2x22x16xf32> to vector<2x16x16xf32>
    %503 = vector.broadcast %501 : f32 to vector<2x16x16xf32>
    %504 = arith.mulf %503, %502 : vector<2x16x16xf32>
    %505 = arith.addf %500, %504 : vector<2x16x16xf32>
    %c79 = arith.constant 79 : index
    %506 = memref.load %arg1[%c79] : memref<98xf32, #tpu.memory_space<smem>>
    %507 = vector.extract_strided_slice %485 {offsets = [0, 4, 0], sizes = [2, 16, 16], strides = [1, 1, 1]} : vector<2x22x16xf32> to vector<2x16x16xf32>
    %508 = vector.broadcast %506 : f32 to vector<2x16x16xf32>
    %509 = arith.mulf %508, %507 : vector<2x16x16xf32>
    %510 = arith.addf %505, %509 : vector<2x16x16xf32>
    %c86 = arith.constant 86 : index
    %511 = memref.load %arg1[%c86] : memref<98xf32, #tpu.memory_space<smem>>
    %512 = vector.extract_strided_slice %485 {offsets = [0, 5, 0], sizes = [2, 16, 16], strides = [1, 1, 1]} : vector<2x22x16xf32> to vector<2x16x16xf32>
    %513 = vector.broadcast %511 : f32 to vector<2x16x16xf32>
    %514 = arith.mulf %513, %512 : vector<2x16x16xf32>
    %515 = arith.addf %510, %514 : vector<2x16x16xf32>
    %c93 = arith.constant 93 : index
    %516 = memref.load %arg1[%c93] : memref<98xf32, #tpu.memory_space<smem>>
    %517 = vector.extract_strided_slice %485 {offsets = [0, 6, 0], sizes = [2, 16, 16], strides = [1, 1, 1]} : vector<2x22x16xf32> to vector<2x16x16xf32>
    %518 = vector.broadcast %516 : f32 to vector<2x16x16xf32>
    %519 = arith.mulf %518, %517 : vector<2x16x16xf32>
    %520 = arith.addf %515, %519 : vector<2x16x16xf32>
    %c1_200 = arith.constant 1 : index
    %c0_201 = arith.constant 0 : index
    %c0_202 = arith.constant 0 : index
    %c3_203 = arith.constant 3 : index
    %521 = vector.load %arg4[%c1_200, %c0_201, %c0_202, %c3_203] : memref<2x2x22x22xf32, #tpu.memory_space<vmem>>, vector<1x2x22x16xf32>
    %522 = vector.shape_cast %521 : vector<1x2x22x16xf32> to vector<2x22x16xf32>
    %c52 = arith.constant 52 : index
    %523 = memref.load %arg1[%c52] : memref<98xf32, #tpu.memory_space<smem>>
    %524 = vector.extract_strided_slice %522 {offsets = [0, 0, 0], sizes = [2, 16, 16], strides = [1, 1, 1]} : vector<2x22x16xf32> to vector<2x16x16xf32>
    %525 = vector.broadcast %523 : f32 to vector<2x16x16xf32>
    %526 = arith.mulf %525, %524 : vector<2x16x16xf32>
    %527 = arith.addf %520, %526 : vector<2x16x16xf32>
    %c59 = arith.constant 59 : index
    %528 = memref.load %arg1[%c59] : memref<98xf32, #tpu.memory_space<smem>>
    %529 = vector.extract_strided_slice %522 {offsets = [0, 1, 0], sizes = [2, 16, 16], strides = [1, 1, 1]} : vector<2x22x16xf32> to vector<2x16x16xf32>
    %530 = vector.broadcast %528 : f32 to vector<2x16x16xf32>
    %531 = arith.mulf %530, %529 : vector<2x16x16xf32>
    %532 = arith.addf %527, %531 : vector<2x16x16xf32>
    %c66 = arith.constant 66 : index
    %533 = memref.load %arg1[%c66] : memref<98xf32, #tpu.memory_space<smem>>
    %534 = vector.extract_strided_slice %522 {offsets = [0, 2, 0], sizes = [2, 16, 16], strides = [1, 1, 1]} : vector<2x22x16xf32> to vector<2x16x16xf32>
    %535 = vector.broadcast %533 : f32 to vector<2x16x16xf32>
    %536 = arith.mulf %535, %534 : vector<2x16x16xf32>
    %537 = arith.addf %532, %536 : vector<2x16x16xf32>
    %c73 = arith.constant 73 : index
    %538 = memref.load %arg1[%c73] : memref<98xf32, #tpu.memory_space<smem>>
    %539 = vector.extract_strided_slice %522 {offsets = [0, 3, 0], sizes = [2, 16, 16], strides = [1, 1, 1]} : vector<2x22x16xf32> to vector<2x16x16xf32>
    %540 = vector.broadcast %538 : f32 to vector<2x16x16xf32>
    %541 = arith.mulf %540, %539 : vector<2x16x16xf32>
    %542 = arith.addf %537, %541 : vector<2x16x16xf32>
    %c80 = arith.constant 80 : index
    %543 = memref.load %arg1[%c80] : memref<98xf32, #tpu.memory_space<smem>>
    %544 = vector.extract_strided_slice %522 {offsets = [0, 4, 0], sizes = [2, 16, 16], strides = [1, 1, 1]} : vector<2x22x16xf32> to vector<2x16x16xf32>
    %545 = vector.broadcast %543 : f32 to vector<2x16x16xf32>
    %546 = arith.mulf %545, %544 : vector<2x16x16xf32>
    %547 = arith.addf %542, %546 : vector<2x16x16xf32>
    %c87 = arith.constant 87 : index
    %548 = memref.load %arg1[%c87] : memref<98xf32, #tpu.memory_space<smem>>
    %549 = vector.extract_strided_slice %522 {offsets = [0, 5, 0], sizes = [2, 16, 16], strides = [1, 1, 1]} : vector<2x22x16xf32> to vector<2x16x16xf32>
    %550 = vector.broadcast %548 : f32 to vector<2x16x16xf32>
    %551 = arith.mulf %550, %549 : vector<2x16x16xf32>
    %552 = arith.addf %547, %551 : vector<2x16x16xf32>
    %c94 = arith.constant 94 : index
    %553 = memref.load %arg1[%c94] : memref<98xf32, #tpu.memory_space<smem>>
    %554 = vector.extract_strided_slice %522 {offsets = [0, 6, 0], sizes = [2, 16, 16], strides = [1, 1, 1]} : vector<2x22x16xf32> to vector<2x16x16xf32>
    %555 = vector.broadcast %553 : f32 to vector<2x16x16xf32>
    %556 = arith.mulf %555, %554 : vector<2x16x16xf32>
    %557 = arith.addf %552, %556 : vector<2x16x16xf32>
    %c1_204 = arith.constant 1 : index
    %c0_205 = arith.constant 0 : index
    %c0_206 = arith.constant 0 : index
    %c4_207 = arith.constant 4 : index
    %558 = vector.load %arg4[%c1_204, %c0_205, %c0_206, %c4_207] : memref<2x2x22x22xf32, #tpu.memory_space<vmem>>, vector<1x2x22x16xf32>
    %559 = vector.shape_cast %558 : vector<1x2x22x16xf32> to vector<2x22x16xf32>
    %c53 = arith.constant 53 : index
    %560 = memref.load %arg1[%c53] : memref<98xf32, #tpu.memory_space<smem>>
    %561 = vector.extract_strided_slice %559 {offsets = [0, 0, 0], sizes = [2, 16, 16], strides = [1, 1, 1]} : vector<2x22x16xf32> to vector<2x16x16xf32>
    %562 = vector.broadcast %560 : f32 to vector<2x16x16xf32>
    %563 = arith.mulf %562, %561 : vector<2x16x16xf32>
    %564 = arith.addf %557, %563 : vector<2x16x16xf32>
    %c60 = arith.constant 60 : index
    %565 = memref.load %arg1[%c60] : memref<98xf32, #tpu.memory_space<smem>>
    %566 = vector.extract_strided_slice %559 {offsets = [0, 1, 0], sizes = [2, 16, 16], strides = [1, 1, 1]} : vector<2x22x16xf32> to vector<2x16x16xf32>
    %567 = vector.broadcast %565 : f32 to vector<2x16x16xf32>
    %568 = arith.mulf %567, %566 : vector<2x16x16xf32>
    %569 = arith.addf %564, %568 : vector<2x16x16xf32>
    %c67 = arith.constant 67 : index
    %570 = memref.load %arg1[%c67] : memref<98xf32, #tpu.memory_space<smem>>
    %571 = vector.extract_strided_slice %559 {offsets = [0, 2, 0], sizes = [2, 16, 16], strides = [1, 1, 1]} : vector<2x22x16xf32> to vector<2x16x16xf32>
    %572 = vector.broadcast %570 : f32 to vector<2x16x16xf32>
    %573 = arith.mulf %572, %571 : vector<2x16x16xf32>
    %574 = arith.addf %569, %573 : vector<2x16x16xf32>
    %c74 = arith.constant 74 : index
    %575 = memref.load %arg1[%c74] : memref<98xf32, #tpu.memory_space<smem>>
    %576 = vector.extract_strided_slice %559 {offsets = [0, 3, 0], sizes = [2, 16, 16], strides = [1, 1, 1]} : vector<2x22x16xf32> to vector<2x16x16xf32>
    %577 = vector.broadcast %575 : f32 to vector<2x16x16xf32>
    %578 = arith.mulf %577, %576 : vector<2x16x16xf32>
    %579 = arith.addf %574, %578 : vector<2x16x16xf32>
    %c81 = arith.constant 81 : index
    %580 = memref.load %arg1[%c81] : memref<98xf32, #tpu.memory_space<smem>>
    %581 = vector.extract_strided_slice %559 {offsets = [0, 4, 0], sizes = [2, 16, 16], strides = [1, 1, 1]} : vector<2x22x16xf32> to vector<2x16x16xf32>
    %582 = vector.broadcast %580 : f32 to vector<2x16x16xf32>
    %583 = arith.mulf %582, %581 : vector<2x16x16xf32>
    %584 = arith.addf %579, %583 : vector<2x16x16xf32>
    %c88 = arith.constant 88 : index
    %585 = memref.load %arg1[%c88] : memref<98xf32, #tpu.memory_space<smem>>
    %586 = vector.extract_strided_slice %559 {offsets = [0, 5, 0], sizes = [2, 16, 16], strides = [1, 1, 1]} : vector<2x22x16xf32> to vector<2x16x16xf32>
    %587 = vector.broadcast %585 : f32 to vector<2x16x16xf32>
    %588 = arith.mulf %587, %586 : vector<2x16x16xf32>
    %589 = arith.addf %584, %588 : vector<2x16x16xf32>
    %c95 = arith.constant 95 : index
    %590 = memref.load %arg1[%c95] : memref<98xf32, #tpu.memory_space<smem>>
    %591 = vector.extract_strided_slice %559 {offsets = [0, 6, 0], sizes = [2, 16, 16], strides = [1, 1, 1]} : vector<2x22x16xf32> to vector<2x16x16xf32>
    %592 = vector.broadcast %590 : f32 to vector<2x16x16xf32>
    %593 = arith.mulf %592, %591 : vector<2x16x16xf32>
    %594 = arith.addf %589, %593 : vector<2x16x16xf32>
    %c1_208 = arith.constant 1 : index
    %c0_209 = arith.constant 0 : index
    %c0_210 = arith.constant 0 : index
    %c5_211 = arith.constant 5 : index
    %595 = vector.load %arg4[%c1_208, %c0_209, %c0_210, %c5_211] : memref<2x2x22x22xf32, #tpu.memory_space<vmem>>, vector<1x2x22x16xf32>
    %596 = vector.shape_cast %595 : vector<1x2x22x16xf32> to vector<2x22x16xf32>
    %c54 = arith.constant 54 : index
    %597 = memref.load %arg1[%c54] : memref<98xf32, #tpu.memory_space<smem>>
    %598 = vector.extract_strided_slice %596 {offsets = [0, 0, 0], sizes = [2, 16, 16], strides = [1, 1, 1]} : vector<2x22x16xf32> to vector<2x16x16xf32>
    %599 = vector.broadcast %597 : f32 to vector<2x16x16xf32>
    %600 = arith.mulf %599, %598 : vector<2x16x16xf32>
    %601 = arith.addf %594, %600 : vector<2x16x16xf32>
    %c61 = arith.constant 61 : index
    %602 = memref.load %arg1[%c61] : memref<98xf32, #tpu.memory_space<smem>>
    %603 = vector.extract_strided_slice %596 {offsets = [0, 1, 0], sizes = [2, 16, 16], strides = [1, 1, 1]} : vector<2x22x16xf32> to vector<2x16x16xf32>
    %604 = vector.broadcast %602 : f32 to vector<2x16x16xf32>
    %605 = arith.mulf %604, %603 : vector<2x16x16xf32>
    %606 = arith.addf %601, %605 : vector<2x16x16xf32>
    %c68 = arith.constant 68 : index
    %607 = memref.load %arg1[%c68] : memref<98xf32, #tpu.memory_space<smem>>
    %608 = vector.extract_strided_slice %596 {offsets = [0, 2, 0], sizes = [2, 16, 16], strides = [1, 1, 1]} : vector<2x22x16xf32> to vector<2x16x16xf32>
    %609 = vector.broadcast %607 : f32 to vector<2x16x16xf32>
    %610 = arith.mulf %609, %608 : vector<2x16x16xf32>
    %611 = arith.addf %606, %610 : vector<2x16x16xf32>
    %c75 = arith.constant 75 : index
    %612 = memref.load %arg1[%c75] : memref<98xf32, #tpu.memory_space<smem>>
    %613 = vector.extract_strided_slice %596 {offsets = [0, 3, 0], sizes = [2, 16, 16], strides = [1, 1, 1]} : vector<2x22x16xf32> to vector<2x16x16xf32>
    %614 = vector.broadcast %612 : f32 to vector<2x16x16xf32>
    %615 = arith.mulf %614, %613 : vector<2x16x16xf32>
    %616 = arith.addf %611, %615 : vector<2x16x16xf32>
    %c82 = arith.constant 82 : index
    %617 = memref.load %arg1[%c82] : memref<98xf32, #tpu.memory_space<smem>>
    %618 = vector.extract_strided_slice %596 {offsets = [0, 4, 0], sizes = [2, 16, 16], strides = [1, 1, 1]} : vector<2x22x16xf32> to vector<2x16x16xf32>
    %619 = vector.broadcast %617 : f32 to vector<2x16x16xf32>
    %620 = arith.mulf %619, %618 : vector<2x16x16xf32>
    %621 = arith.addf %616, %620 : vector<2x16x16xf32>
    %c89 = arith.constant 89 : index
    %622 = memref.load %arg1[%c89] : memref<98xf32, #tpu.memory_space<smem>>
    %623 = vector.extract_strided_slice %596 {offsets = [0, 5, 0], sizes = [2, 16, 16], strides = [1, 1, 1]} : vector<2x22x16xf32> to vector<2x16x16xf32>
    %624 = vector.broadcast %622 : f32 to vector<2x16x16xf32>
    %625 = arith.mulf %624, %623 : vector<2x16x16xf32>
    %626 = arith.addf %621, %625 : vector<2x16x16xf32>
    %c96 = arith.constant 96 : index
    %627 = memref.load %arg1[%c96] : memref<98xf32, #tpu.memory_space<smem>>
    %628 = vector.extract_strided_slice %596 {offsets = [0, 6, 0], sizes = [2, 16, 16], strides = [1, 1, 1]} : vector<2x22x16xf32> to vector<2x16x16xf32>
    %629 = vector.broadcast %627 : f32 to vector<2x16x16xf32>
    %630 = arith.mulf %629, %628 : vector<2x16x16xf32>
    %631 = arith.addf %626, %630 : vector<2x16x16xf32>
    %c1_212 = arith.constant 1 : index
    %c0_213 = arith.constant 0 : index
    %c0_214 = arith.constant 0 : index
    %c6_215 = arith.constant 6 : index
    %632 = vector.load %arg4[%c1_212, %c0_213, %c0_214, %c6_215] : memref<2x2x22x22xf32, #tpu.memory_space<vmem>>, vector<1x2x22x16xf32>
    %633 = vector.shape_cast %632 : vector<1x2x22x16xf32> to vector<2x22x16xf32>
    %c55 = arith.constant 55 : index
    %634 = memref.load %arg1[%c55] : memref<98xf32, #tpu.memory_space<smem>>
    %635 = vector.extract_strided_slice %633 {offsets = [0, 0, 0], sizes = [2, 16, 16], strides = [1, 1, 1]} : vector<2x22x16xf32> to vector<2x16x16xf32>
    %636 = vector.broadcast %634 : f32 to vector<2x16x16xf32>
    %637 = arith.mulf %636, %635 : vector<2x16x16xf32>
    %638 = arith.addf %631, %637 : vector<2x16x16xf32>
    %c62 = arith.constant 62 : index
    %639 = memref.load %arg1[%c62] : memref<98xf32, #tpu.memory_space<smem>>
    %640 = vector.extract_strided_slice %633 {offsets = [0, 1, 0], sizes = [2, 16, 16], strides = [1, 1, 1]} : vector<2x22x16xf32> to vector<2x16x16xf32>
    %641 = vector.broadcast %639 : f32 to vector<2x16x16xf32>
    %642 = arith.mulf %641, %640 : vector<2x16x16xf32>
    %643 = arith.addf %638, %642 : vector<2x16x16xf32>
    %c69 = arith.constant 69 : index
    %644 = memref.load %arg1[%c69] : memref<98xf32, #tpu.memory_space<smem>>
    %645 = vector.extract_strided_slice %633 {offsets = [0, 2, 0], sizes = [2, 16, 16], strides = [1, 1, 1]} : vector<2x22x16xf32> to vector<2x16x16xf32>
    %646 = vector.broadcast %644 : f32 to vector<2x16x16xf32>
    %647 = arith.mulf %646, %645 : vector<2x16x16xf32>
    %648 = arith.addf %643, %647 : vector<2x16x16xf32>
    %c76 = arith.constant 76 : index
    %649 = memref.load %arg1[%c76] : memref<98xf32, #tpu.memory_space<smem>>
    %650 = vector.extract_strided_slice %633 {offsets = [0, 3, 0], sizes = [2, 16, 16], strides = [1, 1, 1]} : vector<2x22x16xf32> to vector<2x16x16xf32>
    %651 = vector.broadcast %649 : f32 to vector<2x16x16xf32>
    %652 = arith.mulf %651, %650 : vector<2x16x16xf32>
    %653 = arith.addf %648, %652 : vector<2x16x16xf32>
    %c83 = arith.constant 83 : index
    %654 = memref.load %arg1[%c83] : memref<98xf32, #tpu.memory_space<smem>>
    %655 = vector.extract_strided_slice %633 {offsets = [0, 4, 0], sizes = [2, 16, 16], strides = [1, 1, 1]} : vector<2x22x16xf32> to vector<2x16x16xf32>
    %656 = vector.broadcast %654 : f32 to vector<2x16x16xf32>
    %657 = arith.mulf %656, %655 : vector<2x16x16xf32>
    %658 = arith.addf %653, %657 : vector<2x16x16xf32>
    %c90 = arith.constant 90 : index
    %659 = memref.load %arg1[%c90] : memref<98xf32, #tpu.memory_space<smem>>
    %660 = vector.extract_strided_slice %633 {offsets = [0, 5, 0], sizes = [2, 16, 16], strides = [1, 1, 1]} : vector<2x22x16xf32> to vector<2x16x16xf32>
    %661 = vector.broadcast %659 : f32 to vector<2x16x16xf32>
    %662 = arith.mulf %661, %660 : vector<2x16x16xf32>
    %663 = arith.addf %658, %662 : vector<2x16x16xf32>
    %c97 = arith.constant 97 : index
    %664 = memref.load %arg1[%c97] : memref<98xf32, #tpu.memory_space<smem>>
    %665 = vector.extract_strided_slice %633 {offsets = [0, 6, 0], sizes = [2, 16, 16], strides = [1, 1, 1]} : vector<2x22x16xf32> to vector<2x16x16xf32>
    %666 = vector.broadcast %664 : f32 to vector<2x16x16xf32>
    %667 = arith.mulf %666, %665 : vector<2x16x16xf32>
    %668 = arith.addf %663, %667 : vector<2x16x16xf32>
    %669 = vector.extract_strided_slice %668 {offsets = [0, 0, 0], sizes = [2, 1, 16], strides = [1, 1, 1]} : vector<2x16x16xf32> to vector<2x1x16xf32>
    %670 = vector.shape_cast %669 : vector<2x1x16xf32> to vector<2x16xf32>
    %c0_216 = arith.constant 0 : index
    %c0_217 = arith.constant 0 : index
    %671 = vector.load %arg5[%c0_216, %c0_217] : memref<2x256xf32, #tpu.memory_space<vmem>>, vector<2x16xf32>
    tpu.vector_store %arg5[%c0_216, %c0_217], %670 {strides = array<i32>} : memref<2x256xf32, #tpu.memory_space<vmem>>, vector<2x16xf32>,
    %672 = vector.extract_strided_slice %668 {offsets = [0, 1, 0], sizes = [2, 1, 16], strides = [1, 1, 1]} : vector<2x16x16xf32> to vector<2x1x16xf32>
    %673 = vector.shape_cast %672 : vector<2x1x16xf32> to vector<2x16xf32>
    %c0_218 = arith.constant 0 : index
    %c16_219 = arith.constant 16 : index
    %674 = vector.load %arg5[%c0_218, %c16_219] : memref<2x256xf32, #tpu.memory_space<vmem>>, vector<2x16xf32>
    tpu.vector_store %arg5[%c0_218, %c16_219], %673 {strides = array<i32>} : memref<2x256xf32, #tpu.memory_space<vmem>>, vector<2x16xf32>,
    %675 = vector.extract_strided_slice %668 {offsets = [0, 2, 0], sizes = [2, 1, 16], strides = [1, 1, 1]} : vector<2x16x16xf32> to vector<2x1x16xf32>
    %676 = vector.shape_cast %675 : vector<2x1x16xf32> to vector<2x16xf32>
    %c0_220 = arith.constant 0 : index
    %c32_221 = arith.constant 32 : index
    %677 = vector.load %arg5[%c0_220, %c32_221] : memref<2x256xf32, #tpu.memory_space<vmem>>, vector<2x16xf32>
    tpu.vector_store %arg5[%c0_220, %c32_221], %676 {strides = array<i32>} : memref<2x256xf32, #tpu.memory_space<vmem>>, vector<2x16xf32>,
    %678 = vector.extract_strided_slice %668 {offsets = [0, 3, 0], sizes = [2, 1, 16], strides = [1, 1, 1]} : vector<2x16x16xf32> to vector<2x1x16xf32>
    %679 = vector.shape_cast %678 : vector<2x1x16xf32> to vector<2x16xf32>
    %c0_222 = arith.constant 0 : index
    %c48_223 = arith.constant 48 : index
    %680 = vector.load %arg5[%c0_222, %c48_223] : memref<2x256xf32, #tpu.memory_space<vmem>>, vector<2x16xf32>
    tpu.vector_store %arg5[%c0_222, %c48_223], %679 {strides = array<i32>} : memref<2x256xf32, #tpu.memory_space<vmem>>, vector<2x16xf32>,
    %681 = vector.extract_strided_slice %668 {offsets = [0, 4, 0], sizes = [2, 1, 16], strides = [1, 1, 1]} : vector<2x16x16xf32> to vector<2x1x16xf32>
    %682 = vector.shape_cast %681 : vector<2x1x16xf32> to vector<2x16xf32>
    %c0_224 = arith.constant 0 : index
    %c64_225 = arith.constant 64 : index
    %683 = vector.load %arg5[%c0_224, %c64_225] : memref<2x256xf32, #tpu.memory_space<vmem>>, vector<2x16xf32>
    tpu.vector_store %arg5[%c0_224, %c64_225], %682 {strides = array<i32>} : memref<2x256xf32, #tpu.memory_space<vmem>>, vector<2x16xf32>,
    %684 = vector.extract_strided_slice %668 {offsets = [0, 5, 0], sizes = [2, 1, 16], strides = [1, 1, 1]} : vector<2x16x16xf32> to vector<2x1x16xf32>
    %685 = vector.shape_cast %684 : vector<2x1x16xf32> to vector<2x16xf32>
    %c0_226 = arith.constant 0 : index
    %c80_227 = arith.constant 80 : index
    %686 = vector.load %arg5[%c0_226, %c80_227] : memref<2x256xf32, #tpu.memory_space<vmem>>, vector<2x16xf32>
    tpu.vector_store %arg5[%c0_226, %c80_227], %685 {strides = array<i32>} : memref<2x256xf32, #tpu.memory_space<vmem>>, vector<2x16xf32>,
    %687 = vector.extract_strided_slice %668 {offsets = [0, 6, 0], sizes = [2, 1, 16], strides = [1, 1, 1]} : vector<2x16x16xf32> to vector<2x1x16xf32>
    %688 = vector.shape_cast %687 : vector<2x1x16xf32> to vector<2x16xf32>
    %c0_228 = arith.constant 0 : index
    %c96_229 = arith.constant 96 : index
    %689 = vector.load %arg5[%c0_228, %c96_229] : memref<2x256xf32, #tpu.memory_space<vmem>>, vector<2x16xf32>
    tpu.vector_store %arg5[%c0_228, %c96_229], %688 {strides = array<i32>} : memref<2x256xf32, #tpu.memory_space<vmem>>, vector<2x16xf32>,
    %690 = vector.extract_strided_slice %668 {offsets = [0, 7, 0], sizes = [2, 1, 16], strides = [1, 1, 1]} : vector<2x16x16xf32> to vector<2x1x16xf32>
    %691 = vector.shape_cast %690 : vector<2x1x16xf32> to vector<2x16xf32>
    %c0_230 = arith.constant 0 : index
    %c112 = arith.constant 112 : index
    %692 = vector.load %arg5[%c0_230, %c112] : memref<2x256xf32, #tpu.memory_space<vmem>>, vector<2x16xf32>
    tpu.vector_store %arg5[%c0_230, %c112], %691 {strides = array<i32>} : memref<2x256xf32, #tpu.memory_space<vmem>>, vector<2x16xf32>,
    %693 = vector.extract_strided_slice %668 {offsets = [0, 8, 0], sizes = [2, 1, 16], strides = [1, 1, 1]} : vector<2x16x16xf32> to vector<2x1x16xf32>
    %694 = vector.shape_cast %693 : vector<2x1x16xf32> to vector<2x16xf32>
    %c0_231 = arith.constant 0 : index
    %c128 = arith.constant 128 : index
    %695 = vector.load %arg5[%c0_231, %c128] : memref<2x256xf32, #tpu.memory_space<vmem>>, vector<2x16xf32>
    tpu.vector_store %arg5[%c0_231, %c128], %694 {strides = array<i32>} : memref<2x256xf32, #tpu.memory_space<vmem>>, vector<2x16xf32>,
    %696 = vector.extract_strided_slice %668 {offsets = [0, 9, 0], sizes = [2, 1, 16], strides = [1, 1, 1]} : vector<2x16x16xf32> to vector<2x1x16xf32>
    %697 = vector.shape_cast %696 : vector<2x1x16xf32> to vector<2x16xf32>
    %c0_232 = arith.constant 0 : index
    %c144 = arith.constant 144 : index
    %698 = vector.load %arg5[%c0_232, %c144] : memref<2x256xf32, #tpu.memory_space<vmem>>, vector<2x16xf32>
    tpu.vector_store %arg5[%c0_232, %c144], %697 {strides = array<i32>} : memref<2x256xf32, #tpu.memory_space<vmem>>, vector<2x16xf32>,
    %699 = vector.extract_strided_slice %668 {offsets = [0, 10, 0], sizes = [2, 1, 16], strides = [1, 1, 1]} : vector<2x16x16xf32> to vector<2x1x16xf32>
    %700 = vector.shape_cast %699 : vector<2x1x16xf32> to vector<2x16xf32>
    %c0_233 = arith.constant 0 : index
    %c160 = arith.constant 160 : index
    %701 = vector.load %arg5[%c0_233, %c160] : memref<2x256xf32, #tpu.memory_space<vmem>>, vector<2x16xf32>
    tpu.vector_store %arg5[%c0_233, %c160], %700 {strides = array<i32>} : memref<2x256xf32, #tpu.memory_space<vmem>>, vector<2x16xf32>,
    %702 = vector.extract_strided_slice %668 {offsets = [0, 11, 0], sizes = [2, 1, 16], strides = [1, 1, 1]} : vector<2x16x16xf32> to vector<2x1x16xf32>
    %703 = vector.shape_cast %702 : vector<2x1x16xf32> to vector<2x16xf32>
    %c0_234 = arith.constant 0 : index
    %c176 = arith.constant 176 : index
    %704 = vector.load %arg5[%c0_234, %c176] : memref<2x256xf32, #tpu.memory_space<vmem>>, vector<2x16xf32>
    tpu.vector_store %arg5[%c0_234, %c176], %703 {strides = array<i32>} : memref<2x256xf32, #tpu.memory_space<vmem>>, vector<2x16xf32>,
    %705 = vector.extract_strided_slice %668 {offsets = [0, 12, 0], sizes = [2, 1, 16], strides = [1, 1, 1]} : vector<2x16x16xf32> to vector<2x1x16xf32>
    %706 = vector.shape_cast %705 : vector<2x1x16xf32> to vector<2x16xf32>
    %c0_235 = arith.constant 0 : index
    %c192 = arith.constant 192 : index
    %707 = vector.load %arg5[%c0_235, %c192] : memref<2x256xf32, #tpu.memory_space<vmem>>, vector<2x16xf32>
    tpu.vector_store %arg5[%c0_235, %c192], %706 {strides = array<i32>} : memref<2x256xf32, #tpu.memory_space<vmem>>, vector<2x16xf32>,
    %708 = vector.extract_strided_slice %668 {offsets = [0, 13, 0], sizes = [2, 1, 16], strides = [1, 1, 1]} : vector<2x16x16xf32> to vector<2x1x16xf32>
    %709 = vector.shape_cast %708 : vector<2x1x16xf32> to vector<2x16xf32>
    %c0_236 = arith.constant 0 : index
    %c208 = arith.constant 208 : index
    %710 = vector.load %arg5[%c0_236, %c208] : memref<2x256xf32, #tpu.memory_space<vmem>>, vector<2x16xf32>
    tpu.vector_store %arg5[%c0_236, %c208], %709 {strides = array<i32>} : memref<2x256xf32, #tpu.memory_space<vmem>>, vector<2x16xf32>,
    %711 = vector.extract_strided_slice %668 {offsets = [0, 14, 0], sizes = [2, 1, 16], strides = [1, 1, 1]} : vector<2x16x16xf32> to vector<2x1x16xf32>
    %712 = vector.shape_cast %711 : vector<2x1x16xf32> to vector<2x16xf32>
    %c0_237 = arith.constant 0 : index
    %c224 = arith.constant 224 : index
    %713 = vector.load %arg5[%c0_237, %c224] : memref<2x256xf32, #tpu.memory_space<vmem>>, vector<2x16xf32>
    tpu.vector_store %arg5[%c0_237, %c224], %712 {strides = array<i32>} : memref<2x256xf32, #tpu.memory_space<vmem>>, vector<2x16xf32>,
    %714 = vector.extract_strided_slice %668 {offsets = [0, 15, 0], sizes = [2, 1, 16], strides = [1, 1, 1]} : vector<2x16x16xf32> to vector<2x1x16xf32>
    %715 = vector.shape_cast %714 : vector<2x1x16xf32> to vector<2x16xf32>
    %c0_238 = arith.constant 0 : index
    %c240 = arith.constant 240 : index
    %716 = vector.load %arg5[%c0_238, %c240] : memref<2x256xf32, #tpu.memory_space<vmem>>, vector<2x16xf32>
    tpu.vector_store %arg5[%c0_238, %c240], %715 {strides = array<i32>} : memref<2x256xf32, #tpu.memory_space<vmem>>, vector<2x16xf32>,
    %c0_239 = arith.constant 0 : index
    %c0_240 = arith.constant 0 : index
    %717 = vector.load %arg5[%c0_239, %c0_240] : memref<2x256xf32, #tpu.memory_space<vmem>>, vector<2x256xf32>
    %718 = arith.negf %717 : vector<2x256xf32>
    %719 = math.exp %718 : vector<2x256xf32>
    %cst_241 = arith.constant 1.000000e+00 : f32
    %720 = vector.broadcast %cst_241 : f32 to vector<2x256xf32>
    %721 = arith.addf %720, %719 : vector<2x256xf32>
    %722 = arith.divf %720, %721 : vector<2x256xf32>
    %c0_242 = arith.constant 0 : index
    %c0_243 = arith.constant 0 : index
    %c0_244 = arith.constant 0 : index
    %723 = vector.load %arg2[%c0_242, %c0_243, %c0_244] : memref<2x4x256xf32, #tpu.memory_space<vmem>>, vector<2x1x256xf32>
    %724 = vector.shape_cast %723 : vector<2x1x256xf32> to vector<2x256xf32>
    %725 = arith.mulf %724, %722 : vector<2x256xf32>
    %c0_245 = arith.constant 0 : index
    %c0_246 = arith.constant 0 : index
    %c0_247 = arith.constant 0 : index
    %726 = vector.load %arg3[%c0_245, %c0_246, %c0_247] : memref<2x4x256xf32, #tpu.memory_space<vmem>>, vector<2x1x256xf32>
    %727 = vector.shape_cast %726 : vector<2x1x256xf32> to vector<2x256xf32>
    %728 = vector.shape_cast %725 : vector<2x256xf32> to vector<2x1x256xf32>
    tpu.vector_store %arg3[%c0_245, %c0_246, %c0_247], %728 {strides = array<i32>} : memref<2x4x256xf32, #tpu.memory_space<vmem>>, vector<2x1x256xf32>,
    %c0_248 = arith.constant 0 : index
    %c1_249 = arith.constant 1 : index
    %c0_250 = arith.constant 0 : index
    %729 = vector.load %arg2[%c0_248, %c1_249, %c0_250] : memref<2x4x256xf32, #tpu.memory_space<vmem>>, vector<2x1x256xf32>
    %730 = vector.shape_cast %729 : vector<2x1x256xf32> to vector<2x256xf32>
    %731 = arith.mulf %730, %722 : vector<2x256xf32>
    %c0_251 = arith.constant 0 : index
    %c1_252 = arith.constant 1 : index
    %c0_253 = arith.constant 0 : index
    %732 = vector.load %arg3[%c0_251, %c1_252, %c0_253] : memref<2x4x256xf32, #tpu.memory_space<vmem>>, vector<2x1x256xf32>
    %733 = vector.shape_cast %732 : vector<2x1x256xf32> to vector<2x256xf32>
    %734 = vector.shape_cast %731 : vector<2x256xf32> to vector<2x1x256xf32>
    tpu.vector_store %arg3[%c0_251, %c1_252, %c0_253], %734 {strides = array<i32>} : memref<2x4x256xf32, #tpu.memory_space<vmem>>, vector<2x1x256xf32>,
    %c0_254 = arith.constant 0 : index
    %c2_255 = arith.constant 2 : index
    %c0_256 = arith.constant 0 : index
    %735 = vector.load %arg2[%c0_254, %c2_255, %c0_256] : memref<2x4x256xf32, #tpu.memory_space<vmem>>, vector<2x1x256xf32>
    %736 = vector.shape_cast %735 : vector<2x1x256xf32> to vector<2x256xf32>
    %737 = arith.mulf %736, %722 : vector<2x256xf32>
    %c0_257 = arith.constant 0 : index
    %c2_258 = arith.constant 2 : index
    %c0_259 = arith.constant 0 : index
    %738 = vector.load %arg3[%c0_257, %c2_258, %c0_259] : memref<2x4x256xf32, #tpu.memory_space<vmem>>, vector<2x1x256xf32>
    %739 = vector.shape_cast %738 : vector<2x1x256xf32> to vector<2x256xf32>
    %740 = vector.shape_cast %737 : vector<2x256xf32> to vector<2x1x256xf32>
    tpu.vector_store %arg3[%c0_257, %c2_258, %c0_259], %740 {strides = array<i32>} : memref<2x4x256xf32, #tpu.memory_space<vmem>>, vector<2x1x256xf32>,
    %c0_260 = arith.constant 0 : index
    %c3_261 = arith.constant 3 : index
    %c0_262 = arith.constant 0 : index
    %741 = vector.load %arg2[%c0_260, %c3_261, %c0_262] : memref<2x4x256xf32, #tpu.memory_space<vmem>>, vector<2x1x256xf32>
    %742 = vector.shape_cast %741 : vector<2x1x256xf32> to vector<2x256xf32>
    %743 = arith.mulf %742, %722 : vector<2x256xf32>
    %c0_263 = arith.constant 0 : index
    %c3_264 = arith.constant 3 : index
    %c0_265 = arith.constant 0 : index
    %744 = vector.load %arg3[%c0_263, %c3_264, %c0_265] : memref<2x4x256xf32, #tpu.memory_space<vmem>>, vector<2x1x256xf32>
    %745 = vector.shape_cast %744 : vector<2x1x256xf32> to vector<2x256xf32>
    %746 = vector.shape_cast %743 : vector<2x256xf32> to vector<2x1x256xf32>
    tpu.vector_store %arg3[%c0_263, %c3_264, %c0_265], %746 {strides = array<i32>} : memref<2x4x256xf32, #tpu.memory_space<vmem>>, vector<2x1x256xf32>,
    return
  }
  func.func @transform_0(%arg0: i32) -> i32 {
    %c0_i32 = arith.constant 0 : i32
    %c0_i32_0 = arith.constant 0 : i32
    return %c0_i32 : i32
  }
  func.func @transform_1(%arg0: i32) -> (i32, i32, i32) {
    %c0_i32 = arith.constant 0 : i32
    %c0_i32_0 = arith.constant 0 : i32
    %c0_i32_1 = arith.constant 0 : i32
    return %arg0, %c0_i32, %c0_i32_0 : i32, i32, i32
  }
  func.func @transform_2(%arg0: i32) -> (i32, i32, i32) {
    %c0_i32 = arith.constant 0 : i32
    %c0_i32_0 = arith.constant 0 : i32
    %c0_i32_1 = arith.constant 0 : i32
    return %arg0, %c0_i32, %c0_i32_0 : i32, i32, i32
  }
}

</mosaic_0001>

<bundles_post_ra>
// kernel: tpu_custom_call.1
= control target key start
LH: loop header
LB: loop body
LE: loop exit
PB: predicated region body
PF: predicated region fallthrough
CT: control target
= control target key end

     0   :  { %s9082_s0 = inlined_call_operand.hbm [shape: f32[98], index: 0, kind: input, shape index: {}]   ;;  %s9083_s1 = inlined_call_operand.hbm [shape: f32[2,4,256], index: 1, kind: input, shape index: {}]   ;;  %s9084_s2 = inlined_call_operand.hbm [shape: f32[2,4,256], index: 2, kind: output, shape index: {}]  }
   0x1   :  { %9336 = sst [smem:[#allocation308_spill]] %s9084_s2 }
   0x2   :  { %7 = vsyncpa [#allocation7], 0 }
   0x3   :  { %8 = vsyncpa [#allocation5], 0 }
   0x4   :  { %9 = vsyncpa [#allocation6], 0  ;;  %s4744_s9 = smov [#allocation4]   ;;  %s4745_s12 = smov [#allocation8]  }
   0x5   :  { %17 = dma.hbm_to_smem %s9082_s0, 16, %s4744_s9, [#allocation7]  }
   0x6   :  { %s23_s13 = sshll.u32 %s4745_s12, 4  ;;  %s24_s13 = int_to_ptr.vmem [resolvable:$true] %s23_s13 }
   0x7   :  { %s4706_s14 = scalar_lea.vmem %s24_s13, 256  ;;  %p4711_p1 = scmp.lt.s32.totalorder %s24_s13, %s24_s13 }
   0x8   :  { %p4707_p0 = scmp.ne.s32.totalorder %s24_s13, %s4706_s14  ;;  %p4712_p2 = scmp.lt.s32.totalorder %s4706_s14, %s4706_s14 }
   0xa   :  { %p4713_p3 = por %p4712_p2, %p4711_p1 }
   0xc   :  { %p4714_p4 = pnand %p4713_p3, %p4707_p0 }
   0xe   :  { %4717 = shalt.err (!%p4714_p4)
}
   0xf   :  { %s9085_s15 = smov 128   ;;  %s9086_s16 = smov 8  }
  0x10   :  { %29 = dma.hbm_to_vmem [thread:$0]  %s9083_s1, 256, %s24_s13, [#allocation5], %s9085_s15, %s9085_s15, %s9086_s16  }
  0x11   :  { %4738 = dma.done.wait [#allocation7], 16  }
  0x12   :  { %4739 = vsyncadd [#allocation7], 4294967280 }
  0x13   :  { %4740 = dma.done.wait [#allocation5], 256  }
  0x14   :  { %4741 = vsyncadd [#allocation5], 4294967040 }
  0x15   :  { %36 = sfence }
  0x16   :  { %v37_v0 = vld [vmem:[#allocation8] ss:$4 sm:$0x3]  ;;  %v41_v1 = vld [vmem:[#allocation8 + $0x1] ss:$4 sm:$0x3]  ;;  %v9099_v2 = vlaneseq }
  0x17   :  { %v46_v3 = vmax.f32 %v37_v0, %v41_v1  ;;  %v49_v4 = vld [vmem:[#allocation8 + $0x2] ss:$4 sm:$0x3]  ;;  %v57_v5 = vld [vmem:[#allocation8 + $0x3] ss:$4 sm:$0x3]  ;;  %v44_v6 = vadd.f32 %v41_v1, %v37_v0 }
  0x18   :  { %v4798_v7 = vshrl.u32 %v9099_v2, 7  ;;  %v39_v8 = vld [vmem:[#allocation8 + $0x8] ss:$4 sm:$0x3]  ;;  %vm64_vm0 = vcmask 174080   ;;  %v4748_v21 = vmov 0.0  }
  0x19   :  { %v54_v9 = vmax.f32 %v46_v3, %v49_v4  ;;  %v52_v10 = vadd.f32 %v49_v4, %v44_v6  ;;  %v43_v11 = vld [vmem:[#allocation8 + $0x9] ss:$4 sm:$0x3]  ;;  %v51_v12 = vld [vmem:[#allocation8 + $0xa] ss:$4 sm:$0x3] }
  0x1a   :  { %9337 = vst [vmem:[#allocation13_spill] sm:$0xff] %v4798_v7  ;;  %v4801_v13 = vsub.s32 0, %v4798_v7  ;;  %v47_v14 = vmax.f32 %v39_v8, %v43_v11  ;;  %v45_v15 = vadd.f32 %v43_v11, %v39_v8  ;;  %v59_v18 = vld [vmem:[#allocation8 + $0xb] ss:$4 sm:$0x3]  ;;  %vm73_vm1 = vcmask 23552  }
  0x1b   :  { %v4803_v16 = vmax.f32 %v54_v9, %v57_v5  ;;  %v4805_v17 = vadd.f32 %v57_v5, %v52_v10  ;;  %67 = vst.msk [vmem:[#allocation2 + $0x30] sm:$0x7] %vm64_vm0, %v4748_v21  ;;  %vm87_vm2 = vcmask 179352   ;;  %65 = vst.msk [vmem:[#allocation2] sm:$0x7] %vm64_vm0, %v4748_v21  ;;  %s9097_s0 = smov 3  }
  0x1c   :  { %9338 = vst [vmem:[#allocation14_spill] sm:$0xff] %v4801_v13  ;;  %v55_v19 = vmax.f32 %v47_v14, %v51_v12  ;;  %v53_v20 = vadd.f32 %v51_v12, %v45_v15  ;;  %66 = vst.msk [vmem:[#allocation2 + $0x18] sm:$0x7] %vm64_vm0, %v4748_v21  ;;  %s4750_s1 = smov 115   ;;  %s4751_s19 = smov 99   ;;  %vm117_vm3 = vcmask 147480  }
  0x1d   :  { %9339 = vst [vmem:[#allocation15_spill] sm:$0xff] %v4803_v16  ;;  %9340 = vst [vmem:[#allocation16_spill] sm:$0xff] %v4805_v17  ;;  %v125_v22 = vrot.slane %v4803_v16, %v4801_v13  ;;  %v106_v23 = vrot.slane %v4805_v17, %v4801_v13  ;;  %s4752_s20 = smov 83   ;;  %s4753_s21 = smov 67   ;;  %v251_v29 = vrot.slane %v4805_v17, 1  ;;  %v269_v33 = vrot.slane %v4803_v16, 1 }
  0x1e   :  { %68 = vst.msk [vmem:[#allocation2 + $0x48] sm:$0x7] %vm64_vm0, %v4748_v21  ;;  %69 = vst.msk [vmem:[#allocation2 + $0x13] sm:$0x7] %vm64_vm0, %v4748_v21  ;;  %v4835_v24 = vmax.f32 %v55_v19, %v59_v18  ;;  %v4837_v25 = vadd.f32 %v59_v18, %v53_v20  ;;  %s4754_s22 = smov 51   ;;  %s4755_s23 = smov 35  }
  0x1f   :  { %70 = vst.msk [vmem:[#allocation2 + $0x2b] sm:$0x7] %vm64_vm0, %v4748_v21  ;;  %71 = vst.msk [vmem:[#allocation2 + $0x43] sm:$0x7] %vm64_vm0, %v4748_v21  ;;  %130 = vrot.lane.b32.xlu1 %v125_v22, %s9097_s0  ;;  %111 = vrot.lane.b32.xlu0 %v106_v23, %s9097_s0  ;;  %s4756_s24 = smov 19   ;;  %v256_v31 = vrot.slane %v251_v29, %v4801_v13  ;;  %v274_v35 = vrot.slane %v269_v33, %v4801_v13  ;;  %s9087_s25 = smov 112  }
  0x20   :  { %72 = vst.msk [vmem:[#allocation2 + $0x5b] sm:$0x7] %vm64_vm0, %v4748_v21  ;;  %9341 = vst [vmem:[#allocation17_spill] sm:$0xff] %v4835_v24  ;;  %v129_v26 = vrot.slane %v4835_v24, %v4801_v13  ;;  %v110_v27 = vrot.slane %v4837_v25, %v4801_v13  ;;  %v252_v28 = vrot.slane %v4837_v25, 1  ;;  %v270_v32 = vrot.slane %v4835_v24, 1  ;;  %s9089_s26 = smov 96  }
  0x21   :  { %81 = vst.msk [vmem:[#allocation2 + $0x30] sm:$0xff] %vm73_vm1, %v4748_v21  ;;  %75 = vst.msk [vmem:[#allocation2 + $0x8] sm:$0xff] %vm73_vm1, %v4748_v21  ;;  %s9091_s27 = smov 80   ;;  %s9093_s28 = smov 64   ;;  %vm76_vm4 = vcmask 21504   ;;  %vm90_vm5 = vcmask 177304  }
  0x22   :  { %79 = vst.msk [vmem:[#allocation2 + $0x20] sm:$0xff] %vm73_vm1, %v4748_v21  ;;  %82 = vst.msk [vmem:[#allocation2 + $0x38] sm:$0xff] %vm73_vm1, %v4748_v21  ;;  %v260_v30 = vrot.slane %v252_v28, %v4801_v13  ;;  %v278_v34 = vrot.slane %v270_v32, %v4801_v13  ;;  %s9095_s29 = smov 48   ;;  %s5001_s30 = sld [smem:[#allocation4 + $0x41]]  ;;  %vm658_vm6 = vcmask 1045504   ;;  %vm691_vm7 = vcmask 1044480  }
  0x23   :  { %85 = vst.msk [vmem:[#allocation2 + $0x50] sm:$0xff] %vm73_vm1, %v4748_v21  ;;  %74 = vst.msk [vmem:[#allocation2] sm:$0xff] %vm73_vm1, %v4748_v21  ;;  %132 = vrot.lane.b32.xlu1 %v129_v26, %s9097_s0  ;;  %113 = vrot.lane.b32.xlu0 %v110_v27, %s9097_s0  ;;  %s5003_s3 = sld [smem:[#allocation4 + $0x48]]  ;;  %vm724_vm8 = vcmask 1043456   ;;  %vm757_vm9 = vcmask 1042432   ;;  %vm790_vm10 = vcmask 1041408  }
  0x24   :  { %78 = vst.msk [vmem:[#allocation2 + $0x18] sm:$0xff] %vm73_vm1, %v4748_v21  ;;  %84 = vst.msk [vmem:[#allocation2 + $0x48] sm:$0xff] %vm73_vm1, %v4748_v21  ;;  %s5005_s4 = sld [smem:[#allocation4 + $0x4f]]  ;;  %vm625_vm11 = vcmask 1046528   ;;  %vm4230_vm12 = vcmask 1041409   ;;  %vm4232_vm13 = vcmask 1043459  }
  0x25   :  { %9342 = vst [vmem:[#allocation18_spill] sm:$0xff] %v4837_v25  ;;  %95 = vst.msk [vmem:[#allocation2 + $0x30] sm:$0xff] %vm87_vm2, %v4748_v21  ;;  %s5007_s5 = sld [smem:[#allocation4 + $0x56]]  ;;  %vm4234_vm14 = vcmask 1045509   ;;  %vm4236_vm15 = vcmask 1047559   ;;  %vm4239_vm0 = vcmask 123904  }
  0x26   :  { %88 = vst.msk [vmem:[#allocation2] sm:$0xff] %vm87_vm2, %v4748_v21  ;;  %89 = vst.msk [vmem:[#allocation2 + $0x8] sm:$0xff] %vm87_vm2, %v4748_v21  ;;  %s5009_s6 = sld [smem:[#allocation4 + $0x5d]]  ;;  %vm4251_vm1 = vcmask 255104  }
  0x27   :  { %93 = vst.msk [vmem:[#allocation2 + $0x20] sm:$0xff] %vm87_vm2, %v4748_v21  ;;  %96 = vst.msk [vmem:[#allocation2 + $0x38] sm:$0xff] %vm87_vm2, %v4748_v21  ;;  %141 = vrot.lane.b32.xlu1 %v110_v27, %s4750_s1  ;;  %139 = vrot.lane.b32.xlu0 %v106_v23, %s4750_s1  ;;  %s5011_s7 = sld [smem:[#allocation4 + $0x38]] }
  0x28   :  { %99 = vst.msk [vmem:[#allocation2 + $0x50] sm:$0xff] %vm87_vm2, %v4748_v21  ;;  %98 = vst.msk [vmem:[#allocation2 + $0x48] sm:$0xff] %vm87_vm2, %v4748_v21  ;;  %s5013_s8 = sld [smem:[#allocation4 + $0x3f]] }
  0x29   :  { %92 = vst.msk [vmem:[#allocation2 + $0x18] sm:$0xff] %vm87_vm2, %v4748_v21  ;;  %s5015_s9 = sld [smem:[#allocation4 + $0x46]]  ;;  %vm4265_vm2 = vcmask 386304  }
  0x2a   :  { %80 = vst.msk [vmem:[#allocation2 + $0x28] sm:$0x3f] %vm76_vm4, %v4748_v21  ;;  %77 = vst.msk [vmem:[#allocation2 + $0x10] sm:$0x3f] %vm76_vm4, %v4748_v21  ;;  %s5017_s10 = sld [smem:[#allocation4 + $0x4d]] }
  0x2b   :  { %149 = vrot.lane.b32.xlu1 %v129_v26, %s4750_s1  ;;  %147 = vrot.lane.b32.xlu0 %v125_v22, %s4750_s1  ;;  %83 = vst.msk [vmem:[#allocation2 + $0x40] sm:$0x3f] %vm76_vm4, %v4748_v21  ;;  %86 = vst.msk [vmem:[#allocation2 + $0x58] sm:$0x3f] %vm76_vm4, %v4748_v21  ;;  %s5019_s11 = sld [smem:[#allocation4 + $0x54]]  ;;  %vm4305_vm4 = vcmask 648704  }
  0x2c   :  { %94 = vst.msk [vmem:[#allocation2 + $0x28] sm:$0x3f] %vm90_vm5, %v4748_v21  ;;  %91 = vst.msk [vmem:[#allocation2 + $0x10] sm:$0x3f] %vm90_vm5, %v4748_v21  ;;  %s5021_s12 = sld [smem:[#allocation4 + $0x5b]] }
  0x2d   :  { %97 = vst.msk [vmem:[#allocation2 + $0x40] sm:$0x3f] %vm90_vm5, %v4748_v21  ;;  %100 = vst.msk [vmem:[#allocation2 + $0x58] sm:$0x3f] %vm90_vm5, %v4748_v21  ;;  %s5023_s13 = sld [smem:[#allocation4 + $0x3b]]  ;;  %v5066_v21 = vstv %s5001_s30  ;;  %vm4317_vm5 = vcmask 779904  }
  0x2e   :  { %s5025_s14 = sld [smem:[#allocation4 + $0x42]]  ;;  %9346 = vst [vmem:[#allocation22_spill] sm:$0xff] %v5066_v21 }
  0x2f   :  { %157 = vrot.lane.b32.xlu1 %v110_v27, %s4751_s19  ;;  %155 = vrot.lane.b32.xlu0 %v106_v23, %s4751_s19  ;;  %s5027_s17 = sld [smem:[#allocation4 + $0x49]] }
  0x30   :  { %s5029_s18 = sld [smem:[#allocation4 + $0x50]] }
  0x31   :  { %s5031_s1 = sld [smem:[#allocation4 + $0x57]] }
  0x32   :  { %s5045_s15 = sld [smem:[#allocation4 + $0x5f]] }
  0x33   :  { %165 = vrot.lane.b32.xlu1 %v129_v26, %s4751_s19  ;;  %163 = vrot.lane.b32.xlu0 %v125_v22, %s4751_s19  ;;  %s5033_s19 = sld [smem:[#allocation4 + $0x5e]] }
  0x34   :  { %s5047_s16 = sld [smem:[#allocation4 + $0x3d]] }
  0x35   :  { %s5061_s2 = sld [smem:[#allocation4 + $0x45]] }
  0x36   :  { %s5096_s30 = sld [smem:[#allocation4 + $0x61]] }
  0x37   :  { %173 = vrot.lane.b32.xlu1 %v110_v27, %s4752_s20  ;;  %171 = vrot.lane.b32.xlu0 %v106_v23, %s4752_s20 }
  0x3a   :  { %9343 = sst [smem:[#allocation19_spill]] %s5047_s16 }
  0x3b   :  { %181 = vrot.lane.b32.xlu1 %v129_v26, %s4752_s20  ;;  %179 = vrot.lane.b32.xlu0 %v125_v22, %s4752_s20  ;;  %s5035_s20 = sld [smem:[#allocation4 + $0x3c]] }
  0x3c   :  { %9345 = sst [smem:[#allocation21_spill]] %s5061_s2 }
  0x3d   :  { %s5063_s16 = sld [smem:[#allocation4 + $0x4c]] }
  0x3e   :  { %s5082_s2 = sld [smem:[#allocation4 + $0x5a]] }
  0x3f   :  { %189 = vrot.lane.b32.xlu1 %v110_v27, %s4753_s21  ;;  %187 = vrot.lane.b32.xlu0 %v106_v23, %s4753_s21 }
  0x43   :  { %197 = vrot.lane.b32.xlu1 %v129_v26, %s4753_s21  ;;  %195 = vrot.lane.b32.xlu0 %v125_v22, %s4753_s21  ;;  %s5037_s21 = sld [smem:[#allocation4 + $0x43]] }
  0x47   :  { %205 = vrot.lane.b32.xlu1 %v110_v27, %s4754_s22  ;;  %203 = vrot.lane.b32.xlu0 %v106_v23, %s4754_s22 }
  0x4b   :  { %213 = vrot.lane.b32.xlu1 %v129_v26, %s4754_s22  ;;  %211 = vrot.lane.b32.xlu0 %v125_v22, %s4754_s22  ;;  %s5039_s22 = sld [smem:[#allocation4 + $0x4a]] }
  0x4f   :  { %221 = vrot.lane.b32.xlu1 %v110_v27, %s4755_s23  ;;  %219 = vrot.lane.b32.xlu0 %v106_v23, %s4755_s23 }
  0x53   :  { %229 = vrot.lane.b32.xlu1 %v129_v26, %s4755_s23  ;;  %227 = vrot.lane.b32.xlu0 %v125_v22, %s4755_s23  ;;  %s5041_s23 = sld [smem:[#allocation4 + $0x51]] }
  0x57   :  { %237 = vrot.lane.b32.xlu1 %v110_v27, %s4756_s24  ;;  %235 = vrot.lane.b32.xlu0 %v106_v23, %s4756_s24 }
  0x5b   :  { %245 = vrot.lane.b32.xlu1 %v129_v26, %s4756_s24  ;;  %243 = vrot.lane.b32.xlu0 %v125_v22, %s4756_s24  ;;  %s5043_s24 = sld [smem:[#allocation4 + $0x58]] }
  0x5f   :  { %263 = vrot.lane.b32.xlu1 %v260_v30, %s9097_s0  ;;  %261 = vrot.lane.b32.xlu0 %v256_v31, %s9097_s0 }
  0x63   :  { %281 = vrot.lane.b32.xlu1 %v278_v34, %s9097_s0  ;;  %279 = vrot.lane.b32.xlu0 %v274_v35, %s9097_s0 }
  0x67   :  { %289 = vrot.lane.b32.xlu1 %v4837_v25, %s9087_s25  ;;  %287 = vrot.lane.b32.xlu0 %v4805_v17, %s9087_s25 }
  0x6b   :  { %311 = vrot.lane.b32.xlu1 %v4835_v24, %s9087_s25  ;;  %309 = vrot.lane.b32.xlu0 %v4803_v16, %s9087_s25  ;;  %s5049_s25 = sld [smem:[#allocation4 + $0x44]] }
  0x6f   :  { %333 = vrot.lane.b32.xlu1 %v4837_v25, %s9089_s26  ;;  %331 = vrot.lane.b32.xlu0 %v4805_v17, %s9089_s26 }
  0x73   :  { %355 = vrot.lane.b32.xlu1 %v4835_v24, %s9089_s26  ;;  %353 = vrot.lane.b32.xlu0 %v4803_v16, %s9089_s26  ;;  %s5051_s26 = sld [smem:[#allocation4 + $0x4b]] }
  0x77   :  { %377 = vrot.lane.b32.xlu1 %v4837_v25, %s9091_s27  ;;  %375 = vrot.lane.b32.xlu0 %v4805_v17, %s9091_s27 }
  0x79   :  { %9344 = sst [smem:[#allocation20_spill]] %s5051_s26 }
  0x7a   :  { %s5068_s26 = sld [smem:[#allocation4 + $0x53]] }
  0x7b   :  { %399 = vrot.lane.b32.xlu1 %v4835_v24, %s9091_s27  ;;  %397 = vrot.lane.b32.xlu0 %v4803_v16, %s9091_s27  ;;  %s5053_s27 = sld [smem:[#allocation4 + $0x52]] }
  0x7f   :  { %421 = vrot.lane.b32.xlu1 %v4837_v25, %s9093_s28  ;;  %419 = vrot.lane.b32.xlu0 %v4805_v17, %s9093_s28 }
  0x91   :  { %v131_v36 = vpop.permute.xlu1 %130  ;;  %v112_v37 = vpop.permute.xlu0 %111 }
  0x92   :  { %137 = vst.msk [vmem:[#allocation2 + $0x33] sm:$0x1] %vm117_vm3, %v131_v36  ;;  %118 = vst.msk [vmem:[#allocation2 + $0x3] sm:$0x1] %vm117_vm3, %v112_v37 }
  0x95   :  { %v133_v38 = vpop.permute.xlu1 %132  ;;  %v114_v39 = vpop.permute.xlu0 %113 }
  0x96   :  { %138 = vst.msk [vmem:[#allocation2 + $0x4b] sm:$0x1] %vm117_vm3, %v133_v38  ;;  %119 = vst.msk [vmem:[#allocation2 + $0x1b] sm:$0x1] %vm117_vm3, %v114_v39 }
  0x99   :  { %v142_v40 = vpop.permute.xlu1 %141  ;;  %v140_v41 = vpop.permute.xlu0 %139 }
  0x9a   :  { %146 = vst.msk [vmem:[#allocation2 + $0x1c] sm:$0x1] %vm117_vm3, %v142_v40  ;;  %145 = vst.msk [vmem:[#allocation2 + $0x4] sm:$0x1] %vm117_vm3, %v140_v41 }
  0x9d   :  { %v150_v42 = vpop.permute.xlu1 %149  ;;  %v148_v43 = vpop.permute.xlu0 %147 }
  0x9e   :  { %154 = vst.msk [vmem:[#allocation2 + $0x4c] sm:$0x1] %vm117_vm3, %v150_v42  ;;  %153 = vst.msk [vmem:[#allocation2 + $0x34] sm:$0x1] %vm117_vm3, %v148_v43 }
  0xa1   :  { %v158_v44 = vpop.permute.xlu1 %157  ;;  %v156_v45 = vpop.permute.xlu0 %155 }
  0xa2   :  { %162 = vst.msk [vmem:[#allocation2 + $0x1d] sm:$0x1] %vm117_vm3, %v158_v44  ;;  %161 = vst.msk [vmem:[#allocation2 + $0x5] sm:$0x1] %vm117_vm3, %v156_v45 }
  0xa5   :  { %v166_v46 = vpop.permute.xlu1 %165  ;;  %v164_v47 = vpop.permute.xlu0 %163 }
  0xa6   :  { %170 = vst.msk [vmem:[#allocation2 + $0x4d] sm:$0x1] %vm117_vm3, %v166_v46  ;;  %169 = vst.msk [vmem:[#allocation2 + $0x35] sm:$0x1] %vm117_vm3, %v164_v47 }
  0xa9   :  { %v174_v48 = vpop.permute.xlu1 %173  ;;  %v172_v49 = vpop.permute.xlu0 %171 }
  0xaa   :  { %178 = vst.msk [vmem:[#allocation2 + $0x1e] sm:$0x1] %vm117_vm3, %v174_v48  ;;  %177 = vst.msk [vmem:[#allocation2 + $0x6] sm:$0x1] %vm117_vm3, %v172_v49 }
  0xad   :  { %v182_v50 = vpop.permute.xlu1 %181  ;;  %v180_v51 = vpop.permute.xlu0 %179 }
  0xae   :  { %186 = vst.msk [vmem:[#allocation2 + $0x4e] sm:$0x1] %vm117_vm3, %v182_v50  ;;  %185 = vst.msk [vmem:[#allocation2 + $0x36] sm:$0x1] %vm117_vm3, %v180_v51 }
  0xb1   :  { %v190_v52 = vpop.permute.xlu1 %189  ;;  %v188_v53 = vpop.permute.xlu0 %187 }
  0xb2   :  { %194 = vst.msk [vmem:[#allocation2 + $0x1f] sm:$0x1] %vm117_vm3, %v190_v52  ;;  %193 = vst.msk [vmem:[#allocation2 + $0x7] sm:$0x1] %vm117_vm3, %v188_v53 }
  0xb5   :  { %v198_v54 = vpop.permute.xlu1 %197  ;;  %v196_v55 = vpop.permute.xlu0 %195 }
  0xb6   :  { %202 = vst.msk [vmem:[#allocation2 + $0x4f] sm:$0x1] %vm117_vm3, %v198_v54  ;;  %201 = vst.msk [vmem:[#allocation2 + $0x37] sm:$0x1] %vm117_vm3, %v196_v55 }
  0xb9   :  { %v206_v56 = vpop.permute.xlu1 %205  ;;  %v204_v57 = vpop.permute.xlu0 %203 }
  0xba   :  { %210 = vst.msk [vmem:[#allocation2 + $0x20] sm:$0x1] %vm117_vm3, %v206_v56  ;;  %209 = vst.msk [vmem:[#allocation2 + $0x8] sm:$0x1] %vm117_vm3, %v204_v57 }
  0xbd   :  { %v214_v58 = vpop.permute.xlu1 %213  ;;  %v212_v59 = vpop.permute.xlu0 %211 }
  0xbe   :  { %218 = vst.msk [vmem:[#allocation2 + $0x50] sm:$0x1] %vm117_vm3, %v214_v58  ;;  %217 = vst.msk [vmem:[#allocation2 + $0x38] sm:$0x1] %vm117_vm3, %v212_v59 }
  0xc1   :  { %v222_v60 = vpop.permute.xlu1 %221  ;;  %v220_v61 = vpop.permute.xlu0 %219 }
  0xc2   :  { %226 = vst.msk [vmem:[#allocation2 + $0x21] sm:$0x1] %vm117_vm3, %v222_v60  ;;  %225 = vst.msk [vmem:[#allocation2 + $0x9] sm:$0x1] %vm117_vm3, %v220_v61 }
  0xc5   :  { %v230_v62 = vpop.permute.xlu1 %229  ;;  %v228_v63 = vpop.permute.xlu0 %227 }
  0xc6   :  { %234 = vst.msk [vmem:[#allocation2 + $0x51] sm:$0x1] %vm117_vm3, %v230_v62  ;;  %233 = vst.msk [vmem:[#allocation2 + $0x39] sm:$0x1] %vm117_vm3, %v228_v63 }
  0xc9   :  { %v238_v0 = vpop.permute.xlu1 %237  ;;  %v236_v1 = vpop.permute.xlu0 %235 }
  0xca   :  { %242 = vst.msk [vmem:[#allocation2 + $0x22] sm:$0x1] %vm117_vm3, %v238_v0  ;;  %241 = vst.msk [vmem:[#allocation2 + $0xa] sm:$0x1] %vm117_vm3, %v236_v1 }
  0xcd   :  { %v246_v3 = vpop.permute.xlu1 %245  ;;  %v244_v4 = vpop.permute.xlu0 %243 }
  0xce   :  { %250 = vst.msk [vmem:[#allocation2 + $0x52] sm:$0x1] %vm117_vm3, %v246_v3  ;;  %249 = vst.msk [vmem:[#allocation2 + $0x3a] sm:$0x1] %vm117_vm3, %v244_v4 }
  0xd1   :  { %v264_v5 = vpop.permute.xlu1 %263  ;;  %v262_v6 = vpop.permute.xlu0 %261 }
  0xd2   :  { %268 = vst.msk [vmem:[#allocation2 + $0x23] sm:$0x1] %vm117_vm3, %v264_v5  ;;  %267 = vst.msk [vmem:[#allocation2 + $0xb] sm:$0x1] %vm117_vm3, %v262_v6 }
  0xd5   :  { %v282_v8 = vpop.permute.xlu1 %281  ;;  %v280_v9 = vpop.permute.xlu0 %279 }
  0xd6   :  { %286 = vst.msk [vmem:[#allocation2 + $0x53] sm:$0x1] %vm117_vm3, %v282_v8  ;;  %285 = vst.msk [vmem:[#allocation2 + $0x3b] sm:$0x1] %vm117_vm3, %v280_v9 }
  0xd9   :  { %v290_v10 = vpop.permute.xlu1 %289  ;;  %v288_v11 = vpop.permute.xlu0 %287 }
  0xda   :  { %v292_v12 = vrot.slane %v290_v10, 1  ;;  %v291_v14 = vrot.slane %v288_v11, 1 }
  0xdc   :  { %v300_v15 = vrot.slane %v292_v12, %v4801_v13  ;;  %v296_v18 = vrot.slane %v291_v14, %v4801_v13 }
  0xdd   :  { %v312_v19 = vpop.permute.xlu1 %311  ;;  %v310_v20 = vpop.permute.xlu0 %309 }
  0xde   :  { %v314_v22 = vrot.slane %v312_v19, 1  ;;  %v313_v23 = vrot.slane %v310_v20, 1  ;;  %303 = vrot.lane.b32.xlu1 %v300_v15, %s9097_s0  ;;  %301 = vrot.lane.b32.xlu0 %v296_v18, %s9097_s0  ;;  %v5071_v19 = vstv %s5003_s3  ;;  %v5074_v20 = vstv %s5005_s4  ;;  %s9356_s3 = sld [smem:[#allocation19_spill]] }
  0xdf   :  { %9347 = vst [vmem:[#allocation23_spill] sm:$0xff] %v5071_v19  ;;  %9348 = vst [vmem:[#allocation24_spill] sm:$0xff] %v5074_v20  ;;  %s9360_s4 = sld [smem:[#allocation20_spill]] }
  0xe0   :  { %v322_v26 = vrot.slane %v314_v22, %v4801_v13  ;;  %v318_v27 = vrot.slane %v313_v23, %v4801_v13  ;;  %v5077_v22 = vstv %s5007_s5  ;;  %v5080_v23 = vstv %s5009_s6  ;;  %s9365_s5 = sld [smem:[#allocation21_spill]]  ;;  %s4765_s6 = smov 126  }
  0xe1   :  { %v334_v28 = vpop.permute.xlu1 %333  ;;  %v332_v29 = vpop.permute.xlu0 %331  ;;  %9349 = vst [vmem:[#allocation25_spill] sm:$0xff] %v5077_v22  ;;  %9350 = vst [vmem:[#allocation26_spill] sm:$0xff] %v5080_v23 }
  0xe2   :  { %v336_v30 = vrot.slane %v334_v28, 1  ;;  %v335_v31 = vrot.slane %v332_v29, 1  ;;  %325 = vrot.lane.b32.xlu1 %v322_v26, %s9097_s0  ;;  %323 = vrot.lane.b32.xlu0 %v318_v27, %s9097_s0  ;;  %v5085_v26 = vstv %s5011_s7  ;;  %v5088_v27 = vstv %s5013_s8  ;;  %s4547_s7 = sld [smem:[#allocation4 + $0x16]] }
  0xe3   :  { %9351 = vst [vmem:[#allocation27_spill] sm:$0xff] %v5085_v26  ;;  %9352 = vst [vmem:[#allocation28_spill] sm:$0xff] %v5088_v27  ;;  %v5091_v28 = vstv %s5015_s9  ;;  %v5094_v29 = vstv %s5017_s10  ;;  %s4548_s8 = sld [smem:[#allocation4 + $0x1d]] }
  0xe4   :  { %v344_v32 = vrot.slane %v336_v30, %v4801_v13  ;;  %v340_v33 = vrot.slane %v335_v31, %v4801_v13  ;;  %9353 = vst [vmem:[#allocation29_spill] sm:$0xff] %v5091_v28  ;;  %9354 = vst [vmem:[#allocation30_spill] sm:$0xff] %v5094_v29  ;;  %v5099_v30 = vstv %s5019_s11  ;;  %v5102_v31 = vstv %s5021_s12  ;;  %s4549_s9 = sld [smem:[#allocation4 + $0x24]] }
  0xe5   :  { %v356_v34 = vpop.permute.xlu1 %355  ;;  %v354_v35 = vpop.permute.xlu0 %353  ;;  %9355 = vst [vmem:[#allocation31_spill] sm:$0xff] %v5099_v30  ;;  %9357 = vst [vmem:[#allocation32_spill] sm:$0xff] %v5102_v31  ;;  %s4550_s10 = sld [smem:[#allocation4 + $0x2b]] }
  0xe6   :  { %v358_v36 = vrot.slane %v356_v34, 1  ;;  %v357_v37 = vrot.slane %v354_v35, 1  ;;  %347 = vrot.lane.b32.xlu1 %v344_v32, %s9097_s0  ;;  %345 = vrot.lane.b32.xlu0 %v340_v33, %s9097_s0  ;;  %v5105_v32 = vstv %s5023_s13  ;;  %v5108_v33 = vstv %s5025_s14  ;;  %v5110_v34 = vld [vmem:[#allocation2 + $0x30] sm:$0xff]  ;;  %s4552_s11 = sld [smem:[#allocation4 + $0x9]] }
  0xe7   :  { %9358 = vst [vmem:[#allocation33_spill] sm:$0xff] %v5105_v32  ;;  %9359 = vst [vmem:[#allocation34_spill] sm:$0xff] %v5108_v33  ;;  %v5113_v35 = vstv %s5027_s17  ;;  %v5244_v2 = vmul.f32 %v5102_v31, %v5110_v34  ;;  %s4553_s12 = sld [smem:[#allocation4 + $0x10]] }
  0xe8   :  { %v366_v38 = vrot.slane %v358_v36, %v4801_v13  ;;  %v362_v39 = vrot.slane %v357_v37, %v4801_v13  ;;  %9361 = vst [vmem:[#allocation35_spill] sm:$0xff] %v5113_v35  ;;  %v5116_v36 = vstv %s5029_s18  ;;  %v5119_v37 = vstv %s5031_s1  ;;  %s4554_s13 = sld [smem:[#allocation4 + $0x17]] }
  0xe9   :  { %v378_v40 = vpop.permute.xlu1 %377  ;;  %v376_v41 = vpop.permute.xlu0 %375  ;;  %9362 = vst [vmem:[#allocation36_spill] sm:$0xff] %v5116_v36  ;;  %9363 = vst [vmem:[#allocation37_spill] sm:$0xff] %v5119_v37  ;;  %s4555_s14 = sld [smem:[#allocation4 + $0x1e]] }
  0xea   :  { %v380_v42 = vrot.slane %v378_v40, 1  ;;  %v379_v43 = vrot.slane %v376_v41, 1  ;;  %369 = vrot.lane.b32.xlu1 %v366_v38, %s9097_s0  ;;  %367 = vrot.lane.b32.xlu0 %v362_v39, %s9097_s0  ;;  %v5122_v38 = vstv %s5033_s19  ;;  %v5124_v39 = vld [vmem:[#allocation2 + $0x48] sm:$0xff]  ;;  %v5127_v40 = vstv %s5035_s20  ;;  %9389 = vst [vmem:[#allocation62_spill] sm:$0xff] %v5244_v2  ;;  %s4556_s17 = sld [smem:[#allocation4 + $0x25]] }
  0xeb   :  { %9364 = vst [vmem:[#allocation38_spill] sm:$0xff] %v5122_v38  ;;  %9366 = vst [vmem:[#allocation39_spill] sm:$0xff] %v5127_v40  ;;  %v5130_v41 = vstv %s5037_s21  ;;  %v5255_v7 = vmul.f32 %v5085_v26, %v5124_v39  ;;  %v5331_v2 = vmul.f32 %v5122_v38, %v5124_v39  ;;  %s4557_s18 = sld [smem:[#allocation4 + $0x2c]]  ;;  %s4766_s21 = smov 125  }
  0xec   :  { %v388_v44 = vrot.slane %v380_v42, %v4801_v13  ;;  %v384_v45 = vrot.slane %v379_v43, %v4801_v13  ;;  %9367 = vst [vmem:[#allocation40_spill] sm:$0xff] %v5130_v41  ;;  %v5133_v42 = vstv %s5039_s22  ;;  %v5136_v43 = vstv %s5041_s23  ;;  %s4558_s1 = sld [smem:[#allocation4 + $0x3]] }
  0xed   :  { %v400_v46 = vpop.permute.xlu1 %399  ;;  %v398_v47 = vpop.permute.xlu0 %397  ;;  %9368 = vst [vmem:[#allocation41_spill] sm:$0xff] %v5133_v42  ;;  %9369 = vst [vmem:[#allocation42_spill] sm:$0xff] %v5136_v43  ;;  %s4559_s19 = sld [smem:[#allocation4 + $0xa]] }
  0xee   :  { %v402_v48 = vrot.slane %v400_v46, 1  ;;  %v401_v49 = vrot.slane %v398_v47, 1  ;;  %391 = vrot.lane.b32.xlu1 %v388_v44, %s9097_s0  ;;  %389 = vrot.lane.b32.xlu0 %v384_v45, %s9097_s0  ;;  %v5139_v44 = vstv %s5043_s24  ;;  %v5142_v45 = vstv %s5045_s15  ;;  %9391 = vst [vmem:[#allocation64_spill] sm:$0xff] %v5255_v7  ;;  %9398 = vst [vmem:[#allocation71_spill] sm:$0xff] %v5331_v2  ;;  %s9409_s15 = smov 48   ;;  %s4560_s20 = sld [smem:[#allocation4 + $0x11]] }
  0xef   :  { %9370 = vst [vmem:[#allocation43_spill] sm:$0xff] %v5139_v44  ;;  %9371 = vst [vmem:[#allocation44_spill] sm:$0xff] %v5142_v45  ;;  %v5145_v46 = vstv %s9356_s3  ;;  %v5148_v47 = vstv %s5049_s25  ;;  %v5308_v7 = vmul.f32 %v5113_v35, %v5110_v34  ;;  %s4544_s25 = sld [smem:[#allocation4 + $0x1]] }
  0xf0   :  { %v410_v50 = vrot.slane %v402_v48, %v4801_v13  ;;  %v406_v51 = vrot.slane %v401_v49, %v4801_v13  ;;  %9372 = vst [vmem:[#allocation45_spill] sm:$0xff] %v5145_v46  ;;  %9373 = vst [vmem:[#allocation46_spill] sm:$0xff] %v5148_v47  ;;  %v5152_v48 = vmul.f32 %v5066_v21, %v5110_v34  ;;  %v5155_v49 = vstv %s9360_s4  ;;  %s4561_s22 = sld [smem:[#allocation4 + $0x18]] }
  0xf1   :  { %v422_v52 = vpop.permute.xlu1 %421  ;;  %v420_v53 = vpop.permute.xlu0 %419  ;;  %9374 = vst [vmem:[#allocation47_spill] sm:$0xff] %v5155_v49  ;;  %s4562_s23 = sld [smem:[#allocation4 + $0x1f]] }
  0xf2   :  { %v424_v54 = vrot.slane %v422_v52, 1  ;;  %v423_v55 = vrot.slane %v420_v53, 1  ;;  %413 = vrot.lane.b32.xlu1 %v410_v50, %s9097_s0  ;;  %411 = vrot.lane.b32.xlu0 %v406_v51, %s9097_s0  ;;  %v5158_v50 = vstv %s5053_s27  ;;  %v5165_v52 = vmul.f32 %v5066_v21, %v5124_v39  ;;  %s4545_s27 = sld [smem:[#allocation4 + $0x8]] }
  0xf3   :  { %9375 = vst [vmem:[#allocation48_spill] sm:$0xff] %v5158_v50  ;;  %s4563_s24 = sld [smem:[#allocation4 + $0x26]] }
  0xf4   :  { %v432_v56 = vrot.slane %v424_v54, %v4801_v13  ;;  %v428_v57 = vrot.slane %v423_v55, %v4801_v13  ;;  %v5174_v55 = vstv %s9365_s5  ;;  %s4565_s3 = sld [smem:[#allocation4 + $0x4]] }
  0xf5   :  { %9379 = vst [vmem:[#allocation52_spill] sm:$0xff] %v5174_v55  ;;  %s4566_s4 = sld [smem:[#allocation4 + $0xb]] }
  0xf6   :  { %435 = vrot.lane.b32.xlu1 %v432_v56, %s9097_s0  ;;  %433 = vrot.lane.b32.xlu0 %v428_v57, %s9097_s0  ;;  %v5178_v56 = vmul.f32 %v5071_v19, %v5110_v34  ;;  %v5182_v57 = vmul.f32 %v5071_v19, %v5124_v39  ;;  %s4567_s5 = sld [smem:[#allocation4 + $0x12]] }
  0xfa   :  { %443 = vrot.lane.b32.xlu1 %v4835_v24, %s9093_s28  ;;  %441 = vrot.lane.b32.xlu0 %v4803_v16, %s9093_s28  ;;  %s5055_s28 = sld [smem:[#allocation4 + $0x59]] }
 0x100   :  { %v5161_v51 = vstv %s5055_s28  ;;  %s4764_s28 = smov 127  }
 0x101   :  { %9376 = vst [vmem:[#allocation49_spill] sm:$0xff] %v5161_v51 }
 0x150   :  { %v304_v58 = vpop.permute.xlu1 %303  ;;  %v302_v59 = vpop.permute.xlu0 %301 }
 0x151   :  { %308 = vst.msk [vmem:[#allocation2 + $0x24] sm:$0x1] %vm117_vm3, %v304_v58  ;;  %307 = vst.msk [vmem:[#allocation2 + $0xc] sm:$0x1] %vm117_vm3, %v302_v59  ;;  %v5185_v58 = vstv %s5063_s16  ;;  %v5188_v59 = vstv %s5068_s26  ;;  %s4762_s16 = smov 32   ;;  %s4551_s26 = sld [smem:[#allocation4 + $0x2]] }
 0x152   :  { %9380 = vst [vmem:[#allocation53_spill] sm:$0xff] %v5185_v58  ;;  %9381 = vst [vmem:[#allocation54_spill] sm:$0xff] %v5188_v59 }
 0x154   :  { %v326_v60 = vpop.permute.xlu1 %325  ;;  %v324_v61 = vpop.permute.xlu0 %323 }
 0x155   :  { %330 = vst.msk [vmem:[#allocation2 + $0x54] sm:$0x1] %vm117_vm3, %v326_v60  ;;  %329 = vst.msk [vmem:[#allocation2 + $0x3c] sm:$0x1] %vm117_vm3, %v324_v61  ;;  %v5192_v60 = vmul.f32 %v5074_v20, %v5110_v34  ;;  %v5196_v61 = vmul.f32 %v5074_v20, %v5124_v39 }
 0x158   :  { %v348_v62 = vpop.permute.xlu1 %347  ;;  %v346_v63 = vpop.permute.xlu0 %345 }
 0x159   :  { %352 = vst.msk [vmem:[#allocation2 + $0x25] sm:$0x1] %vm117_vm3, %v348_v62  ;;  %351 = vst.msk [vmem:[#allocation2 + $0xd] sm:$0x1] %vm117_vm3, %v346_v63  ;;  %v5199_v62 = vstv %s5082_s2  ;;  %v5202_v63 = vstv %s5096_s30  ;;  %s9402_s2 = smov 3   ;;  %s4564_s30 = sld [smem:[#allocation4 + $0x2d]] }
 0x15a   :  { %9382 = vst [vmem:[#allocation55_spill] sm:$0xff] %v5199_v62  ;;  %9383 = vst [vmem:[#allocation56_spill] sm:$0xff] %v5202_v63  ;;  %v5272_v63 = vmul.f32 %v5094_v29, %v5124_v39  ;;  %v5287_v62 = vmul.f32 %v5105_v32, %v5110_v34 }
 0x15c   :  { %v370_v0 = vpop.permute.xlu1 %369  ;;  %v368_v1 = vpop.permute.xlu0 %367  ;;  %9394 = vst [vmem:[#allocation67_spill] sm:$0xff] %v5272_v63  ;;  %v5354_v63 = vmul.f32 %v5127_v40, %v5110_v34 }
 0x15d   :  { %374 = vst.msk [vmem:[#allocation2 + $0x55] sm:$0x1] %vm117_vm3, %v370_v0  ;;  %373 = vst.msk [vmem:[#allocation2 + $0x3d] sm:$0x1] %vm117_vm3, %v368_v1  ;;  %v5207_v1 = vmul.f32 %v5077_v22, %v5110_v34  ;;  %v5268_v0 = vmul.f32 %v5091_v28, %v5124_v39 }
 0x15f   :  { %9393 = vst [vmem:[#allocation66_spill] sm:$0xff] %v5268_v0 }
 0x160   :  { %v392_v3 = vpop.permute.xlu1 %391  ;;  %v390_v4 = vpop.permute.xlu0 %389 }
 0x161   :  { %396 = vst.msk [vmem:[#allocation2 + $0x26] sm:$0x1] %vm117_vm3, %v392_v3  ;;  %395 = vst.msk [vmem:[#allocation2 + $0xe] sm:$0x1] %vm117_vm3, %v390_v4  ;;  %v5211_v3 = vmul.f32 %v5077_v22, %v5124_v39  ;;  %v5215_v4 = vmul.f32 %v5080_v23, %v5110_v34 }
 0x164   :  { %v414_v5 = vpop.permute.xlu1 %413  ;;  %v412_v6 = vpop.permute.xlu0 %411 }
 0x165   :  { %418 = vst.msk [vmem:[#allocation2 + $0x56] sm:$0x1] %vm117_vm3, %v414_v5  ;;  %417 = vst.msk [vmem:[#allocation2 + $0x3e] sm:$0x1] %vm117_vm3, %v412_v6  ;;  %v5220_v6 = vmul.f32 %v5085_v26, %v5110_v34  ;;  %v5304_v5 = vmul.f32 %v5113_v35, %v5124_v39  ;;  %v5323_v35 = vmul.f32 %v5119_v37, %v5124_v39 }
 0x167   :  { %9384 = vst [vmem:[#allocation57_spill] sm:$0xff] %v5220_v6  ;;  %v5344_v6 = vmul.f32 %v5122_v38, %v5110_v34 }
 0x168   :  { %v436_v8 = vpop.permute.xlu1 %435  ;;  %v434_v9 = vpop.permute.xlu0 %433 }
 0x169   :  { %440 = vst.msk [vmem:[#allocation2 + $0x27] sm:$0x1] %vm117_vm3, %v436_v8  ;;  %439 = vst.msk [vmem:[#allocation2 + $0xf] sm:$0x1] %vm117_vm3, %v434_v9  ;;  %v5224_v8 = vmul.f32 %v5088_v27, %v5110_v34  ;;  %v5228_v9 = vmul.f32 %v5091_v28, %v5110_v34 }
 0x16a   :  { %9399 = vst [vmem:[#allocation72_spill] sm:$0xff] %v5344_v6  ;;  %v5411_v6 = vmul.f32 %v5145_v46, %v5124_v39 }
 0x16b   :  { %9385 = vst [vmem:[#allocation58_spill] sm:$0xff] %v5224_v8  ;;  %9386 = vst [vmem:[#allocation59_spill] sm:$0xff] %v5228_v9  ;;  %v5350_v9 = vmul.f32 %v5127_v40, %v5124_v39  ;;  %v5369_v40 = vmul.f32 %v5133_v42, %v5124_v39  ;;  %v5392_v8 = vmul.f32 %v5139_v44, %v5110_v34 }
 0x16c   :  { %v444_v10 = vpop.permute.xlu1 %443  ;;  %v442_v11 = vpop.permute.xlu0 %441  ;;  %9404 = vst [vmem:[#allocation76_spill] sm:$0xff] %v5411_v6  ;;  %v5522_v6 = vmul.f32 %v5188_v59, %v5124_v39 }
 0x16d   :  { %v446_v12 = vrot.slane %v444_v10, 1  ;;  %v445_v14 = vrot.slane %v442_v11, 1  ;;  %v5248_v10 = vmul.f32 %v5080_v23, %v5124_v39  ;;  %v5282_v11 = vmul.f32 %v5102_v31, %v5124_v39  ;;  %9400 = vst [vmem:[#allocation73_spill] sm:$0xff] %v5369_v40 }
 0x16e   :  { %v5428_v40 = vmul.f32 %v5148_v47, %v5110_v34 }
 0x16f   :  { %v454_v15 = vrot.slane %v446_v12, %v4801_v13  ;;  %v450_v18 = vrot.slane %v445_v14, %v4801_v13  ;;  %v5234_v12 = vmul.f32 %v5094_v29, %v5110_v34  ;;  %v5238_v14 = vmul.f32 %v5099_v30, %v5110_v34  ;;  %9390 = vst [vmem:[#allocation63_spill] sm:$0xff] %v5248_v10 }
 0x170   :  { %v5300_v10 = vmul.f32 %v5108_v33, %v5124_v39  ;;  %9406 = vst [vmem:[#allocation78_spill] sm:$0xff] %v5428_v40 }
 0x171   :  { %457 = vrot.lane.b32.xlu1 %v454_v15, %s9097_s0  ;;  %455 = vrot.lane.b32.xlu0 %v450_v18, %s9097_s0  ;;  %s5059_s0 = sld [smem:[#allocation4 + $0x3e]]  ;;  %9387 = vst [vmem:[#allocation60_spill] sm:$0xff] %v5234_v12  ;;  %9388 = vst [vmem:[#allocation61_spill] sm:$0xff] %v5238_v14  ;;  %v5278_v18 = vmul.f32 %v5099_v30, %v5124_v39  ;;  %v5291_v14 = vmul.f32 %v5105_v32, %v5124_v39 }
 0x172   :  { %v5314_v12 = vmul.f32 %v5116_v36, %v5124_v39  ;;  %v5318_v15 = vmul.f32 %v5116_v36, %v5110_v34  ;;  %v5327_v32 = vmul.f32 %v5119_v37, %v5110_v34  ;;  %v5378_v36 = vmul.f32 %v5136_v43, %v5124_v39 }
 0x173   :  { %9395 = vst [vmem:[#allocation68_spill] sm:$0xff] %v5278_v18  ;;  %v5374_v18 = vmul.f32 %v5133_v42, %v5110_v34 }
 0x174   :  { %9396 = vst [vmem:[#allocation69_spill] sm:$0xff] %v5318_v15  ;;  %9397 = vst [vmem:[#allocation70_spill] sm:$0xff] %v5327_v32  ;;  %v5365_v15 = vmul.f32 %v5130_v41, %v5110_v34  ;;  %v5437_v32 = vmul.f32 %v5155_v49, %v5110_v34 }
 0x175   :  { %465 = vrot.lane.b32.xlu1 %v4837_v25, %s9095_s29  ;;  %463 = vrot.lane.b32.xlu0 %v4805_v17, %s9095_s29  ;;  %s5057_s29 = sld [smem:[#allocation4 + $0x60]]  ;;  %v5262_v25 = vmul.f32 %v5088_v27, %v5124_v39  ;;  %v5295_v17 = vmul.f32 %v5108_v33, %v5110_v34 }
 0x176   :  { %9407 = vst [vmem:[#allocation79_spill] sm:$0xff] %v5437_v32 }
 0x177   :  { %v5171_v54 = vstv %s5059_s0  ;;  %9392 = vst [vmem:[#allocation65_spill] sm:$0xff] %v5262_v25  ;;  %s4763_s0 = smov 16  }
 0x178   :  { %9378 = vst [vmem:[#allocation51_spill] sm:$0xff] %v5171_v54 }
 0x17b   :  { %v5168_v53 = vstv %s5057_s29  ;;  %s4546_s29 = sld [smem:[#allocation4 + $0xf]] }
 0x17c   :  { %9377 = vst [vmem:[#allocation50_spill] sm:$0xff] %v5168_v53 }
 0x1e3   :  { %v458_v33 = vpop.permute.xlu1 %457  ;;  %v456_v25 = vpop.permute.xlu0 %455 }
 0x1e4   :  { %462 = vst.msk [vmem:[#allocation2 + $0x57] sm:$0x1] %vm117_vm3, %v458_v33  ;;  %461 = vst.msk [vmem:[#allocation2 + $0x3f] sm:$0x1] %vm117_vm3, %v456_v25  ;;  %v5361_v25 = vmul.f32 %v5130_v41, %v5124_v39  ;;  %v5388_v41 = vmul.f32 %v5139_v44, %v5124_v39 }
 0x1e7   :  { %v466_v0 = vpop.permute.xlu1 %465  ;;  %v464_v37 = vpop.permute.xlu0 %463 }
 0x1e8   :  { %v468_v33 = vrot.slane %v466_v0, 1  ;;  %v467_v38 = vrot.slane %v464_v37, 1  ;;  %v5382_v37 = vmul.f32 %v5136_v43, %v5110_v34  ;;  %v5399_v43 = vmul.f32 %v5142_v45, %v5124_v39 }
 0x1ea   :  { %v476_v0 = vrot.slane %v468_v33, %v4801_v13  ;;  %v472_v2 = vrot.slane %v467_v38, %v4801_v13  ;;  %9401 = vst [vmem:[#allocation74_spill] sm:$0xff] %v5399_v43  ;;  %v5407_v13 = vmul.f32 %v5142_v45, %v5110_v34  ;;  %v5424_v45 = vmul.f32 %v5148_v47, %v5124_v39 }
 0x1eb   :  { %v5441_v38 = vmul.f32 %v5158_v50, %v5124_v39  ;;  %v5451_v47 = vmul.f32 %v5158_v50, %v5110_v34  ;;  %v5468_v33 = vmul.f32 %v5168_v53, %v5110_v34  ;;  %v5470_v42 = vld [vmem:[#allocation2 + $0x38] sm:$0xff]  ;;  %v5476_v43 = vmul.f32 %v5171_v54, %v5124_v39 }
 0x1ec   :  { %479 = vrot.lane.b32.xlu1 %v476_v0, %s9402_s2  ;;  %477 = vrot.lane.b32.xlu0 %v472_v2, %s9402_s2  ;;  %9403 = vst [vmem:[#allocation75_spill] sm:$0xff] %v5407_v13  ;;  %v5418_v2 = vmul.f32 %v5145_v46, %v5110_v34  ;;  %v5433_v0 = vmul.f32 %v5155_v49, %v5124_v39 }
 0x1ed   :  { %9408 = vst [vmem:[#allocation80_spill] sm:$0xff] %v5441_v38  ;;  %9410 = vst [vmem:[#allocation81_spill] sm:$0xff] %v5451_v47  ;;  %v5455_v49 = vmul.f32 %v5161_v51, %v5124_v39  ;;  %v5489_v50 = vmul.f32 %v5174_v55, %v5124_v39  ;;  %v5503_v46 = vmul.f32 %v5066_v21, %v5470_v42 }
 0x1ee   :  { %9405 = vst [vmem:[#allocation77_spill] sm:$0xff] %v5418_v2  ;;  %v5482_v2 = vld [vmem:[#allocation2 + $0x50] sm:$0xff]  ;;  %v5516_v47 = vmul.f32 %v5185_v58, %v5110_v34  ;;  %v5526_v38 = vmul.f32 %v5188_v59, %v5110_v34 }
 0x1ef   :  { %9411 = vst [vmem:[#allocation82_spill] sm:$0xff] %v5455_v49  ;;  %9413 = vst [vmem:[#allocation84_spill] sm:$0xff] %v5489_v50  ;;  %v5510_v40 = vmul.f32 %v5066_v21, %v5482_v2  ;;  %v5531_v49 = vmul.f32 %v5071_v19, %v5470_v42  ;;  %v9418_v13 = vrot.slane %v5503_v46, 2  ;;  %v9419_v50 = vrot.slane %v5152_v48, 2 }
 0x1f0   :  { %487 = vrot.lane.b32.xlu1 %v4835_v24, %s9409_s15  ;;  %485 = vrot.lane.b32.xlu0 %v4803_v16, %s9409_s15  ;;  %v5460_v24 = vmul.f32 %v5161_v51, %v5110_v34  ;;  %v5464_v16 = vmul.f32 %v5168_v53, %v5124_v39  ;;  %v5480_v51 = vmul.f32 %v5171_v54, %v5110_v34 }
 0x1f1   :  { %v5495_v54 = vmul.f32 %v5174_v55, %v5110_v34  ;;  %v5499_v53 = vmul.f32 %v5185_v58, %v5124_v39  ;;  %9415 = vst [vmem:[#allocation86_spill] sm:$0xff] %v5503_v46  ;;  %9416 = vst [vmem:[#allocation87_spill] sm:$0xff] %v5510_v40  ;;  %v5544_v59 = vmul.f32 %v5071_v19, %v5482_v2  ;;  %v9424_v32 = vrot.slane %v5510_v40, 2 }
 0x1f2   :  { %9412 = vst [vmem:[#allocation83_spill] sm:$0xff] %v5480_v51  ;;  %9417 = vst [vmem:[#allocation88_spill] sm:$0xff] %v5531_v49  ;;  %v5540_v51 = vsel %vm658_vm6, %v9419_v50, %v9418_v13  ;;  %v5548_v55 = vmul.f32 %v5074_v20, %v5470_v42  ;;  %v5552_v21 = vmul.f32 %v5074_v20, %v5482_v2  ;;  %v9425_v46 = vrot.slane %v5165_v52, 2 }
 0x1f3   :  { %9414 = vst [vmem:[#allocation85_spill] sm:$0xff] %v5499_v53  ;;  %9420 = vst [vmem:[#allocation89_spill] sm:$0xff] %v5540_v51  ;;  %v9194_v13 = vrot.slane %v5531_v49, 3  ;;  %v5564_v50 = vmul.f32 %v5077_v22, %v5470_v42  ;;  %v5568_v51 = vmul.f32 %v5077_v22, %v5482_v2  ;;  %v9432_v19 = vrot.slane %v5544_v59, 3 }
 0x1f4   :  { %9421 = vst [vmem:[#allocation90_spill] sm:$0xff] %v5544_v59  ;;  %9422 = vst [vmem:[#allocation91_spill] sm:$0xff] %v5548_v55  ;;  %v5559_v48 = vsel %vm658_vm6, %v9425_v46, %v9424_v32  ;;  %v5575_v32 = vmul.f32 %v5080_v23, %v5470_v42  ;;  %v9430_v46 = vrot.slane %v5178_v56, 3  ;;  %v9433_v40 = vrot.slane %v5182_v57, 3 }
 0x1f5   :  { %9423 = vst [vmem:[#allocation92_spill] sm:$0xff] %v5552_v21  ;;  %9426 = vst [vmem:[#allocation93_spill] sm:$0xff] %v5559_v48  ;;  %v9435_v49 = vrot.slane %v5548_v55, 4  ;;  %v9436_v56 = vrot.slane %v5192_v60, 4  ;;  %v9439_v48 = vrot.slane %v5196_v61, 4  ;;  %v9441_v57 = vrot.slane %v5564_v50, 5 }
 0x1f6   :  { %9427 = vst [vmem:[#allocation94_spill] sm:$0xff] %v5564_v50  ;;  %9428 = vst [vmem:[#allocation95_spill] sm:$0xff] %v5568_v51  ;;  %v5582_v52 = vsel %vm691_vm7, %v9430_v46, %v9194_v13  ;;  %v5592_v53 = vsel %vm691_vm7, %v9433_v40, %v9432_v19  ;;  %v9438_v13 = vrot.slane %v5552_v21, 4  ;;  %v9195_v22 = vrot.slane %v5575_v32, 6 }
 0x1f7   :  { %9429 = vst [vmem:[#allocation96_spill] sm:$0xff] %v5575_v32  ;;  %9431 = vst [vmem:[#allocation97_spill] sm:$0xff] %v5582_v52  ;;  %v5599_v46 = vsel %vm724_vm8, %v9436_v56, %v9435_v49  ;;  %v9442_v19 = vrot.slane %v5207_v1, 5  ;;  %v9444_v60 = vrot.slane %v5568_v51, 5  ;;  %v9445_v49 = vrot.slane %v5211_v3, 5  ;;  %v9457_v51 = vld [vmem:[#allocation57_spill] sm:$0xff] }
 0x1f8   :  { %9434 = vst [vmem:[#allocation98_spill] sm:$0xff] %v5592_v53  ;;  %9437 = vst [vmem:[#allocation99_spill] sm:$0xff] %v5599_v46  ;;  %v5606_v20 = vsel %vm724_vm8, %v9439_v48, %v9438_v13  ;;  %v5625_v61 = vmul.f32 %v5085_v26, %v5470_v42  ;;  %v5629_v48 = vmul.f32 %v5088_v27, %v5470_v42  ;;  %v9449_v1 = vrot.slane %v5215_v4, 6 }
 0x1f9   :  { %9440 = vst [vmem:[#allocation100_spill] sm:$0xff] %v5606_v20  ;;  %v5614_v40 = vsel %vm757_vm9, %v9442_v19, %v9441_v57  ;;  %v5621_v56 = vsel %vm757_vm9, %v9445_v49, %v9444_v60  ;;  %v5640_v3 = vmul.f32 %v5091_v28, %v5470_v42  ;;  %v5644_v57 = vmul.f32 %v5094_v29, %v5470_v42  ;;  %v9461_v20 = vld [vmem:[#allocation58_spill] sm:$0xff] }
 0x1fa   :  { %9443 = vst [vmem:[#allocation101_spill] sm:$0xff] %v5614_v40  ;;  %9446 = vst [vmem:[#allocation102_spill] sm:$0xff] %v5621_v56  ;;  %v5636_v13 = vsel %vm790_vm10, %v9449_v1, %v9195_v22  ;;  %v5648_v19 = vmul.f32 %v5099_v30, %v5470_v42  ;;  %v5654_v4 = vmul.f32 %v5102_v31, %v5470_v42  ;;  %v9456_v49 = vrot.slane %v5625_v61, 1 }
 0x1fb   :  { %9447 = vst [vmem:[#allocation103_spill] sm:$0xff] %v5625_v61  ;;  %9448 = vst [vmem:[#allocation104_spill] sm:$0xff] %v5629_v48  ;;  %v5658_v1 = vmul.f32 %v5080_v23, %v5482_v2  ;;  %v9458_v40 = vrot.slane %v9457_v51, 1  ;;  %v9460_v23 = vrot.slane %v5629_v48, 2  ;;  %v9462_v21 = vrot.slane %v9461_v20, 2 }
 0x1fc   :  { %9450 = vst [vmem:[#allocation105_spill] sm:$0xff] %v5636_v13  ;;  %9451 = vst [vmem:[#allocation106_spill] sm:$0xff] %v5640_v3  ;;  %v9464_v56 = vrot.slane %v5640_v3, 3  ;;  %v9465_v13 = vld [vmem:[#allocation59_spill] sm:$0xff]  ;;  %v9468_v51 = vrot.slane %v5644_v57, 4  ;;  %v9472_v20 = vrot.slane %v5648_v19, 5 }
 0x1fd   :  { %9452 = vst [vmem:[#allocation107_spill] sm:$0xff] %v5644_v57  ;;  %9453 = vst [vmem:[#allocation108_spill] sm:$0xff] %v5648_v19  ;;  %v5670_v50 = vsel %vm625_vm11, %v9458_v40, %v9456_v49  ;;  %v5677_v22 = vsel %vm658_vm6, %v9462_v21, %v9460_v23  ;;  %v9466_v60 = vrot.slane %v9465_v13, 3  ;;  %v9469_v40 = vld [vmem:[#allocation60_spill] sm:$0xff]  ;;  %v9473_v21 = vld [vmem:[#allocation61_spill] sm:$0xff]  ;;  %v5703_v13 = vmul.f32 %v5085_v26, %v5482_v2 }
 0x1fe   :  { %9454 = vst [vmem:[#allocation109_spill] sm:$0xff] %v5654_v4  ;;  %9455 = vst [vmem:[#allocation110_spill] sm:$0xff] %v5658_v1  ;;  %v9470_v49 = vrot.slane %v9469_v40, 4  ;;  %v9474_v23 = vrot.slane %v9473_v21, 5 }
 0x1ff   :  { %9459 = vst [vmem:[#allocation57_spill] sm:$0xff] %v5670_v50  ;;  %9463 = vst [vmem:[#allocation58_spill] sm:$0xff] %v5677_v22  ;;  %v5685_v61 = vsel %vm691_vm7, %v9466_v60, %v9464_v56  ;;  %v9477_v56 = vrot.slane %v5654_v4, 6  ;;  %v9478_v60 = vld [vmem:[#allocation62_spill] sm:$0xff]  ;;  %v9491_v57 = vrot.slane %v5703_v13, 1 }
 0x200   :  { %9467 = vst [vmem:[#allocation59_spill] sm:$0xff] %v5685_v61  ;;  %v5692_v50 = vsel %vm724_vm8, %v9470_v49, %v9468_v51  ;;  %v5699_v32 = vsel %vm757_vm9, %v9474_v23, %v9472_v20  ;;  %9476 = vst [vmem:[#allocation111_spill] sm:$0xff] %v5703_v13  ;;  %v9479_v61 = vrot.slane %v9478_v60, 6  ;;  %v9481_v51 = vrot.slane %v5658_v1, 6  ;;  %v9482_v49 = vld [vmem:[#allocation63_spill] sm:$0xff]  ;;  %v9503_v13 = vld [vmem:[#allocation33_spill] sm:$0xff] }
 0x201   :  { %9471 = vst [vmem:[#allocation60_spill] sm:$0xff] %v5692_v50  ;;  %9475 = vst [vmem:[#allocation61_spill] sm:$0xff] %v5699_v32  ;;  %v9483_v50 = vrot.slane %v9482_v49, 6  ;;  %v5721_v20 = vmul.f32 %v5088_v27, %v5482_v2  ;;  %v5725_v23 = vmul.f32 %v5091_v28, %v5482_v2  ;;  %v9490_v60 = vld [vmem:[#allocation55_spill] sm:$0xff] }
 0x202   :  { %v5710_v40 = vsel %vm790_vm10, %v9479_v61, %v9477_v56  ;;  %v5730_v61 = vmul.f32 %v5094_v29, %v5482_v2  ;;  %v5734_v56 = vmul.f32 %v5099_v30, %v5482_v2  ;;  %v5745_v4 = vmul.f32 %v9490_v60, %v5124_v39  ;;  %v6839_v28 = vld [vmem:[#allocation2 + $0x18] sm:$0xff] }
 0x203   :  { %9480 = vst [vmem:[#allocation62_spill] sm:$0xff] %v5710_v40  ;;  %v5717_v21 = vsel %vm790_vm10, %v9483_v50, %v9481_v51  ;;  %9485 = vst [vmem:[#allocation112_spill] sm:$0xff] %v5721_v20  ;;  %v5738_v50 = vmul.f32 %v5102_v31, %v5482_v2  ;;  %v9495_v49 = vrot.slane %v5721_v20, 2  ;;  %v9496_v40 = vld [vmem:[#allocation65_spill] sm:$0xff]  ;;  %v9499_v32 = vrot.slane %v5725_v23, 3  ;;  %v9500_v31 = vld [vmem:[#allocation66_spill] sm:$0xff] }
 0x204   :  { %9484 = vst [vmem:[#allocation63_spill] sm:$0xff] %v5717_v21  ;;  %9486 = vst [vmem:[#allocation113_spill] sm:$0xff] %v5725_v23  ;;  %v9492_v21 = vld [vmem:[#allocation64_spill] sm:$0xff]  ;;  %v9497_v48 = vrot.slane %v9496_v40, 2  ;;  %v9501_v22 = vrot.slane %v9500_v31, 3  ;;  %v9507_v40 = vld [vmem:[#allocation67_spill] sm:$0xff] }
 0x205   :  { %9487 = vst [vmem:[#allocation114_spill] sm:$0xff] %v5730_v61  ;;  %9488 = vst [vmem:[#allocation115_spill] sm:$0xff] %v5734_v56  ;;  %v9493_v3 = vrot.slane %v9492_v21, 1  ;;  %v5773_v21 = vmul.f32 %v9503_v13, %v5470_v42  ;;  %v9510_v31 = vrot.slane %v5734_v56, 5  ;;  %v9511_v23 = vld [vmem:[#allocation68_spill] sm:$0xff] }
 0x206   :  { %9489 = vst [vmem:[#allocation116_spill] sm:$0xff] %v5738_v50  ;;  %v5762_v1 = vsel %vm658_vm6, %v9497_v48, %v9495_v49  ;;  %v5769_v19 = vsel %vm691_vm7, %v9501_v22, %v9499_v32  ;;  %v9508_v48 = vrot.slane %v9507_v40, 4  ;;  %v9512_v22 = vrot.slane %v9511_v23, 5 }
 0x207   :  { %v5755_v51 = vsel %vm625_vm11, %v9493_v3, %v9491_v57  ;;  %9498 = vst [vmem:[#allocation65_spill] sm:$0xff] %v5762_v1  ;;  %9502 = vst [vmem:[#allocation66_spill] sm:$0xff] %v5769_v19  ;;  %v5777_v3 = vmul.f32 %v9503_v13, %v5482_v2  ;;  %v9506_v57 = vrot.slane %v5730_v61, 4  ;;  %v9514_v19 = vrot.slane %v5738_v50, 6  ;;  %v9517_v61 = vld [vmem:[#allocation34_spill] sm:$0xff] }
 0x208   :  { %9494 = vst [vmem:[#allocation64_spill] sm:$0xff] %v5755_v51  ;;  %9504 = vst [vmem:[#allocation117_spill] sm:$0xff] %v5773_v21  ;;  %v5791_v32 = vsel %vm757_vm9, %v9512_v22, %v9510_v31  ;;  %v9515_v1 = vrot.slane %v5282_v11, 6  ;;  %v5802_v40 = vmul.f32 %v9517_v61, %v5470_v42  ;;  %v5808_v23 = vmul.f32 %v9517_v61, %v5482_v2  ;;  %v9520_v31 = vld [vmem:[#allocation35_spill] sm:$0xff] }
 0x209   :  { %9505 = vst [vmem:[#allocation118_spill] sm:$0xff] %v5777_v3  ;;  %v5784_v49 = vsel %vm724_vm8, %v9508_v48, %v9506_v57  ;;  %9513 = vst [vmem:[#allocation68_spill] sm:$0xff] %v5791_v32  ;;  %v9221_v57 = vrot.slane %v5773_v21, 1  ;;  %v5812_v22 = vmul.f32 %v9520_v31, %v5482_v2  ;;  %v9526_v50 = vrot.slane %v5287_v62, 1 }
 0x20a   :  { %9509 = vst [vmem:[#allocation67_spill] sm:$0xff] %v5784_v49  ;;  %v5798_v20 = vsel %vm790_vm10, %v9515_v1, %v9514_v19  ;;  %9518 = vst [vmem:[#allocation120_spill] sm:$0xff] %v5802_v40  ;;  %v5817_v19 = vmul.f32 %v9520_v31, %v5470_v42  ;;  %v9523_v1 = vld [vmem:[#allocation36_spill] sm:$0xff]  ;;  %v9528_v11 = vrot.slane %v5777_v3, 1  ;;  %v9529_v31 = vrot.slane %v5291_v14, 1 }
 0x20b   :  { %9516 = vst [vmem:[#allocation119_spill] sm:$0xff] %v5798_v20  ;;  %9519 = vst [vmem:[#allocation121_spill] sm:$0xff] %v5808_v23  ;;  %v5821_v20 = vmul.f32 %v9523_v1, %v5482_v2  ;;  %v5825_v48 = vmul.f32 %v9523_v1, %v5470_v42  ;;  %v5832_v32 = vsel %vm625_vm11, %v9526_v50, %v9221_v57  ;;  %v9222_v49 = vrot.slane %v5808_v23, 2  ;;  %v9567_v23 = vld [vmem:[#allocation71_spill] sm:$0xff] }
 0x20c   :  { %9521 = vst [vmem:[#allocation122_spill] sm:$0xff] %v5812_v22  ;;  %9522 = vst [vmem:[#allocation123_spill] sm:$0xff] %v5817_v19  ;;  %v5839_v56 = vsel %vm625_vm11, %v9529_v31, %v9528_v11  ;;  %v9223_v61 = vrot.slane %v5812_v22, 3  ;;  %v9531_v1 = vrot.slane %v5802_v40, 2  ;;  %v9532_v21 = vrot.slane %v5295_v17, 2 }
 0x20d   :  { %9524 = vst [vmem:[#allocation124_spill] sm:$0xff] %v5821_v20  ;;  %9525 = vst [vmem:[#allocation125_spill] sm:$0xff] %v5825_v48  ;;  %v9227_v57 = vrot.slane %v5821_v20, 4  ;;  %v9534_v31 = vrot.slane %v5300_v10, 2  ;;  %v9536_v17 = vrot.slane %v5304_v5, 3  ;;  %v9541_v10 = vrot.slane %v5817_v19, 3 }
 0x20e   :  { %9527 = vst [vmem:[#allocation126_spill] sm:$0xff] %v5832_v32  ;;  %9530 = vst [vmem:[#allocation127_spill] sm:$0xff] %v5839_v56  ;;  %v5848_v62 = vsel %vm658_vm6, %v9532_v21, %v9531_v1  ;;  %v9538_v1 = vld [vmem:[#allocation37_spill] sm:$0xff]  ;;  %v9544_v5 = vrot.slane %v5314_v12, 4  ;;  %v9550_v19 = vld [vmem:[#allocation38_spill] sm:$0xff]  ;;  %v1674_v56 = vstv %s4567_s5  ;;  %s7110_s5 = sld [smem:[#allocation4 + $0x2a]] }
 0x20f   :  { %9533 = vst [vmem:[#allocation128_spill] sm:$0xff] %v5848_v62  ;;  %v5858_v11 = vsel %vm658_vm6, %v9534_v31, %v9222_v49  ;;  %v5865_v21 = vsel %vm691_vm7, %v9536_v17, %v9223_v61  ;;  %v5869_v50 = vmul.f32 %v9538_v1, %v5482_v2  ;;  %v5873_v14 = vmul.f32 %v9538_v1, %v5470_v42 }
 0x210   :  { %9535 = vst [vmem:[#allocation129_spill] sm:$0xff] %v5858_v11  ;;  %9537 = vst [vmem:[#allocation130_spill] sm:$0xff] %v5865_v21  ;;  %v9542_v31 = vrot.slane %v5308_v7, 3  ;;  %v5887_v17 = vsel %vm724_vm8, %v9544_v5, %v9227_v57  ;;  %v9546_v61 = vrot.slane %v5825_v48, 4  ;;  %v9547_v21 = vld [vmem:[#allocation69_spill] sm:$0xff]  ;;  %v5898_v7 = vmul.f32 %v9550_v19, %v5482_v2  ;;  %v9564_v11 = vld [vmem:[#allocation40_spill] sm:$0xff] }
 0x211   :  { %9539 = vst [vmem:[#allocation131_spill] sm:$0xff] %v5869_v50  ;;  %9540 = vst [vmem:[#allocation132_spill] sm:$0xff] %v5873_v14  ;;  %v9548_v22 = vrot.slane %v9547_v21, 4  ;;  %v5904_v12 = vmul.f32 %v9550_v19, %v5470_v42  ;;  %v5908_v5 = vmul.f32 %v9490_v60, %v5110_v34  ;;  %v9557_v19 = vrot.slane %v5869_v50, 5 }
 0x212   :  { %v5880_v49 = vsel %vm691_vm7, %v9542_v31, %v9541_v10  ;;  %9545 = vst [vmem:[#allocation134_spill] sm:$0xff] %v5887_v17  ;;  %9551 = vst [vmem:[#allocation135_spill] sm:$0xff] %v5898_v7  ;;  %v9556_v31 = vld [vmem:[#allocation56_spill] sm:$0xff]  ;;  %v9560_v21 = vrot.slane %v5873_v14, 5  ;;  %v9561_v17 = vld [vmem:[#allocation70_spill] sm:$0xff]  ;;  %v9566_v50 = vrot.slane %v5898_v7, 6  ;;  %v1608_v7 = vstv %s4565_s3 }
 0x213   :  { %9543 = vst [vmem:[#allocation133_spill] sm:$0xff] %v5880_v49  ;;  %v5894_v1 = vsel %vm724_vm8, %v9548_v22, %v9546_v61  ;;  %9552 = vst [vmem:[#allocation136_spill] sm:$0xff] %v5904_v12  ;;  %v9553_v61 = vld [vmem:[#allocation39_spill] sm:$0xff]  ;;  %v5921_v10 = vmul.f32 %v9556_v31, %v5124_v39  ;;  %v9562_v20 = vrot.slane %v9561_v17, 5  ;;  %v5940_v39 = vmul.f32 %v9564_v11, %v5482_v2  ;;  %s7103_s3 = sld [smem:[#allocation4 + $0x23]] }
 0x214   :  { %9549 = vst [vmem:[#allocation69_spill] sm:$0xff] %v5894_v1  ;;  %v5913_v22 = vmul.f32 %v9553_v61, %v5482_v2  ;;  %v5917_v57 = vmul.f32 %v9553_v61, %v5470_v42  ;;  %v9558_v1 = vrot.slane %v5323_v35, 5  ;;  %v9237_v61 = vrot.slane %v5904_v12, 6 }
 0x215   :  { %v5935_v49 = vsel %vm757_vm9, %v9562_v20, %v9560_v21  ;;  %9565 = vst [vmem:[#allocation140_spill] sm:$0xff] %v5940_v39  ;;  %v9568_v35 = vrot.slane %v9567_v23, 6  ;;  %v5953_v20 = vmul.f32 %v9564_v11, %v5470_v42  ;;  %v9571_v21 = vld [vmem:[#allocation72_spill] sm:$0xff]  ;;  %v9577_v11 = vrot.slane %v5350_v9, 1 }
 0x216   :  { %9554 = vst [vmem:[#allocation137_spill] sm:$0xff] %v5913_v22  ;;  %9555 = vst [vmem:[#allocation138_spill] sm:$0xff] %v5917_v57  ;;  %v5928_v48 = vsel %vm757_vm9, %v9558_v1, %v9557_v19  ;;  %v9240_v1 = vrot.slane %v5913_v22, 1  ;;  %v9584_v22 = vrot.slane %v5940_v39, 2  ;;  %v9585_v9 = vrot.slane %v5361_v25, 2 }
 0x217   :  { %9559 = vst [vmem:[#allocation139_spill] sm:$0xff] %v5928_v48  ;;  %9563 = vst [vmem:[#allocation70_spill] sm:$0xff] %v5935_v49  ;;  %v5947_v19 = vsel %vm790_vm10, %v9568_v35, %v9566_v50  ;;  %v9572_v49 = vrot.slane %v9571_v21, 6  ;;  %v9574_v50 = vld [vmem:[#allocation41_spill] sm:$0xff]  ;;  %v9580_v21 = vrot.slane %v5354_v63, 1  ;;  %v9243_v23 = vrot.slane %v5953_v20, 2 }
 0x218   :  { %9569 = vst [vmem:[#allocation71_spill] sm:$0xff] %v5947_v19  ;;  %9570 = vst [vmem:[#allocation141_spill] sm:$0xff] %v5953_v20  ;;  %v5965_v35 = vmul.f32 %v9574_v50, %v5482_v2  ;;  %v5969_v17 = vmul.f32 %v9574_v50, %v5470_v42  ;;  %v5976_v12 = vsel %vm625_vm11, %v9577_v11, %v9240_v1  ;;  %v9592_v63 = vld [vmem:[#allocation73_spill] sm:$0xff] }
 0x219   :  { %v5960_v14 = vsel %vm790_vm10, %v9572_v49, %v9237_v61  ;;  %9578 = vst [vmem:[#allocation144_spill] sm:$0xff] %v5976_v12  ;;  %v9579_v49 = vrot.slane %v5917_v57, 1  ;;  %v5995_v11 = vsel %vm658_vm6, %v9585_v9, %v9584_v22  ;;  %v6013_v22 = vmul.f32 %v5139_v44, %v5482_v2 }
 0x21a   :  { %9573 = vst [vmem:[#allocation72_spill] sm:$0xff] %v5960_v14  ;;  %9575 = vst [vmem:[#allocation142_spill] sm:$0xff] %v5965_v35  ;;  %v9582_v14 = vld [vmem:[#allocation42_spill] sm:$0xff]  ;;  %v9247_v1 = vrot.slane %v5965_v35, 3  ;;  %v6017_v9 = vmul.f32 %v5139_v44, %v5470_v42 }
 0x21b   :  { %9576 = vst [vmem:[#allocation143_spill] sm:$0xff] %v5969_v17  ;;  %v5983_v61 = vsel %vm625_vm11, %v9580_v21, %v9579_v49  ;;  %v5988_v50 = vmul.f32 %v9582_v14, %v5482_v2  ;;  %9586 = vst [vmem:[#allocation147_spill] sm:$0xff] %v5995_v11  ;;  %v6001_v49 = vmul.f32 %v9582_v14, %v5470_v42  ;;  %v9588_v21 = vrot.slane %v5365_v15, 2 }
 0x21c   :  { %9581 = vst [vmem:[#allocation145_spill] sm:$0xff] %v5983_v61  ;;  %9590 = vst [vmem:[#allocation150_spill] sm:$0xff] %v6013_v22  ;;  %v9593_v14 = vrot.slane %v9592_v63, 3  ;;  %v9595_v15 = vrot.slane %v5969_v17, 3  ;;  %v9601_v63 = vrot.slane %v5378_v36, 4  ;;  %v9611_v36 = vld [vmem:[#allocation45_spill] sm:$0xff] }
 0x21d   :  { %9583 = vst [vmem:[#allocation146_spill] sm:$0xff] %v5988_v50  ;;  %9587 = vst [vmem:[#allocation148_spill] sm:$0xff] %v6001_v49  ;;  %v6008_v61 = vsel %vm658_vm6, %v9588_v21, %v9243_v23  ;;  %v9596_v21 = vrot.slane %v5374_v18, 3  ;;  %v9249_v25 = vrot.slane %v6001_v49, 4  ;;  %v9600_v35 = vrot.slane %v5988_v50, 4 }
 0x21e   :  { %9589 = vst [vmem:[#allocation149_spill] sm:$0xff] %v6008_v61  ;;  %9591 = vst [vmem:[#allocation151_spill] sm:$0xff] %v6017_v9  ;;  %v6024_v20 = vsel %vm691_vm7, %v9593_v14, %v9247_v1  ;;  %v9598_v61 = vld [vmem:[#allocation44_spill] sm:$0xff]  ;;  %v9251_v1 = vrot.slane %v6013_v22, 5  ;;  %v9606_v18 = vrot.slane %v5388_v41, 5 }
 0x21f   :  { %9594 = vst [vmem:[#allocation73_spill] sm:$0xff] %v6024_v20  ;;  %v6031_v23 = vsel %vm691_vm7, %v9596_v21, %v9595_v15  ;;  %v6036_v44 = vmul.f32 %v9598_v61, %v5482_v2  ;;  %v6043_v14 = vsel %vm724_vm8, %v9601_v63, %v9600_v35  ;;  %v6049_v15 = vmul.f32 %v9598_v61, %v5470_v42 }
 0x220   :  { %9597 = vst [vmem:[#allocation152_spill] sm:$0xff] %v6031_v23  ;;  %9602 = vst [vmem:[#allocation154_spill] sm:$0xff] %v6043_v14  ;;  %v9604_v21 = vrot.slane %v5382_v37, 4  ;;  %v6062_v63 = vmul.f32 %v9556_v31, %v5110_v34  ;;  %v6069_v61 = vsel %vm757_vm9, %v9606_v18, %v9251_v1  ;;  %v9608_v37 = vrot.slane %v6017_v9, 5 }
 0x221   :  { %9599 = vst [vmem:[#allocation153_spill] sm:$0xff] %v6036_v44  ;;  %9603 = vst [vmem:[#allocation155_spill] sm:$0xff] %v6049_v15  ;;  %v9257_v35 = vrot.slane %v6049_v15, 6  ;;  %v6081_v34 = vmul.f32 %v9611_v36, %v5482_v2  ;;  %v9613_v22 = vrot.slane %v6036_v44, 6  ;;  %v6092_v1 = vmul.f32 %v9611_v36, %v5470_v42  ;;  %v9621_v44 = vld [vmem:[#allocation75_spill] sm:$0xff]  ;;  %v9633_v15 = vld [vmem:[#allocation77_spill] sm:$0xff] }
 0x222   :  { %v6056_v23 = vsel %vm724_vm8, %v9604_v21, %v9249_v25  ;;  %9607 = vst [vmem:[#allocation157_spill] sm:$0xff] %v6069_v61  ;;  %v9609_v21 = vrot.slane %v5392_v8, 5  ;;  %v9618_v8 = vld [vmem:[#allocation46_spill] sm:$0xff]  ;;  %v9634_v14 = vrot.slane %v9633_v15, 1 }
 0x223   :  { %9605 = vst [vmem:[#allocation156_spill] sm:$0xff] %v6056_v23  ;;  %9612 = vst [vmem:[#allocation159_spill] sm:$0xff] %v6081_v34  ;;  %v9614_v23 = vld [vmem:[#allocation74_spill] sm:$0xff] }
 0x224   :  { %v6076_v25 = vsel %vm757_vm9, %v9609_v21, %v9608_v37  ;;  %v9615_v41 = vrot.slane %v9614_v23, 6  ;;  %9617 = vst [vmem:[#allocation160_spill] sm:$0xff] %v6092_v1  ;;  %v6096_v37 = vmul.f32 %v9618_v8, %v5482_v2  ;;  %v6100_v21 = vmul.f32 %v9618_v8, %v5470_v42 }
 0x225   :  { %9610 = vst [vmem:[#allocation158_spill] sm:$0xff] %v6076_v25  ;;  %v9622_v25 = vrot.slane %v9621_v44, 6  ;;  %v9264_v8 = vrot.slane %v6092_v1, 1  ;;  %v9627_v44 = vld [vmem:[#allocation48_spill] sm:$0xff] }
 0x226   :  { %v6088_v18 = vsel %vm790_vm10, %v9615_v41, %v9613_v22  ;;  %9619 = vst [vmem:[#allocation161_spill] sm:$0xff] %v6096_v37  ;;  %9620 = vst [vmem:[#allocation162_spill] sm:$0xff] %v6100_v21  ;;  %v9261_v22 = vrot.slane %v6081_v34, 1  ;;  %v9624_v41 = vld [vmem:[#allocation47_spill] sm:$0xff]  ;;  %v6136_v9 = vmul.f32 %v9627_v44, %v5470_v42  ;;  %v9639_v49 = vrot.slane %v6100_v21, 2 }
 0x227   :  { %9616 = vst [vmem:[#allocation74_spill] sm:$0xff] %v6088_v18  ;;  %v6107_v23 = vsel %vm790_vm10, %v9622_v25, %v9257_v35  ;;  %v6112_v36 = vmul.f32 %v9624_v41, %v5482_v2  ;;  %v6116_v18 = vmul.f32 %v9624_v41, %v5470_v42  ;;  %v6123_v25 = vmul.f32 %v9627_v44, %v5482_v2  ;;  %v9629_v35 = vld [vmem:[#allocation76_spill] sm:$0xff]  ;;  %v9640_v41 = vld [vmem:[#allocation78_spill] sm:$0xff] }
 0x228   :  { %9623 = vst [vmem:[#allocation75_spill] sm:$0xff] %v6107_v23  ;;  %v9630_v23 = vrot.slane %v9629_v35, 1  ;;  %9632 = vst [vmem:[#allocation166_spill] sm:$0xff] %v6136_v9  ;;  %v6143_v50 = vsel %vm625_vm11, %v9634_v14, %v9264_v8  ;;  %v9636_v35 = vrot.slane %v6096_v37, 2  ;;  %v9644_v14 = vrot.slane %v5433_v0, 3 }
 0x229   :  { %9625 = vst [vmem:[#allocation163_spill] sm:$0xff] %v6112_v36  ;;  %9626 = vst [vmem:[#allocation164_spill] sm:$0xff] %v6116_v18  ;;  %v9268_v1 = vrot.slane %v6123_v25, 4  ;;  %v9643_v15 = vrot.slane %v6112_v36, 3  ;;  %v9652_v36 = vld [vmem:[#allocation80_spill] sm:$0xff] }
 0x22a   :  { %9628 = vst [vmem:[#allocation165_spill] sm:$0xff] %v6123_v25  ;;  %v6130_v61 = vsel %vm625_vm11, %v9630_v23, %v9261_v22  ;;  %9635 = vst [vmem:[#allocation77_spill] sm:$0xff] %v6143_v50  ;;  %v9637_v23 = vrot.slane %v5424_v45, 2  ;;  %v9646_v45 = vrot.slane %v6116_v18, 3  ;;  %v9653_v0 = vrot.slane %v9652_v36, 4  ;;  %v9659_v25 = vld [vmem:[#allocation81_spill] sm:$0xff] }
 0x22b   :  { %9631 = vst [vmem:[#allocation76_spill] sm:$0xff] %v6130_v61  ;;  %v9641_v61 = vrot.slane %v9640_v41, 2  ;;  %v6165_v8 = vsel %vm691_vm7, %v9644_v14, %v9643_v15  ;;  %v9273_v41 = vrot.slane %v6136_v9, 4 }
 0x22c   :  { %v6150_v22 = vsel %vm658_vm6, %v9637_v23, %v9636_v35  ;;  %9645 = vst [vmem:[#allocation168_spill] sm:$0xff] %v6165_v8  ;;  %v9647_v35 = vld [vmem:[#allocation79_spill] sm:$0xff]  ;;  %v6184_v15 = vsel %vm724_vm8, %v9653_v0, %v9268_v1  ;;  %v4143_v1 = vrot.slane %v5908_v5, 5  ;;  %v9668_v5 = vld [vmem:[#allocation52_spill] sm:$0xff] }
 0x22d   :  { %9638 = vst [vmem:[#allocation167_spill] sm:$0xff] %v6150_v22  ;;  %v6157_v44 = vsel %vm658_vm6, %v9641_v61, %v9639_v49  ;;  %v9648_v23 = vrot.slane %v9647_v35, 3  ;;  %v9650_v61 = vld [vmem:[#allocation49_spill] sm:$0xff]  ;;  %9654 = vst [vmem:[#allocation80_spill] sm:$0xff] %v6184_v15  ;;  %v4188_v15 = vrot.slane %v5921_v10, 6  ;;  %v9662_v8 = vld [vmem:[#allocation51_spill] sm:$0xff]  ;;  %v6228_v18 = vmul.f32 %v9668_v5, %v5482_v2 }
 0x22e   :  { %9642 = vst [vmem:[#allocation78_spill] sm:$0xff] %v6157_v44  ;;  %v6177_v49 = vmul.f32 %v9650_v61, %v5482_v2  ;;  %v6188_v14 = vmul.f32 %v9650_v61, %v5470_v42  ;;  %v6213_v9 = vmul.f32 %v9662_v8, %v5482_v2  ;;  %v6224_v10 = vmul.f32 %v9662_v8, %v5470_v42 }
 0x22f   :  { %v6172_v21 = vsel %vm691_vm7, %v9648_v23, %v9646_v45  ;;  %v9656_v45 = vld [vmem:[#allocation50_spill] sm:$0xff]  ;;  %9669 = vst [vmem:[#allocation175_spill] sm:$0xff] %v6228_v18 }
 0x230   :  { %9649 = vst [vmem:[#allocation79_spill] sm:$0xff] %v6172_v21  ;;  %9651 = vst [vmem:[#allocation169_spill] sm:$0xff] %v6177_v49  ;;  %v6192_v35 = vmul.f32 %v9656_v45, %v5482_v2  ;;  %v6196_v23 = vmul.f32 %v9656_v45, %v5470_v42  ;;  %v9660_v21 = vrot.slane %v9659_v25, 4  ;;  %v9275_v0 = vrot.slane %v6177_v49, 5 }
 0x231   :  { %9655 = vst [vmem:[#allocation170_spill] sm:$0xff] %v6188_v14  ;;  %v9279_v61 = vrot.slane %v6188_v14, 5  ;;  %9663 = vst [vmem:[#allocation173_spill] sm:$0xff] %v6213_v9  ;;  %v6232_v45 = vmul.f32 %v9668_v5, %v5470_v42  ;;  %v9671_v49 = vrot.slane %v5460_v24, 5  ;;  %v9281_v14 = vrot.slane %v6213_v9, 1 }
 0x232   :  { %9657 = vst [vmem:[#allocation171_spill] sm:$0xff] %v6192_v35  ;;  %9658 = vst [vmem:[#allocation172_spill] sm:$0xff] %v6196_v23  ;;  %v6203_v36 = vsel %vm724_vm8, %v9660_v21, %v9273_v41  ;;  %v9664_v21 = vld [vmem:[#allocation82_spill] sm:$0xff]  ;;  %v9287_v24 = vrot.slane %v6224_v10, 1 }
 0x233   :  { %9661 = vst [vmem:[#allocation81_spill] sm:$0xff] %v6203_v36  ;;  %v9665_v25 = vrot.slane %v9664_v21, 5  ;;  %9667 = vst [vmem:[#allocation174_spill] sm:$0xff] %v6224_v10  ;;  %v6239_v21 = vsel %vm757_vm9, %v9671_v49, %v9279_v61  ;;  %v9677_v36 = vrot.slane %v5468_v33, 6  ;;  %v9686_v49 = vld [vmem:[#allocation83_spill] sm:$0xff] }
 0x234   :  { %9670 = vst [vmem:[#allocation176_spill] sm:$0xff] %v6232_v45  ;;  %9672 = vst [vmem:[#allocation177_spill] sm:$0xff] %v6239_v21  ;;  %v9687_v9 = vrot.slane %v9686_v49, 1 }
 0x235   :  { %v6220_v41 = vsel %vm757_vm9, %v9665_v25, %v9275_v0  ;;  %v9673_v25 = vrot.slane %v6192_v35, 6  ;;  %v9674_v0 = vrot.slane %v5464_v16, 6  ;;  %v6261_v16 = vmul.f32 %v5185_v58, %v5482_v2 }
 0x236   :  { %9666 = vst [vmem:[#allocation82_spill] sm:$0xff] %v6220_v41  ;;  %v9676_v41 = vrot.slane %v6196_v23, 6  ;;  %v9694_v23 = vrot.slane %v5495_v54, 2 }
 0x237   :  { %v6246_v8 = vsel %vm790_vm10, %v9674_v0, %v9673_v25  ;;  %9679 = vst [vmem:[#allocation180_spill] sm:$0xff] %v6261_v16  ;;  %v9680_v0 = vrot.slane %v5476_v43, 1  ;;  %v6287_v43 = vsel %vm625_vm11, %v9687_v9, %v9287_v24  ;;  %v9288_v10 = vrot.slane %v6261_v16, 3 }
 0x238   :  { %9675 = vst [vmem:[#allocation178_spill] sm:$0xff] %v6246_v8  ;;  %v6253_v5 = vsel %vm790_vm10, %v9677_v36, %v9676_v41  ;;  %v6272_v41 = vmul.f32 %v5185_v58, %v5470_v42  ;;  %v9683_v36 = vld [vmem:[#allocation54_spill] sm:$0xff]  ;;  %9688 = vst [vmem:[#allocation83_spill] sm:$0xff] %v6287_v43  ;;  %v6328_v24 = vmul.f32 %v9556_v31, %v5470_v42  ;;  %v9703_v9 = vrot.slane %v5516_v47, 3 }
 0x239   :  { %9678 = vst [vmem:[#allocation179_spill] sm:$0xff] %v6253_v5  ;;  %v6268_v33 = vsel %vm625_vm11, %v9680_v0, %v9281_v14  ;;  %v6276_v25 = vmul.f32 %v9683_v36, %v5482_v2  ;;  %v6280_v61 = vmul.f32 %v9683_v36, %v5470_v42  ;;  %v9689_v0 = vrot.slane %v6228_v18, 2  ;;  %v9690_v14 = vld [vmem:[#allocation84_spill] sm:$0xff] }
 0x23a   :  { %9681 = vst [vmem:[#allocation181_spill] sm:$0xff] %v6268_v33  ;;  %9682 = vst [vmem:[#allocation182_spill] sm:$0xff] %v6272_v41  ;;  %v9691_v58 = vrot.slane %v9690_v14, 2  ;;  %v9693_v5 = vrot.slane %v6232_v45, 2  ;;  %v9291_v49 = vrot.slane %v6272_v41, 3  ;;  %v6309_v14 = vmul.f32 %v9490_v60, %v5482_v2 }
 0x23b   :  { %9684 = vst [vmem:[#allocation183_spill] sm:$0xff] %v6276_v25  ;;  %9685 = vst [vmem:[#allocation184_spill] sm:$0xff] %v6280_v61 }
 0x23c   :  { %v6294_v33 = vsel %vm658_vm6, %v9691_v58, %v9689_v0  ;;  %v6301_v36 = vsel %vm658_vm6, %v9694_v23, %v9693_v5  ;;  %9696 = vst [vmem:[#allocation186_spill] sm:$0xff] %v6309_v14  ;;  %v9697_v58 = vld [vmem:[#allocation85_spill] sm:$0xff]  ;;  %v6320_v23 = vmul.f32 %v9490_v60, %v5470_v42  ;;  %v6324_v5 = vmul.f32 %v9556_v31, %v5482_v2 }
 0x23d   :  { %9692 = vst [vmem:[#allocation84_spill] sm:$0xff] %v6294_v33  ;;  %9695 = vst [vmem:[#allocation185_spill] sm:$0xff] %v6301_v36  ;;  %v9698_v0 = vrot.slane %v9697_v58, 3  ;;  %v6335_v58 = vsel %vm691_vm7, %v9703_v9, %v9291_v49  ;;  %v9708_v2 = vrot.slane %v6280_v61, 4  ;;  %v9292_v31 = vrot.slane %v6309_v14, 5 }
 0x23e   :  { %9700 = vst [vmem:[#allocation187_spill] sm:$0xff] %v6320_v23  ;;  %9701 = vst [vmem:[#allocation188_spill] sm:$0xff] %v6324_v5  ;;  %v9293_v47 = vrot.slane %v6320_v23, 5  ;;  %v9296_v9 = vrot.slane %v6324_v5, 6  ;;  %v9295_v49 = vrot.slane %v6328_v24, 6 }
 0x23f   :  { %v6316_v54 = vsel %vm691_vm7, %v9698_v0, %v9288_v10  ;;  %9702 = vst [vmem:[#allocation189_spill] sm:$0xff] %v6328_v24  ;;  %9704 = vst [vmem:[#allocation190_spill] sm:$0xff] %v6335_v58  ;;  %v9705_v0 = vrot.slane %v6276_v25, 4  ;;  %v9706_v10 = vrot.slane %v5522_v6, 4  ;;  %v4183_v6 = vrot.slane %v6062_v63, 6 }
 0x240   :  { %9699 = vst [vmem:[#allocation85_spill] sm:$0xff] %v6316_v54  ;;  %v9709_v54 = vrot.slane %v5526_v38, 4  ;;  %v6366_v38 = vsel %vm757_vm9, %v4143_v1, %v9293_v47  ;;  %v836_v24 = vstv %s4545_s27  ;;  %s4570_s27 = sld [smem:[#allocation4 + $0x27]] }
 0x241   :  { %v6342_v60 = vsel %vm724_vm8, %v9706_v10, %v9705_v0  ;;  %v9711_v10 = vrot.slane %v5745_v4, 5  ;;  %9713 = vst [vmem:[#allocation194_spill] sm:$0xff] %v6366_v38  ;;  %v6376_v63 = vsel %vm790_vm10, %v4183_v6, %v9295_v49  ;;  %v9716_v38 = vld [vmem:[#allocation14_spill] sm:$0xff] }
 0x242   :  { %9707 = vst [vmem:[#allocation191_spill] sm:$0xff] %v6342_v60  ;;  %v6349_v42 = vsel %vm724_vm8, %v9709_v54, %v9708_v2  ;;  %v6371_v54 = vsel %vm790_vm10, %v4188_v15, %v9296_v9  ;;  %9715 = vst [vmem:[#allocation196_spill] sm:$0xff] %v6376_v63  ;;  %v9717_v6 = vld [vmem:[#allocation18_spill] sm:$0xff]  ;;  %v9719_v9 = vld [vmem:[#allocation17_spill] sm:$0xff] }
 0x243   :  { %9710 = vst [vmem:[#allocation192_spill] sm:$0xff] %v6349_v42  ;;  %v6361_v0 = vsel %vm757_vm9, %v9711_v10, %v9292_v31  ;;  %9714 = vst [vmem:[#allocation195_spill] sm:$0xff] %v6371_v54  ;;  %v9720_v63 = vld [vmem:[#allocation15_spill] sm:$0xff] }
 0x244   :  { %9712 = vst [vmem:[#allocation193_spill] sm:$0xff] %v6361_v0 }
 0x25e   :  { %v480_v2 = vpop.permute.xlu1 %479  ;;  %v478_v4 = vpop.permute.xlu0 %477 }
 0x25f   :  { %484 = vst.msk [vmem:[#allocation2 + $0x28] sm:$0x1] %vm117_vm3, %v480_v2  ;;  %483 = vst.msk [vmem:[#allocation2 + $0x10] sm:$0x1] %vm117_vm3, %v478_v4  ;;  %v9718_v2 = vld [vmem:[#allocation16_spill] sm:$0xff] }
 0x262   :  { %v488_v10 = vpop.permute.xlu1 %487  ;;  %v486_v31 = vpop.permute.xlu0 %485 }
 0x263   :  { %v490_v1 = vrot.slane %v488_v10, 1  ;;  %v489_v47 = vrot.slane %v486_v31, 1 }
 0x265   :  { %v498_v5 = vrot.slane %v490_v1, %v9716_v38  ;;  %v494_v15 = vrot.slane %v489_v47, %v9716_v38 }
 0x267   :  { %501 = vrot.lane.b32.xlu1 %v498_v5, %s9402_s2  ;;  %499 = vrot.lane.b32.xlu0 %v494_v15, %s9402_s2 }
 0x26b   :  { %509 = vrot.lane.b32.xlu1 %v9717_v6, %s4762_s16  ;;  %507 = vrot.lane.b32.xlu0 %v9718_v2, %s4762_s16 }
 0x2d9   :  { %v502_v4 = vpop.permute.xlu1 %501  ;;  %v500_v49 = vpop.permute.xlu0 %499 }
 0x2da   :  { %506 = vst.msk [vmem:[#allocation2 + $0x58] sm:$0x1] %vm117_vm3, %v502_v4  ;;  %505 = vst.msk [vmem:[#allocation2 + $0x40] sm:$0x1] %vm117_vm3, %v500_v49 }
 0x2dd   :  { %v510_v31 = vpop.permute.xlu1 %509  ;;  %v508_v10 = vpop.permute.xlu0 %507 }
 0x2de   :  { %v512_v47 = vrot.slane %v510_v31, 1  ;;  %v511_v1 = vrot.slane %v508_v10, 1 }
 0x2e0   :  { %v520_v5 = vrot.slane %v512_v47, %v9716_v38  ;;  %v516_v15 = vrot.slane %v511_v1, %v9716_v38 }
 0x2e2   :  { %523 = vrot.lane.b32.xlu1 %v520_v5, %s9402_s2  ;;  %521 = vrot.lane.b32.xlu0 %v516_v15, %s9402_s2 }
 0x2e6   :  { %531 = vrot.lane.b32.xlu1 %v9719_v9, %s4762_s16  ;;  %529 = vrot.lane.b32.xlu0 %v9720_v63, %s4762_s16 }
 0x354   :  { %v524_v4 = vpop.permute.xlu1 %523  ;;  %v522_v49 = vpop.permute.xlu0 %521 }
 0x355   :  { %528 = vst.msk [vmem:[#allocation2 + $0x29] sm:$0x1] %vm117_vm3, %v524_v4  ;;  %527 = vst.msk [vmem:[#allocation2 + $0x11] sm:$0x1] %vm117_vm3, %v522_v49 }
 0x358   :  { %v532_v31 = vpop.permute.xlu1 %531  ;;  %v530_v10 = vpop.permute.xlu0 %529 }
 0x359   :  { %v534_v47 = vrot.slane %v532_v31, 1  ;;  %v533_v1 = vrot.slane %v530_v10, 1 }
 0x35b   :  { %v542_v5 = vrot.slane %v534_v47, %v9716_v38  ;;  %v538_v15 = vrot.slane %v533_v1, %v9716_v38 }
 0x35d   :  { %545 = vrot.lane.b32.xlu1 %v542_v5, %s9402_s2  ;;  %543 = vrot.lane.b32.xlu0 %v538_v15, %s9402_s2 }
 0x361   :  { %553 = vrot.lane.b32.xlu1 %v9717_v6, %s4763_s0  ;;  %551 = vrot.lane.b32.xlu0 %v9718_v2, %s4763_s0 }
 0x3cf   :  { %v546_v4 = vpop.permute.xlu1 %545  ;;  %v544_v49 = vpop.permute.xlu0 %543 }
 0x3d0   :  { %550 = vst.msk [vmem:[#allocation2 + $0x59] sm:$0x1] %vm117_vm3, %v546_v4  ;;  %549 = vst.msk [vmem:[#allocation2 + $0x41] sm:$0x1] %vm117_vm3, %v544_v49 }
 0x3d3   :  { %v554_v31 = vpop.permute.xlu1 %553  ;;  %v552_v10 = vpop.permute.xlu0 %551 }
 0x3d4   :  { %v556_v47 = vrot.slane %v554_v31, 1  ;;  %v555_v1 = vrot.slane %v552_v10, 1 }
 0x3d6   :  { %v564_v5 = vrot.slane %v556_v47, %v9716_v38  ;;  %v560_v15 = vrot.slane %v555_v1, %v9716_v38 }
 0x3d8   :  { %567 = vrot.lane.b32.xlu1 %v564_v5, %s9402_s2  ;;  %565 = vrot.lane.b32.xlu0 %v560_v15, %s9402_s2  ;;  %v6422_v5 = vld [vmem:[#allocation2] sm:$0xff] }
 0x3dc   :  { %575 = vrot.lane.b32.xlu1 %v9719_v9, %s4763_s0  ;;  %573 = vrot.lane.b32.xlu0 %v9720_v63, %s4763_s0  ;;  %v6424_v9 = vld [vmem:[#allocation2 + $0x8] sm:$0xff]  ;;  %v810_v63 = vstv %s4544_s25  ;;  %s4568_s25 = sld [smem:[#allocation4 + $0x19]] }
 0x3dd   :  { %v812_v15 = vmul.f32 %v810_v63, %v6424_v9  ;;  %v1676_v51 = vmul.f32 %v1674_v56, %v6424_v9 }
 0x44a   :  { %v568_v6 = vpop.permute.xlu1 %567  ;;  %v566_v2 = vpop.permute.xlu0 %565 }
 0x44b   :  { %572 = vst.msk [vmem:[#allocation2 + $0x2a] sm:$0x1] %vm117_vm3, %v568_v6  ;;  %571 = vst.msk [vmem:[#allocation2 + $0x12] sm:$0x1] %vm117_vm3, %v566_v2  ;;  %v811_v6 = vmul.f32 %v810_v63, %v6422_v5  ;;  %v6430_v2 = vld [vmem:[#allocation2 + $0x18] sm:$0xff] }
 0x44e   :  { %v576_v4 = vpop.permute.xlu1 %575  ;;  %v574_v49 = vpop.permute.xlu0 %573 }
 0x44f   :  { %v578_v31 = vrot.slane %v576_v4, 1  ;;  %v577_v10 = vrot.slane %v574_v49, 1  ;;  %v6432_v4 = vld [vmem:[#allocation2 + $0x20] sm:$0xff]  ;;  %v813_v49 = vmul.f32 %v810_v63, %v6430_v2 }
 0x450   :  { %v841_v23 = vmul.f32 %v836_v24, %v6432_v4 }
 0x451   :  { %v586_v47 = vrot.slane %v578_v31, %v9716_v38  ;;  %v582_v1 = vrot.slane %v577_v10, %v9716_v38  ;;  %v814_v38 = vmul.f32 %v810_v63, %v6432_v4  ;;  %v1076_v31 = vstv %s4551_s26  ;;  %s4569_s26 = sld [smem:[#allocation4 + $0x20]] }
 0x452   :  { %v6438_v10 = vld [vmem:[#allocation2 + $0x10] sm:$0x3f]  ;;  %v6446_v54 = vld [vmem:[#allocation2 + $0x28] sm:$0x3f]  ;;  %v837_v63 = vmul.f32 %v836_v24, %v6422_v5  ;;  %v855_v60 = vrot.slane %v841_v23, 1 }
 0x453   :  { %589 = vrot.lane.b32.xlu1 %v586_v47, %s9402_s2  ;;  %587 = vrot.lane.b32.xlu0 %v582_v1, %s9402_s2  ;;  %v1078_v47 = vmul.f32 %v1076_v31, %v6424_v9  ;;  %v1077_v1 = vmul.f32 %v1076_v31, %v6422_v5  ;;  %v842_v42 = vmul.f32 %v836_v24, %v6446_v54  ;;  %s4767_s2 = smov 124  }
 0x454   :  { %v849_v61 = vrot.slane %v837_v63, 1 }
 0x457   :  { %821 = vrot.lane.b32.xlu1 %v812_v15, %s4764_s28  ;;  %819 = vrot.lane.b32.xlu0 %v811_v6, %s4764_s28  ;;  %v838_v15 = vmul.f32 %v836_v24, %v6424_v9  ;;  %v839_v6 = vmul.f32 %v836_v24, %v6438_v10  ;;  %v1754_v27 = vstv %s4569_s26  ;;  %s7124_s26 = sld [smem:[#allocation4 + $0x29]] }
 0x459   :  { %v850_v0 = vrot.slane %v838_v15, 1  ;;  %v852_v14 = vrot.slane %v839_v6, 1  ;;  %v857_v15 = vrot.slane %v842_v42, 1 }
 0x45b   :  { %825 = vrot.lane.b32.xlu1 %v814_v38, %s4764_s28  ;;  %823 = vrot.lane.b32.xlu0 %v813_v49, %s4764_s28  ;;  %v1080_v38 = vmul.f32 %v1076_v31, %v6432_v4  ;;  %v1079_v49 = vmul.f32 %v1076_v31, %v6430_v2  ;;  %v853_v31 = vsel %vm625_vm11, %v850_v0, %v852_v14 }
 0x45c   :  { %v851_v58 = vsel %vm625_vm11, %v849_v61, %v850_v0  ;;  %v858_v23 = vsel %vm625_vm11, %v855_v60, %v857_v15  ;;  %v916_v0 = vstv %s4547_s7  ;;  %s4572_s7 = sld [smem:[#allocation4 + $0x5]] }
 0x45f   :  { %1087 = vrot.lane.b32.xlu1 %v1078_v47, %s4765_s6  ;;  %1085 = vrot.lane.b32.xlu0 %v1077_v1, %s4765_s6  ;;  %v840_v47 = vmul.f32 %v836_v24, %v6430_v2  ;;  %v876_v1 = vstv %s4546_s29  ;;  %s4571_s29 = sld [smem:[#allocation4 + $0x2e]] }
 0x460   :  { %v878_v25 = vmul.f32 %v876_v1, %v6424_v9  ;;  %v879_v6 = vmul.f32 %v876_v1, %v6438_v10  ;;  %v877_v63 = vmul.f32 %v876_v1, %v6422_v5  ;;  %v882_v61 = vmul.f32 %v876_v1, %v6446_v54 }
 0x462   :  { %v890_v24 = vrot.slane %v878_v25, 2  ;;  %v892_v14 = vrot.slane %v879_v6, 2  ;;  %v889_v42 = vrot.slane %v877_v63, 2  ;;  %v918_v25 = vmul.f32 %v916_v0, %v6424_v9 }
 0x463   :  { %1091 = vrot.lane.b32.xlu1 %v1080_v38, %s4765_s6  ;;  %1089 = vrot.lane.b32.xlu0 %v1079_v49, %s4765_s6  ;;  %v854_v38 = vrot.slane %v840_v47, 1  ;;  %v881_v49 = vmul.f32 %v876_v1, %v6432_v4  ;;  %v919_v6 = vmul.f32 %v916_v0, %v6438_v10  ;;  %v921_v63 = vmul.f32 %v916_v0, %v6432_v4 }
 0x464   :  { %v891_v15 = vsel %vm658_vm6, %v889_v42, %v890_v24  ;;  %v920_v42 = vmul.f32 %v916_v0, %v6430_v2 }
 0x465   :  { %v856_v41 = vsel %vm625_vm11, %v854_v38, %v855_v60  ;;  %v895_v47 = vrot.slane %v881_v49, 2  ;;  %v897_v60 = vrot.slane %v882_v61, 2  ;;  %v917_v38 = vmul.f32 %v916_v0, %v6422_v5 }
 0x467   :  { %861 = vrot.lane.b32.xlu1 %v853_v31, %s4764_s28  ;;  %859 = vrot.lane.b32.xlu0 %v851_v58, %s4764_s28  ;;  %v880_v58 = vmul.f32 %v876_v1, %v6430_v2  ;;  %v893_v31 = vsel %vm658_vm6, %v890_v24, %v892_v14  ;;  %v930_v1 = vrot.slane %v918_v25, 3  ;;  %v898_v49 = vsel %vm658_vm6, %v895_v47, %v897_v60 }
 0x468   :  { %v932_v14 = vrot.slane %v919_v6, 3  ;;  %v922_v24 = vmul.f32 %v916_v0, %v6446_v54  ;;  %v929_v61 = vrot.slane %v917_v38, 3  ;;  %v934_v38 = vrot.slane %v920_v42, 3 }
 0x46a   :  { %v931_v60 = vsel %vm691_vm7, %v929_v61, %v930_v1 }
 0x46b   :  { %865 = vrot.lane.b32.xlu1 %v858_v23, %s4764_s28  ;;  %863 = vrot.lane.b32.xlu0 %v856_v41, %s4764_s28  ;;  %v894_v41 = vrot.slane %v880_v58, 2  ;;  %v956_v58 = vstv %s4548_s8  ;;  %s4573_s8 = sld [smem:[#allocation4 + $0xc]] }
 0x46c   :  { %v958_v25 = vmul.f32 %v956_v58, %v6424_v9  ;;  %v959_v6 = vmul.f32 %v956_v58, %v6438_v10  ;;  %v960_v61 = vmul.f32 %v956_v58, %v6430_v2 }
 0x46d   :  { %v896_v23 = vsel %vm658_vm6, %v894_v41, %v895_v47  ;;  %v937_v47 = vrot.slane %v922_v24, 3  ;;  %v957_v41 = vmul.f32 %v956_v58, %v6422_v5 }
 0x46e   :  { %v970_v0 = vrot.slane %v958_v25, 4 }
 0x46f   :  { %901 = vrot.lane.b32.xlu1 %v893_v31, %s4764_s28  ;;  %899 = vrot.lane.b32.xlu0 %v891_v15, %s4764_s28  ;;  %v935_v31 = vrot.slane %v921_v63, 3  ;;  %v933_v15 = vsel %vm691_vm7, %v930_v1, %v932_v14  ;;  %v961_v63 = vmul.f32 %v956_v58, %v6432_v4  ;;  %v972_v14 = vrot.slane %v959_v6, 4 }
 0x470   :  { %v962_v1 = vmul.f32 %v956_v58, %v6446_v54  ;;  %v969_v24 = vrot.slane %v957_v41, 4 }
 0x471   :  { %v975_v25 = vrot.slane %v961_v63, 4 }
 0x472   :  { %v971_v42 = vsel %vm724_vm8, %v969_v24, %v970_v0 }
 0x473   :  { %905 = vrot.lane.b32.xlu1 %v898_v49, %s4764_s28  ;;  %903 = vrot.lane.b32.xlu0 %v896_v23, %s4764_s28  ;;  %v938_v49 = vsel %vm691_vm7, %v935_v31, %v937_v47  ;;  %v936_v23 = vsel %vm691_vm7, %v934_v38, %v935_v31  ;;  %v977_v47 = vrot.slane %v962_v1, 4  ;;  %v974_v38 = vrot.slane %v960_v61, 4 }
 0x474   :  { %v1036_v61 = vstv %s4550_s10  ;;  %s4768_s10 = smov 123  }
 0x475   :  { %v976_v58 = vsel %vm724_vm8, %v974_v38, %v975_v25  ;;  %v978_v63 = vsel %vm724_vm8, %v975_v25, %v977_v47 }
 0x477   :  { %941 = vrot.lane.b32.xlu1 %v933_v15, %s4764_s28  ;;  %939 = vrot.lane.b32.xlu0 %v931_v60, %s4764_s28  ;;  %v996_v15 = vstv %s4549_s9  ;;  %v973_v60 = vsel %vm724_vm8, %v970_v0, %v972_v14  ;;  %s4574_s9 = sld [smem:[#allocation4 + $0x13]] }
 0x478   :  { %v998_v31 = vmul.f32 %v996_v15, %v6424_v9  ;;  %v999_v6 = vmul.f32 %v996_v15, %v6438_v10  ;;  %v997_v41 = vmul.f32 %v996_v15, %v6422_v5  ;;  %v1002_v14 = vmul.f32 %v996_v15, %v6446_v54 }
 0x479   :  { %v1000_v24 = vmul.f32 %v996_v15, %v6430_v2 }
 0x47a   :  { %v1012_v0 = vrot.slane %v999_v6, 5  ;;  %v1009_v1 = vrot.slane %v997_v41, 5  ;;  %v1017_v47 = vrot.slane %v1002_v14, 5  ;;  %v1037_v41 = vmul.f32 %v1036_v61, %v6422_v5 }
 0x47b   :  { %945 = vrot.lane.b32.xlu1 %v938_v49, %s4764_s28  ;;  %943 = vrot.lane.b32.xlu0 %v936_v23, %s4764_s28  ;;  %v1001_v49 = vmul.f32 %v996_v15, %v6432_v4  ;;  %v1010_v23 = vrot.slane %v998_v31, 5  ;;  %v1039_v31 = vmul.f32 %v1036_v61, %v6438_v10  ;;  %v1014_v6 = vrot.slane %v1000_v24, 5 }
 0x47c   :  { %v1049_v14 = vrot.slane %v1037_v41, 6  ;;  %v1102_v24 = vstv %s4552_s11  ;;  %s4575_s11 = sld [smem:[#allocation4 + $0x1a]] }
 0x47d   :  { %v1013_v38 = vsel %vm757_vm9, %v1010_v23, %v1012_v0  ;;  %v1011_v25 = vsel %vm757_vm9, %v1009_v1, %v1010_v23  ;;  %v1052_v0 = vrot.slane %v1039_v31, 6  ;;  %v1042_v23 = vmul.f32 %v1036_v61, %v6446_v54 }
 0x47e   :  { %v1040_v1 = vmul.f32 %v1036_v61, %v6430_v2  ;;  %v1105_v31 = vmul.f32 %v1102_v24, %v6438_v10  ;;  %v1103_v41 = vmul.f32 %v1102_v24, %v6422_v5 }
 0x47f   :  { %981 = vrot.lane.b32.xlu1 %v973_v60, %s4764_s28  ;;  %979 = vrot.lane.b32.xlu0 %v971_v42, %s4764_s28  ;;  %v1015_v42 = vrot.slane %v1001_v49, 5  ;;  %v1038_v60 = vmul.f32 %v1036_v61, %v6424_v9 }
 0x481   :  { %v1050_v15 = vrot.slane %v1038_v60, 6  ;;  %v1018_v49 = vsel %vm757_vm9, %v1015_v42, %v1017_v47  ;;  %v1104_v60 = vmul.f32 %v1102_v24, %v6424_v9 }
 0x483   :  { %985 = vrot.lane.b32.xlu1 %v978_v63, %s4764_s28  ;;  %983 = vrot.lane.b32.xlu0 %v976_v58, %s4764_s28  ;;  %v1041_v58 = vmul.f32 %v1036_v61, %v6432_v4  ;;  %v1016_v63 = vsel %vm757_vm9, %v1014_v6, %v1015_v42  ;;  %v1051_v47 = vsel %vm790_vm10, %v1049_v14, %v1050_v15  ;;  %v1057_v42 = vrot.slane %v1042_v23, 6 }
 0x484   :  { %v1054_v6 = vrot.slane %v1040_v1, 6  ;;  %v1116_v61 = vrot.slane %v1104_v60, 1  ;;  %v1115_v23 = vrot.slane %v1103_v41, 1  ;;  %v1106_v14 = vmul.f32 %v1102_v24, %v6430_v2 }
 0x485   :  { %v1142_v1 = vstv %s4553_s12  ;;  %s4576_s12 = sld [smem:[#allocation4 + $0x21]] }
 0x486   :  { %v1144_v60 = vmul.f32 %v1142_v1, %v6424_v9  ;;  %v1120_v41 = vrot.slane %v1106_v14, 1 }
 0x487   :  { %1021 = vrot.lane.b32.xlu1 %v1013_v38, %s4764_s28  ;;  %1019 = vrot.lane.b32.xlu0 %v1011_v25, %s4764_s28  ;;  %v1055_v38 = vrot.slane %v1041_v58, 6  ;;  %v1053_v25 = vsel %vm790_vm10, %v1050_v15, %v1052_v0  ;;  %v1118_v0 = vrot.slane %v1105_v31, 1  ;;  %v1108_v15 = vmul.f32 %v1102_v24, %v6446_v54 }
 0x488   :  { %v1145_v31 = vmul.f32 %v1142_v1, %v6438_v10 }
 0x489   :  { %v1058_v58 = vsel %vm790_vm10, %v1055_v38, %v1057_v42  ;;  %v1117_v42 = vsel %vm625_vm11, %v1115_v23, %v1116_v61  ;;  %v1146_v23 = vmul.f32 %v1142_v1, %v6430_v2 }
 0x48b   :  { %1025 = vrot.lane.b32.xlu1 %v1018_v49, %s4764_s28  ;;  %1023 = vrot.lane.b32.xlu0 %v1016_v63, %s4764_s28  ;;  %v1107_v49 = vmul.f32 %v1102_v24, %v6432_v4  ;;  %v1056_v63 = vsel %vm790_vm10, %v1054_v6, %v1055_v38  ;;  %v1123_v38 = vrot.slane %v1108_v15, 1  ;;  %v1143_v6 = vmul.f32 %v1142_v1, %v6422_v5 }
 0x48c   :  { %v1156_v24 = vrot.slane %v1144_v60, 2 }
 0x48d   :  { %v1155_v15 = vrot.slane %v1143_v6, 2 }
 0x48f   :  { %1061 = vrot.lane.b32.xlu1 %v1053_v25, %s4764_s28  ;;  %1059 = vrot.lane.b32.xlu0 %v1051_v47, %s4764_s28  ;;  %v1121_v25 = vrot.slane %v1107_v49, 1  ;;  %v1119_v47 = vsel %vm625_vm11, %v1116_v61, %v1118_v0  ;;  %v1147_v49 = vmul.f32 %v1142_v1, %v6432_v4  ;;  %v1158_v0 = vrot.slane %v1145_v31, 2 }
 0x490   :  { %v1148_v61 = vmul.f32 %v1142_v1, %v6446_v54  ;;  %v1157_v14 = vsel %vm658_vm6, %v1155_v15, %v1156_v24 }
 0x491   :  { %v1161_v60 = vrot.slane %v1147_v49, 2 }
 0x493   :  { %1065 = vrot.lane.b32.xlu1 %v1058_v58, %s4764_s28  ;;  %1063 = vrot.lane.b32.xlu0 %v1056_v63, %s4764_s28  ;;  %v1124_v58 = vsel %vm625_vm11, %v1121_v25, %v1123_v38  ;;  %v1122_v63 = vsel %vm625_vm11, %v1120_v41, %v1121_v25  ;;  %v1163_v38 = vrot.slane %v1148_v61, 2  ;;  %v1160_v41 = vrot.slane %v1146_v23, 2 }
 0x494   :  { %v1222_v23 = vstv %s4555_s14  ;;  %s4578_s14 = sld [smem:[#allocation4 + $0x2f]] }
 0x495   :  { %v1162_v1 = vsel %vm658_vm6, %v1160_v41, %v1161_v60  ;;  %v1164_v49 = vsel %vm658_vm6, %v1161_v60, %v1163_v38 }
 0x497   :  { %1127 = vrot.lane.b32.xlu1 %v1119_v47, %s4765_s6  ;;  %1125 = vrot.lane.b32.xlu0 %v1117_v42, %s4765_s6  ;;  %v1182_v47 = vstv %s4554_s13  ;;  %v1159_v42 = vsel %vm658_vm6, %v1156_v24, %v1158_v0  ;;  %s4577_s13 = sld [smem:[#allocation4 + $0x28]] }
 0x498   :  { %v1184_v25 = vmul.f32 %v1182_v47, %v6424_v9  ;;  %v1185_v31 = vmul.f32 %v1182_v47, %v6438_v10  ;;  %v1183_v6 = vmul.f32 %v1182_v47, %v6422_v5  ;;  %v1188_v0 = vmul.f32 %v1182_v47, %v6446_v54 }
 0x499   :  { %v1186_v15 = vmul.f32 %v1182_v47, %v6430_v2 }
 0x49a   :  { %v1198_v24 = vrot.slane %v1185_v31, 3  ;;  %v1195_v61 = vrot.slane %v1183_v6, 3  ;;  %v1203_v38 = vrot.slane %v1188_v0, 3  ;;  %v1223_v6 = vmul.f32 %v1222_v23, %v6422_v5 }
 0x49b   :  { %1131 = vrot.lane.b32.xlu1 %v1124_v58, %s4765_s6  ;;  %1129 = vrot.lane.b32.xlu0 %v1122_v63, %s4765_s6  ;;  %v1187_v58 = vmul.f32 %v1182_v47, %v6432_v4  ;;  %v1196_v63 = vrot.slane %v1184_v25, 3  ;;  %v1225_v25 = vmul.f32 %v1222_v23, %v6438_v10  ;;  %v1200_v31 = vrot.slane %v1186_v15, 3 }
 0x49c   :  { %v1235_v0 = vrot.slane %v1223_v6, 4  ;;  %v1262_v15 = vstv %s4556_s17  ;;  %s4579_s17 = sld [smem:[#allocation4 + $0x6]] }
 0x49d   :  { %v1199_v41 = vsel %vm691_vm7, %v1196_v63, %v1198_v24  ;;  %v1197_v60 = vsel %vm691_vm7, %v1195_v61, %v1196_v63  ;;  %v1238_v24 = vrot.slane %v1225_v25, 4  ;;  %v1228_v63 = vmul.f32 %v1222_v23, %v6446_v54 }
 0x49e   :  { %v1226_v61 = vmul.f32 %v1222_v23, %v6430_v2  ;;  %v1265_v25 = vmul.f32 %v1262_v15, %v6438_v10  ;;  %v1263_v6 = vmul.f32 %v1262_v15, %v6422_v5 }
 0x49f   :  { %1167 = vrot.lane.b32.xlu1 %v1159_v42, %s4765_s6  ;;  %1165 = vrot.lane.b32.xlu0 %v1157_v14, %s4765_s6  ;;  %v1201_v14 = vrot.slane %v1187_v58, 3  ;;  %v1224_v42 = vmul.f32 %v1222_v23, %v6424_v9 }
 0x4a1   :  { %v1236_v47 = vrot.slane %v1224_v42, 4  ;;  %v1204_v58 = vsel %vm691_vm7, %v1201_v14, %v1203_v38  ;;  %v1264_v42 = vmul.f32 %v1262_v15, %v6424_v9 }
 0x4a3   :  { %1171 = vrot.lane.b32.xlu1 %v1164_v49, %s4765_s6  ;;  %1169 = vrot.lane.b32.xlu0 %v1162_v1, %s4765_s6  ;;  %v1227_v1 = vmul.f32 %v1222_v23, %v6432_v4  ;;  %v1202_v49 = vsel %vm691_vm7, %v1200_v31, %v1201_v14  ;;  %v1237_v38 = vsel %vm724_vm8, %v1235_v0, %v1236_v47  ;;  %v1243_v14 = vrot.slane %v1228_v63, 4 }
 0x4a4   :  { %v1240_v31 = vrot.slane %v1226_v61, 4  ;;  %v1276_v23 = vrot.slane %v1264_v42, 5  ;;  %v1275_v63 = vrot.slane %v1263_v6, 5  ;;  %v1266_v0 = vmul.f32 %v1262_v15, %v6430_v2 }
 0x4a5   :  { %v1302_v61 = vstv %s4557_s18  ;;  %s4580_s18 = sld [smem:[#allocation4 + $0xd]] }
 0x4a6   :  { %v1304_v42 = vmul.f32 %v1302_v61, %v6424_v9 }
 0x4a7   :  { %1207 = vrot.lane.b32.xlu1 %v1199_v41, %s4765_s6  ;;  %1205 = vrot.lane.b32.xlu0 %v1197_v60, %s4765_s6  ;;  %v1241_v41 = vrot.slane %v1227_v1, 4  ;;  %v1239_v60 = vsel %vm724_vm8, %v1236_v47, %v1238_v24  ;;  %v1278_v24 = vrot.slane %v1265_v25, 5  ;;  %v1268_v47 = vmul.f32 %v1262_v15, %v6446_v54 }
 0x4a8   :  { %v1280_v25 = vrot.slane %v1266_v0, 5  ;;  %v1316_v6 = vrot.slane %v1304_v42, 6 }
 0x4a9   :  { %v1244_v1 = vsel %vm724_vm8, %v1241_v41, %v1243_v14  ;;  %v1277_v14 = vsel %vm757_vm9, %v1275_v63, %v1276_v23  ;;  %v1283_v16 = vrot.slane %v1268_v47, 5  ;;  %v1306_v47 = vmul.f32 %v1302_v61, %v6430_v2 }
 0x4ab   :  { %1211 = vrot.lane.b32.xlu1 %v1204_v58, %s4765_s6  ;;  %1209 = vrot.lane.b32.xlu0 %v1202_v49, %s4765_s6  ;;  %v1267_v58 = vmul.f32 %v1262_v15, %v6432_v4  ;;  %v1242_v49 = vsel %vm724_vm8, %v1240_v31, %v1241_v41  ;;  %v1305_v41 = vmul.f32 %v1302_v61, %v6438_v10 }
 0x4ac   :  { %v1303_v31 = vmul.f32 %v1302_v61, %v6422_v5  ;;  %v1307_v15 = vmul.f32 %v1302_v61, %v6432_v4 }
 0x4ae   :  { %v1321_v42 = vrot.slane %v1307_v15, 6 }
 0x4af   :  { %1247 = vrot.lane.b32.xlu1 %v1239_v60, %s4765_s6  ;;  %1245 = vrot.lane.b32.xlu0 %v1237_v38, %s4765_s6  ;;  %v1281_v60 = vrot.slane %v1267_v58, 5  ;;  %v1279_v38 = vsel %vm757_vm9, %v1276_v23, %v1278_v24  ;;  %v1308_v23 = vmul.f32 %v1302_v61, %v6446_v54  ;;  %v1315_v24 = vrot.slane %v1303_v31, 6 }
 0x4b0   :  { %v1368_v61 = vstv %s4559_s19  ;;  %s7080_s19 = sld [smem:[#allocation4]] }
 0x4b1   :  { %v1284_v58 = vsel %vm757_vm9, %v1281_v60, %v1283_v16  ;;  %v1317_v0 = vsel %vm790_vm10, %v1315_v24, %v1316_v6  ;;  %v1323_v16 = vrot.slane %v1308_v23, 6 }
 0x4b3   :  { %1251 = vrot.lane.b32.xlu1 %v1244_v1, %s4765_s6  ;;  %1249 = vrot.lane.b32.xlu0 %v1242_v49, %s4765_s6  ;;  %v1282_v1 = vsel %vm757_vm9, %v1280_v25, %v1281_v60  ;;  %v1318_v49 = vrot.slane %v1305_v41, 6  ;;  %v1320_v60 = vrot.slane %v1306_v47, 6  ;;  %v1342_v41 = vstv %s4558_s1  ;;  %s4581_s1 = sld [smem:[#allocation4 + $0x14]] }
 0x4b4   :  { %v1343_v15 = vmul.f32 %v1342_v41, %v6422_v5  ;;  %v1346_v47 = vmul.f32 %v1342_v41, %v6432_v4 }
 0x4b5   :  { %v1319_v63 = vsel %vm790_vm10, %v1316_v6, %v1318_v49  ;;  %v1344_v6 = vmul.f32 %v1342_v41, %v6424_v9  ;;  %v1369_v49 = vmul.f32 %v1368_v61, %v6422_v5 }
 0x4b7   :  { %1287 = vrot.lane.b32.xlu1 %v1279_v38, %s4765_s6  ;;  %1285 = vrot.lane.b32.xlu0 %v1277_v14, %s4765_s6  ;;  %v1324_v38 = vsel %vm790_vm10, %v1321_v42, %v1323_v16  ;;  %v1322_v14 = vsel %vm790_vm10, %v1320_v60, %v1321_v42  ;;  %v1373_v42 = vmul.f32 %v1368_v61, %v6432_v4 }
 0x4b8   :  { %v1374_v60 = vmul.f32 %v1368_v61, %v6446_v54 }
 0x4bb   :  { %1291 = vrot.lane.b32.xlu1 %v1284_v58, %s4765_s6  ;;  %1289 = vrot.lane.b32.xlu0 %v1282_v1, %s4765_s6  ;;  %v1370_v58 = vmul.f32 %v1368_v61, %v6424_v9  ;;  %v1371_v1 = vmul.f32 %v1368_v61, %v6438_v10 }
 0x4bd   :  { %v1384_v16 = vrot.slane %v1371_v1, 1  ;;  %v1389_v1 = vrot.slane %v1374_v60, 1 }
 0x4bf   :  { %1327 = vrot.lane.b32.xlu1 %v1319_v63, %s4765_s6  ;;  %1325 = vrot.lane.b32.xlu0 %v1317_v0, %s4765_s6  ;;  %v1345_v63 = vmul.f32 %v1342_v41, %v6430_v2  ;;  %v1382_v0 = vrot.slane %v1370_v58, 1 }
 0x4c1   :  { %v1385_v58 = vsel %vm625_vm11, %v1382_v0, %v1384_v16 }
 0x4c3   :  { %1331 = vrot.lane.b32.xlu1 %v1324_v38, %s4765_s6  ;;  %1329 = vrot.lane.b32.xlu0 %v1322_v14, %s4765_s6  ;;  %v1381_v38 = vrot.slane %v1369_v49, 1  ;;  %v1372_v14 = vmul.f32 %v1368_v61, %v6430_v2 }
 0x4c5   :  { %v590_v25 = vpop.permute.xlu1 %589  ;;  %v588_v31 = vpop.permute.xlu0 %587  ;;  %v1383_v41 = vsel %vm625_vm11, %v1381_v38, %v1382_v0  ;;  %v1386_v61 = vrot.slane %v1372_v14, 1 }
 0x4c6   :  { %594 = vst.msk [vmem:[#allocation2 + $0x5a] sm:$0x1] %vm117_vm3, %v590_v25  ;;  %593 = vst.msk [vmem:[#allocation2 + $0x42] sm:$0x1] %vm117_vm3, %v588_v31  ;;  %vm4277_vm3 = vcmask 517504  }
 0x4c7   :  { %1353 = vrot.lane.b32.xlu1 %v1344_v6, %s4766_s21  ;;  %1351 = vrot.lane.b32.xlu0 %v1343_v15, %s4766_s21  ;;  %v1387_v6 = vrot.slane %v1373_v42, 1  ;;  %v1408_v15 = vstv %s4560_s20  ;;  %s7084_s20 = sld [smem:[#allocation4 + $0x7]] }
 0x4c8   :  { %v1410_v36 = vmul.f32 %v1408_v15, %v6424_v9  ;;  %v1409_v49 = vmul.f32 %v1408_v15, %v6422_v5  ;;  %v1413_v0 = vmul.f32 %v1408_v15, %v6432_v4  ;;  %v1414_v33 = vmul.f32 %v1408_v15, %v6446_v54 }
 0x4c9   :  { %v6629_v23 = vpop.permute.xlu1 %821  ;;  %v6631_v24 = vpop.permute.xlu0 %819  ;;  %v1388_v42 = vsel %vm625_vm11, %v1386_v61, %v1387_v6  ;;  %v1390_v16 = vsel %vm625_vm11, %v1387_v6, %v1389_v1 }
 0x4ca   :  { %9721 = vst [vmem:[#allocation14_spill] sm:$0xff] %v6629_v23  ;;  %9722 = vst [vmem:[#allocation18_spill] sm:$0xff] %v6631_v24  ;;  %v1422_v60 = vrot.slane %v1410_v36, 2  ;;  %v1421_v14 = vrot.slane %v1409_v49, 2  ;;  %v1427_v43 = vrot.slane %v1413_v0, 2 }
 0x4cb   :  { %1357 = vrot.lane.b32.xlu1 %v1346_v47, %s4766_s21  ;;  %1355 = vrot.lane.b32.xlu0 %v1345_v63, %s4766_s21  ;;  %v1411_v47 = vmul.f32 %v1408_v15, %v6438_v10 }
 0x4cc   :  { %v1423_v1 = vsel %vm658_vm6, %v1421_v14, %v1422_v60 }
 0x4cd   :  { %v6640_v25 = vpop.permute.xlu1 %825  ;;  %v6642_v31 = vpop.permute.xlu0 %823  ;;  %v1424_v38 = vrot.slane %v1411_v47, 2  ;;  %v1429_v47 = vrot.slane %v1414_v33, 2 }
 0x4ce   :  { %9723 = vst [vmem:[#allocation16_spill] sm:$0xff] %v6640_v25  ;;  %9724 = vst [vmem:[#allocation17_spill] sm:$0xff] %v6642_v31 }
 0x4cf   :  { %1393 = vrot.lane.b32.xlu1 %v1385_v58, %s4766_s21  ;;  %1391 = vrot.lane.b32.xlu0 %v1383_v41, %s4766_s21  ;;  %v1412_v41 = vmul.f32 %v1408_v15, %v6430_v2  ;;  %v1448_v58 = vstv %s4561_s22  ;;  %v1425_v36 = vsel %vm658_vm6, %v1422_v60, %v1424_v38  ;;  %v1430_v38 = vsel %vm658_vm6, %v1427_v43, %v1429_v47  ;;  %s4769_s22 = smov 122  }
 0x4d0   :  { %v1450_v6 = vmul.f32 %v1448_v58, %v6424_v9  ;;  %v1449_v49 = vmul.f32 %v1448_v58, %v6422_v5  ;;  %v1453_v35 = vmul.f32 %v1448_v58, %v6432_v4  ;;  %v1454_v14 = vmul.f32 %v1448_v58, %v6446_v54 }
 0x4d1   :  { %v6651_v63 = vpop.permute.xlu1 %1087  ;;  %v6653_v45 = vpop.permute.xlu0 %1085  ;;  %v1426_v15 = vrot.slane %v1412_v41, 2 }
 0x4d2   :  { %9725 = vst [vmem:[#allocation15_spill] sm:$0xff] %v6651_v63  ;;  %9726 = vst [vmem:[#allocation197_spill] sm:$0xff] %v6653_v45  ;;  %v1462_v0 = vrot.slane %v1450_v6, 3  ;;  %v1461_v41 = vrot.slane %v1449_v49, 3  ;;  %v1467_v44 = vrot.slane %v1453_v35, 3 }
 0x4d3   :  { %1397 = vrot.lane.b32.xlu1 %v1390_v16, %s4766_s21  ;;  %1395 = vrot.lane.b32.xlu0 %v1388_v42, %s4766_s21  ;;  %v1451_v16 = vmul.f32 %v1448_v58, %v6438_v10  ;;  %v1428_v33 = vsel %vm658_vm6, %v1426_v15, %v1427_v43  ;;  %v1469_v15 = vrot.slane %v1454_v14, 3 }
 0x4d5   :  { %v6662_v18 = vpop.permute.xlu1 %1091  ;;  %v6664_v61 = vpop.permute.xlu0 %1089  ;;  %v1464_v60 = vrot.slane %v1451_v16, 3  ;;  %v1463_v16 = vsel %vm691_vm7, %v1461_v41, %v1462_v0 }
 0x4d6   :  { %9727 = vst [vmem:[#allocation198_spill] sm:$0xff] %v6662_v18  ;;  %9728 = vst [vmem:[#allocation199_spill] sm:$0xff] %v6664_v61 }
 0x4d7   :  { %1433 = vrot.lane.b32.xlu1 %v1425_v36, %s4766_s21  ;;  %1431 = vrot.lane.b32.xlu0 %v1423_v1, %s4766_s21  ;;  %v1452_v36 = vmul.f32 %v1448_v58, %v6430_v2  ;;  %v1488_v1 = vstv %s4562_s23  ;;  %v1465_v43 = vsel %vm691_vm7, %v1462_v0, %v1464_v60  ;;  %v1470_v60 = vsel %vm691_vm7, %v1467_v44, %v1469_v15  ;;  %s7088_s23 = sld [smem:[#allocation4 + $0xe]] }
 0x4d8   :  { %v1490_v47 = vmul.f32 %v1488_v1, %v6424_v9  ;;  %v1489_v58 = vmul.f32 %v1488_v1, %v6422_v5  ;;  %v1493_v37 = vmul.f32 %v1488_v1, %v6432_v4  ;;  %v1494_v41 = vmul.f32 %v1488_v1, %v6446_v54 }
 0x4d9   :  { %v6673_v42 = vpop.permute.xlu1 %861  ;;  %v6675_v8 = vpop.permute.xlu0 %859  ;;  %v1466_v49 = vrot.slane %v1452_v36, 3  ;;  %v1492_v36 = vmul.f32 %v1488_v1, %v6430_v2 }
 0x4da   :  { %9729 = vst [vmem:[#allocation200_spill] sm:$0xff] %v6673_v42  ;;  %9730 = vst [vmem:[#allocation201_spill] sm:$0xff] %v6675_v8  ;;  %v1502_v35 = vrot.slane %v1490_v47, 4  ;;  %v1509_v34 = vrot.slane %v1494_v41, 4  ;;  %v4677_v42 = vld [vmem:[#allocation2 + $0x20] sm:$0xff] }
 0x4db   :  { %1437 = vrot.lane.b32.xlu1 %v1430_v38, %s4766_s21  ;;  %1435 = vrot.lane.b32.xlu0 %v1428_v33, %s4766_s21  ;;  %v1491_v38 = vmul.f32 %v1488_v1, %v6438_v10  ;;  %v1468_v0 = vsel %vm691_vm7, %v1466_v49, %v1467_v44  ;;  %v1507_v49 = vrot.slane %v1493_v37, 4 }
 0x4dd   :  { %v6684_v21 = vpop.permute.xlu1 %865  ;;  %v6686_v6 = vpop.permute.xlu0 %863  ;;  %v1504_v14 = vrot.slane %v1491_v38, 4 }
 0x4de   :  { %9731 = vst [vmem:[#allocation202_spill] sm:$0xff] %v6684_v21  ;;  %9732 = vst [vmem:[#allocation203_spill] sm:$0xff] %v6686_v6 }
 0x4df   :  { %1473 = vrot.lane.b32.xlu1 %v1465_v43, %s4766_s21  ;;  %1471 = vrot.lane.b32.xlu0 %v1463_v16, %s4766_s21  ;;  %v1501_v43 = vrot.slane %v1489_v58, 4  ;;  %v1528_v16 = vstv %s4563_s24  ;;  %v1505_v38 = vsel %vm724_vm8, %v1502_v35, %v1504_v14  ;;  %v1506_v58 = vrot.slane %v1492_v36, 4  ;;  %s7091_s24 = sld [smem:[#allocation4 + $0x15]] }
 0x4e0   :  { %v1530_v44 = vmul.f32 %v1528_v16, %v6424_v9  ;;  %v1529_v1 = vmul.f32 %v1528_v16, %v6422_v5  ;;  %v1533_v20 = vmul.f32 %v1528_v16, %v6432_v4  ;;  %v1534_v41 = vmul.f32 %v1528_v16, %v6446_v54 }
 0x4e1   :  { %v6695_v33 = vpop.permute.xlu1 %901  ;;  %v6697_v22 = vpop.permute.xlu0 %899  ;;  %v1503_v15 = vsel %vm724_vm8, %v1501_v43, %v1502_v35  ;;  %v1510_v35 = vsel %vm724_vm8, %v1507_v49, %v1509_v34  ;;  %v1508_v37 = vsel %vm724_vm8, %v1506_v58, %v1507_v49  ;;  %v1532_v36 = vmul.f32 %v1528_v16, %v6430_v2 }
 0x4e2   :  { %9733 = vst [vmem:[#allocation204_spill] sm:$0xff] %v6695_v33  ;;  %9734 = vst [vmem:[#allocation205_spill] sm:$0xff] %v6697_v22  ;;  %v1542_v43 = vrot.slane %v1530_v44, 5  ;;  %v1549_v58 = vrot.slane %v1534_v41, 5 }
 0x4e3   :  { %1477 = vrot.lane.b32.xlu1 %v1470_v60, %s4766_s21  ;;  %1475 = vrot.lane.b32.xlu0 %v1468_v0, %s4766_s21  ;;  %v1531_v60 = vmul.f32 %v1528_v16, %v6438_v10  ;;  %v1546_v16 = vrot.slane %v1532_v36, 5 }
 0x4e5   :  { %v6706_v50 = vpop.permute.xlu1 %905  ;;  %v6708_v47 = vpop.permute.xlu0 %903  ;;  %v1544_v14 = vrot.slane %v1531_v60, 5  ;;  %v1547_v60 = vrot.slane %v1533_v20, 5 }
 0x4e6   :  { %9735 = vst [vmem:[#allocation206_spill] sm:$0xff] %v6706_v50  ;;  %9736 = vst [vmem:[#allocation207_spill] sm:$0xff] %v6708_v47 }
 0x4e7   :  { %1513 = vrot.lane.b32.xlu1 %v1505_v38, %s4766_s21  ;;  %1511 = vrot.lane.b32.xlu0 %v1503_v15, %s4766_s21  ;;  %v1541_v15 = vrot.slane %v1529_v1, 5  ;;  %v1568_v38 = vstv %s4564_s30  ;;  %v1545_v49 = vsel %vm757_vm9, %v1542_v43, %v1544_v14  ;;  %v1548_v20 = vsel %vm757_vm9, %v1546_v16, %v1547_v60  ;;  %s7100_s30 = sld [smem:[#allocation4 + $0x1c]] }
 0x4e8   :  { %v1570_v34 = vmul.f32 %v1568_v38, %v6424_v9  ;;  %v1569_v1 = vmul.f32 %v1568_v38, %v6422_v5  ;;  %v1573_v12 = vmul.f32 %v1568_v38, %v6432_v4  ;;  %v1574_v41 = vmul.f32 %v1568_v38, %v6446_v54 }
 0x4e9   :  { %v6717_v0 = vpop.permute.xlu1 %941  ;;  %v6719_v17 = vpop.permute.xlu0 %939  ;;  %v1543_v39 = vsel %vm757_vm9, %v1541_v15, %v1542_v43  ;;  %v1550_v43 = vsel %vm757_vm9, %v1547_v60, %v1549_v58  ;;  %v1572_v36 = vmul.f32 %v1568_v38, %v6430_v2 }
 0x4ea   :  { %9737 = vst [vmem:[#allocation208_spill] sm:$0xff] %v6717_v0  ;;  %9738 = vst [vmem:[#allocation209_spill] sm:$0xff] %v6719_v17  ;;  %v1582_v15 = vrot.slane %v1570_v34, 6  ;;  %v1589_v16 = vrot.slane %v1574_v41, 6  ;;  %v1609_v41 = vmul.f32 %v1608_v7, %v6422_v5 }
 0x4eb   :  { %1517 = vrot.lane.b32.xlu1 %v1510_v35, %s4766_s21  ;;  %1515 = vrot.lane.b32.xlu0 %v1508_v37, %s4766_s21  ;;  %v1571_v35 = vmul.f32 %v1568_v38, %v6438_v10 }
 0x4ed   :  { %v6728_v11 = vpop.permute.xlu1 %945  ;;  %v6730_v44 = vpop.permute.xlu0 %943  ;;  %v1584_v14 = vrot.slane %v1571_v35, 6  ;;  %v1587_v35 = vrot.slane %v1573_v12, 6 }
 0x4ee   :  { %9739 = vst [vmem:[#allocation210_spill] sm:$0xff] %v6728_v11  ;;  %9740 = vst [vmem:[#allocation211_spill] sm:$0xff] %v6730_v44 }
 0x4ef   :  { %1553 = vrot.lane.b32.xlu1 %v1545_v49, %s4766_s21  ;;  %1551 = vrot.lane.b32.xlu0 %v1543_v39, %s4766_s21  ;;  %v1581_v39 = vrot.slane %v1569_v1, 6  ;;  %v1585_v58 = vsel %vm790_vm10, %v1582_v15, %v1584_v14  ;;  %v1590_v38 = vsel %vm790_vm10, %v1587_v35, %v1589_v16  ;;  %v1610_v14 = vmul.f32 %v1608_v7, %v6424_v9 }
 0x4f0   :  { %v1612_v16 = vmul.f32 %v1608_v7, %v6432_v4 }
 0x4f1   :  { %v6739_v37 = vpop.permute.xlu1 %981  ;;  %v6741_v57 = vpop.permute.xlu0 %979  ;;  %v1583_v60 = vsel %vm790_vm10, %v1581_v39, %v1582_v15  ;;  %v1634_v39 = vstv %s4566_s4  ;;  %s7108_s4 = sld [smem:[#allocation4 + $0x1b]] }
 0x4f2   :  { %9741 = vst [vmem:[#allocation212_spill] sm:$0xff] %v6739_v37  ;;  %9742 = vst [vmem:[#allocation213_spill] sm:$0xff] %v6741_v57  ;;  %v1640_v40 = vmul.f32 %v1634_v39, %v6446_v54 }
 0x4f3   :  { %1557 = vrot.lane.b32.xlu1 %v1550_v43, %s4766_s21  ;;  %1555 = vrot.lane.b32.xlu0 %v1548_v20, %s4766_s21  ;;  %v1586_v43 = vrot.slane %v1572_v36, 6  ;;  %v1636_v36 = vmul.f32 %v1634_v39, %v6424_v9  ;;  %v1679_v9 = vmul.f32 %v1674_v56, %v6432_v4 }
 0x4f4   :  { %v1655_v13 = vrot.slane %v1640_v40, 1 }
 0x4f5   :  { %v6750_v49 = vpop.permute.xlu1 %985  ;;  %v6752_v34 = vpop.permute.xlu0 %983  ;;  %v1588_v19 = vsel %vm790_vm10, %v1586_v43, %v1587_v35  ;;  %v1611_v43 = vmul.f32 %v1608_v7, %v6430_v2  ;;  %v1648_v48 = vrot.slane %v1636_v36, 1 }
 0x4f6   :  { %9743 = vst [vmem:[#allocation214_spill] sm:$0xff] %v6750_v49  ;;  %9744 = vst [vmem:[#allocation215_spill] sm:$0xff] %v6752_v34 }
 0x4f7   :  { %1593 = vrot.lane.b32.xlu1 %v1585_v58, %s4766_s21  ;;  %1591 = vrot.lane.b32.xlu0 %v1583_v60, %s4766_s21  ;;  %v1637_v58 = vmul.f32 %v1634_v39, %v6438_v10 }
 0x4f9   :  { %v6758_v20 = vpop.permute.xlu1 %1021  ;;  %v6760_v1 = vpop.permute.xlu0 %1019  ;;  %v1650_v62 = vrot.slane %v1637_v58, 1 }
 0x4fa   :  { %9745 = vst [vmem:[#allocation216_spill] sm:$0xff] %v6758_v20  ;;  %9746 = vst [vmem:[#allocation217_spill] sm:$0xff] %v6760_v1 }
 0x4fb   :  { %1597 = vrot.lane.b32.xlu1 %v1590_v38, %s4766_s21  ;;  %1595 = vrot.lane.b32.xlu0 %v1588_v19, %s4766_s21  ;;  %v1635_v19 = vmul.f32 %v1634_v39, %v6422_v5  ;;  %v1639_v38 = vmul.f32 %v1634_v39, %v6432_v4  ;;  %v1651_v36 = vsel %vm625_vm11, %v1648_v48, %v1650_v62  ;;  %v1693_v4 = vrot.slane %v1679_v9, 2 }
 0x4fd   :  { %v6766_v12 = vpop.permute.xlu1 %1025  ;;  %v6768_v15 = vpop.permute.xlu0 %1023  ;;  %v1653_v7 = vrot.slane %v1639_v38, 1  ;;  %v1688_v38 = vrot.slane %v1676_v51, 2 }
 0x4fe   :  { %9747 = vst [vmem:[#allocation218_spill] sm:$0xff] %v6766_v12  ;;  %9748 = vst [vmem:[#allocation219_spill] sm:$0xff] %v6768_v15 }
 0x4ff   :  { %1619 = vrot.lane.b32.xlu1 %v1610_v14, %s4767_s2  ;;  %1617 = vrot.lane.b32.xlu0 %v1609_v41, %s4767_s2  ;;  %v1647_v14 = vrot.slane %v1635_v19, 1  ;;  %v1638_v41 = vmul.f32 %v1634_v39, %v6430_v2  ;;  %v1675_v19 = vmul.f32 %v1674_v56, %v6422_v5  ;;  %v1656_v62 = vsel %vm625_vm11, %v1653_v7, %v1655_v13  ;;  %v6814_v13 = vld [vmem:[#allocation2 + $0x8] sm:$0xff] }
 0x500   :  { %v1678_v5 = vmul.f32 %v1674_v56, %v6430_v2 }
 0x501   :  { %v6777_v60 = vpop.permute.xlu1 %1061  ;;  %v6779_v35 = vpop.permute.xlu0 %1059  ;;  %v1649_v58 = vsel %vm625_vm11, %v1647_v14, %v1648_v48  ;;  %v1652_v39 = vrot.slane %v1638_v41, 1  ;;  %v1680_v14 = vmul.f32 %v1674_v56, %v6446_v54  ;;  %v1687_v41 = vrot.slane %v1675_v19, 2 }
 0x502   :  { %9749 = vst [vmem:[#allocation220_spill] sm:$0xff] %v6777_v60  ;;  %9750 = vst [vmem:[#allocation221_spill] sm:$0xff] %v6779_v35  ;;  %v1692_v9 = vrot.slane %v1678_v5, 2 }
 0x503   :  { %1623 = vrot.lane.b32.xlu1 %v1612_v16, %s4767_s2  ;;  %1621 = vrot.lane.b32.xlu0 %v1611_v43, %s4767_s2  ;;  %v1677_v16 = vmul.f32 %v1674_v56, %v6438_v10  ;;  %v1654_v40 = vsel %vm625_vm11, %v1652_v39, %v1653_v7  ;;  %v1695_v39 = vrot.slane %v1680_v14, 2  ;;  %v6822_v56 = vld [vmem:[#allocation2] sm:$0xff] }
 0x504   :  { %v1694_v14 = vsel %vm658_vm6, %v1692_v9, %v1693_v4  ;;  %v1755_v55 = vmul.f32 %v6822_v56, %v1754_v27 }
 0x505   :  { %v6788_v3 = vpop.permute.xlu1 %1065  ;;  %v6790_v32 = vpop.permute.xlu0 %1063  ;;  %v1690_v48 = vrot.slane %v1677_v16, 2  ;;  %v1689_v16 = vsel %vm658_vm6, %v1687_v41, %v1688_v38 }
 0x506   :  { %9751 = vst [vmem:[#allocation222_spill] sm:$0xff] %v6788_v3  ;;  %9752 = vst [vmem:[#allocation223_spill] sm:$0xff] %v6790_v32 }
 0x507   :  { %1659 = vrot.lane.b32.xlu1 %v1651_v36, %s4767_s2  ;;  %1657 = vrot.lane.b32.xlu0 %v1649_v58, %s4767_s2  ;;  %v1714_v36 = vstv %s4568_s25  ;;  %v1691_v54 = vsel %vm658_vm6, %v1688_v38, %v1690_v48  ;;  %v6829_v48 = vld [vmem:[#allocation2 + $0x20] sm:$0xff]  ;;  %s7120_s25 = sld [smem:[#allocation4 + $0x22]] }
 0x508   :  { %v1716_v7 = vmul.f32 %v6814_v13, %v1714_v36  ;;  %v1717_v19 = vmul.f32 %v1714_v36, %v6438_v10  ;;  %v1715_v2 = vmul.f32 %v6822_v56, %v1714_v36  ;;  %v1719_v38 = vmul.f32 %v6829_v48, %v1714_v36 }
 0x509   :  { %v6799_v43 = vpop.permute.xlu1 %1127  ;;  %v6801_v30 = vpop.permute.xlu0 %1125  ;;  %v1696_v10 = vsel %vm658_vm6, %v1693_v4, %v1695_v39 }
 0x50a   :  { %9753 = vst [vmem:[#allocation224_spill] sm:$0xff] %v6799_v43  ;;  %9754 = vst [vmem:[#allocation225_spill] sm:$0xff] %v6801_v30  ;;  %v1728_v29 = vrot.slane %v1716_v7, 3  ;;  %v1730_v41 = vrot.slane %v1717_v19, 3  ;;  %v1727_v5 = vrot.slane %v1715_v2, 3  ;;  %v1718_v7 = vmul.f32 %v6839_v28, %v1714_v36 }
 0x50b   :  { %1663 = vrot.lane.b32.xlu1 %v1656_v62, %s4767_s2  ;;  %1661 = vrot.lane.b32.xlu0 %v1654_v40, %s4767_s2  ;;  %v1756_v19 = vmul.f32 %v6814_v13, %v1754_v27 }
 0x50c   :  { %v1729_v4 = vsel %vm691_vm7, %v1727_v5, %v1728_v29  ;;  %v1731_v9 = vsel %vm691_vm7, %v1728_v29, %v1730_v41  ;;  %v1759_v29 = vmul.f32 %v6829_v48, %v1754_v27 }
 0x50d   :  { %v6810_v58 = vpop.permute.xlu1 %1131  ;;  %v6812_v51 = vpop.permute.xlu0 %1129  ;;  %v1768_v59 = vrot.slane %v1756_v19, 4 }
 0x50e   :  { %9755 = vst [vmem:[#allocation226_spill] sm:$0xff] %v6810_v58  ;;  %9756 = vst [vmem:[#allocation227_spill] sm:$0xff] %v6812_v51  ;;  %v7173_v51 = vstv %s7103_s3  ;;  %v7176_v58 = vstv %s7110_s5 }
 0x50f   :  { %1699 = vrot.lane.b32.xlu1 %v1691_v54, %s4767_s2  ;;  %1697 = vrot.lane.b32.xlu0 %v1689_v16, %s4767_s2  ;;  %v6834_v54 = vld [vmem:[#allocation2 + $0x28] sm:$0x3f]  ;;  %v7305_v11 = vmul.f32 %v6839_v28, %v7173_v51  ;;  %v7421_v8 = vmul.f32 %v6814_v13, %v7173_v51 }
 0x510   :  { %v1720_v16 = vmul.f32 %v6834_v54, %v1714_v36  ;;  %v1732_v36 = vrot.slane %v1718_v7, 3  ;;  %v1760_v52 = vmul.f32 %v6834_v54, %v1754_v27  ;;  %v1758_v7 = vmul.f32 %v6839_v28, %v1754_v27 }
 0x511   :  { %v6825_v62 = vpop.permute.xlu1 %1167  ;;  %v6827_v40 = vpop.permute.xlu0 %1165 }
 0x512   :  { %9757 = vst [vmem:[#allocation228_spill] sm:$0xff] %v6825_v62  ;;  %9758 = vst [vmem:[#allocation229_spill] sm:$0xff] %v6827_v40  ;;  %v1735_v46 = vrot.slane %v1720_v16, 3 }
 0x513   :  { %1703 = vrot.lane.b32.xlu1 %v1696_v10, %s4767_s2  ;;  %1701 = vrot.lane.b32.xlu0 %v1694_v14, %s4767_s2  ;;  %v1733_v10 = vrot.slane %v1719_v38, 3  ;;  %v6849_v14 = vld [vmem:[#allocation2 + $0x10] sm:$0x3f] }
 0x514   :  { %v1757_v2 = vmul.f32 %v6849_v14, %v1754_v27  ;;  %v1772_v27 = vrot.slane %v1758_v7, 4 }
 0x515   :  { %v6842_v26 = vpop.permute.xlu1 %1171  ;;  %v6844_v39 = vpop.permute.xlu0 %1169  ;;  %v1736_v38 = vsel %vm691_vm7, %v1733_v10, %v1735_v46  ;;  %v1734_v41 = vsel %vm691_vm7, %v1732_v36, %v1733_v10  ;;  %v1775_v36 = vrot.slane %v1760_v52, 4 }
 0x516   :  { %9759 = vst [vmem:[#allocation230_spill] sm:$0xff] %v6842_v26  ;;  %9760 = vst [vmem:[#allocation231_spill] sm:$0xff] %v6844_v39  ;;  %v1770_v16 = vrot.slane %v1757_v2, 4  ;;  %v1773_v26 = vrot.slane %v1759_v29, 4 }
 0x517   :  { %1739 = vrot.lane.b32.xlu1 %v1731_v9, %s4767_s2  ;;  %1737 = vrot.lane.b32.xlu0 %v1729_v4, %s4767_s2  ;;  %v1767_v4 = vrot.slane %v1755_v55, 4  ;;  %v1794_v9 = vstv %s4570_s27  ;;  %s7127_s27 = sld [smem:[#allocation4 + $0x30]] }
 0x518   :  { %v1796_v46 = vmul.f32 %v6814_v13, %v1794_v9  ;;  %v1771_v10 = vsel %vm724_vm8, %v1768_v59, %v1770_v16  ;;  %v1795_v55 = vmul.f32 %v6822_v56, %v1794_v9  ;;  %v1774_v29 = vsel %vm724_vm8, %v1772_v27, %v1773_v26 }
 0x519   :  { %v6855_v53 = vpop.permute.xlu1 %1207  ;;  %v6857_v5 = vpop.permute.xlu0 %1205  ;;  %v1769_v2 = vsel %vm724_vm8, %v1767_v4, %v1768_v59  ;;  %v1799_v16 = vmul.f32 %v6829_v48, %v1794_v9  ;;  %v1776_v59 = vsel %vm724_vm8, %v1773_v26, %v1775_v36 }
 0x51a   :  { %9761 = vst [vmem:[#allocation232_spill] sm:$0xff] %v6855_v53  ;;  %9762 = vst [vmem:[#allocation233_spill] sm:$0xff] %v6857_v5  ;;  %v1808_v52 = vrot.slane %v1796_v46, 5  ;;  %v1807_v7 = vrot.slane %v1795_v55, 5 }
 0x51b   :  { %1743 = vrot.lane.b32.xlu1 %v1736_v38, %s4767_s2  ;;  %1741 = vrot.lane.b32.xlu0 %v1734_v41, %s4767_s2  ;;  %v1797_v38 = vmul.f32 %v6849_v14, %v1794_v9  ;;  %v1813_v27 = vrot.slane %v1799_v16, 5 }
 0x51c   :  { %v1809_v46 = vsel %vm757_vm9, %v1807_v7, %v1808_v52 }
 0x51d   :  { %v6866_v39 = vpop.permute.xlu1 %1211  ;;  %v6868_v19 = vpop.permute.xlu0 %1209  ;;  %v1810_v4 = vrot.slane %v1797_v38, 5  ;;  %v7193_v40 = vstv %s7127_s27 }
 0x51e   :  { %9763 = vst [vmem:[#allocation234_spill] sm:$0xff] %v6866_v39  ;;  %9764 = vst [vmem:[#allocation235_spill] sm:$0xff] %v6868_v19  ;;  %v1800_v39 = vmul.f32 %v6834_v54, %v1794_v9  ;;  %v2369_v17 = vmul.f32 %v6849_v14, %v7193_v40  ;;  %v2371_v22 = vmul.f32 %v6829_v48, %v7193_v40 }
 0x51f   :  { %1779 = vrot.lane.b32.xlu1 %v1771_v10, %s4767_s2  ;;  %1777 = vrot.lane.b32.xlu0 %v1769_v2, %s4767_s2  ;;  %v1798_v10 = vmul.f32 %v6839_v28, %v1794_v9  ;;  %v1834_v2 = vstv %s4571_s29  ;;  %v1811_v26 = vsel %vm757_vm9, %v1808_v52, %v1810_v4  ;;  %s7135_s29 = sld [smem:[#allocation4 + $0x32]] }
 0x520   :  { %v1836_v5 = vmul.f32 %v6814_v13, %v1834_v2  ;;  %v1815_v36 = vrot.slane %v1800_v39, 5  ;;  %v1837_v38 = vmul.f32 %v6849_v14, %v1834_v2  ;;  %v1835_v55 = vmul.f32 %v6822_v56, %v1834_v2 }
 0x521   :  { %v6877_v41 = vpop.permute.xlu1 %1247  ;;  %v6879_v19 = vpop.permute.xlu0 %1245  ;;  %v1812_v9 = vrot.slane %v1798_v10, 5  ;;  %v1840_v7 = vmul.f32 %v6834_v54, %v1834_v2  ;;  %v2382_v25 = vrot.slane %v2369_v17, 6  ;;  %v7431_v17 = vmul.f32 %v6814_v13, %v7176_v58 }
 0x522   :  { %9765 = vst [vmem:[#allocation236_spill] sm:$0xff] %v6877_v41  ;;  %9766 = vst [vmem:[#allocation237_spill] sm:$0xff] %v6879_v19  ;;  %v1848_v16 = vrot.slane %v1836_v5, 6  ;;  %v1816_v4 = vsel %vm757_vm9, %v1813_v27, %v1815_v36  ;;  %v1850_v52 = vrot.slane %v1837_v38, 6  ;;  %v1847_v10 = vrot.slane %v1835_v55, 6 }
 0x523   :  { %1783 = vrot.lane.b32.xlu1 %v1776_v59, %s4767_s2  ;;  %1781 = vrot.lane.b32.xlu0 %v1774_v29, %s4767_s2  ;;  %v1814_v39 = vsel %vm757_vm9, %v1812_v9, %v1813_v27  ;;  %v1855_v9 = vrot.slane %v1840_v7, 6 }
 0x524   :  { %v1851_v36 = vsel %vm790_vm10, %v1848_v16, %v1850_v52  ;;  %v1849_v27 = vsel %vm790_vm10, %v1847_v10, %v1848_v16  ;;  %v1900_v10 = vstv %s4573_s8  ;;  %s7149_s8 = sld [smem:[#allocation4 + $0x40]] }
 0x525   :  { %v6888_v41 = vpop.permute.xlu1 %1251  ;;  %v6890_v19 = vpop.permute.xlu0 %1249 }
 0x526   :  { %9767 = vst [vmem:[#allocation238_spill] sm:$0xff] %v6888_v41  ;;  %9768 = vst [vmem:[#allocation239_spill] sm:$0xff] %v6890_v19  ;;  %v1839_v19 = vmul.f32 %v6829_v48, %v1834_v2 }
 0x527   :  { %1819 = vrot.lane.b32.xlu1 %v1811_v26, %s4767_s2  ;;  %1817 = vrot.lane.b32.xlu0 %v1809_v46, %s4767_s2  ;;  %v1838_v26 = vmul.f32 %v6839_v28, %v1834_v2 }
 0x528   :  { %v1853_v38 = vrot.slane %v1839_v19, 6 }
 0x529   :  { %v6899_v29 = vpop.permute.xlu1 %1287  ;;  %v6901_v59 = vpop.permute.xlu0 %1285 }
 0x52a   :  { %9769 = vst [vmem:[#allocation240_spill] sm:$0xff] %v6899_v29  ;;  %9770 = vst [vmem:[#allocation241_spill] sm:$0xff] %v6901_v59  ;;  %v1856_v2 = vsel %vm790_vm10, %v1853_v38, %v1855_v9 }
 0x52b   :  { %1823 = vrot.lane.b32.xlu1 %v1816_v4, %s4767_s2  ;;  %1821 = vrot.lane.b32.xlu0 %v1814_v39, %s4767_s2  ;;  %v1852_v4 = vrot.slane %v1838_v26, 6  ;;  %v1902_v26 = vmul.f32 %v6814_v13, %v1900_v10 }
 0x52d   :  { %v6910_v46 = vpop.permute.xlu1 %1291  ;;  %v6912_v5 = vpop.permute.xlu0 %1289 }
 0x52e   :  { %9771 = vst [vmem:[#allocation242_spill] sm:$0xff] %v6910_v46  ;;  %9772 = vst [vmem:[#allocation243_spill] sm:$0xff] %v6912_v5  ;;  %v1854_v5 = vsel %vm790_vm10, %v1852_v4, %v1853_v38  ;;  %v1874_v46 = vstv %s4572_s7  ;;  %s7139_s7 = sld [smem:[#allocation4 + $0x39]] }
 0x52f   :  { %1859 = vrot.lane.b32.xlu1 %v1851_v36, %s4767_s2  ;;  %1857 = vrot.lane.b32.xlu0 %v1849_v27, %s4767_s2  ;;  %v1876_v52 = vmul.f32 %v6814_v13, %v1874_v46  ;;  %v1875_v7 = vmul.f32 %v6822_v56, %v1874_v46  ;;  %v1903_v36 = vmul.f32 %v6849_v14, %v1900_v10 }
 0x530   :  { %v1878_v9 = vmul.f32 %v6829_v48, %v1874_v46  ;;  %v1877_v4 = vmul.f32 %v6839_v28, %v1874_v46 }
 0x531   :  { %v6918_v39 = vpop.permute.xlu1 %1327  ;;  %v6920_v55 = vpop.permute.xlu0 %1325 }
 0x532   :  { %9773 = vst [vmem:[#allocation244_spill] sm:$0xff] %v6918_v39  ;;  %9774 = vst [vmem:[#allocation245_spill] sm:$0xff] %v6920_v55  ;;  %v1906_v55 = vmul.f32 %v6834_v54, %v1900_v10 }
 0x533   :  { %1863 = vrot.lane.b32.xlu1 %v1856_v2, %s4767_s2  ;;  %1861 = vrot.lane.b32.xlu0 %v1854_v5, %s4767_s2  ;;  %v1901_v5 = vmul.f32 %v6822_v56, %v1900_v10  ;;  %v1905_v2 = vmul.f32 %v6829_v48, %v1900_v10 }
 0x534   :  { %v1921_v59 = vrot.slane %v1906_v55, 1 }
 0x535   :  { %v6926_v19 = vpop.permute.xlu1 %1331  ;;  %v6928_v16 = vpop.permute.xlu0 %1329  ;;  %v1919_v46 = vrot.slane %v1905_v2, 1 }
 0x536   :  { %9775 = vst [vmem:[#allocation246_spill] sm:$0xff] %v6926_v19  ;;  %9776 = vst [vmem:[#allocation247_spill] sm:$0xff] %v6928_v16  ;;  %v1914_v16 = vrot.slane %v1902_v26, 1  ;;  %v1916_v19 = vrot.slane %v1903_v36, 1 }
 0x537   :  { %1885 = vrot.lane.b32.xlu1 %v1876_v52, %s4768_s10  ;;  %1883 = vrot.lane.b32.xlu0 %v1875_v7, %s4768_s10  ;;  %v1913_v52 = vrot.slane %v1901_v5, 1  ;;  %v1904_v7 = vmul.f32 %v6839_v28, %v1900_v10 }
 0x538   :  { %v1917_v26 = vsel %vm625_vm11, %v1914_v16, %v1916_v19  ;;  %v1922_v19 = vsel %vm625_vm11, %v1919_v46, %v1921_v59 }
 0x539   :  { %v6937_v27 = vpop.permute.xlu1 %1353  ;;  %v6939_v38 = vpop.permute.xlu0 %1351  ;;  %v1915_v36 = vsel %vm625_vm11, %v1913_v52, %v1914_v16  ;;  %v1918_v5 = vrot.slane %v1904_v7, 1 }
 0x53a   :  { %9777 = vst [vmem:[#allocation248_spill] sm:$0xff] %v6937_v27  ;;  %9778 = vst [vmem:[#allocation249_spill] sm:$0xff] %v6939_v38  ;;  %v1940_v27 = vstv %s4574_s9  ;;  %s7156_s9 = sld [smem:[#allocation4 + $0x47]] }
 0x53b   :  { %1889 = vrot.lane.b32.xlu1 %v1878_v9, %s4768_s10  ;;  %1887 = vrot.lane.b32.xlu0 %v1877_v4, %s4768_s10  ;;  %v1942_v41 = vmul.f32 %v6814_v13, %v1940_v27  ;;  %v1943_v9 = vmul.f32 %v6849_v14, %v1940_v27  ;;  %v1941_v10 = vmul.f32 %v6822_v56, %v1940_v27 }
 0x53c   :  { %v1920_v55 = vsel %vm625_vm11, %v1918_v5, %v1919_v46  ;;  %v1946_v52 = vmul.f32 %v6834_v54, %v1940_v27  ;;  %v1944_v7 = vmul.f32 %v6839_v28, %v1940_v27 }
 0x53d   :  { %v6948_v38 = vpop.permute.xlu1 %1357  ;;  %v6950_v39 = vpop.permute.xlu0 %1355  ;;  %v1954_v2 = vrot.slane %v1942_v41, 2  ;;  %v1956_v16 = vrot.slane %v1943_v9, 2 }
 0x53e   :  { %9779 = vst [vmem:[#allocation250_spill] sm:$0xff] %v6948_v38  ;;  %9780 = vst [vmem:[#allocation251_spill] sm:$0xff] %v6950_v39  ;;  %v1945_v38 = vmul.f32 %v6829_v48, %v1940_v27  ;;  %v1958_v27 = vrot.slane %v1944_v7, 2 }
 0x53f   :  { %1925 = vrot.lane.b32.xlu1 %v1917_v26, %s4768_s10  ;;  %1923 = vrot.lane.b32.xlu0 %v1915_v36, %s4768_s10  ;;  %v1953_v26 = vrot.slane %v1941_v10, 2  ;;  %v1980_v36 = vstv %s4575_s11  ;;  %v1957_v9 = vsel %vm658_vm6, %v1954_v2, %v1956_v16  ;;  %s7180_s11 = sld [smem:[#allocation4 + $0x4e]] }
 0x540   :  { %v1982_v46 = vmul.f32 %v6814_v13, %v1980_v36  ;;  %v1959_v5 = vrot.slane %v1945_v38, 2  ;;  %v1981_v10 = vmul.f32 %v6822_v56, %v1980_v36  ;;  %v7215_v43 = vstv %s7156_s9 }
 0x541   :  { %v6959_v4 = vpop.permute.xlu1 %1393  ;;  %v6961_v39 = vpop.permute.xlu0 %1391  ;;  %v1955_v59 = vsel %vm658_vm6, %v1953_v26, %v1954_v2 }
 0x542   :  { %9781 = vst [vmem:[#allocation252_spill] sm:$0xff] %v6959_v4  ;;  %9782 = vst [vmem:[#allocation253_spill] sm:$0xff] %v6961_v39  ;;  %v1961_v4 = vrot.slane %v1946_v52, 2  ;;  %v1994_v26 = vrot.slane %v1982_v46, 3  ;;  %v1960_v38 = vsel %vm658_vm6, %v1958_v27, %v1959_v5  ;;  %v1986_v52 = vmul.f32 %v6834_v54, %v1980_v36 }
 0x543   :  { %1929 = vrot.lane.b32.xlu1 %v1922_v19, %s4768_s10  ;;  %1927 = vrot.lane.b32.xlu0 %v1920_v55, %s4768_s10  ;;  %v1983_v19 = vmul.f32 %v6849_v14, %v1980_v36  ;;  %v1993_v7 = vrot.slane %v1981_v10, 3 }
 0x544   :  { %v1962_v2 = vsel %vm658_vm6, %v1959_v5, %v1961_v4  ;;  %v2001_v27 = vrot.slane %v1986_v52, 3 }
 0x545   :  { %v6970_v39 = vpop.permute.xlu1 %1397  ;;  %v6972_v41 = vpop.permute.xlu0 %1395  ;;  %v1996_v16 = vrot.slane %v1983_v19, 3  ;;  %v1995_v19 = vsel %vm691_vm7, %v1993_v7, %v1994_v26 }
 0x546   :  { %9783 = vst [vmem:[#allocation254_spill] sm:$0xff] %v6970_v39  ;;  %9784 = vst [vmem:[#allocation255_spill] sm:$0xff] %v6972_v41  ;;  %v1985_v39 = vmul.f32 %v6829_v48, %v1980_v36 }
 0x547   :  { %1965 = vrot.lane.b32.xlu1 %v1957_v9, %s4768_s10  ;;  %1963 = vrot.lane.b32.xlu0 %v1955_v59, %s4768_s10  ;;  %v1984_v59 = vmul.f32 %v6839_v28, %v1980_v36  ;;  %v2020_v9 = vstv %s4576_s12  ;;  %v1997_v5 = vsel %vm691_vm7, %v1994_v26, %v1996_v16  ;;  %s7690_s12 = sld [smem:[#allocation4 + $0x55]] }
 0x548   :  { %v2022_v4 = vmul.f32 %v6814_v13, %v2020_v9  ;;  %v2021_v10 = vmul.f32 %v6822_v56, %v2020_v9  ;;  %v2026_v7 = vmul.f32 %v6834_v54, %v2020_v9 }
 0x549   :  { %v6981_v55 = vpop.permute.xlu1 %1433  ;;  %v6983_v41 = vpop.permute.xlu0 %1431  ;;  %v1998_v36 = vrot.slane %v1984_v59, 3  ;;  %v2024_v59 = vmul.f32 %v6839_v28, %v2020_v9 }
 0x54a   :  { %9785 = vst [vmem:[#allocation256_spill] sm:$0xff] %v6981_v55  ;;  %9786 = vst [vmem:[#allocation257_spill] sm:$0xff] %v6983_v41  ;;  %v1999_v55 = vrot.slane %v1985_v39, 3  ;;  %v2034_v39 = vrot.slane %v2022_v4, 4 }
 0x54b   :  { %1969 = vrot.lane.b32.xlu1 %v1962_v2, %s4768_s10  ;;  %1967 = vrot.lane.b32.xlu0 %v1960_v38, %s4768_s10  ;;  %v2023_v2 = vmul.f32 %v6849_v14, %v2020_v9 }
 0x54c   :  { %v2002_v16 = vsel %vm691_vm7, %v1999_v55, %v2001_v27  ;;  %v2000_v26 = vsel %vm691_vm7, %v1998_v36, %v1999_v55  ;;  %v2041_v36 = vrot.slane %v2026_v7, 4 }
 0x54d   :  { %v6992_v41 = vpop.permute.xlu1 %1437  ;;  %v6994_v46 = vpop.permute.xlu0 %1435  ;;  %v2036_v52 = vrot.slane %v2023_v2, 4 }
 0x54e   :  { %9787 = vst [vmem:[#allocation258_spill] sm:$0xff] %v6992_v41  ;;  %9788 = vst [vmem:[#allocation259_spill] sm:$0xff] %v6994_v46  ;;  %v2025_v41 = vmul.f32 %v6829_v48, %v2020_v9  ;;  %v2038_v9 = vrot.slane %v2024_v59, 4 }
 0x54f   :  { %2005 = vrot.lane.b32.xlu1 %v1997_v5, %s4768_s10  ;;  %2003 = vrot.lane.b32.xlu0 %v1995_v19, %s4768_s10  ;;  %v2033_v5 = vrot.slane %v2021_v10, 4  ;;  %v2060_v19 = vstv %s4577_s13  ;;  %v2037_v55 = vsel %vm724_vm8, %v2034_v39, %v2036_v52  ;;  %s7736_s13 = sld [smem:[#allocation4 + $0x5c]] }
 0x550   :  { %v2062_v27 = vmul.f32 %v6814_v13, %v2060_v19  ;;  %v2061_v10 = vmul.f32 %v6822_v56, %v2060_v19  ;;  %v2065_v52 = vmul.f32 %v6829_v48, %v2060_v19 }
 0x551   :  { %v7003_v38 = vpop.permute.xlu1 %1473  ;;  %v7005_v46 = vpop.permute.xlu0 %1471  ;;  %v2035_v2 = vsel %vm724_vm8, %v2033_v5, %v2034_v39 }
 0x552   :  { %9789 = vst [vmem:[#allocation260_spill] sm:$0xff] %v7003_v38  ;;  %9790 = vst [vmem:[#allocation261_spill] sm:$0xff] %v7005_v46  ;;  %v2039_v38 = vrot.slane %v2025_v41, 4  ;;  %v2074_v7 = vrot.slane %v2062_v27, 5  ;;  %v2073_v59 = vrot.slane %v2061_v10, 5 }
 0x553   :  { %2009 = vrot.lane.b32.xlu1 %v2002_v16, %s4768_s10  ;;  %2007 = vrot.lane.b32.xlu0 %v2000_v26, %s4768_s10  ;;  %v2063_v16 = vmul.f32 %v6849_v14, %v2060_v19 }
 0x554   :  { %v2040_v41 = vsel %vm724_vm8, %v2038_v9, %v2039_v38  ;;  %v2042_v39 = vsel %vm724_vm8, %v2039_v38, %v2041_v36  ;;  %v2079_v9 = vrot.slane %v2065_v52, 5  ;;  %v2075_v27 = vsel %vm757_vm9, %v2073_v59, %v2074_v7 }
 0x555   :  { %v7014_v46 = vpop.permute.xlu1 %1477  ;;  %v7016_v4 = vpop.permute.xlu0 %1475  ;;  %v2076_v5 = vrot.slane %v2063_v16, 5 }
 0x556   :  { %9791 = vst [vmem:[#allocation262_spill] sm:$0xff] %v7014_v46  ;;  %9792 = vst [vmem:[#allocation263_spill] sm:$0xff] %v7016_v4  ;;  %v2066_v46 = vmul.f32 %v6834_v54, %v2060_v19 }
 0x557   :  { %2045 = vrot.lane.b32.xlu1 %v2037_v55, %s4768_s10  ;;  %2043 = vrot.lane.b32.xlu0 %v2035_v2, %s4768_s10  ;;  %v2064_v55 = vmul.f32 %v6839_v28, %v2060_v19  ;;  %v2100_v2 = vstv %s4578_s14  ;;  %v2077_v38 = vsel %vm757_vm9, %v2074_v7, %v2076_v5  ;;  %s7803_s14 = sld [smem:[#allocation4 + $0x33]] }
 0x558   :  { %v2102_v29 = vmul.f32 %v6814_v13, %v2100_v2  ;;  %v2081_v36 = vrot.slane %v2066_v46, 5  ;;  %v2103_v16 = vmul.f32 %v6849_v14, %v2100_v2  ;;  %v2101_v10 = vmul.f32 %v6822_v56, %v2100_v2 }
 0x559   :  { %v7025_v26 = vpop.permute.xlu1 %1513  ;;  %v7027_v4 = vpop.permute.xlu0 %1511  ;;  %v2078_v19 = vrot.slane %v2064_v55, 5  ;;  %v2106_v59 = vmul.f32 %v6834_v54, %v2100_v2 }
 0x55a   :  { %9793 = vst [vmem:[#allocation264_spill] sm:$0xff] %v7025_v26  ;;  %9794 = vst [vmem:[#allocation265_spill] sm:$0xff] %v7027_v4  ;;  %v2114_v52 = vrot.slane %v2102_v29, 6  ;;  %v2082_v5 = vsel %vm757_vm9, %v2079_v9, %v2081_v36  ;;  %v2116_v7 = vrot.slane %v2103_v16, 6  ;;  %v2113_v55 = vrot.slane %v2101_v10, 6 }
 0x55b   :  { %2049 = vrot.lane.b32.xlu1 %v2042_v39, %s4768_s10  ;;  %2047 = vrot.lane.b32.xlu0 %v2040_v41, %s4768_s10  ;;  %v2080_v46 = vsel %vm757_vm9, %v2078_v19, %v2079_v9  ;;  %v2121_v19 = vrot.slane %v2106_v59, 6 }
 0x55c   :  { %v2117_v36 = vsel %vm790_vm10, %v2114_v52, %v2116_v7  ;;  %v2115_v9 = vsel %vm790_vm10, %v2113_v55, %v2114_v52  ;;  %v2166_v55 = vstv %s4580_s18  ;;  %s7984_s18 = sld [smem:[#allocation4 + $0x34]] }
 0x55d   :  { %v7036_v26 = vpop.permute.xlu1 %1517  ;;  %v7038_v4 = vpop.permute.xlu0 %1515 }
 0x55e   :  { %9795 = vst [vmem:[#allocation266_spill] sm:$0xff] %v7036_v26  ;;  %9796 = vst [vmem:[#allocation267_spill] sm:$0xff] %v7038_v4  ;;  %v2105_v4 = vmul.f32 %v6829_v48, %v2100_v2 }
 0x55f   :  { %2085 = vrot.lane.b32.xlu1 %v2077_v38, %s4768_s10  ;;  %2083 = vrot.lane.b32.xlu0 %v2075_v27, %s4768_s10  ;;  %v2104_v38 = vmul.f32 %v6839_v28, %v2100_v2 }
 0x560   :  { %v2119_v16 = vrot.slane %v2105_v4, 6 }
 0x561   :  { %v7047_v41 = vpop.permute.xlu1 %1553  ;;  %v7049_v39 = vpop.permute.xlu0 %1551 }
 0x562   :  { %9797 = vst [vmem:[#allocation268_spill] sm:$0xff] %v7047_v41  ;;  %9798 = vst [vmem:[#allocation269_spill] sm:$0xff] %v7049_v39  ;;  %v2122_v2 = vsel %vm790_vm10, %v2119_v16, %v2121_v19 }
 0x563   :  { %2089 = vrot.lane.b32.xlu1 %v2082_v5, %s4768_s10  ;;  %2087 = vrot.lane.b32.xlu0 %v2080_v46, %s4768_s10  ;;  %v2118_v5 = vrot.slane %v2104_v38, 6  ;;  %v2168_v38 = vmul.f32 %v6814_v13, %v2166_v55 }
 0x565   :  { %v7058_v27 = vpop.permute.xlu1 %1557  ;;  %v7060_v29 = vpop.permute.xlu0 %1555 }
 0x566   :  { %9799 = vst [vmem:[#allocation270_spill] sm:$0xff] %v7058_v27  ;;  %9800 = vst [vmem:[#allocation271_spill] sm:$0xff] %v7060_v29  ;;  %v2120_v29 = vsel %vm790_vm10, %v2118_v5, %v2119_v16  ;;  %v2140_v27 = vstv %s4579_s17  ;;  %s7812_s17 = sld [smem:[#allocation4 + $0x3a]] }
 0x567   :  { %2125 = vrot.lane.b32.xlu1 %v2117_v36, %s4768_s10  ;;  %2123 = vrot.lane.b32.xlu0 %v2115_v9, %s4768_s10  ;;  %v2142_v7 = vmul.f32 %v6814_v13, %v2140_v27  ;;  %v2141_v59 = vmul.f32 %v6822_v56, %v2140_v27  ;;  %v2169_v36 = vmul.f32 %v6849_v14, %v2166_v55 }
 0x568   :  { %v2144_v19 = vmul.f32 %v6829_v48, %v2140_v27  ;;  %v2143_v5 = vmul.f32 %v6839_v28, %v2140_v27 }
 0x569   :  { %v7066_v46 = vpop.permute.xlu1 %1593  ;;  %v7068_v10 = vpop.permute.xlu0 %1591 }
 0x56a   :  { %9801 = vst [vmem:[#allocation272_spill] sm:$0xff] %v7066_v46  ;;  %9802 = vst [vmem:[#allocation273_spill] sm:$0xff] %v7068_v10 }
 0x56b   :  { %2129 = vrot.lane.b32.xlu1 %v2122_v2, %s4768_s10  ;;  %2127 = vrot.lane.b32.xlu0 %v2120_v29, %s4768_s10  ;;  %v2167_v29 = vmul.f32 %v6822_v56, %v2166_v55  ;;  %v2171_v2 = vmul.f32 %v6829_v48, %v2166_v55 }
 0x56d   :  { %v7074_v4 = vpop.permute.xlu1 %1597  ;;  %v7076_v52 = vpop.permute.xlu0 %1595 }
 0x56e   :  { %9803 = vst [vmem:[#allocation274_spill] sm:$0xff] %v7074_v4  ;;  %9804 = vst [vmem:[#allocation275_spill] sm:$0xff] %v7076_v52  ;;  %v2172_v52 = vmul.f32 %v6834_v54, %v2166_v55  ;;  %v2170_v4 = vmul.f32 %v6839_v28, %v2166_v55 }
 0x56f   :  { %2151 = vrot.lane.b32.xlu1 %v2142_v7, %s4769_s22  ;;  %2149 = vrot.lane.b32.xlu0 %v2141_v59, %s4769_s22  ;;  %v2180_v7 = vrot.slane %v2168_v38, 1  ;;  %v2182_v59 = vrot.slane %v2169_v36, 1  ;;  %v2185_v36 = vrot.slane %v2171_v2, 1 }
 0x571   :  { %v7093_v9 = vpop.permute.xlu1 %1619  ;;  %v7095_v16 = vpop.permute.xlu0 %1617  ;;  %v2183_v46 = vsel %vm625_vm11, %v2180_v7, %v2182_v59 }
 0x572   :  { %9805 = vst [vmem:[#allocation276_spill] sm:$0xff] %v7093_v9  ;;  %9806 = vst [vmem:[#allocation277_spill] sm:$0xff] %v7095_v16  ;;  %v2179_v16 = vrot.slane %v2167_v29, 1  ;;  %v2206_v9 = vstv %s4581_s1  ;;  %v2184_v29 = vrot.slane %v2170_v4, 1  ;;  %s4772_s1 = smov [#allocation9]  }
 0x573   :  { %2155 = vrot.lane.b32.xlu1 %v2144_v19, %s4769_s22  ;;  %2153 = vrot.lane.b32.xlu0 %v2143_v5, %s4769_s22  ;;  %v2208_v10 = vmul.f32 %v6814_v13, %v2206_v9  ;;  %v2187_v5 = vrot.slane %v2172_v52, 1  ;;  %v2209_v55 = vmul.f32 %v6849_v14, %v2206_v9  ;;  %v2207_v2 = vmul.f32 %v6822_v56, %v2206_v9 }
 0x574   :  { %v2181_v19 = vsel %vm625_vm11, %v2179_v16, %v2180_v7  ;;  %v2186_v7 = vsel %vm625_vm11, %v2184_v29, %v2185_v36  ;;  %v7152_v29 = vstv %s7088_s23 }
 0x575   :  { %v7112_v27 = vpop.permute.xlu1 %1623  ;;  %v7114_v38 = vpop.permute.xlu0 %1621  ;;  %v2188_v4 = vsel %vm625_vm11, %v2185_v36, %v2187_v5  ;;  %v2220_v59 = vrot.slane %v2208_v10, 2  ;;  %v2219_v10 = vrot.slane %v2207_v2, 2  ;;  %v2210_v36 = vmul.f32 %v6839_v28, %v2206_v9 }
 0x576   :  { %9807 = vst [vmem:[#allocation278_spill] sm:$0xff] %v7112_v27  ;;  %9808 = vst [vmem:[#allocation279_spill] sm:$0xff] %v7114_v38  ;;  %v2212_v38 = vmul.f32 %v6834_v54, %v2206_v9  ;;  %v7142_v27 = vstv %s7080_s19  ;;  %v2246_v5 = vstv %s7108_s4  ;;  %s4525_s19 = sshll.u32 %s4772_s1, 4  ;;  %s4526_s19 = int_to_ptr.vmem [resolvable:$true] %s4525_s19 }
 0x577   :  { %2191 = vrot.lane.b32.xlu1 %v2183_v46, %s4769_s22  ;;  %2189 = vrot.lane.b32.xlu0 %v2181_v19, %s4769_s22  ;;  %v2211_v46 = vmul.f32 %v6829_v48, %v2206_v9  ;;  %v2222_v19 = vrot.slane %v2209_v55, 2  ;;  %v7159_v55 = vstv %s7091_s24  ;;  %v2248_v39 = vmul.f32 %v6814_v13, %v2246_v5  ;;  %p4723_p6 = scmp.lt.s32.totalorder %s4526_s19, %s4526_s19 }
 0x578   :  { %v2221_v9 = vsel %vm658_vm6, %v2219_v10, %v2220_v59  ;;  %v2227_v41 = vrot.slane %v2212_v38, 2  ;;  %v2249_v53 = vmul.f32 %v6849_v14, %v2246_v5  ;;  %v7185_v38 = vstv %s7124_s26 }
 0x579   :  { %v7129_v16 = vpop.permute.xlu1 %1659  ;;  %v7131_v52 = vpop.permute.xlu0 %1657  ;;  %v2225_v26 = vrot.slane %v2211_v46, 2  ;;  %v2223_v2 = vsel %vm658_vm6, %v2220_v59, %v2222_v19  ;;  %v2224_v46 = vrot.slane %v2210_v36, 2  ;;  %v2247_v19 = vmul.f32 %v6822_v56, %v2246_v5 }
 0x57a   :  { %9809 = vst [vmem:[#allocation280_spill] sm:$0xff] %v7129_v16  ;;  %9810 = vst [vmem:[#allocation281_spill] sm:$0xff] %v7131_v52  ;;  %v7145_v52 = vstv %s7084_s20  ;;  %v7162_v16 = vstv %s7100_s30  ;;  %v2286_v59 = vstv %s7120_s25  ;;  %v2262_v61 = vrot.slane %v2249_v53, 3  ;;  %s4718_s20 = scalar_lea.vmem %s4526_s19, 256 }
 0x57b   :  { %2195 = vrot.lane.b32.xlu1 %v2188_v4, %s4769_s22  ;;  %2193 = vrot.lane.b32.xlu0 %v2186_v7, %s4769_s22  ;;  %v2228_v36 = vsel %vm658_vm6, %v2225_v26, %v2227_v41  ;;  %v2226_v62 = vsel %vm658_vm6, %v2224_v46, %v2225_v26  ;;  %v2252_v18 = vmul.f32 %v6834_v54, %v2246_v5  ;;  %v2259_v30 = vrot.slane %v2247_v19, 3  ;;  %p4719_p5 = scmp.ne.s32.totalorder %s4526_s19, %s4718_s20  ;;  %p4724_p7 = scmp.lt.s32.totalorder %s4718_s20, %s4718_s20 }
 0x57c   :  { %v2250_v41 = vmul.f32 %v6839_v28, %v2246_v5  ;;  %v7219_v53 = vmul.f32 %v6822_v56, %v7142_v27  ;;  %v2288_v19 = vmul.f32 %v6814_v13, %v2286_v59  ;;  %v2289_v45 = vmul.f32 %v6849_v14, %v2286_v59 }
 0x57d   :  { %v7164_v4 = vpop.permute.xlu1 %1663  ;;  %v7166_v7 = vpop.permute.xlu0 %1661  ;;  %v2267_v3 = vrot.slane %v2252_v18, 3  ;;  %v7235_v63 = vmul.f32 %v6822_v56, %v7159_v55  ;;  %v7239_v15 = vmul.f32 %v6822_v56, %v7162_v16  ;;  %v7250_v18 = vmul.f32 %v6822_v56, %v7173_v51  ;;  %p4725_p8 = por %p4724_p7, %p4723_p6 }
 0x57e   :  { %9811 = vst [vmem:[#allocation282_spill] sm:$0xff] %v7164_v4  ;;  %9812 = vst [vmem:[#allocation283_spill] sm:$0xff] %v7166_v7  ;;  %v2260_v4 = vrot.slane %v2248_v39, 3  ;;  %v7207_v39 = vstv %s7149_s8  ;;  %v2291_v35 = vmul.f32 %v6829_v48, %v2286_v59  ;;  %v2302_v49 = vrot.slane %v2289_v45, 4 }
 0x57f   :  { %2231 = vrot.lane.b32.xlu1 %v2223_v2, %s4769_s22  ;;  %2229 = vrot.lane.b32.xlu0 %v2221_v9, %s4769_s22  ;;  %v2251_v2 = vmul.f32 %v6829_v48, %v2246_v5  ;;  %v7196_v9 = vstv %s7135_s29  ;;  %v7273_v20 = vmul.f32 %v6839_v28, %v7145_v52  ;;  %v7281_v45 = vmul.f32 %v6839_v28, %v7152_v29  ;;  %p4726_p9 = pnand %p4725_p8, %p4719_p5 }
 0x580   :  { %v2263_v5 = vsel %vm691_vm7, %v2260_v4, %v2262_v61  ;;  %v2261_v32 = vsel %vm691_vm7, %v2259_v30, %v2260_v4  ;;  %v7245_v61 = vstv %s7180_s11  ;;  %v7254_v4 = vmul.f32 %v6822_v56, %v7176_v58 }
 0x581   :  { %v7187_v10 = vpop.permute.xlu1 %1699  ;;  %v7189_v7 = vpop.permute.xlu0 %1697  ;;  %v2300_v30 = vrot.slane %v2288_v19, 4  ;;  %v7286_v1 = vmul.f32 %v6839_v28, %v7159_v55 }
 0x582   :  { %9813 = vst [vmem:[#allocation284_spill] sm:$0xff] %v7187_v10  ;;  %9814 = vst [vmem:[#allocation285_spill] sm:$0xff] %v7189_v7  ;;  %v7204_v7 = vstv %s7139_s7  ;;  %v7211_v10 = vmul.f32 %v6822_v56, %v7145_v52 }
 0x583   :  { %2235 = vrot.lane.b32.xlu1 %v2228_v36, %s4769_s22  ;;  %2233 = vrot.lane.b32.xlu0 %v2226_v62, %s4769_s22  ;;  %v7223_v62 = vmul.f32 %v6822_v56, %v7152_v29  ;;  %v2265_v36 = vrot.slane %v2251_v2, 3  ;;  %v2287_v2 = vmul.f32 %v6822_v56, %v2286_v59 }
 0x585   :  { %v7225_v26 = vpop.permute.xlu1 %1703  ;;  %v7227_v46 = vpop.permute.xlu0 %1701  ;;  %v2268_v60 = vsel %vm691_vm7, %v2265_v36, %v2267_v3  ;;  %v2299_v19 = vrot.slane %v2287_v2, 4  ;;  %v2328_v3 = vmul.f32 %v6814_v13, %v7185_v38 }
 0x586   :  { %9815 = vst [vmem:[#allocation286_spill] sm:$0xff] %v7225_v26  ;;  %9816 = vst [vmem:[#allocation287_spill] sm:$0xff] %v7227_v46  ;;  %v2264_v46 = vrot.slane %v2250_v41, 3  ;;  %v2292_v41 = vmul.f32 %v6834_v54, %v2286_v59  ;;  %v2303_v26 = vsel %vm724_vm8, %v2300_v30, %v2302_v49  ;;  %v2327_v49 = vmul.f32 %v6822_v56, %v7185_v38 }
 0x587   :  { %2271 = vrot.lane.b32.xlu1 %v2263_v5, %s4769_s22  ;;  %2269 = vrot.lane.b32.xlu0 %v2261_v32, %s4769_s22  ;;  %v7259_v32 = vmul.f32 %v6839_v28, %v7142_v27  ;;  %v2340_v57 = vrot.slane %v2328_v3, 5 }
 0x588   :  { %v2266_v34 = vsel %vm691_vm7, %v2264_v46, %v2265_v36  ;;  %v2290_v36 = vmul.f32 %v6839_v28, %v2286_v59  ;;  %v2301_v46 = vsel %vm724_vm8, %v2299_v19, %v2300_v30  ;;  %v2305_v59 = vrot.slane %v2291_v35, 4 }
 0x589   :  { %v7261_v5 = vpop.permute.xlu1 %1739  ;;  %v7263_v12 = vpop.permute.xlu0 %1737  ;;  %v7320_v19 = vmul.f32 %v6822_v56, %v7193_v40  ;;  %v2331_v35 = vmul.f32 %v6829_v48, %v7185_v38  ;;  %v2332_v56 = vmul.f32 %v6834_v54, %v7185_v38  ;;  %v2339_v3 = vrot.slane %v2327_v49, 5 }
 0x58a   :  { %9817 = vst [vmem:[#allocation288_spill] sm:$0xff] %v7261_v5  ;;  %9818 = vst [vmem:[#allocation289_spill] sm:$0xff] %v7263_v12  ;;  %v2307_v12 = vrot.slane %v2292_v41, 4  ;;  %v2329_v5 = vmul.f32 %v6849_v14, %v7185_v38  ;;  %v2304_v30 = vrot.slane %v2290_v36, 4  ;;  %v2330_v41 = vmul.f32 %v6839_v28, %v7185_v38 }
 0x58b   :  { %2275 = vrot.lane.b32.xlu1 %v2268_v60, %s4769_s22  ;;  %2273 = vrot.lane.b32.xlu0 %v2266_v34, %s4769_s22  ;;  %v7290_v60 = vmul.f32 %v6839_v28, %v7162_v16  ;;  %v2347_v50 = vrot.slane %v2332_v56, 5  ;;  %v2372_v56 = vmul.f32 %v6834_v54, %v7193_v40 }
 0x58c   :  { %v2308_v36 = vsel %vm724_vm8, %v2305_v59, %v2307_v12  ;;  %v2306_v37 = vsel %vm724_vm8, %v2304_v30, %v2305_v59  ;;  %v2342_v47 = vrot.slane %v2329_v5, 5  ;;  %v2344_v12 = vrot.slane %v2330_v41, 5  ;;  %v7343_v5 = vld [vmem:[#allocation2 + $0x30] sm:$0xff]  ;;  %v7349_v30 = vld [vmem:[#allocation2 + $0x48] sm:$0xff] }
 0x58d   :  { %v7292_v34 = vpop.permute.xlu1 %1743  ;;  %v7294_v2 = vpop.permute.xlu0 %1741  ;;  %v2379_v59 = vrot.slane %v7320_v19, 6  ;;  %9824 = vst [vmem:[#allocation295_spill] sm:$0xff] %v7343_v5  ;;  %v7347_v38 = vmul.f32 %v7343_v5, %v7196_v9  ;;  %v2345_v41 = vrot.slane %v2331_v35, 5  ;;  %v2368_v19 = vmul.f32 %v6814_v13, %v7193_v40 }
 0x58e   :  { %9819 = vst [vmem:[#allocation290_spill] sm:$0xff] %v7292_v34  ;;  %9820 = vst [vmem:[#allocation291_spill] sm:$0xff] %v7294_v2  ;;  %v7309_v2 = vmul.f32 %v6839_v28, %v7176_v58  ;;  %v7367_v34 = vmul.f32 %v7343_v5, %v7204_v7  ;;  %v2343_v44 = vsel %vm757_vm9, %v2340_v57, %v2342_v47 }
 0x58f   :  { %2311 = vrot.lane.b32.xlu1 %v2303_v26, %s4769_s22  ;;  %2309 = vrot.lane.b32.xlu0 %v2301_v46, %s4769_s22  ;;  %v7390_v47 = vmul.f32 %v6814_v13, %v7152_v29  ;;  %v2346_v21 = vsel %vm757_vm9, %v2344_v12, %v2345_v41  ;;  %v2348_v33 = vsel %vm757_vm9, %v2345_v41, %v2347_v50  ;;  %v2380_v31 = vrot.slane %v2368_v19, 6 }
 0x590   :  { %9821 = vst [vmem:[#allocation292_spill] sm:$0xff] %v7309_v2  ;;  %v2385_v50 = vrot.slane %v2371_v22, 6  ;;  %v617_v41 = vmul.f32 %v6829_v48, %v7145_v52  ;;  %v7467_v48 = vmul.f32 %v7343_v5, %v7245_v61 }
 0x591   :  { %v7324_v26 = vpop.permute.xlu1 %1779  ;;  %v7326_v46 = vpop.permute.xlu0 %1777  ;;  %v2381_v54 = vsel %vm790_vm10, %v2379_v59, %v2380_v31 }
 0x592   :  { %9822 = vst [vmem:[#allocation293_spill] sm:$0xff] %v7324_v26  ;;  %9823 = vst [vmem:[#allocation294_spill] sm:$0xff] %v7326_v46  ;;  %v7340_v46 = vmul.f32 %v6839_v28, %v7193_v40  ;;  %v2341_v26 = vsel %vm757_vm9, %v2339_v3, %v2340_v57  ;;  %v7386_v57 = vmul.f32 %v7349_v30, %v7207_v39 }
 0x593   :  { %2315 = vrot.lane.b32.xlu1 %v2308_v36, %s4769_s22  ;;  %2313 = vrot.lane.b32.xlu0 %v2306_v37, %s4769_s22  ;;  %v7353_v36 = vmul.f32 %v7349_v30, %v7196_v9  ;;  %v7357_v37 = vmul.f32 %v6814_v13, %v7145_v52  ;;  %v7407_v3 = vmul.f32 %v6814_v13, %v7162_v16 }
 0x594   :  { %v2384_v35 = vrot.slane %v7340_v46, 6  ;;  %v7402_v46 = vmul.f32 %v7349_v30, %v7215_v43  ;;  %v2383_v40 = vsel %vm790_vm10, %v2380_v31, %v2382_v25  ;;  %v7461_v31 = vld [vmem:[#allocation2 + $0x28] sm:$0x3f]  ;;  %9834 = vst [vmem:[#allocation303_spill] sm:$0xff] %v7467_v48 }
 0x595   :  { %v7359_v28 = vpop.permute.xlu1 %1783  ;;  %v7361_v49 = vpop.permute.xlu0 %1781  ;;  %v9830_v19 = vrot.slane %v7357_v37, 1  ;;  %v618_v59 = vmul.f32 %v7461_v31, %v7145_v52 }
 0x596   :  { %9825 = vst [vmem:[#allocation296_spill] sm:$0xff] %v7359_v28  ;;  %9826 = vst [vmem:[#allocation297_spill] sm:$0xff] %v7361_v49  ;;  %v7378_v49 = vmul.f32 %v7349_v30, %v7204_v7  ;;  %v7382_v28 = vmul.f32 %v7343_v5, %v7207_v39 }
 0x597   :  { %2351 = vrot.lane.b32.xlu1 %v2343_v44, %s4769_s22  ;;  %2349 = vrot.lane.b32.xlu0 %v2341_v26, %s4769_s22  ;;  %v7394_v44 = vmul.f32 %v6814_v13, %v7159_v55  ;;  %v7398_v26 = vmul.f32 %v7343_v5, %v7215_v43  ;;  %9827 = vst [vmem:[#allocation298_spill] sm:$0xff] %v7402_v46  ;;  %v634_v5 = vrot.slane %v618_v59, 1 }
 0x599   :  { %v7409_v0 = vpop.permute.xlu1 %1819  ;;  %v7411_v6 = vpop.permute.xlu0 %1817 }
 0x59a   :  { %9828 = vst [vmem:[#allocation299_spill] sm:$0xff] %v7409_v0  ;;  %9829 = vst [vmem:[#allocation300_spill] sm:$0xff] %v7411_v6  ;;  %v9831_v0 = vrot.slane %v7211_v10, 1  ;;  %v7454_v10 = vmul.f32 %v4677_v42, %v7152_v29 }
 0x59b   :  { %2355 = vrot.lane.b32.xlu1 %v2348_v33, %s4769_s22  ;;  %2353 = vrot.lane.b32.xlu0 %v2346_v21, %s4769_s22  ;;  %v615_v33 = vmul.f32 %v6849_v14, %v7145_v52  ;;  %v2387_v14 = vrot.slane %v2372_v56, 6  ;;  %v4679_v56 = vld [vmem:[#allocation2 + $0x8] sm:$0xff]  ;;  %v9839_v52 = vrot.slane %v7394_v44, 3 }
 0x59c   :  { %v628_v6 = vsel %vm625_vm11, %v9831_v0, %v9830_v19  ;;  %v9836_v0 = vrot.slane %v7223_v62, 2 }
 0x59d   :  { %v7444_v12 = vpop.permute.xlu1 %1823  ;;  %v7446_v13 = vpop.permute.xlu0 %1821  ;;  %v640_v22 = vadd.f32 %v628_v6, %v7219_v53  ;;  %v629_v19 = vrot.slane %v615_v33, 1  ;;  %v606_v6 = vmul.f32 %v4677_v42, %v7142_v27  ;;  %v9841_v33 = vrot.slane %v7407_v3, 4 }
 0x59e   :  { %9832 = vst [vmem:[#allocation301_spill] sm:$0xff] %v7444_v12  ;;  %9833 = vst [vmem:[#allocation302_spill] sm:$0xff] %v7446_v13  ;;  %v9840_v13 = vrot.slane %v7235_v63, 3 }
 0x59f   :  { %2391 = vrot.lane.b32.xlu1 %v2383_v40, %s4769_s22  ;;  %2389 = vrot.lane.b32.xlu0 %v2381_v54, %s4769_s22  ;;  %v604_v40 = vmul.f32 %v4679_v56, %v7142_v27  ;;  %v9835_v54 = vrot.slane %v7390_v47, 2  ;;  %v9842_v56 = vrot.slane %v7239_v15, 4  ;;  %v2386_v27 = vsel %vm790_vm10, %v2384_v35, %v2385_v50 }
 0x5a0   :  { %v694_v12 = vsel %vm691_vm7, %v9840_v13, %v9839_v52  ;;  %v9843_v13 = vrot.slane %v7421_v8, 5  ;;  %v9844_v52 = vrot.slane %v7250_v18, 5  ;;  %v7518_v18 = vmul.f32 %v4677_v42, %v7159_v55 }
 0x5a1   :  { %v661_v25 = vsel %vm658_vm6, %v9836_v0, %v9835_v54  ;;  %v7476_v53 = vpop.permute.xlu1 %1859  ;;  %v7478_v21 = vpop.permute.xlu0 %1857  ;;  %v7490_v62 = vsel %vm724_vm8, %v9842_v56, %v9841_v33  ;;  %v2388_v0 = vsel %vm790_vm10, %v2385_v50, %v2387_v14  ;;  %v7494_v54 = vld [vmem:[#allocation2 + $0x40] sm:$0x3f]  ;;  %v632_v33 = vrot.slane %v617_v41, 1 }
 0x5a2   :  { %9837 = vst [vmem:[#allocation304_spill] sm:$0xff] %v7476_v53  ;;  %9838 = vst [vmem:[#allocation305_spill] sm:$0xff] %v7478_v21  ;;  %v7496_v21 = vld [vmem:[#allocation2 + $0x10] sm:$0x3f]  ;;  %v7505_v15 = vsel %vm757_vm9, %v9844_v52, %v9843_v13  ;;  %v665_v56 = vrot.slane %v7454_v10, 2  ;;  %v673_v35 = vadd.f32 %v661_v25, %v640_v22  ;;  %v9845_v50 = vrot.slane %v7431_v17, 6 }
 0x5a3   :  { %v648_v63 = vmul.f32 %v7496_v21, %v7152_v29  ;;  %2395 = vrot.lane.b32.xlu1 %v2388_v0, %s4769_s22  ;;  %2393 = vrot.lane.b32.xlu0 %v2386_v27, %s4769_s22  ;;  %v9846_v14 = vrot.slane %v7254_v4, 6  ;;  %v9847_v41 = vrot.slane %v7357_v37, 1  ;;  %v651_v0 = vmul.f32 %v7461_v31, %v7152_v29  ;;  %v7529_v22 = vld [vmem:[#allocation2 + $0x38] sm:$0xff] }
 0x5a4   :  { %v2616_v4 = vmul.f32 %v7529_v22, %v7196_v9  ;;  %v2642_v59 = vmul.f32 %v7529_v22, %v7204_v7  ;;  %v7536_v13 = vmul.f32 %v4677_v42, %v7162_v16  ;;  %v7539_v37 = vmul.f32 %v4677_v42, %v7173_v51  ;;  %v7546_v52 = vld [vmem:[#allocation2 + $0x58] sm:$0x3f] }
 0x5a5   :  { %v7515_v53 = vsel %vm790_vm10, %v9846_v14, %v9845_v50  ;;  %v630_v10 = vsel %vm625_vm11, %v9847_v41, %v629_v19  ;;  %v7525_v27 = vpop.permute.xlu1 %1863  ;;  %v7527_v25 = vpop.permute.xlu0 %1861  ;;  %v7542_v29 = vmul.f32 %v4677_v42, %v7176_v58  ;;  %v2643_v19 = vmul.f32 %v7204_v7, %v7494_v54 }
 0x5a6   :  { %9848 = vst [vmem:[#allocation306_spill] sm:$0xff] %v7525_v27  ;;  %9849 = vst [vmem:[#allocation307_spill] sm:$0xff] %v7527_v25  ;;  %v662_v50 = vrot.slane %v648_v63, 2  ;;  %v681_v14 = vmul.f32 %v7496_v21, %v7159_v55  ;;  %v9850_v41 = vrot.slane %v7273_v20, 1  ;;  %v9851_v27 = vrot.slane %v7281_v45, 2 }
 0x5a7   :  { %2625 = vrot.lane.b32.xlu1 %v2616_v4, %s4764_s28  ;;  %2623 = vrot.lane.b32.xlu0 %v7347_v38, %s4764_s28  ;;  %v641_v42 = vadd.f32 %v630_v10, %v604_v40  ;;  %v706_v48 = vadd.f32 %v694_v12, %v673_v35  ;;  %v635_v63 = vsel %vm625_vm11, %v632_v33, %v634_v5  ;;  %v698_v2 = vrot.slane %v7518_v18, 3 }
 0x5a8   :  { %v633_v25 = vsel %vm625_vm11, %v9850_v41, %v632_v33  ;;  %v666_v46 = vsel %vm658_vm6, %v9851_v27, %v665_v56  ;;  %v667_v24 = vrot.slane %v651_v0, 2  ;;  %v7565_v41 = vld [vmem:[#allocation2 + $0x50] sm:$0xff]  ;;  %v2654_v27 = vrot.slane %v2642_v59, 1 }
 0x5a9   :  { %v7561_v23 = vpop.permute.xlu1 %1885  ;;  %v7563_v20 = vpop.permute.xlu0 %1883  ;;  %v2618_v45 = vmul.f32 %v7565_v41, %v7196_v9  ;;  %v2645_v38 = vmul.f32 %v7565_v41, %v7204_v7  ;;  %v684_v12 = vmul.f32 %v7461_v31, %v7159_v55  ;;  %v731_v5 = vrot.slane %v7536_v13, 4 }
 0x5aa   :  { %v2656_v40 = vrot.slane %v2643_v19, 1  ;;  %v2646_v33 = vmul.f32 %v7204_v7, %v7546_v52  ;;  %v9852_v35 = vrot.slane %v7390_v47, 2  ;;  %v695_v10 = vrot.slane %v681_v14, 3 }
 0x5ab   :  { %v714_v9 = vmul.f32 %v7496_v21, %v7162_v16  ;;  %v643_v0 = vadd.f32 %v635_v63, %v606_v6  ;;  %2629 = vrot.lane.b32.xlu1 %v2618_v45, %s4764_s28  ;;  %2627 = vrot.lane.b32.xlu0 %v7353_v36, %s4764_s28  ;;  %v764_v4 = vrot.slane %v7539_v37, 5  ;;  %v642_v59 = vadd.f32 %v633_v25, %v7259_v32 }
 0x5ac   :  { %v663_v18 = vsel %vm658_vm6, %v9852_v35, %v662_v50  ;;  %v2682_v7 = vmul.f32 %v7529_v22, %v7207_v39  ;;  %v668_v47 = vsel %vm658_vm6, %v665_v56, %v667_v24  ;;  %v717_v19 = vmul.f32 %v7461_v31, %v7162_v16 }
 0x5ad   :  { %v674_v55 = vadd.f32 %v663_v18, %v641_v42  ;;  %v7591_v50 = vpop.permute.xlu1 %1889  ;;  %v7593_v6 = vpop.permute.xlu0 %1887  ;;  %v9853_v14 = vrot.slane %v7367_v34, 1  ;;  %v2659_v42 = vrot.slane %v2645_v38, 1  ;;  %v700_v63 = vrot.slane %v684_v12, 3 }
 0x5ae   :  { %v2657_v32 = vsel %vm625_vm11, %v2654_v27, %v2656_v40  ;;  %v2661_v25 = vrot.slane %v2646_v33, 1  ;;  %v2683_v45 = vmul.f32 %v7207_v39, %v7494_v54  ;;  %v9854_v24 = vrot.slane %v7394_v44, 3 }
 0x5af   :  { %v2655_v36 = vsel %vm625_vm11, %v9853_v14, %v2654_v27  ;;  %v728_v56 = vrot.slane %v714_v9, 4  ;;  %v747_v35 = vmul.f32 %v7496_v21, %v7173_v51  ;;  %v676_v18 = vadd.f32 %v668_v47, %v643_v0  ;;  %2665 = vrot.lane.b32.xlu1 %v2657_v32, %s4764_s28 }
 0x5b0   :  { %v696_v16 = vsel %vm691_vm7, %v9854_v24, %v695_v10  ;;  %2663 = vrot.lane.b32.xlu0 %v2655_v36, %s4764_s28  ;;  %v675_v38 = vadd.f32 %v666_v46, %v642_v59  ;;  %v9855_v27 = vrot.slane %v7286_v1, 3  ;;  %v2685_v44 = vmul.f32 %v7565_v41, %v7207_v39 }
 0x5b1   :  { %v707_v34 = vadd.f32 %v696_v16, %v674_v55  ;;  %v733_v40 = vrot.slane %v717_v19, 4  ;;  %v750_v33 = vmul.f32 %v7461_v31, %v7173_v51  ;;  %v7615_v10 = vpop.permute.xlu1 %1925  ;;  %v7617_v9 = vpop.permute.xlu0 %1923  ;;  %v9856_v0 = vrot.slane %v7378_v49, 1 }
 0x5b2   :  { %v699_v12 = vsel %vm691_vm7, %v9855_v27, %v698_v2  ;;  %v2694_v46 = vrot.slane %v2682_v7, 2  ;;  %v701_v1 = vsel %vm691_vm7, %v698_v2, %v700_v63  ;;  %v2662_v59 = vsel %vm625_vm11, %v2659_v42, %v2661_v25 }
 0x5b3   :  { %v2660_v55 = vsel %vm625_vm11, %v9856_v0, %v2659_v42  ;;  %v2696_v47 = vrot.slane %v2683_v45, 2  ;;  %v2686_v19 = vmul.f32 %v7207_v39, %v7546_v52  ;;  %v9857_v14 = vrot.slane %v7407_v3, 4  ;;  %2669 = vrot.lane.b32.xlu1 %v2662_v59, %s4764_s28 }
 0x5b4   :  { %v761_v36 = vrot.slane %v747_v35, 5  ;;  %v780_v32 = vmul.f32 %v7496_v21, %v7176_v58  ;;  %v709_v49 = vadd.f32 %v701_v1, %v676_v18  ;;  %2667 = vrot.lane.b32.xlu0 %v2660_v55, %s4764_s28  ;;  %v739_v7 = vadd.f32 %v7490_v62, %v706_v48 }
 0x5b5   :  { %v729_v51 = vsel %vm724_vm8, %v9857_v14, %v728_v56  ;;  %v708_v42 = vadd.f32 %v699_v12, %v675_v38  ;;  %v2722_v39 = vmul.f32 %v7529_v22, %v7215_v43  ;;  %v766_v63 = vrot.slane %v750_v33, 5  ;;  %v7638_v25 = vpop.permute.xlu1 %1929  ;;  %v7640_v45 = vpop.permute.xlu0 %1927 }
 0x5b6   :  { %v740_v2 = vadd.f32 %v729_v51, %v707_v34  ;;  %v783_v3 = vmul.f32 %v7461_v31, %v7176_v58  ;;  %v9858_v21 = vrot.slane %v7382_v28, 2  ;;  %v2699_v16 = vrot.slane %v2685_v44, 2 }
 0x5b7   :  { %v734_v48 = vsel %vm724_vm8, %v731_v5, %v733_v40  ;;  %v2697_v62 = vsel %vm658_vm6, %v2694_v46, %v2696_v47  ;;  %v2701_v56 = vrot.slane %v2686_v19, 2  ;;  %v2723_v35 = vmul.f32 %v7215_v43, %v7494_v54 }
 0x5b8   :  { %v2695_v24 = vsel %vm658_vm6, %v9858_v21, %v2694_v46  ;;  %v9859_v58 = vrot.slane %v7421_v8, 5  ;;  %v794_v18 = vrot.slane %v780_v32, 6  ;;  %v742_v34 = vadd.f32 %v734_v48, %v709_v49  ;;  %2705 = vrot.lane.b32.xlu1 %v2697_v62, %s4764_s28  ;;  %v9867_v48 = vld [vmem:[#allocation292_spill] sm:$0xff] }
 0x5b9   :  { %v9860_v28 = vrot.slane %v7290_v60, 4  ;;  %2703 = vrot.lane.b32.xlu0 %v2695_v24, %s4764_s28  ;;  %v772_v12 = vadd.f32 %v7505_v15, %v739_v7  ;;  %v9861_v8 = vrot.slane %v7305_v11, 5  ;;  %v799_v33 = vrot.slane %v783_v3, 6  ;;  %v7667_v13 = vpop.permute.xlu1 %1965  ;;  %v7669_v60 = vpop.permute.xlu0 %1963 }
 0x5ba   :  { %v762_v31 = vsel %vm757_vm9, %v9859_v58, %v761_v36  ;;  %v2734_v55 = vrot.slane %v2722_v39, 3  ;;  %v2725_v15 = vmul.f32 %v7565_v41, %v7215_v43  ;;  %v767_v46 = vsel %vm757_vm9, %v764_v4, %v766_v63  ;;  %v9865_v39 = vld [vmem:[#allocation14_spill] sm:$0xff] }
 0x5bb   :  { %v732_v38 = vsel %vm724_vm8, %v9860_v28, %v731_v5  ;;  %v773_v27 = vadd.f32 %v762_v31, %v740_v2  ;;  %v765_v40 = vsel %vm757_vm9, %v9861_v8, %v764_v4  ;;  %v9862_v5 = vrot.slane %v7386_v57, 2  ;;  %v9866_v63 = vld [vmem:[#allocation18_spill] sm:$0xff]  ;;  %v9869_v31 = vld [vmem:[#allocation200_spill] sm:$0xff] }
 0x5bc   :  { %v741_v44 = vadd.f32 %v732_v38, %v708_v42  ;;  %v2702_v11 = vsel %vm658_vm6, %v2699_v16, %v2701_v56  ;;  %v2736_v1 = vrot.slane %v2723_v35, 3  ;;  %v2726_v59 = vmul.f32 %v7215_v43, %v7546_v52  ;;  %v9871_v38 = vld [vmem:[#allocation303_spill] sm:$0xff] }
 0x5bd   :  { %v2700_v0 = vsel %vm658_vm6, %v9862_v5, %v2699_v16  ;;  %v9863_v47 = vrot.slane %v7431_v17, 6  ;;  %v775_v19 = vadd.f32 %v767_v46, %v742_v34  ;;  %v797_v14 = vrot.slane %v7542_v29, 6  ;;  %2709 = vrot.lane.b32.xlu1 %v2702_v11, %s4764_s28  ;;  %v7696_v32 = vpop.permute.xlu1 %1969  ;;  %v7698_v29 = vpop.permute.xlu0 %1967  ;;  %v9870_v34 = vld [vmem:[#allocation201_spill] sm:$0xff]  ;;  %v9875_v46 = vld [vmem:[#allocation17_spill] sm:$0xff] }
 0x5be   :  { %2707 = vrot.lane.b32.xlu0 %v2700_v0, %s4764_s28  ;;  %v2762_v37 = vmul.f32 %v7529_v22, %v7245_v61  ;;  %v805_v51 = vadd.f32 %v7515_v53, %v772_v12  ;;  %v774_v43 = vadd.f32 %v765_v40, %v741_v44  ;;  %v2764_v17 = vmul.f32 %v7349_v30, %v7245_v61  ;;  %v9872_v12 = vld [vmem:[#allocation16_spill] sm:$0xff] }
 0x5bf   :  { %v795_v57 = vsel %vm790_vm10, %v9863_v47, %v794_v18  ;;  %v800_v36 = vsel %vm790_vm10, %v797_v14, %v799_v33  ;;  %v9864_v49 = vrot.slane %v7398_v26, 3  ;;  %v2739_v7 = vrot.slane %v2725_v15, 3  ;;  %v9873_v33 = vld [vmem:[#allocation298_spill] sm:$0xff]  ;;  %v9877_v47 = vld [vmem:[#allocation205_spill] sm:$0xff] }
 0x5c0   :  { %v806_v4 = vadd.f32 %v795_v57, %v773_v27  ;;  %v2763_v42 = vmul.f32 %v7245_v61, %v7494_v54  ;;  %v831_v3 = vadd.f32 %v9866_v63, %v805_v51  ;;  %v2737_v21 = vsel %vm691_vm7, %v2734_v55, %v2736_v1  ;;  %v9876_v1 = vld [vmem:[#allocation204_spill] sm:$0xff] }
 0x5c1   :  { %v2735_v2 = vsel %vm691_vm7, %v9864_v49, %v2734_v55  ;;  %v2741_v24 = vrot.slane %v2726_v59, 3  ;;  %v808_v16 = vadd.f32 %v800_v36, %v775_v19  ;;  %v9868_v62 = vrot.slane %v9867_v48, 6  ;;  %2745 = vrot.lane.b32.xlu1 %v2737_v21, %s4764_s28  ;;  %v7719_v8 = vpop.permute.xlu1 %2005  ;;  %v7721_v40 = vpop.permute.xlu0 %2003  ;;  %v9879_v36 = vld [vmem:[#allocation203_spill] sm:$0xff] }
 0x5c2   :  { %v832_v53 = vadd.f32 %v9865_v39, %v806_v4  ;;  %2743 = vrot.lane.b32.xlu0 %v2735_v2, %s4764_s28  ;;  %v2774_v26 = vrot.slane %v2762_v37, 4  ;;  %v2765_v35 = vmul.f32 %v7565_v41, %v7245_v61  ;;  %v871_v28 = vadd.f32 %v9870_v34, %v831_v3  ;;  %v9880_v2 = vld [vmem:[#allocation208_spill] sm:$0xff]  ;;  %v9881_v39 = vld [vmem:[#allocation209_spill] sm:$0xff] }
 0x5c3   :  { %v798_v56 = vsel %vm790_vm10, %v9868_v62, %v797_v14  ;;  %v2773_v27 = vrot.slane %v9871_v38, 4  ;;  %v834_v44 = vadd.f32 %v9872_v12, %v808_v16  ;;  %v9874_v5 = vrot.slane %v9873_v33, 3  ;;  %v9882_v16 = vld [vmem:[#allocation206_spill] sm:$0xff]  ;;  %v9883_v62 = vld [vmem:[#allocation207_spill] sm:$0xff] }
 0x5c4   :  { %v807_v58 = vadd.f32 %v798_v56, %v774_v43  ;;  %v872_v18 = vadd.f32 %v9869_v31, %v832_v53  ;;  %v2776_v55 = vrot.slane %v2763_v42, 4  ;;  %v2766_v15 = vmul.f32 %v7245_v61, %v7546_v52  ;;  %v9878_v61 = vld [vmem:[#allocation202_spill] sm:$0xff]  ;;  %v9885_v31 = vld [vmem:[#allocation213_spill] sm:$0xff] }
 0x5c5   :  { %v2740_v0 = vsel %vm691_vm7, %v9874_v5, %v2739_v7  ;;  %v911_v57 = vadd.f32 %v9877_v47, %v871_v28  ;;  %v2742_v19 = vsel %vm691_vm7, %v2739_v7, %v2741_v24  ;;  %v2775_v14 = vsel %vm724_vm8, %v2773_v27, %v2774_v26  ;;  %v7742_v7 = vpop.permute.xlu1 %2009  ;;  %v7744_v63 = vpop.permute.xlu0 %2007  ;;  %v9887_v27 = vld [vmem:[#allocation210_spill] sm:$0xff]  ;;  %v9889_v5 = vld [vmem:[#allocation216_spill] sm:$0xff] }
 0x5c6   :  { %v833_v11 = vadd.f32 %v9875_v46, %v807_v58  ;;  %v912_v59 = vadd.f32 %v9876_v1, %v872_v18  ;;  %2749 = vrot.lane.b32.xlu1 %v2742_v19, %s4764_s28  ;;  %2747 = vrot.lane.b32.xlu0 %v2740_v0, %s4764_s28  ;;  %v2779_v37 = vrot.slane %v2765_v35, 4  ;;  %v2778_v4 = vrot.slane %v2764_v17, 4  ;;  %v9884_v35 = vld [vmem:[#allocation212_spill] sm:$0xff]  ;;  %v9891_v19 = vld [vmem:[#allocation214_spill] sm:$0xff] }
 0x5c7   :  { %v2800_v51 = vstv %s7690_s12  ;;  %v874_v43 = vadd.f32 %v9878_v61, %v834_v44  ;;  %v951_v53 = vadd.f32 %v9881_v39, %v911_v57  ;;  %v2777_v3 = vsel %vm724_vm8, %v2774_v26, %v2776_v55  ;;  %v9886_v26 = vld [vmem:[#allocation295_spill] sm:$0xff]  ;;  %v9890_v55 = vld [vmem:[#allocation217_spill] sm:$0xff] }
 0x5c8   :  { %v873_v49 = vadd.f32 %v9879_v36, %v833_v11  ;;  %v952_v42 = vadd.f32 %v9880_v2, %v912_v59  ;;  %v2781_v21 = vrot.slane %v2766_v15, 4  ;;  %v2802_v17 = vmul.f32 %v7529_v22, %v2800_v51  ;;  %v9888_v44 = vld [vmem:[#allocation211_spill] sm:$0xff] }
 0x5c9   :  { %v2803_v24 = vmul.f32 %v2800_v51, %v7494_v54  ;;  %v914_v48 = vadd.f32 %v9882_v16, %v874_v43  ;;  %v991_v18 = vadd.f32 %v9885_v31, %v951_v53  ;;  %v2780_v34 = vsel %vm724_vm8, %v2778_v4, %v2779_v37  ;;  %v7762_v46 = vpop.permute.xlu1 %2045  ;;  %v7764_v11 = vpop.permute.xlu0 %2043  ;;  %v9892_v4 = vld [vmem:[#allocation215_spill] sm:$0xff]  ;;  %v9893_v43 = vld [vmem:[#allocation220_spill] sm:$0xff]  ;;  %v9895_v53 = vld [vmem:[#allocation218_spill] sm:$0xff] }
 0x5ca   :  { %v913_v56 = vadd.f32 %v9883_v62, %v873_v49  ;;  %v992_v58 = vadd.f32 %v9884_v35, %v952_v42  ;;  %2785 = vrot.lane.b32.xlu1 %v2777_v3, %s4764_s28  ;;  %2783 = vrot.lane.b32.xlu0 %v2775_v14, %s4764_s28  ;;  %v2801_v28 = vmul.f32 %v9886_v26, %v2800_v51  ;;  %v2814_v59 = vrot.slane %v2802_v17, 5  ;;  %v9894_v49 = vld [vmem:[#allocation221_spill] sm:$0xff] }
 0x5cb   :  { %v2805_v38 = vmul.f32 %v7565_v41, %v2800_v51  ;;  %v954_v12 = vadd.f32 %v9887_v27, %v914_v48  ;;  %v1031_v15 = vadd.f32 %v9890_v55, %v991_v18  ;;  %v2782_v1 = vsel %vm724_vm8, %v2779_v37, %v2781_v21  ;;  %v9896_v21 = vld [vmem:[#allocation219_spill] sm:$0xff]  ;;  %v9899_v27 = vld [vmem:[#allocation222_spill] sm:$0xff] }
 0x5cc   :  { %v953_v33 = vadd.f32 %v9888_v44, %v913_v56  ;;  %v1032_v0 = vadd.f32 %v9889_v5, %v992_v58  ;;  %v2816_v47 = vrot.slane %v2803_v24, 5  ;;  %v2806_v57 = vmul.f32 %v2800_v51, %v7546_v52 }
 0x5cd   :  { %v994_v14 = vadd.f32 %v9891_v19, %v954_v12  ;;  %v1071_v2 = vadd.f32 %v9894_v49, %v1031_v15  ;;  %v2813_v42 = vrot.slane %v2801_v28, 5  ;;  %v2804_v39 = vmul.f32 %v7349_v30, %v2800_v51  ;;  %v7779_v48 = vpop.permute.xlu1 %2049  ;;  %v7781_v62 = vpop.permute.xlu0 %2047  ;;  %v9897_v51 = vld [vmem:[#allocation15_spill] sm:$0xff]  ;;  %v9902_v15 = vld [vmem:[#allocation225_spill] sm:$0xff] }
 0x5ce   :  { %v993_v61 = vadd.f32 %v9892_v4, %v953_v33  ;;  %v1072_v36 = vadd.f32 %v9893_v43, %v1032_v0  ;;  %2789 = vrot.lane.b32.xlu1 %v2782_v1, %s4764_s28  ;;  %2787 = vrot.lane.b32.xlu0 %v2780_v34, %s4764_s28  ;;  %v2840_v37 = vstv %s7736_s13  ;;  %v2819_v24 = vrot.slane %v2805_v38, 5  ;;  %v9898_v34 = vld [vmem:[#allocation197_spill] sm:$0xff]  ;;  %v9900_v38 = vld [vmem:[#allocation223_spill] sm:$0xff]  ;;  %v9901_v0 = vld [vmem:[#allocation224_spill] sm:$0xff] }
 0x5cf   :  { %v1034_v3 = vadd.f32 %v9895_v53, %v994_v14  ;;  %v2842_v16 = vmul.f32 %v7529_v22, %v2840_v37  ;;  %v2817_v56 = vsel %vm757_vm9, %v2814_v59, %v2816_v47  ;;  %v2815_v35 = vsel %vm757_vm9, %v2813_v42, %v2814_v59 }
 0x5d0   :  { %v1033_v17 = vadd.f32 %v9896_v21, %v993_v61  ;;  %v2821_v58 = vrot.slane %v2806_v57, 5  ;;  %v2843_v31 = vmul.f32 %v2840_v37, %v7494_v54  ;;  %v1098_v18 = vadd.f32 %v9897_v51, %v1072_v36  ;;  %v9903_v36 = vld [vmem:[#allocation198_spill] sm:$0xff] }
 0x5d1   :  { %v1097_v28 = vadd.f32 %v9898_v34, %v1071_v2  ;;  %v1074_v12 = vadd.f32 %v9899_v27, %v1034_v3  ;;  %v2818_v33 = vrot.slane %v2804_v39, 5  ;;  %v2841_v5 = vmul.f32 %v9886_v26, %v2840_v37  ;;  %v7796_v57 = vpop.permute.xlu1 %2085  ;;  %v7798_v19 = vpop.permute.xlu0 %2083  ;;  %v9904_v2 = vld [vmem:[#allocation199_spill] sm:$0xff]  ;;  %v9905_v39 = vld [vmem:[#allocation228_spill] sm:$0xff]  ;;  %v9906_v3 = vld [vmem:[#allocation229_spill] sm:$0xff] }
 0x5d2   :  { %v1073_v44 = vadd.f32 %v9900_v38, %v1033_v17  ;;  %2825 = vrot.lane.b32.xlu1 %v2817_v56, %s4764_s28  ;;  %2823 = vrot.lane.b32.xlu0 %v2815_v35, %s4764_s28  ;;  %v1138_v55 = vadd.f32 %v9901_v0, %v1098_v18  ;;  %v2854_v59 = vrot.slane %v2842_v16, 6  ;;  %v2845_v47 = vmul.f32 %v7565_v41, %v2840_v37  ;;  %v9907_v16 = vld [vmem:[#allocation226_spill] sm:$0xff]  ;;  %v9908_v35 = vld [vmem:[#allocation227_spill] sm:$0xff]  ;;  %v9910_v18 = vld [vmem:[#allocation233_spill] sm:$0xff] }
 0x5d3   :  { %v1137_v1 = vadd.f32 %v9902_v15, %v1097_v28  ;;  %v2822_v14 = vsel %vm757_vm9, %v2819_v24, %v2821_v58  ;;  %v2820_v4 = vsel %vm757_vm9, %v2818_v33, %v2819_v24  ;;  %v2856_v61 = vrot.slane %v2843_v31, 6  ;;  %v9909_v31 = vld [vmem:[#allocation232_spill] sm:$0xff]  ;;  %v9911_v33 = vld [vmem:[#allocation230_spill] sm:$0xff]  ;;  %v9912_v0 = vld [vmem:[#allocation231_spill] sm:$0xff] }
 0x5d4   :  { %v2846_v43 = vmul.f32 %v2840_v37, %v7546_v52  ;;  %v1100_v49 = vadd.f32 %v9903_v36, %v1074_v12  ;;  %v1099_v42 = vadd.f32 %v9904_v2, %v1073_v44  ;;  %v1178_v53 = vadd.f32 %v9905_v39, %v1138_v55  ;;  %v9913_v15 = vld [vmem:[#allocation236_spill] sm:$0xff] }
 0x5d5   :  { %v1177_v21 = vadd.f32 %v9906_v3, %v1137_v1  ;;  %v2853_v17 = vrot.slane %v2841_v5, 6  ;;  %v2844_v24 = vmul.f32 %v7349_v30, %v2840_v37  ;;  %v7818_v28 = vpop.permute.xlu1 %2089  ;;  %v7820_v27 = vpop.permute.xlu0 %2087  ;;  %v2857_v12 = vsel %vm790_vm10, %v2854_v59, %v2856_v61 }
 0x5d6   :  { %2829 = vrot.lane.b32.xlu1 %v2822_v14, %s4764_s28  ;;  %2827 = vrot.lane.b32.xlu0 %v2820_v4, %s4764_s28  ;;  %v1140_v56 = vadd.f32 %v9907_v16, %v1100_v49  ;;  %v1139_v58 = vadd.f32 %v9908_v35, %v1099_v42  ;;  %v1218_v51 = vadd.f32 %v9909_v31, %v1178_v53  ;;  %v2859_v44 = vrot.slane %v2845_v47, 6  ;;  %v9914_v14 = vld [vmem:[#allocation237_spill] sm:$0xff]  ;;  %v9915_v49 = vld [vmem:[#allocation234_spill] sm:$0xff]  ;;  %v9920_v35 = vld [vmem:[#allocation239_spill] sm:$0xff] }
 0x5d7   :  { %v1217_v34 = vadd.f32 %v9910_v18, %v1177_v21  ;;  %v2855_v38 = vsel %vm790_vm10, %v2853_v17, %v2854_v59  ;;  %v2861_v37 = vrot.slane %v2846_v43, 6  ;;  %v2858_v36 = vrot.slane %v2844_v24, 6  ;;  %v9916_v59 = vld [vmem:[#allocation235_spill] sm:$0xff]  ;;  %v9917_v43 = vld [vmem:[#allocation240_spill] sm:$0xff]  ;;  %v9918_v42 = vld [vmem:[#allocation241_spill] sm:$0xff] }
 0x5d8   :  { %v1180_v5 = vadd.f32 %v9911_v33, %v1140_v56  ;;  %v1179_v55 = vadd.f32 %v9912_v0, %v1139_v58  ;;  %v1258_v1 = vadd.f32 %v9913_v15, %v1218_v51  ;;  %v2880_v16 = vstv %s7803_s14  ;;  %v9919_v56 = vld [vmem:[#allocation238_spill] sm:$0xff]  ;;  %v9921_v31 = vld [vmem:[#allocation244_spill] sm:$0xff]  ;;  %v9922_v18 = vld [vmem:[#allocation245_spill] sm:$0xff] }
 0x5d9   :  { %v1257_v4 = vadd.f32 %v9914_v14, %v1217_v34  ;;  %v7834_v53 = vpop.permute.xlu1 %2125  ;;  %v7836_v3 = vpop.permute.xlu0 %2123  ;;  %v2862_v21 = vsel %vm790_vm10, %v2859_v44, %v2861_v37  ;;  %v2860_v17 = vsel %vm790_vm10, %v2858_v36, %v2859_v44  ;;  %v9925_v0 = vld [vmem:[#allocation248_spill] sm:$0xff]  ;;  %v2881_v36 = vmul.f32 %v9886_v26, %v2880_v16 }
 0x5da   :  { %2865 = vrot.lane.b32.xlu1 %v2857_v12, %s4764_s28  ;;  %2863 = vrot.lane.b32.xlu0 %v2855_v38, %s4764_s28  ;;  %v1220_v61 = vadd.f32 %v9915_v49, %v1180_v5  ;;  %v1219_v47 = vadd.f32 %v9916_v59, %v1179_v55  ;;  %v1298_v2 = vadd.f32 %v9917_v43, %v1258_v1  ;;  %v2906_v12 = vstv %s7812_s17  ;;  %v9923_v38 = vld [vmem:[#allocation242_spill] sm:$0xff]  ;;  %v9924_v5 = vld [vmem:[#allocation243_spill] sm:$0xff]  ;;  %v9926_v55 = vld [vmem:[#allocation249_spill] sm:$0xff] }
 0x5db   :  { %v1297_v39 = vadd.f32 %v9918_v42, %v1257_v4  ;;  %v2882_v4 = vmul.f32 %v7529_v22, %v2880_v16  ;;  %v2908_v49 = vmul.f32 %v7529_v22, %v2906_v12  ;;  %v9927_v59 = vld [vmem:[#allocation246_spill] sm:$0xff]  ;;  %v9928_v43 = vld [vmem:[#allocation247_spill] sm:$0xff]  ;;  %v9929_v42 = vld [vmem:[#allocation252_spill] sm:$0xff] }
 0x5dc   :  { %v1260_v24 = vadd.f32 %v9919_v56, %v1220_v61  ;;  %v1259_v58 = vadd.f32 %v9920_v35, %v1219_v47  ;;  %v1338_v51 = vadd.f32 %v9921_v31, %v1298_v2  ;;  %v2909_v61 = vmul.f32 %v2906_v12, %v7494_v54 }
 0x5dd   :  { %v1337_v34 = vadd.f32 %v9922_v18, %v1297_v39  ;;  %v7852_v1 = vpop.permute.xlu1 %2129  ;;  %v7854_v14 = vpop.permute.xlu0 %2127  ;;  %v2883_v56 = vmul.f32 %v7349_v30, %v2880_v16  ;;  %v2911_v35 = vmul.f32 %v7565_v41, %v2906_v12 }
 0x5de   :  { %2869 = vrot.lane.b32.xlu1 %v2862_v21, %s4764_s28  ;;  %2867 = vrot.lane.b32.xlu0 %v2860_v17, %s4764_s28  ;;  %v1300_v33 = vadd.f32 %v9923_v38, %v1260_v24  ;;  %v1299_v37 = vadd.f32 %v9924_v5, %v1259_v58  ;;  %v1364_v44 = vadd.f32 %v9925_v0, %v1338_v51  ;;  %v9930_v21 = vld [vmem:[#allocation253_spill] sm:$0xff]  ;;  %v9931_v58 = vld [vmem:[#allocation250_spill] sm:$0xff]  ;;  %v9932_v51 = vld [vmem:[#allocation251_spill] sm:$0xff]  ;;  %s7975_s28 = sld [smem:[#allocation4 + $0x31]] }
 0x5df   :  { %v1363_v15 = vadd.f32 %v9926_v55, %v1337_v34  ;;  %v2907_v24 = vmul.f32 %v9886_v26, %v2906_v12  ;;  %v9933_v34 = vld [vmem:[#allocation256_spill] sm:$0xff]  ;;  %v2920_v55 = vrot.slane %v2908_v49, 1  ;;  %v9939_v49 = vld [vmem:[#allocation258_spill] sm:$0xff] }
 0x5e0   :  { %v1340_v47 = vadd.f32 %v9927_v59, %v1300_v33  ;;  %v1339_v2 = vadd.f32 %v9928_v43, %v1299_v37  ;;  %v1404_v39 = vadd.f32 %v9929_v42, %v1364_v44  ;;  %v9934_v33 = vld [vmem:[#allocation257_spill] sm:$0xff]  ;;  %v2884_v44 = vmul.f32 %v7565_v41, %v2880_v16  ;;  %v9936_v43 = vld [vmem:[#allocation255_spill] sm:$0xff]  ;;  %v9937_v42 = vld [vmem:[#allocation260_spill] sm:$0xff] }
 0x5e1   :  { %v1403_v17 = vadd.f32 %v9930_v21, %v1363_v15  ;;  %v7873_v37 = vpop.permute.xlu1 %2151  ;;  %v7875_v0 = vpop.permute.xlu0 %2149  ;;  %v2922_v15 = vrot.slane %v2909_v61, 1  ;;  %v9938_v21 = vld [vmem:[#allocation261_spill] sm:$0xff]  ;;  %v2910_v16 = vmul.f32 %v7349_v30, %v2906_v12 }
 0x5e2   :  { %2891 = vrot.lane.b32.xlu1 %v2882_v4, %s4765_s6  ;;  %2889 = vrot.lane.b32.xlu0 %v2881_v36, %s4765_s6  ;;  %v1366_v31 = vadd.f32 %v9931_v58, %v1340_v47  ;;  %v1365_v18 = vadd.f32 %v9932_v51, %v1339_v2  ;;  %v1444_v38 = vadd.f32 %v9933_v34, %v1404_v39  ;;  %v9935_v36 = vld [vmem:[#allocation254_spill] sm:$0xff]  ;;  %v2925_v58 = vrot.slane %v2911_v35, 1  ;;  %v9940_v51 = vld [vmem:[#allocation259_spill] sm:$0xff] }
 0x5e3   :  { %v1443_v5 = vadd.f32 %v9934_v33, %v1403_v17  ;;  %v2912_v4 = vmul.f32 %v2906_v12, %v7546_v52  ;;  %v2919_v17 = vrot.slane %v2907_v24, 1  ;;  %v9941_v33 = vld [vmem:[#allocation264_spill] sm:$0xff]  ;;  %v9944_v35 = vld [vmem:[#allocation22_spill] sm:$0xff] }
 0x5e4   :  { %v1406_v59 = vadd.f32 %v9935_v36, %v1366_v31  ;;  %v1405_v47 = vadd.f32 %v9936_v43, %v1365_v18  ;;  %v1484_v2 = vadd.f32 %v9937_v42, %v1444_v38  ;;  %v9942_v36 = vld [vmem:[#allocation265_spill] sm:$0xff]  ;;  %v2949_v30 = vmul.f32 %v9944_v35, %v7494_v54  ;;  %v9945_v12 = vld [vmem:[#allocation262_spill] sm:$0xff]  ;;  %v9947_v42 = vld [vmem:[#allocation268_spill] sm:$0xff] }
 0x5e5   :  { %v1483_v39 = vadd.f32 %v9938_v21, %v1443_v5  ;;  %v7890_v43 = vpop.permute.xlu1 %2155  ;;  %v7892_v38 = vpop.permute.xlu0 %2153  ;;  %v2923_v5 = vsel %vm625_vm11, %v2920_v55, %v2922_v15  ;;  %v2927_v24 = vrot.slane %v2912_v4, 1  ;;  %v9948_v21 = vld [vmem:[#allocation269_spill] sm:$0xff]  ;;  %v9949_v15 = vld [vmem:[#allocation266_spill] sm:$0xff] }
 0x5e6   :  { %2895 = vrot.lane.b32.xlu1 %v2884_v44, %s4765_s6  ;;  %2893 = vrot.lane.b32.xlu0 %v2883_v56, %s4765_s6  ;;  %v1446_v61 = vadd.f32 %v9939_v49, %v1406_v59  ;;  %v1445_v34 = vadd.f32 %v9940_v51, %v1405_v47  ;;  %v1524_v31 = vadd.f32 %v9941_v33, %v1484_v2  ;;  %v9946_v59 = vld [vmem:[#allocation263_spill] sm:$0xff]  ;;  %v2924_v49 = vrot.slane %v2910_v16, 1 }
 0x5e7   :  { %v1523_v18 = vadd.f32 %v9942_v36, %v1483_v39  ;;  %9943 = vst [vmem:[#allocation14_spill] sm:$0xff] %v7892_v38  ;;  %v2921_v56 = vsel %vm625_vm11, %v2919_v17, %v2920_v55  ;;  %v9950_v55 = vld [vmem:[#allocation267_spill] sm:$0xff]  ;;  %v9951_v17 = vld [vmem:[#allocation272_spill] sm:$0xff]  ;;  %v9952_v36 = vld [vmem:[#allocation273_spill] sm:$0xff]  ;;  %v2952_v16 = vmul.f32 %v9944_v35, %v7546_v52 }
 0x5e8   :  { %v1486_v44 = vadd.f32 %v9945_v12, %v1446_v61  ;;  %v1485_v47 = vadd.f32 %v9946_v59, %v1445_v34  ;;  %v1564_v2 = vadd.f32 %v9947_v42, %v1524_v31  ;;  %v2928_v31 = vsel %vm625_vm11, %v2925_v58, %v2927_v24 }
 0x5e9   :  { %v1563_v39 = vadd.f32 %v9948_v21, %v1523_v18  ;;  %v7908_v61 = vpop.permute.xlu1 %2191  ;;  %v7910_v34 = vpop.permute.xlu0 %2189  ;;  %v2926_v18 = vsel %vm625_vm11, %v2924_v49, %v2925_v58 }
 0x5ea   :  { %2931 = vrot.lane.b32.xlu1 %v2923_v5, %s4765_s6  ;;  %2929 = vrot.lane.b32.xlu0 %v2921_v56, %s4765_s6  ;;  %v1526_v51 = vadd.f32 %v9949_v15, %v1486_v44  ;;  %v1525_v4 = vadd.f32 %v9950_v55, %v1485_v47  ;;  %v1604_v33 = vadd.f32 %v9951_v17, %v1564_v2  ;;  %v2962_v5 = vrot.slane %v2949_v30, 2  ;;  %v9953_v56 = vld [vmem:[#allocation270_spill] sm:$0xff]  ;;  %v9954_v44 = vld [vmem:[#allocation271_spill] sm:$0xff]  ;;  %v9955_v47 = vld [vmem:[#allocation276_spill] sm:$0xff] }
 0x5eb   :  { %v1603_v38 = vadd.f32 %v9952_v36, %v1563_v39  ;;  %v9956_v2 = vld [vmem:[#allocation277_spill] sm:$0xff]  ;;  %v9957_v39 = vld [vmem:[#allocation274_spill] sm:$0xff]  ;;  %v9958_v15 = vld [vmem:[#allocation275_spill] sm:$0xff]  ;;  %v2967_v36 = vrot.slane %v2952_v16, 2 }
 0x5ec   :  { %v1566_v12 = vadd.f32 %v9953_v56, %v1526_v51  ;;  %v1565_v59 = vadd.f32 %v9954_v44, %v1525_v4  ;;  %v1630_v42 = vadd.f32 %v9955_v47, %v1604_v33  ;;  %v9959_v30 = vld [vmem:[#allocation280_spill] sm:$0xff]  ;;  %v9960_v55 = vld [vmem:[#allocation281_spill] sm:$0xff]  ;;  %v9963_v4 = vld [vmem:[#allocation86_spill] sm:$0xff] }
 0x5ed   :  { %v1629_v21 = vadd.f32 %v9956_v2, %v1603_v38  ;;  %v7926_v17 = vpop.permute.xlu1 %2195  ;;  %v7928_v51 = vpop.permute.xlu0 %2193  ;;  %v9964_v33 = vrot.slane %v9963_v4, 2  ;;  %v9966_v56 = vld [vmem:[#allocation278_spill] sm:$0xff]  ;;  %v9967_v44 = vld [vmem:[#allocation279_spill] sm:$0xff]  ;;  %v9968_v47 = vld [vmem:[#allocation284_spill] sm:$0xff] }
 0x5ee   :  { %2935 = vrot.lane.b32.xlu1 %v2928_v31, %s4765_s6  ;;  %2933 = vrot.lane.b32.xlu0 %v2926_v18, %s4765_s6  ;;  %v1606_v24 = vadd.f32 %v9957_v39, %v1566_v12  ;;  %v1605_v58 = vadd.f32 %v9958_v15, %v1565_v59  ;;  %v1670_v49 = vadd.f32 %v9959_v30, %v1630_v42  ;;  %v9965_v31 = vld [vmem:[#allocation23_spill] sm:$0xff]  ;;  %v9969_v2 = vld [vmem:[#allocation285_spill] sm:$0xff]  ;;  %v9971_v15 = vld [vmem:[#allocation282_spill] sm:$0xff] }
 0x5ef   :  { %v1669_v35 = vadd.f32 %v9960_v55, %v1629_v21  ;;  %9961 = vst [vmem:[#allocation18_spill] sm:$0xff] %v7926_v17  ;;  %9962 = vst [vmem:[#allocation292_spill] sm:$0xff] %v7928_v51  ;;  %v2963_v38 = vsel %vm658_vm6, %v9964_v33, %v2962_v5  ;;  %v2989_v18 = vmul.f32 %v9965_v31, %v7494_v54  ;;  %v9970_v39 = vld [vmem:[#allocation89_spill] sm:$0xff]  ;;  %v9972_v5 = vld [vmem:[#allocation283_spill] sm:$0xff] }
 0x5f0   :  { %v1632_v12 = vadd.f32 %v9966_v56, %v1606_v24  ;;  %v1631_v59 = vadd.f32 %v9967_v44, %v1605_v58  ;;  %v1710_v42 = vadd.f32 %v9968_v47, %v1670_v49  ;;  %v9973_v55 = vld [vmem:[#allocation288_spill] sm:$0xff]  ;;  %v9974_v33 = vld [vmem:[#allocation289_spill] sm:$0xff]  ;;  %v9975_v49 = vld [vmem:[#allocation87_spill] sm:$0xff]  ;;  %v2992_v44 = vmul.f32 %v9965_v31, %v7546_v52 }
 0x5f1   :  { %v1709_v21 = vadd.f32 %v9969_v2, %v1669_v35  ;;  %v7946_v24 = vpop.permute.xlu1 %2231  ;;  %v7948_v58 = vpop.permute.xlu0 %2229  ;;  %v9976_v56 = vrot.slane %v9975_v49, 2  ;;  %v9977_v47 = vld [vmem:[#allocation286_spill] sm:$0xff]  ;;  %v9978_v2 = vld [vmem:[#allocation287_spill] sm:$0xff]  ;;  %v9985_v31 = vld [vmem:[#allocation300_spill] sm:$0xff] }
 0x5f2   :  { %2971 = vrot.lane.b32.xlu1 %v2963_v38, %s4765_s6  ;;  %2969 = vrot.lane.b32.xlu0 %v9970_v39, %s4765_s6  ;;  %v1672_v30 = vadd.f32 %v9971_v15, %v1632_v12  ;;  %v1671_v16 = vadd.f32 %v9972_v5, %v1631_v59  ;;  %v1750_v4 = vadd.f32 %v9973_v55, %v1710_v42  ;;  %v3002_v38 = vrot.slane %v2989_v18, 3  ;;  %v9979_v39 = vld [vmem:[#allocation293_spill] sm:$0xff]  ;;  %v9980_v15 = vld [vmem:[#allocation294_spill] sm:$0xff]  ;;  %v9984_v49 = vld [vmem:[#allocation299_spill] sm:$0xff] }
 0x5f3   :  { %v1749_v51 = vadd.f32 %v9974_v33, %v1709_v21  ;;  %v2968_v35 = vsel %vm658_vm6, %v9976_v56, %v2967_v36  ;;  %v9981_v5 = vld [vmem:[#allocation93_spill] sm:$0xff]  ;;  %v9982_v55 = vld [vmem:[#allocation290_spill] sm:$0xff]  ;;  %v9983_v36 = vld [vmem:[#allocation291_spill] sm:$0xff] }
 0x5f4   :  { %v1712_v12 = vadd.f32 %v9977_v47, %v1672_v30  ;;  %v1711_v59 = vadd.f32 %v9978_v2, %v1671_v16  ;;  %v1790_v42 = vadd.f32 %v9979_v39, %v1750_v4  ;;  %v9986_v4 = vld [vmem:[#allocation88_spill] sm:$0xff] }
 0x5f5   :  { %v1789_v21 = vadd.f32 %v9980_v15, %v1749_v51  ;;  %v7966_v30 = vpop.permute.xlu1 %2235  ;;  %v7968_v16 = vpop.permute.xlu0 %2233  ;;  %v9987_v47 = vrot.slane %v9986_v4, 3  ;;  %v9988_v2 = vld [vmem:[#allocation24_spill] sm:$0xff]  ;;  %v9990_v15 = vld [vmem:[#allocation297_spill] sm:$0xff] }
 0x5f6   :  { %2975 = vrot.lane.b32.xlu1 %v2968_v35, %s4765_s6  ;;  %2973 = vrot.lane.b32.xlu0 %v9981_v5, %s4765_s6  ;;  %v1752_v33 = vadd.f32 %v9982_v55, %v1712_v12  ;;  %v1751_v18 = vadd.f32 %v9983_v36, %v1711_v59  ;;  %v1830_v56 = vadd.f32 %v9984_v49, %v1790_v42  ;;  %v3007_v35 = vrot.slane %v2992_v44, 3  ;;  %v9989_v12 = vld [vmem:[#allocation296_spill] sm:$0xff]  ;;  %v9992_v55 = vld [vmem:[#allocation305_spill] sm:$0xff] }
 0x5f7   :  { %v1829_v17 = vadd.f32 %v9985_v31, %v1789_v21  ;;  %v3003_v51 = vsel %vm691_vm7, %v9987_v47, %v3002_v38  ;;  %v3029_v39 = vmul.f32 %v9988_v2, %v7494_v54  ;;  %v9991_v5 = vld [vmem:[#allocation304_spill] sm:$0xff]  ;;  %v9993_v49 = vld [vmem:[#allocation97_spill] sm:$0xff]  ;;  %v9995_v31 = vld [vmem:[#allocation302_spill] sm:$0xff] }
 0x5f8   :  { %v1792_v59 = vadd.f32 %v9989_v12, %v1752_v33  ;;  %v1791_v42 = vadd.f32 %v9990_v15, %v1751_v18  ;;  %v1870_v21 = vadd.f32 %v9991_v5, %v1830_v56  ;;  %v9994_v38 = vld [vmem:[#allocation301_spill] sm:$0xff]  ;;  %v3032_v5 = vmul.f32 %v9988_v2, %v7546_v52 }
 0x5f9   :  { %v1869_v36 = vadd.f32 %v9992_v55, %v1829_v17  ;;  %v7990_v18 = vpop.permute.xlu1 %2271  ;;  %v7992_v56 = vpop.permute.xlu0 %2269  ;;  %v9996_v17 = vld [vmem:[#allocation90_spill] sm:$0xff]  ;;  %v3042_v15 = vrot.slane %v3029_v39, 4 }
 0x5fa   :  { %3011 = vrot.lane.b32.xlu1 %v3003_v51, %s4765_s6  ;;  %3009 = vrot.lane.b32.xlu0 %v9993_v49, %s4765_s6  ;;  %v1832_v44 = vadd.f32 %v9994_v38, %v1792_v59  ;;  %v1831_v4 = vadd.f32 %v9995_v31, %v1791_v42  ;;  %v1896_v47 = vadd.f32 %v7561_v23, %v1870_v21  ;;  %v9997_v12 = vrot.slane %v9996_v17, 3  ;;  %v9998_v55 = vld [vmem:[#allocation306_spill] sm:$0xff]  ;;  %v9999_v42 = vld [vmem:[#allocation307_spill] sm:$0xff] }
 0x5fb   :  { %v1895_v33 = vadd.f32 %v7563_v20, %v1869_v36  ;;  %v10000_v21 = vld [vmem:[#allocation98_spill] sm:$0xff] }
 0x5fc   :  { %v3008_v51 = vsel %vm691_vm7, %v9997_v12, %v3007_v35  ;;  %v1872_v59 = vadd.f32 %v9998_v55, %v1832_v44  ;;  %v1871_v49 = vadd.f32 %v9999_v42, %v1831_v4  ;;  %v1936_v23 = vadd.f32 %v7615_v10, %v1896_v47  ;;  %v10001_v10 = vld [vmem:[#allocation91_spill] sm:$0xff]  ;;  %v10003_v47 = vld [vmem:[#allocation25_spill] sm:$0xff] }
 0x5fd   :  { %v1935_v20 = vadd.f32 %v7617_v9, %v1895_v33  ;;  %v8010_v38 = vpop.permute.xlu1 %2275  ;;  %v8012_v44 = vpop.permute.xlu0 %2273  ;;  %v10002_v9 = vrot.slane %v10001_v10, 4  ;;  %v3047_v4 = vrot.slane %v3032_v5, 4  ;;  %v3069_v33 = vmul.f32 %v10003_v47, %v7494_v54  ;;  %v10004_v12 = vld [vmem:[#allocation99_spill] sm:$0xff] }
 0x5fe   :  { %3015 = vrot.lane.b32.xlu1 %v3008_v51, %s4765_s6  ;;  %3013 = vrot.lane.b32.xlu0 %v10000_v21, %s4765_s6  ;;  %v1898_v35 = vadd.f32 %v7591_v50, %v1872_v59  ;;  %v1897_v39 = vadd.f32 %v7593_v6, %v1871_v49  ;;  %v1976_v2 = vadd.f32 %v7667_v13, %v1936_v23  ;;  %v2412_v50 = vstv %s7975_s28  ;;  %v10007_v21 = vld [vmem:[#allocation100_spill] sm:$0xff] }
 0x5ff   :  { %v1975_v36 = vadd.f32 %v7669_v60, %v1935_v20  ;;  %v3043_v31 = vsel %vm724_vm8, %v10002_v9, %v3042_v15  ;;  %v3146_v51 = vstv %s7984_s18  ;;  %v3082_v49 = vrot.slane %v3069_v33, 5 }
 0x600   :  { %v1938_v17 = vadd.f32 %v7638_v25, %v1898_v35  ;;  %v1937_v6 = vadd.f32 %v7640_v45, %v1897_v39  ;;  %v2016_v13 = vadd.f32 %v7719_v8, %v1976_v2  ;;  %v10005_v8 = vld [vmem:[#allocation92_spill] sm:$0xff]  ;;  %v3072_v23 = vmul.f32 %v10003_v47, %v7546_v52 }
 0x601   :  { %v2015_v60 = vadd.f32 %v7721_v40, %v1975_v36  ;;  %v8032_v59 = vpop.permute.xlu1 %2311  ;;  %v8034_v45 = vpop.permute.xlu0 %2309  ;;  %v10006_v40 = vrot.slane %v10005_v8, 4  ;;  %v8051_v35 = vld [vmem:[#allocation2 + $0x48] sm:$0xff] }
 0x602   :  { %3051 = vrot.lane.b32.xlu1 %v3043_v31, %s4765_s6  ;;  %3049 = vrot.lane.b32.xlu0 %v10004_v12, %s4765_s6  ;;  %v1978_v15 = vadd.f32 %v7696_v32, %v1938_v17  ;;  %v1977_v5 = vadd.f32 %v7698_v29, %v1937_v6  ;;  %v2056_v55 = vadd.f32 %v7762_v46, %v2016_v13  ;;  %v10010_v31 = vld [vmem:[#allocation94_spill] sm:$0xff]  ;;  %v3087_v33 = vrot.slane %v3072_v23, 5  ;;  %v10014_v12 = vld [vmem:[#allocation101_spill] sm:$0xff] }
 0x603   :  { %v2055_v25 = vadd.f32 %v7764_v11, %v2015_v60  ;;  %v3048_v42 = vsel %vm724_vm8, %v10006_v40, %v3047_v4  ;;  %v8042_v32 = vmul.f32 %v9886_v26, %v2412_v50  ;;  %10008 = vst [vmem:[#allocation200_spill] sm:$0xff] %v8051_v35  ;;  %v8054_v39 = vmul.f32 %v8051_v35, %v2412_v50  ;;  %v8056_v26 = vld [vmem:[#allocation2 + $0x30] sm:$0xff]  ;;  %v10015_v40 = vld [vmem:[#allocation95_spill] sm:$0xff] }
 0x604   :  { %v2018_v29 = vadd.f32 %v7742_v7, %v1978_v15  ;;  %v2017_v46 = vadd.f32 %v7744_v63, %v1977_v5  ;;  %v2096_v11 = vadd.f32 %v7796_v57, %v2056_v55  ;;  %10009 = vst [vmem:[#allocation201_spill] sm:$0xff] %v8056_v26  ;;  %v8059_v7 = vmul.f32 %v8056_v26, %v3146_v51  ;;  %v10012_v17 = vld [vmem:[#allocation26_spill] sm:$0xff] }
 0x605   :  { %v2095_v20 = vadd.f32 %v7798_v19, %v2055_v25  ;;  %v8062_v63 = vmul.f32 %v8051_v35, %v3146_v51  ;;  %v8068_v10 = vpop.permute.xlu1 %2315  ;;  %v8070_v9 = vpop.permute.xlu0 %2313  ;;  %v10011_v4 = vrot.slane %v10010_v31, 5  ;;  %v3109_v6 = vmul.f32 %v10012_v17, %v7494_v54 }
 0x606   :  { %3055 = vrot.lane.b32.xlu1 %v3048_v42, %s4765_s6  ;;  %3053 = vrot.lane.b32.xlu0 %v10007_v21, %s4765_s6  ;;  %v2058_v57 = vadd.f32 %v7779_v48, %v2018_v29  ;;  %v2057_v19 = vadd.f32 %v7781_v62, %v2017_v46  ;;  %v2136_v2 = vadd.f32 %v7834_v53, %v2096_v11  ;;  %v10013_v48 = vld [vmem:[#allocation27_spill] sm:$0xff]  ;;  %v10016_v42 = vrot.slane %v10015_v40, 5  ;;  %v10019_v11 = vld [vmem:[#allocation28_spill] sm:$0xff]  ;;  %v10020_v21 = vld [vmem:[#allocation29_spill] sm:$0xff] }
 0x607   :  { %v2135_v36 = vadd.f32 %v7836_v3, %v2095_v20  ;;  %v3083_v47 = vsel %vm757_vm9, %v10011_v4, %v3082_v49  ;;  %v2425_v13 = vmul.f32 %v10013_v48, %v7494_v54  ;;  %v8087_v15 = vmul.f32 %v7529_v22, %v2412_v50 }
 0x608   :  { %v2098_v62 = vadd.f32 %v7818_v28, %v2058_v57  ;;  %v2097_v53 = vadd.f32 %v7820_v27, %v2057_v19  ;;  %v2162_v3 = vadd.f32 %v7873_v37, %v2136_v2  ;;  %v8090_v5 = vmul.f32 %v7565_v41, %v2412_v50 }
 0x609   :  { %v2161_v60 = vadd.f32 %v7875_v0, %v2135_v36  ;;  %v8093_v55 = vmul.f32 %v7529_v22, %v3146_v51  ;;  %v2352_v25 = vpop.permute.xlu1 %2351  ;;  %v2350_v8 = vpop.permute.xlu0 %2349  ;;  %v3088_v49 = vsel %vm757_vm9, %v10016_v42, %v3087_v33  ;;  %v3122_v23 = vrot.slane %v3109_v6, 6  ;;  %v10022_v36 = vld [vmem:[#allocation292_spill] sm:$0xff] }
 0x60a   :  { %3091 = vrot.lane.b32.xlu1 %v3083_v47, %s4765_s6  ;;  %3089 = vrot.lane.b32.xlu0 %v10014_v12, %s4765_s6  ;;  %v2138_v28 = vadd.f32 %v7852_v1, %v2098_v62  ;;  %v2137_v27 = vadd.f32 %v7854_v14, %v2097_v53  ;;  %v2202_v37 = vadd.f32 %v7908_v61, %v2162_v3  ;;  %v2438_v50 = vrot.slane %v2425_v13, 1  ;;  %v10017_v1 = vld [vmem:[#allocation14_spill] sm:$0xff]  ;;  %v10023_v33 = vld [vmem:[#allocation96_spill] sm:$0xff]  ;;  %v10025_v13 = vld [vmem:[#allocation103_spill] sm:$0xff] }
 0x60b   :  { %v2201_v0 = vadd.f32 %v7910_v34, %v2161_v60  ;;  %v3112_v22 = vmul.f32 %v10012_v17, %v7546_v52  ;;  %v10018_v34 = vld [vmem:[#allocation102_spill] sm:$0xff]  ;;  %v2457_v20 = vmul.f32 %v10019_v11, %v7494_v54  ;;  %v2489_v57 = vmul.f32 %v10020_v21, %v7494_v54  ;;  %v10030_v42 = vld [vmem:[#allocation32_spill] sm:$0xff] }
 0x60c   :  { %v2164_v29 = vadd.f32 %v7890_v43, %v2138_v28  ;;  %v2163_v46 = vadd.f32 %v10017_v1, %v2137_v27  ;;  %v2242_v14 = vadd.f32 %v7946_v24, %v2202_v37  ;;  %v8116_v19 = vmul.f32 %v7565_v41, %v3146_v51  ;;  %v10021_v43 = vld [vmem:[#allocation18_spill] sm:$0xff]  ;;  %v10027_v41 = vld [vmem:[#allocation30_spill] sm:$0xff] }
 0x60d   :  { %v2241_v61 = vadd.f32 %v7948_v58, %v2201_v0  ;;  %v2356_v4 = vpop.permute.xlu1 %2355  ;;  %v2354_v47 = vpop.permute.xlu0 %2353  ;;  %v10024_v17 = vrot.slane %v10023_v33, 6  ;;  %v10026_v62 = vrot.slane %v10025_v13, 1  ;;  %v2521_v51 = vmul.f32 %v10027_v41, %v7494_v54  ;;  %v10028_v28 = vld [vmem:[#allocation105_spill] sm:$0xff]  ;;  %v10029_v0 = vld [vmem:[#allocation31_spill] sm:$0xff] }
 0x60e   :  { %3095 = vrot.lane.b32.xlu1 %v3088_v49, %s4765_s6  ;;  %3093 = vrot.lane.b32.xlu0 %v10018_v34, %s4765_s6  ;;  %v2204_v2 = vadd.f32 %v10021_v43, %v2164_v29  ;;  %v2203_v24 = vadd.f32 %v10022_v36, %v2163_v46  ;;  %v2282_v58 = vadd.f32 %v7990_v18, %v2242_v14  ;;  %v3127_v3 = vrot.slane %v3112_v22, 6  ;;  %v10031_v29 = vld [vmem:[#allocation110_spill] sm:$0xff] }
 0x60f   :  { %v2281_v31 = vadd.f32 %v7992_v56, %v2241_v61  ;;  %v3123_v6 = vsel %vm790_vm10, %v10024_v17, %v3122_v23  ;;  %v2439_v53 = vsel %vm625_vm11, %v10026_v62, %v2438_v50  ;;  %v2470_v27 = vrot.slane %v2457_v20, 2 }
 0x610   :  { %v2244_v60 = vadd.f32 %v7966_v30, %v2204_v2  ;;  %v2243_v18 = vadd.f32 %v7968_v16, %v2203_v24  ;;  %v2322_v56 = vadd.f32 %v8032_v59, %v2282_v58  ;;  %v2502_v37 = vrot.slane %v2489_v57, 3  ;;  %v10035_v57 = vld [vmem:[#allocation106_spill] sm:$0xff] }
 0x611   :  { %v2321_v12 = vadd.f32 %v8034_v45, %v2281_v31  ;;  %v2553_v40 = vmul.f32 %v10029_v0, %v7494_v54  ;;  %v8141_v49 = vmul.f32 %v10030_v42, %v7494_v54  ;;  %v2392_v23 = vpop.permute.xlu1 %2391  ;;  %v2534_v50 = vrot.slane %v2521_v51, 4  ;;  %v2390_v22 = vpop.permute.xlu0 %2389  ;;  %v10038_v31 = vld [vmem:[#allocation107_spill] sm:$0xff] }
 0x612   :  { %3131 = vrot.lane.b32.xlu1 %v3123_v6, %s4765_s6  ;;  %3129 = vrot.lane.b32.xlu0 %v10028_v28, %s4765_s6  ;;  %v2284_v30 = vadd.f32 %v8010_v38, %v2244_v60  ;;  %v2283_v16 = vadd.f32 %v8012_v44, %v2243_v18  ;;  %v2362_v59 = vadd.f32 %v2352_v25, %v2322_v56  ;;  %v10032_v1 = vrot.slane %v10031_v29, 6  ;;  %v10040_v60 = vld [vmem:[#allocation33_spill] sm:$0xff] }
 0x613   :  { %v2361_v45 = vadd.f32 %v2350_v8, %v2321_v12  ;;  %v2428_v14 = vmul.f32 %v10013_v48, %v7546_v52  ;;  %v2460_v54 = vmul.f32 %v10019_v11, %v7546_v52  ;;  %v10033_v8 = vld [vmem:[#allocation104_spill] sm:$0xff]  ;;  %v10036_v43 = vrot.slane %v10035_v57, 3  ;;  %v10037_v11 = vld [vmem:[#allocation63_spill] sm:$0xff]  ;;  %v10041_v18 = vld [vmem:[#allocation57_spill] sm:$0xff] }
 0x614   :  { %v3128_v46 = vsel %vm790_vm10, %v10032_v1, %v3127_v3  ;;  %v2324_v61 = vadd.f32 %v8068_v10, %v2284_v30  ;;  %v2323_v38 = vadd.f32 %v8070_v9, %v2283_v16  ;;  %v2402_v44 = vadd.f32 %v2392_v23, %v2362_v59  ;;  %v8171_v3 = vld [vmem:[#allocation2 + $0x40] sm:$0x3f] }
 0x615   :  { %v2401_v25 = vadd.f32 %v2390_v22, %v2361_v45  ;;  %v10034_v34 = vrot.slane %v10033_v8, 2  ;;  %v2503_v2 = vsel %vm691_vm7, %v10036_v43, %v2502_v37  ;;  %v2566_v36 = vrot.slane %v2553_v40, 5  ;;  %v2396_v62 = vpop.permute.xlu1 %2395  ;;  %v2394_v51 = vpop.permute.xlu0 %2393  ;;  %v10042_v12 = vld [vmem:[#allocation108_spill] sm:$0xff]  ;;  %v8179_v40 = vld [vmem:[#allocation2 + $0x58] sm:$0x3f] }
 0x616   :  { %v2598_v48 = vrot.slane %v8141_v49, 6  ;;  %3135 = vrot.lane.b32.xlu1 %v3128_v46, %s4765_s6  ;;  %3133 = vrot.lane.b32.xlu0 %v10037_v11, %s4765_s6  ;;  %v2364_v10 = vadd.f32 %v2356_v4, %v2324_v61  ;;  %v2363_v9 = vadd.f32 %v2354_v47, %v2323_v38  ;;  %v2418_v24 = vadd.f32 %v8087_v15, %v2402_v44  ;;  %v10044_v49 = vld [vmem:[#allocation58_spill] sm:$0xff]  ;;  %v10045_v45 = vld [vmem:[#allocation111_spill] sm:$0xff]  ;;  %v10053_v11 = vld [vmem:[#allocation113_spill] sm:$0xff]  ;;  %s4614_s6 = sld [smem:[#allocation4 + $0x35]] }
 0x617   :  { %v2471_v20 = vsel %vm658_vm6, %v10034_v34, %v2470_v27  ;;  %v2417_v58 = vadd.f32 %v8042_v32, %v2401_v25  ;;  %v10039_v33 = vrot.slane %v10038_v31, 4  ;;  %v2443_v6 = vrot.slane %v2428_v14, 1  ;;  %v10047_v1 = vld [vmem:[#allocation59_spill] sm:$0xff] }
 0x618   :  { %v2492_v13 = vmul.f32 %v10020_v21, %v7546_v52  ;;  %v3175_v4 = vmul.f32 %v8171_v3, %v10040_v60  ;;  %v2450_v47 = vadd.f32 %v2439_v53, %v2418_v24  ;;  %v2404_v56 = vadd.f32 %v2396_v62, %v2364_v10 }
 0x619   :  { %v2535_v17 = vsel %vm724_vm8, %v10039_v33, %v2534_v50  ;;  %v2449_v15 = vadd.f32 %v10041_v18, %v2417_v58  ;;  %v2403_v32 = vadd.f32 %v2394_v51, %v2363_v9  ;;  %v10043_v28 = vrot.slane %v10042_v12, 5  ;;  %v8195_v22 = vpop.permute.xlu1 %2625 }
 0x61a   :  { %v2475_v37 = vrot.slane %v2460_v54, 2  ;;  %v2524_v52 = vmul.f32 %v8179_v40, %v10027_v41  ;;  %v2556_v21 = vmul.f32 %v8179_v40, %v10029_v0  ;;  %3157 = vrot.lane.b32.xlu1 %v8093_v55, %s4766_s21  ;;  %3155 = vrot.lane.b32.xlu0 %v8059_v7, %s4766_s21  ;;  %v2482_v53 = vadd.f32 %v2471_v20, %v2450_v47  ;;  %v8197_v0 = vpop.permute.xlu0 %2623  ;;  %v10051_v20 = vld [vmem:[#allocation60_spill] sm:$0xff]  ;;  %v10060_v47 = vld [vmem:[#allocation109_spill] sm:$0xff] }
 0x61b   :  { %v2567_v27 = vsel %vm757_vm9, %v10043_v28, %v2566_v36  ;;  %v2481_v30 = vadd.f32 %v10044_v49, %v2449_v15  ;;  %v2420_v16 = vadd.f32 %v8090_v5, %v2404_v56  ;;  %v2419_v59 = vadd.f32 %v8054_v39, %v2403_v32  ;;  %v10048_v5 = vld [vmem:[#allocation64_spill] sm:$0xff]  ;;  %v10062_v56 = vld [vmem:[#allocation114_spill] sm:$0xff]  ;;  %v10066_v49 = vld [vmem:[#allocation67_spill] sm:$0xff] }
 0x61c   :  { %v10046_v23 = vrot.slane %v10045_v45, 1  ;;  %v2507_v50 = vrot.slane %v2492_v13, 3  ;;  %v3188_v55 = vrot.slane %v3175_v4, 1  ;;  %v3178_v7 = vmul.f32 %v8179_v40, %v10040_v60  ;;  %v10049_v39 = vld [vmem:[#allocation112_spill] sm:$0xff]  ;;  %v10058_v13 = vld [vmem:[#allocation61_spill] sm:$0xff]  ;;  %v10059_v60 = vld [vmem:[#allocation66_spill] sm:$0xff] }
 0x61d   :  { %v2514_v29 = vadd.f32 %v2503_v2, %v2482_v53  ;;  %v2513_v46 = vadd.f32 %v10047_v1, %v2481_v30  ;;  %v2451_v54 = vadd.f32 %v10048_v5, %v2419_v59  ;;  %v10050_v61 = vrot.slane %v10049_v39, 2  ;;  %v10052_v2 = vld [vmem:[#allocation65_spill] sm:$0xff]  ;;  %v8217_v24 = vpop.permute.xlu1 %2629  ;;  %v10072_v5 = vld [vmem:[#allocation116_spill] sm:$0xff] }
 0x61e   :  { %v2444_v41 = vsel %vm625_vm11, %v10046_v23, %v2443_v6  ;;  %v2539_v44 = vrot.slane %v2524_v52, 4  ;;  %v2571_v25 = vrot.slane %v2556_v21, 5  ;;  %v2588_v8 = vmul.f32 %v8179_v40, %v10030_v42  ;;  %3161 = vrot.lane.b32.xlu1 %v8116_v19, %s4766_s21  ;;  %3159 = vrot.lane.b32.xlu0 %v8062_v63, %s4766_s21  ;;  %v8219_v58 = vpop.permute.xlu0 %2627  ;;  %v10055_v42 = vld [vmem:[#allocation117_spill] sm:$0xff]  ;;  %v10057_v63 = vld [vmem:[#allocation34_spill] sm:$0xff] }
 0x61f   :  { %v2452_v14 = vadd.f32 %v2444_v41, %v2420_v16  ;;  %v2476_v38 = vsel %vm658_vm6, %v10050_v61, %v2475_v37  ;;  %v2546_v34 = vadd.f32 %v2535_v17, %v2514_v29  ;;  %v2545_v57 = vadd.f32 %v10051_v20, %v2513_v46  ;;  %v10064_v37 = vld [vmem:[#allocation126_spill] sm:$0xff]  ;;  %v10067_v16 = vld [vmem:[#allocation115_spill] sm:$0xff]  ;;  %v10076_v20 = vld [vmem:[#allocation120_spill] sm:$0xff] }
 0x620   :  { %v2483_v36 = vadd.f32 %v10052_v2, %v2451_v54  ;;  %v10054_v10 = vrot.slane %v10053_v11, 3  ;;  %v10056_v31 = vrot.slane %v10055_v42, 1  ;;  %v3193_v33 = vrot.slane %v3178_v7, 1  ;;  %v10065_v52 = vld [vmem:[#allocation62_spill] sm:$0xff]  ;;  %v10074_v61 = vld [vmem:[#allocation127_spill] sm:$0xff] }
 0x621   :  { %v2484_v43 = vadd.f32 %v2476_v38, %v2452_v14  ;;  %v3215_v17 = vmul.f32 %v8171_v3, %v10057_v63  ;;  %v2578_v6 = vadd.f32 %v2567_v27, %v2546_v34  ;;  %v2577_v62 = vadd.f32 %v10058_v13, %v2545_v57  ;;  %v8246_v45 = vpop.permute.xlu1 %2665  ;;  %v10070_v29 = vld [vmem:[#allocation118_spill] sm:$0xff] }
 0x622   :  { %v2508_v9 = vsel %vm691_vm7, %v10054_v10, %v2507_v50  ;;  %v3189_v19 = vsel %vm625_vm11, %v10056_v31, %v3188_v55  ;;  %v2515_v4 = vadd.f32 %v10059_v60, %v2483_v36  ;;  %v10061_v18 = vrot.slane %v10060_v47, 6  ;;  %3195 = vrot.lane.b32.xlu0 %v10064_v37, %s4766_s21  ;;  %v8248_v23 = vpop.permute.xlu0 %2663  ;;  %v10069_v55 = vld [vmem:[#allocation68_spill] sm:$0xff]  ;;  %v10078_v36 = vld [vmem:[#allocation35_spill] sm:$0xff]  ;;  %v10080_v31 = vld [vmem:[#allocation121_spill] sm:$0xff] }
 0x623   :  { %v2516_v51 = vadd.f32 %v2508_v9, %v2484_v43  ;;  %v10063_v32 = vrot.slane %v10062_v56, 4  ;;  %v2603_v28 = vrot.slane %v2588_v8, 6  ;;  %3197 = vrot.lane.b32.xlu1 %v3189_v19, %s4766_s21  ;;  %v8240_v21 = vadd.f32 %v10065_v52, %v2577_v62  ;;  %v10079_v10 = vld [vmem:[#allocation128_spill] sm:$0xff]  ;;  %v10086_v56 = vld [vmem:[#allocation130_spill] sm:$0xff] }
 0x624   :  { %v2599_v15 = vsel %vm790_vm10, %v10061_v18, %v2598_v48  ;;  %v2547_v30 = vadd.f32 %v10066_v49, %v2515_v4  ;;  %v10068_v48 = vrot.slane %v10067_v16, 5  ;;  %v3218_v41 = vmul.f32 %v8179_v40, %v10057_v63  ;;  %v10085_v18 = vld [vmem:[#allocation36_spill] sm:$0xff] }
 0x625   :  { %v2540_v12 = vsel %vm724_vm8, %v10063_v32, %v2539_v44  ;;  %v8237_v27 = vadd.f32 %v2599_v15, %v2578_v6  ;;  %v10071_v1 = vrot.slane %v10070_v29, 1  ;;  %v3228_v14 = vrot.slane %v3215_v17, 2  ;;  %v10075_v44 = vld [vmem:[#allocation119_spill] sm:$0xff]  ;;  %v8267_v8 = vpop.permute.xlu1 %2669  ;;  %v10082_v6 = vld [vmem:[#allocation129_spill] sm:$0xff] }
 0x626   :  { %v2548_v53 = vadd.f32 %v2540_v12, %v2516_v51  ;;  %v2572_v59 = vsel %vm757_vm9, %v10068_v48, %v2571_v25  ;;  %v2579_v7 = vadd.f32 %v10069_v55, %v2547_v30  ;;  %v10073_v54 = vrot.slane %v10072_v5, 6  ;;  %3199 = vrot.lane.b32.xlu0 %v10074_v61, %s4766_s21  ;;  %v8269_v34 = vpop.permute.xlu0 %2667  ;;  %v10083_v51 = vld [vmem:[#allocation122_spill] sm:$0xff]  ;;  %v10089_v30 = vld [vmem:[#allocation133_spill] sm:$0xff] }
 0x627   :  { %v3194_v46 = vsel %vm625_vm11, %v10071_v1, %v3193_v33  ;;  %v10077_v57 = vrot.slane %v10076_v20, 2  ;;  %v3233_v2 = vrot.slane %v3218_v41, 2  ;;  %v3258_v11 = vmul.f32 %v8179_v40, %v10078_v36  ;;  %v10093_v1 = vld [vmem:[#allocation134_spill] sm:$0xff]  ;;  %v10094_v5 = vld [vmem:[#allocation125_spill] sm:$0xff] }
 0x628   :  { %v2580_v50 = vadd.f32 %v2572_v59, %v2548_v53  ;;  %v2604_v39 = vsel %vm790_vm10, %v10073_v54, %v2603_v28  ;;  %3201 = vrot.lane.b32.xlu1 %v3194_v46, %s4766_s21  ;;  %v8265_v25 = vadd.f32 %v10075_v44, %v2579_v7  ;;  %v10081_v19 = vrot.slane %v10080_v31, 2  ;;  %v10087_v28 = vld [vmem:[#allocation123_spill] sm:$0xff]  ;;  %v10090_v59 = vld [vmem:[#allocation124_spill] sm:$0xff]  ;;  %v10092_v7 = vld [vmem:[#allocation37_spill] sm:$0xff] }
 0x629   :  { %v3229_v43 = vsel %vm658_vm6, %v10077_v57, %v3228_v14  ;;  %v3273_v63 = vrot.slane %v3258_v11, 3  ;;  %v3255_v17 = vmul.f32 %v8171_v3, %v10078_v36  ;;  %v10084_v60 = vrot.slane %v10083_v51, 3  ;;  %v10096_v20 = vld [vmem:[#allocation69_spill] sm:$0xff]  ;;  %v10099_v31 = vld [vmem:[#allocation38_spill] sm:$0xff] }
 0x62a   :  { %v8262_v38 = vadd.f32 %v2604_v39, %v2580_v50  ;;  %3235 = vrot.lane.b32.xlu0 %v10079_v10, %s4766_s21  ;;  %v8279_v9 = vpop.permute.xlu1 %2705  ;;  %v3234_v33 = vsel %vm658_vm6, %v10081_v19, %v3233_v2  ;;  %v3298_v15 = vmul.f32 %v8179_v40, %v10085_v18  ;;  %v10088_v37 = vrot.slane %v10087_v28, 3  ;;  %v10097_v2 = vld [vmem:[#allocation131_spill] sm:$0xff] }
 0x62b   :  { %v8281_v42 = vpop.permute.xlu0 %2703  ;;  %v3274_v4 = vsel %vm691_vm7, %v10084_v60, %v3273_v63  ;;  %v3268_v47 = vrot.slane %v3255_v17, 3  ;;  %v3295_v49 = vmul.f32 %v8171_v3, %v10085_v18  ;;  %v10091_v41 = vrot.slane %v10090_v59, 4  ;;  %v10103_v18 = vld [vmem:[#allocation70_spill] sm:$0xff]  ;;  %v10104_v28 = vld [vmem:[#allocation135_spill] sm:$0xff] }
 0x62c   :  { %3237 = vrot.lane.b32.xlu1 %v3229_v43, %s4766_s21  ;;  %v3313_v53 = vrot.slane %v3298_v15, 4  ;;  %v3338_v29 = vmul.f32 %v8179_v40, %v10092_v7  ;;  %v10095_v54 = vrot.slane %v10094_v5, 4  ;;  %v3335_v44 = vmul.f32 %v8171_v3, %v10092_v7 }
 0x62d   :  { %v3269_v52 = vsel %vm691_vm7, %v10088_v37, %v3268_v47  ;;  %v3308_v55 = vrot.slane %v3295_v49, 4  ;;  %v10098_v36 = vrot.slane %v10097_v2, 5  ;;  %v3378_v19 = vmul.f32 %v8179_v40, %v10099_v31  ;;  %v10106_v49 = vld [vmem:[#allocation71_spill] sm:$0xff] }
 0x62e   :  { %3239 = vrot.lane.b32.xlu0 %v10082_v6, %s4766_s21  ;;  %v3314_v50 = vsel %vm724_vm8, %v10091_v41, %v3313_v53  ;;  %v3353_v61 = vrot.slane %v3338_v29, 5  ;;  %v3348_v10 = vrot.slane %v3335_v44, 5  ;;  %v10101_v6 = vld [vmem:[#allocation132_spill] sm:$0xff]  ;;  %v3375_v47 = vmul.f32 %v8171_v3, %v10099_v31  ;;  %v10111_v44 = vld [vmem:[#allocation39_spill] sm:$0xff] }
 0x62f   :  { %v8291_v13 = vpop.permute.xlu1 %2709  ;;  %v3309_v39 = vsel %vm724_vm8, %v10095_v54, %v3308_v55  ;;  %v10102_v51 = vrot.slane %v10101_v6, 5  ;;  %v10105_v37 = vrot.slane %v10104_v28, 6  ;;  %v10107_v41 = vld [vmem:[#allocation136_spill] sm:$0xff]  ;;  %v3412_v7 = vstv %s4614_s6  ;;  %v8387_v54 = vld [vmem:[#allocation2 + $0x50] sm:$0xff] }
 0x630   :  { %3241 = vrot.lane.b32.xlu1 %v3234_v33, %s4766_s21  ;;  %v8293_v62 = vpop.permute.xlu0 %2707  ;;  %v3354_v11 = vsel %vm757_vm9, %v10098_v36, %v3353_v61  ;;  %v10100_v33 = vld [vmem:[#allocation139_spill] sm:$0xff]  ;;  %v3388_v53 = vrot.slane %v3375_v47, 6  ;;  %v10109_v29 = vld [vmem:[#allocation72_spill] sm:$0xff]  ;;  %10110 = vst [vmem:[#allocation303_spill] sm:$0xff] %v8387_v54  ;;  %v3415_v61 = vmul.f32 %v8051_v35, %v3412_v7  ;;  %v3413_v31 = vmul.f32 %v8056_v26, %v3412_v7 }
 0x631   :  { %v3349_v60 = vsel %vm757_vm9, %v10102_v51, %v3348_v10  ;;  %v10115_v28 = vld [vmem:[#allocation40_spill] sm:$0xff] }
 0x632   :  { %3279 = vrot.lane.b32.xlu0 %v10086_v56, %s4766_s21 }
 0x633   :  { %v8303_v32 = vpop.permute.xlu1 %2745 }
 0x634   :  { %3281 = vrot.lane.b32.xlu1 %v3274_v4, %s4766_s21  ;;  %v8305_v12 = vpop.permute.xlu0 %2743  ;;  %v3393_v4 = vrot.slane %v3378_v19, 6 }
 0x636   :  { %3275 = vrot.lane.b32.xlu0 %v10089_v30, %s4766_s21 }
 0x638   :  { %3277 = vrot.lane.b32.xlu1 %v3269_v52, %s4766_s21  ;;  %v8315_v16 = vpop.permute.xlu1 %2749  ;;  %v8317_v48 = vpop.permute.xlu0 %2747  ;;  %v3394_v52 = vsel %vm790_vm10, %v10105_v37, %v3393_v4  ;;  %v3484_v37 = vmul.f32 %v8179_v40, %v10115_v28 }
 0x63a   :  { %3319 = vrot.lane.b32.xlu0 %v10093_v1, %s4766_s21 }
 0x63c   :  { %3321 = vrot.lane.b32.xlu1 %v3314_v50, %s4766_s21  ;;  %v8327_v46 = vpop.permute.xlu1 %2785  ;;  %v8329_v14 = vpop.permute.xlu0 %2783  ;;  %v10108_v50 = vrot.slane %v10107_v41, 6  ;;  %v10117_v41 = vld [vmem:[#allocation138_spill] sm:$0xff] }
 0x63e   :  { %3315 = vrot.lane.b32.xlu0 %v10096_v20, %s4766_s21  ;;  %v3389_v55 = vsel %vm790_vm10, %v10108_v50, %v3388_v53  ;;  %v3444_v20 = vmul.f32 %v8179_v40, %v10111_v44  ;;  %v10118_v50 = vrot.slane %v10117_v41, 1 }
 0x640   :  { %3317 = vrot.lane.b32.xlu1 %v3309_v39, %s4766_s21  ;;  %v8339_v57 = vpop.permute.xlu1 %2789  ;;  %v8341_v43 = vpop.permute.xlu0 %2787  ;;  %v3416_v39 = vmul.f32 %v8387_v54, %v3412_v7  ;;  %v3459_v19 = vrot.slane %v3444_v20, 1  ;;  %v10120_v20 = vld [vmem:[#allocation140_spill] sm:$0xff] }
 0x642   :  { %3359 = vrot.lane.b32.xlu0 %v10100_v33, %s4766_s21  ;;  %v3441_v33 = vmul.f32 %v8171_v3, %v10111_v44 }
 0x644   :  { %3361 = vrot.lane.b32.xlu1 %v3354_v11, %s4766_s21  ;;  %v8351_v63 = vpop.permute.xlu1 %2825  ;;  %v8353_v17 = vpop.permute.xlu0 %2823  ;;  %v8399_v11 = vld [vmem:[#allocation2 + $0x38] sm:$0xff] }
 0x645   :  { %10112 = vst [vmem:[#allocation16_spill] sm:$0xff] %v8399_v11  ;;  %v3414_v10 = vmul.f32 %v8399_v11, %v3412_v7  ;;  %v3499_v7 = vrot.slane %v3484_v37, 2 }
 0x646   :  { %3355 = vrot.lane.b32.xlu0 %v10103_v18, %s4766_s21  ;;  %v3454_v18 = vrot.slane %v3441_v33, 1  ;;  %v10122_v33 = vld [vmem:[#allocation41_spill] sm:$0xff] }
 0x648   :  { %3357 = vrot.lane.b32.xlu1 %v3349_v60, %s4766_s21  ;;  %v8363_v15 = vpop.permute.xlu1 %2829  ;;  %v8365_v56 = vpop.permute.xlu0 %2827  ;;  %v10113_v60 = vld [vmem:[#allocation137_spill] sm:$0xff] }
 0x649   :  { %v10114_v4 = vrot.slane %v10113_v60, 1  ;;  %v3524_v60 = vmul.f32 %v8179_v40, %v10122_v33 }
 0x64a   :  { %3399 = vrot.lane.b32.xlu0 %v10106_v49, %s4766_s21 }
 0x64b   :  { %v3460_v47 = vsel %vm625_vm11, %v10114_v4, %v3459_v19  ;;  %v10123_v4 = vld [vmem:[#allocation147_spill] sm:$0xff]  ;;  %v3539_v41 = vrot.slane %v3524_v60, 3 }
 0x64c   :  { %3401 = vrot.lane.b32.xlu1 %v3394_v52, %s4766_s21  ;;  %v8373_v30 = vpop.permute.xlu1 %2865  ;;  %v8375_v59 = vpop.permute.xlu0 %2863  ;;  %v10116_v52 = vld [vmem:[#allocation144_spill] sm:$0xff] }
 0x64e   :  { %3395 = vrot.lane.b32.xlu0 %v10109_v29, %s4766_s21  ;;  %v3481_v29 = vmul.f32 %v8171_v3, %v10115_v28  ;;  %v10126_v28 = vld [vmem:[#allocation141_spill] sm:$0xff] }
 0x64f   :  { %v10127_v37 = vrot.slane %v10126_v28, 2 }
 0x650   :  { %3397 = vrot.lane.b32.xlu1 %v3389_v55, %s4766_s21  ;;  %v8383_v1 = vpop.permute.xlu1 %2869  ;;  %v8385_v5 = vpop.permute.xlu0 %2867  ;;  %v3455_v55 = vsel %vm625_vm11, %v10118_v50, %v3454_v18  ;;  %v3494_v19 = vrot.slane %v3481_v29, 2  ;;  %v3521_v50 = vmul.f32 %v8171_v3, %v10122_v33  ;;  %v10132_v33 = vld [vmem:[#allocation73_spill] sm:$0xff]  ;;  %s4621_s21 = sld [smem:[#allocation4 + $0x36]] }
 0x652   :  { %3425 = vrot.lane.b32.xlu0 %v3415_v61, %s4767_s2 }
 0x654   :  { %3427 = vrot.lane.b32.xlu1 %v3416_v39, %s4767_s2  ;;  %v8395_v2 = vpop.permute.xlu1 %2891  ;;  %v8397_v36 = vpop.permute.xlu0 %2889  ;;  %v10119_v39 = vld [vmem:[#allocation145_spill] sm:$0xff] }
 0x656   :  { %3421 = vrot.lane.b32.xlu0 %v3413_v31, %s4767_s2 }
 0x658   :  { %3423 = vrot.lane.b32.xlu1 %v3414_v10, %s4767_s2  ;;  %v8407_v6 = vpop.permute.xlu1 %2895  ;;  %v8409_v51 = vpop.permute.xlu0 %2893  ;;  %v10121_v10 = vrot.slane %v10120_v20, 2 }
 0x65a   :  { %3465 = vrot.lane.b32.xlu0 %v10116_v52, %s4767_s2  ;;  %v3500_v31 = vsel %vm658_vm6, %v10121_v10, %v3499_v7  ;;  %v3495_v52 = vsel %vm658_vm6, %v10127_v37, %v3494_v19  ;;  %v10135_v37 = vld [vmem:[#allocation143_spill] sm:$0xff] }
 0x65c   :  { %3467 = vrot.lane.b32.xlu1 %v3460_v47, %s4767_s2  ;;  %v8419_v53 = vpop.permute.xlu1 %2931  ;;  %v8421_v49 = vpop.permute.xlu0 %2929 }
 0x65e   :  { %3461 = vrot.lane.b32.xlu0 %v10119_v39, %s4767_s2  ;;  %v10129_v39 = vld [vmem:[#allocation142_spill] sm:$0xff] }
 0x65f   :  { %v10130_v20 = vrot.slane %v10129_v39, 3 }
 0x660   :  { %3463 = vrot.lane.b32.xlu1 %v3455_v55, %s4767_s2  ;;  %v8431_v61 = vpop.permute.xlu1 %2935  ;;  %v8433_v44 = vpop.permute.xlu0 %2933  ;;  %v10128_v55 = vld [vmem:[#allocation149_spill] sm:$0xff] }
 0x661   :  { %v3540_v10 = vsel %vm691_vm7, %v10130_v20, %v3539_v41 }
 0x662   :  { %3505 = vrot.lane.b32.xlu0 %v10123_v4, %s4767_s2  ;;  %v10131_v4 = vld [vmem:[#allocation42_spill] sm:$0xff] }
 0x663   :  { %v3564_v19 = vmul.f32 %v8179_v40, %v10131_v4  ;;  %v3561_v41 = vmul.f32 %v8171_v3, %v10131_v4  ;;  %v10142_v4 = vld [vmem:[#allocation154_spill] sm:$0xff] }
 0x664   :  { %3507 = vrot.lane.b32.xlu1 %v3500_v31, %s4767_s2  ;;  %v8443_v47 = vpop.permute.xlu1 %2971  ;;  %v8445_v18 = vpop.permute.xlu0 %2969  ;;  %v3534_v31 = vrot.slane %v3521_v50, 3  ;;  %v10137_v50 = vld [vmem:[#allocation152_spill] sm:$0xff] }
 0x665   :  { %10124 = vst [vmem:[#allocation298_spill] sm:$0xff] %v8443_v47  ;;  %10125 = vst [vmem:[#allocation17_spill] sm:$0xff] %v8445_v18  ;;  %v3579_v39 = vrot.slane %v3564_v19, 4  ;;  %v10141_v18 = vld [vmem:[#allocation43_spill] sm:$0xff] }
 0x666   :  { %3501 = vrot.lane.b32.xlu0 %v10128_v55, %s4767_s2 }
 0x668   :  { %3503 = vrot.lane.b32.xlu1 %v3495_v52, %s4767_s2  ;;  %v8455_v7 = vpop.permute.xlu1 %2975  ;;  %v8457_v29 = vpop.permute.xlu0 %2973  ;;  %v10136_v52 = vrot.slane %v10135_v37, 3  ;;  %v3574_v37 = vrot.slane %v3561_v41, 4 }
 0x66a   :  { %3545 = vrot.lane.b32.xlu0 %v10132_v33, %s4767_s2  ;;  %v3535_v55 = vsel %vm691_vm7, %v10136_v52, %v3534_v31  ;;  %v10139_v33 = vld [vmem:[#allocation146_spill] sm:$0xff]  ;;  %v3604_v31 = vmul.f32 %v8179_v40, %v10141_v18 }
 0x66c   :  { %3547 = vrot.lane.b32.xlu1 %v3540_v10, %s4767_s2  ;;  %v8467_v60 = vpop.permute.xlu1 %3011  ;;  %v8469_v28 = vpop.permute.xlu0 %3009 }
 0x66d   :  { %10133 = vst [vmem:[#allocation204_spill] sm:$0xff] %v8467_v60  ;;  %10134 = vst [vmem:[#allocation205_spill] sm:$0xff] %v8469_v28  ;;  %v10140_v60 = vrot.slane %v10139_v33, 4  ;;  %v3619_v33 = vrot.slane %v3604_v31, 5 }
 0x66e   :  { %3541 = vrot.lane.b32.xlu0 %v10137_v50, %s4767_s2 }
 0x66f   :  { %v3580_v28 = vsel %vm724_vm8, %v10140_v60, %v3579_v39  ;;  %v3601_v60 = vmul.f32 %v8171_v3, %v10141_v18  ;;  %v10147_v39 = vld [vmem:[#allocation156_spill] sm:$0xff]  ;;  %v10152_v18 = vld [vmem:[#allocation157_spill] sm:$0xff] }
 0x670   :  { %3543 = vrot.lane.b32.xlu1 %v3535_v55, %s4767_s2  ;;  %v8479_v20 = vpop.permute.xlu1 %3015  ;;  %v8481_v10 = vpop.permute.xlu0 %3013  ;;  %v10145_v55 = vld [vmem:[#allocation148_spill] sm:$0xff] }
 0x671   :  { %10138 = vst [vmem:[#allocation202_spill] sm:$0xff] %v8481_v10  ;;  %v10146_v50 = vrot.slane %v10145_v55, 4  ;;  %v3614_v55 = vrot.slane %v3601_v60, 5  ;;  %v10151_v10 = vld [vmem:[#allocation44_spill] sm:$0xff] }
 0x672   :  { %3585 = vrot.lane.b32.xlu0 %v10142_v4, %s4767_s2  ;;  %v10149_v4 = vld [vmem:[#allocation150_spill] sm:$0xff] }
 0x673   :  { %v3575_v47 = vsel %vm724_vm8, %v10146_v50, %v3574_v37  ;;  %v3644_v37 = vmul.f32 %v8179_v40, %v10151_v10  ;;  %v10155_v50 = vld [vmem:[#allocation151_spill] sm:$0xff] }
 0x674   :  { %3587 = vrot.lane.b32.xlu1 %v3580_v28, %s4767_s2  ;;  %v8491_v19 = vpop.permute.xlu1 %3051  ;;  %v8493_v52 = vpop.permute.xlu0 %3049 }
 0x675   :  { %10143 = vst [vmem:[#allocation203_spill] sm:$0xff] %v8491_v19  ;;  %10144 = vst [vmem:[#allocation208_spill] sm:$0xff] %v8493_v52  ;;  %v10150_v19 = vrot.slane %v10149_v4, 5  ;;  %v3659_v4 = vrot.slane %v3644_v37, 6  ;;  %v10164_v37 = vld [vmem:[#allocation155_spill] sm:$0xff] }
 0x676   :  { %3581 = vrot.lane.b32.xlu0 %v10147_v39, %s4767_s2  ;;  %v10156_v39 = vrot.slane %v10155_v50, 5 }
 0x677   :  { %v3620_v52 = vsel %vm757_vm9, %v10150_v19, %v3619_v33  ;;  %v3641_v19 = vmul.f32 %v8171_v3, %v10151_v10 }
 0x678   :  { %3583 = vrot.lane.b32.xlu1 %v3575_v47, %s4767_s2  ;;  %v8503_v28 = vpop.permute.xlu1 %3055  ;;  %v8505_v41 = vpop.permute.xlu0 %3053 }
 0x679   :  { %10148 = vst [vmem:[#allocation209_spill] sm:$0xff] %v8505_v41  ;;  %v3615_v41 = vsel %vm757_vm9, %v10156_v39, %v3614_v55  ;;  %v10161_v55 = vld [vmem:[#allocation74_spill] sm:$0xff]  ;;  %v10165_v39 = vrot.slane %v10164_v37, 6 }
 0x67a   :  { %3625 = vrot.lane.b32.xlu0 %v10152_v18, %s4767_s2  ;;  %v10159_v18 = vld [vmem:[#allocation153_spill] sm:$0xff] }
 0x67c   :  { %3627 = vrot.lane.b32.xlu1 %v3620_v52, %s4767_s2  ;;  %v8515_v47 = vpop.permute.xlu1 %3091  ;;  %v8517_v31 = vpop.permute.xlu0 %3089  ;;  %v10157_v52 = vld [vmem:[#allocation158_spill] sm:$0xff] }
 0x67d   :  { %10153 = vst [vmem:[#allocation206_spill] sm:$0xff] %v8515_v47  ;;  %10154 = vst [vmem:[#allocation207_spill] sm:$0xff] %v8517_v31  ;;  %v10160_v31 = vrot.slane %v10159_v18, 6  ;;  %v3654_v47 = vrot.slane %v3641_v19, 6  ;;  %v10166_v18 = vld [vmem:[#allocation75_spill] sm:$0xff] }
 0x67e   :  { %3621 = vrot.lane.b32.xlu0 %v10157_v52, %s4767_s2 }
 0x67f   :  { %v3660_v50 = vsel %vm790_vm10, %v10160_v31, %v3659_v4  ;;  %v3655_v52 = vsel %vm790_vm10, %v10165_v39, %v3654_v47 }
 0x680   :  { %3623 = vrot.lane.b32.xlu1 %v3615_v41, %s4767_s2  ;;  %v8527_v33 = vpop.permute.xlu1 %3095  ;;  %v8529_v60 = vpop.permute.xlu0 %3093 }
 0x681   :  { %10158 = vst [vmem:[#allocation212_spill] sm:$0xff] %v8527_v33  ;;  %v3678_v33 = vstv %s4621_s21 }
 0x682   :  { %3665 = vrot.lane.b32.xlu0 %v10161_v55, %s4767_s2  ;;  %v3682_v19 = vmul.f32 %v8387_v54, %v3678_v33  ;;  %v10167_v55 = vld [vmem:[#allocation45_spill] sm:$0xff]  ;;  %v3680_v39 = vmul.f32 %v8399_v11, %v3678_v33  ;;  %v10173_v11 = vld [vmem:[#allocation46_spill] sm:$0xff] }
 0x683   :  { %v3707_v54 = vmul.f32 %v8171_v3, %v10167_v55 }
 0x684   :  { %3667 = vrot.lane.b32.xlu1 %v3660_v50, %s4767_s2  ;;  %v8537_v10 = vpop.permute.xlu1 %3131  ;;  %v8539_v41 = vpop.permute.xlu0 %3129  ;;  %v3681_v50 = vmul.f32 %v8051_v35, %v3678_v33 }
 0x685   :  { %10162 = vst [vmem:[#allocation213_spill] sm:$0xff] %v8537_v10  ;;  %10163 = vst [vmem:[#allocation295_spill] sm:$0xff] %v8539_v41  ;;  %v3710_v41 = vmul.f32 %v8179_v40, %v10167_v55  ;;  %v3720_v10 = vrot.slane %v3707_v54, 1 }
 0x686   :  { %3661 = vrot.lane.b32.xlu0 %v10166_v18, %s4767_s2 }
 0x687   :  { %v3725_v18 = vrot.slane %v3710_v41, 1  ;;  %v10174_v41 = vld [vmem:[#allocation76_spill] sm:$0xff] }
 0x688   :  { %3663 = vrot.lane.b32.xlu1 %v3655_v52, %s4767_s2  ;;  %v8547_v31 = vpop.permute.xlu1 %3135  ;;  %v8549_v4 = vpop.permute.xlu0 %3133  ;;  %v3679_v52 = vmul.f32 %v8056_v26, %v3678_v33  ;;  %v3750_v33 = vmul.f32 %v8179_v40, %v10173_v11  ;;  %v10177_v26 = vld [vmem:[#allocation160_spill] sm:$0xff]  ;;  %s4628_s2 = sld [smem:[#allocation4 + $0x37]] }
 0x68a   :  { %3691 = vrot.lane.b32.xlu0 %v3681_v50, %s4768_s10  ;;  %v10171_v50 = vld [vmem:[#allocation159_spill] sm:$0xff]  ;;  %v3765_v54 = vrot.slane %v3750_v33, 2 }
 0x68c   :  { %3693 = vrot.lane.b32.xlu1 %v3682_v19, %s4768_s10  ;;  %v8557_v47 = vpop.permute.xlu1 %3157  ;;  %v8559_v37 = vpop.permute.xlu0 %3155 }
 0x68d   :  { %10168 = vst [vmem:[#allocation210_spill] sm:$0xff] %v8557_v47  ;;  %10169 = vst [vmem:[#allocation211_spill] sm:$0xff] %v8559_v37  ;;  %v10172_v47 = vrot.slane %v10171_v50, 1  ;;  %v10178_v50 = vrot.slane %v10177_v26, 1  ;;  %v2637_v26 = vadd.f32 %v8219_v58, %v8265_v25  ;;  %v2636_v25 = vadd.f32 %v8195_v22, %v8237_v27  ;;  %v10189_v22 = vld [vmem:[#allocation163_spill] sm:$0xff] }
 0x68e   :  { %3687 = vrot.lane.b32.xlu0 %v3679_v52, %s4768_s10  ;;  %v3747_v52 = vmul.f32 %v8171_v3, %v10173_v11  ;;  %v2638_v11 = vadd.f32 %v8217_v24, %v8262_v38  ;;  %v10190_v27 = vrot.slane %v10189_v22, 3 }
 0x68f   :  { %v3726_v37 = vsel %vm625_vm11, %v10172_v47, %v3725_v18  ;;  %v3721_v47 = vsel %vm625_vm11, %v10178_v50, %v3720_v10  ;;  %v10179_v18 = vld [vmem:[#allocation77_spill] sm:$0xff] }
 0x690   :  { %3689 = vrot.lane.b32.xlu1 %v3680_v39, %s4768_s10  ;;  %v8567_v35 = vpop.permute.xlu1 %3161  ;;  %v8569_v19 = vpop.permute.xlu0 %3159  ;;  %v10183_v10 = vld [vmem:[#allocation161_spill] sm:$0xff] }
 0x691   :  { %10170 = vst [vmem:[#allocation216_spill] sm:$0xff] %v8569_v19  ;;  %v10182_v19 = vld [vmem:[#allocation47_spill] sm:$0xff]  ;;  %v10184_v33 = vrot.slane %v10183_v10, 2  ;;  %v2678_v10 = vadd.f32 %v8267_v8, %v2638_v11  ;;  %v10191_v8 = vld [vmem:[#allocation48_spill] sm:$0xff]  ;;  %v2676_v11 = vadd.f32 %v8246_v45, %v2636_v25 }
 0x692   :  { %3731 = vrot.lane.b32.xlu0 %v10174_v41, %s4768_s10  ;;  %v3787_v58 = vmul.f32 %v8171_v3, %v10182_v19 }
 0x693   :  { %v3766_v50 = vsel %vm658_vm6, %v10184_v33, %v3765_v54  ;;  %v2635_v54 = vadd.f32 %v8197_v0, %v8240_v21  ;;  %v2677_v33 = vadd.f32 %v8269_v34, %v2637_v26  ;;  %v3830_v34 = vmul.f32 %v8179_v40, %v10191_v8 }
 0x694   :  { %3733 = vrot.lane.b32.xlu1 %v3726_v37, %s4768_s10  ;;  %v8581_v39 = vpop.permute.xlu0 %3195  ;;  %v3800_v21 = vrot.slane %v3787_v58, 3 }
 0x695   :  { %v8579_v55 = vpop.permute.xlu1 %3197  ;;  %10176 = vst [vmem:[#allocation214_spill] sm:$0xff] %v8581_v39  ;;  %v3790_v39 = vmul.f32 %v8179_v40, %v10182_v19  ;;  %v2675_v26 = vadd.f32 %v8248_v23, %v2635_v54  ;;  %v3845_v54 = vrot.slane %v3830_v34, 4  ;;  %v10199_v34 = vld [vmem:[#allocation80_spill] sm:$0xff] }
 0x696   :  { %10175 = vst [vmem:[#allocation217_spill] sm:$0xff] %v8579_v55  ;;  %3727 = vrot.lane.b32.xlu0 %v10179_v18, %s4768_s10  ;;  %v3760_v55 = vrot.slane %v3747_v52, 2 }
 0x697   :  { %v3805_v38 = vrot.slane %v3790_v39, 3  ;;  %v2717_v39 = vadd.f32 %v8293_v62, %v2677_v33  ;;  %v10195_v33 = vld [vmem:[#allocation79_spill] sm:$0xff] }
 0x698   :  { %3729 = vrot.lane.b32.xlu1 %v3721_v47, %s4768_s10  ;;  %v8593_v41 = vpop.permute.xlu0 %3199  ;;  %v10185_v47 = vld [vmem:[#allocation167_spill] sm:$0xff] }
 0x699   :  { %10181 = vst [vmem:[#allocation220_spill] sm:$0xff] %v8593_v41  ;;  %v10186_v41 = vld [vmem:[#allocation162_spill] sm:$0xff]  ;;  %v3806_v0 = vsel %vm691_vm7, %v10190_v27, %v3805_v38  ;;  %v2757_v62 = vadd.f32 %v8317_v48, %v2717_v39 }
 0x69a   :  { %v8591_v37 = vpop.permute.xlu1 %3201  ;;  %3771 = vrot.lane.b32.xlu0 %v10185_v47, %s4768_s10  ;;  %v2716_v47 = vadd.f32 %v8279_v9, %v2676_v11 }
 0x69b   :  { %10180 = vst [vmem:[#allocation215_spill] sm:$0xff] %v8591_v37  ;;  %v10187_v37 = vrot.slane %v10186_v41, 2  ;;  %v10188_v41 = vld [vmem:[#allocation78_spill] sm:$0xff]  ;;  %v2797_v58 = vadd.f32 %v8341_v43, %v2757_v62 }
 0x69c   :  { %3773 = vrot.lane.b32.xlu1 %v3766_v50, %s4768_s10  ;;  %v8609_v52 = vpop.permute.xlu0 %3235  ;;  %v10192_v50 = vld [vmem:[#allocation168_spill] sm:$0xff]  ;;  %v2756_v9 = vadd.f32 %v8303_v32, %v2716_v47 }
 0x69d   :  { %v3761_v24 = vsel %vm658_vm6, %v10187_v37, %v3760_v55  ;;  %v2718_v55 = vadd.f32 %v8291_v13, %v2678_v10  ;;  %v3827_v10 = vmul.f32 %v8171_v3, %v10191_v8  ;;  %v2837_v43 = vadd.f32 %v8365_v56, %v2797_v58 }
 0x69e   :  { %v8607_v18 = vpop.permute.xlu1 %3237  ;;  %3767 = vrot.lane.b32.xlu0 %v10188_v41, %s4768_s10  ;;  %v2796_v41 = vadd.f32 %v8327_v46, %v2756_v9 }
 0x69f   :  { %v2758_v13 = vadd.f32 %v8315_v16, %v2718_v55  ;;  %v10193_v16 = vld [vmem:[#allocation164_spill] sm:$0xff]  ;;  %v2877_v22 = vadd.f32 %v8385_v5, %v2837_v43  ;;  %v10207_v43 = vld [vmem:[#allocation298_spill] sm:$0xff] }
 0x6a0   :  { %3769 = vrot.lane.b32.xlu1 %v3761_v24, %s4768_s10  ;;  %v8629_v37 = vpop.permute.xlu0 %3239  ;;  %v2715_v24 = vadd.f32 %v8281_v42, %v2675_v26  ;;  %v10194_v25 = vrot.slane %v10193_v16, 3  ;;  %v2836_v46 = vadd.f32 %v8351_v63, %v2796_v41  ;;  %v10209_v41 = vld [vmem:[#allocation209_spill] sm:$0xff] }
 0x6a1   :  { %v2798_v38 = vadd.f32 %v8339_v57, %v2758_v13  ;;  %v2903_v5 = vadd.f32 %v8409_v51, %v2877_v22  ;;  %v10211_v22 = vld [vmem:[#allocation204_spill] sm:$0xff] }
 0x6a2   :  { %v8627_v19 = vpop.permute.xlu1 %3241  ;;  %3811 = vrot.lane.b32.xlu0 %v10192_v50, %s4768_s10  ;;  %v3801_v48 = vsel %vm691_vm7, %v10194_v25, %v3800_v21  ;;  %v2755_v42 = vadd.f32 %v8305_v12, %v2715_v24  ;;  %v10198_v21 = vld [vmem:[#allocation49_spill] sm:$0xff]  ;;  %v2876_v11 = vadd.f32 %v8373_v30, %v2836_v46 }
 0x6a3   :  { %v2838_v57 = vadd.f32 %v8363_v15, %v2798_v38  ;;  %v10196_v15 = vld [vmem:[#allocation165_spill] sm:$0xff]  ;;  %v3870_v8 = vmul.f32 %v8179_v40, %v10198_v21  ;;  %v2943_v62 = vadd.f32 %v8433_v44, %v2903_v5  ;;  %v3867_v24 = vmul.f32 %v8171_v3, %v10198_v21 }
 0x6a4   :  { %3813 = vrot.lane.b32.xlu1 %v3806_v0, %s4768_s10  ;;  %v8649_v23 = vpop.permute.xlu0 %3279  ;;  %v2795_v55 = vadd.f32 %v8329_v14, %v2755_v42  ;;  %v10197_v27 = vrot.slane %v10196_v15, 4  ;;  %v3840_v0 = vrot.slane %v3827_v10, 4  ;;  %v2902_v30 = vadd.f32 %v8395_v2, %v2876_v11  ;;  %v10202_v38 = vld [vmem:[#allocation81_spill] sm:$0xff]  ;;  %v10206_v42 = vld [vmem:[#allocation50_spill] sm:$0xff] }
 0x6a5   :  { %v2878_v39 = vadd.f32 %v8383_v1, %v2838_v57  ;;  %v3885_v47 = vrot.slane %v3870_v8, 5  ;;  %v2983_v44 = vadd.f32 %v8457_v29, %v2943_v62  ;;  %v3880_v9 = vrot.slane %v3867_v24, 5  ;;  %v10217_v62 = vld [vmem:[#allocation208_spill] sm:$0xff] }
 0x6a6   :  { %v8647_v45 = vpop.permute.xlu1 %3281  ;;  %3807 = vrot.lane.b32.xlu0 %v10195_v33, %s4768_s10  ;;  %v3846_v56 = vsel %vm724_vm8, %v10197_v27, %v3845_v54  ;;  %v2835_v14 = vadd.f32 %v8353_v17, %v2795_v55  ;;  %v2942_v58 = vadd.f32 %v8419_v53, %v2902_v30  ;;  %v3910_v57 = vmul.f32 %v8179_v40, %v10206_v42  ;;  %v10208_v33 = vld [vmem:[#allocation17_spill] sm:$0xff]  ;;  %v10212_v27 = vld [vmem:[#allocation205_spill] sm:$0xff]  ;;  %v10220_v30 = vld [vmem:[#allocation207_spill] sm:$0xff] }
 0x6a7   :  { %v2904_v1 = vadd.f32 %v8407_v6, %v2878_v39  ;;  %v10200_v6 = vld [vmem:[#allocation166_spill] sm:$0xff]  ;;  %v3907_v11 = vmul.f32 %v8171_v3, %v10206_v42 }
 0x6a8   :  { %3809 = vrot.lane.b32.xlu1 %v3801_v48, %s4768_s10  ;;  %v8669_v12 = vpop.permute.xlu0 %3275  ;;  %v2875_v26 = vadd.f32 %v8375_v59, %v2835_v14  ;;  %v10201_v50 = vrot.slane %v10200_v6, 4  ;;  %v10203_v48 = vld [vmem:[#allocation202_spill] sm:$0xff]  ;;  %v2982_v53 = vadd.f32 %v10207_v43, %v2942_v58 }
 0x6a9   :  { %v2944_v13 = vadd.f32 %v8431_v61, %v2904_v1  ;;  %v3023_v54 = vadd.f32 %v10203_v48, %v2983_v44  ;;  %v10210_v39 = vld [vmem:[#allocation82_spill] sm:$0xff]  ;;  %v10221_v44 = vld [vmem:[#allocation216_spill] sm:$0xff] }
 0x6aa   :  { %v8667_v32 = vpop.permute.xlu1 %3277  ;;  %3851 = vrot.lane.b32.xlu0 %v10199_v34, %s4768_s10  ;;  %v3841_v51 = vsel %vm724_vm8, %v10201_v50, %v3840_v0  ;;  %v2901_v59 = vadd.f32 %v8397_v36, %v2875_v26  ;;  %v3022_v15 = vadd.f32 %v10211_v22, %v2982_v53  ;;  %v10213_v0 = vld [vmem:[#allocation212_spill] sm:$0xff]  ;;  %v10214_v1 = vld [vmem:[#allocation170_spill] sm:$0xff]  ;;  %v3925_v34 = vrot.slane %v3910_v57, 6  ;;  %v10216_v26 = vld [vmem:[#allocation203_spill] sm:$0xff] }
 0x6ab   :  { %v2984_v61 = vadd.f32 %v8455_v7, %v2944_v13  ;;  %v10204_v7 = vld [vmem:[#allocation169_spill] sm:$0xff]  ;;  %v3063_v55 = vadd.f32 %v10209_v41, %v3023_v54  ;;  %v10215_v5 = vrot.slane %v10214_v1, 5  ;;  %v10227_v57 = vld [vmem:[#allocation220_spill] sm:$0xff]  ;;  %v10229_v53 = vld [vmem:[#allocation210_spill] sm:$0xff] }
 0x6ac   :  { %3853 = vrot.lane.b32.xlu1 %v3846_v56, %s4768_s10  ;;  %v8689_v17 = vpop.permute.xlu0 %3319  ;;  %v2941_v16 = vadd.f32 %v8421_v49, %v2901_v59  ;;  %v10205_v10 = vrot.slane %v10204_v7, 5  ;;  %v3062_v13 = vadd.f32 %v10216_v26, %v3022_v15  ;;  %v10224_v54 = vld [vmem:[#allocation213_spill] sm:$0xff]  ;;  %v10231_v15 = vld [vmem:[#allocation172_spill] sm:$0xff]  ;;  %v10234_v1 = vld [vmem:[#allocation214_spill] sm:$0xff] }
 0x6ad   :  { %v3024_v25 = vadd.f32 %v8479_v20, %v2984_v61  ;;  %v3103_v8 = vadd.f32 %v8529_v60, %v3063_v55  ;;  %v10218_v60 = vld [vmem:[#allocation177_spill] sm:$0xff] }
 0x6ae   :  { %v8687_v63 = vpop.permute.xlu1 %3321  ;;  %3847 = vrot.lane.b32.xlu0 %v10202_v38, %s4768_s10  ;;  %v3886_v29 = vsel %vm757_vm9, %v10205_v10, %v3885_v47  ;;  %v2981_v49 = vadd.f32 %v10208_v33, %v2941_v16  ;;  %v10219_v47 = vld [vmem:[#allocation206_spill] sm:$0xff]  ;;  %v10225_v10 = vld [vmem:[#allocation295_spill] sm:$0xff] }
 0x6af   :  { %v3064_v20 = vadd.f32 %v8503_v28, %v3024_v25  ;;  %v3881_v28 = vsel %vm757_vm9, %v10215_v5, %v3880_v9  ;;  %v3102_v24 = vadd.f32 %v10219_v47, %v3062_v13  ;;  %v10222_v25 = vld [vmem:[#allocation171_spill] sm:$0xff] }
 0x6b0   :  { %3849 = vrot.lane.b32.xlu1 %v3841_v51, %s4768_s10  ;;  %v8709_v36 = vpop.permute.xlu0 %3315  ;;  %v3021_v56 = vadd.f32 %v10212_v27, %v2981_v49  ;;  %v3143_v51 = vadd.f32 %v8549_v4, %v3103_v8  ;;  %v10223_v48 = vrot.slane %v10222_v25, 6  ;;  %v3920_v4 = vrot.slane %v3907_v11, 6  ;;  %v10226_v9 = vld [vmem:[#allocation215_spill] sm:$0xff] }
 0x6b1   :  { %v3104_v21 = vadd.f32 %v10213_v0, %v3064_v20  ;;  %v3142_v7 = vadd.f32 %v10224_v54, %v3102_v24  ;;  %v10230_v49 = vld [vmem:[#allocation211_spill] sm:$0xff]  ;;  %v10232_v27 = vrot.slane %v10231_v15, 6  ;;  %v3944_v0 = vstv %s4628_s2 }
 0x6b2   :  { %v8707_v2 = vpop.permute.xlu1 %3317  ;;  %3891 = vrot.lane.b32.xlu0 %v10210_v39, %s4768_s10  ;;  %v3061_v6 = vadd.f32 %v10217_v62, %v3021_v56  ;;  %v3169_v38 = vadd.f32 %v10221_v44, %v3143_v51  ;;  %v10239_v25 = vld [vmem:[#allocation16_spill] sm:$0xff] }
 0x6b3   :  { %v3144_v50 = vadd.f32 %v8547_v31, %v3104_v21  ;;  %v3926_v31 = vsel %vm790_vm10, %v10223_v48, %v3925_v34  ;;  %v3168_v33 = vadd.f32 %v10229_v53, %v3142_v7  ;;  %v3921_v56 = vsel %vm790_vm10, %v10232_v27, %v3920_v4  ;;  %v10233_v21 = vld [vmem:[#allocation217_spill] sm:$0xff] }
 0x6b4   :  { %3893 = vrot.lane.b32.xlu1 %v3886_v29, %s4768_s10  ;;  %v3360_v14 = vpop.permute.xlu0 %3359  ;;  %v3101_v59 = vadd.f32 %v10220_v30, %v3061_v6  ;;  %v3209_v43 = vadd.f32 %v10227_v57, %v3169_v38  ;;  %v3946_v48 = vmul.f32 %v10239_v25, %v3944_v0 }
 0x6b5   :  { %v3170_v61 = vadd.f32 %v8567_v35, %v3144_v50  ;;  %v10228_v35 = vld [vmem:[#allocation178_spill] sm:$0xff]  ;;  %v3208_v8 = vadd.f32 %v10233_v21, %v3168_v33  ;;  %v10236_v50 = vld [vmem:[#allocation303_spill] sm:$0xff]  ;;  %v10244_v33 = vld [vmem:[#allocation181_spill] sm:$0xff] }
 0x6b6   :  { %v3362_v46 = vpop.permute.xlu1 %3361  ;;  %3887 = vrot.lane.b32.xlu0 %v10218_v60, %s4768_s10  ;;  %v3141_v29 = vadd.f32 %v10225_v10, %v3101_v59  ;;  %v3249_v55 = vadd.f32 %v8629_v37, %v3209_v43  ;;  %v3948_v51 = vmul.f32 %v10236_v50, %v3944_v0 }
 0x6b7   :  { %v3210_v42 = vadd.f32 %v10226_v9, %v3170_v61  ;;  %v3248_v37 = vadd.f32 %v8607_v18, %v3208_v8  ;;  %v10241_v9 = vld [vmem:[#allocation52_spill] sm:$0xff] }
 0x6b8   :  { %3889 = vrot.lane.b32.xlu1 %v3881_v28, %s4768_s10  ;;  %v3356_v16 = vpop.permute.xlu0 %3355  ;;  %v3167_v20 = vadd.f32 %v10230_v49, %v3141_v29  ;;  %v3289_v34 = vadd.f32 %v8649_v23, %v3249_v55  ;;  %v10238_v23 = vld [vmem:[#allocation51_spill] sm:$0xff] }
 0x6b9   :  { %v3250_v41 = vadd.f32 %v8627_v19, %v3210_v42  ;;  %v10235_v19 = vld [vmem:[#allocation179_spill] sm:$0xff]  ;;  %v3976_v47 = vmul.f32 %v8179_v40, %v10238_v23  ;;  %v3288_v24 = vadd.f32 %v8667_v32, %v3248_v37  ;;  %v4016_v42 = vmul.f32 %v8179_v40, %v10241_v9 }
 0x6ba   :  { %v3358_v58 = vpop.permute.xlu1 %3357  ;;  %3931 = vrot.lane.b32.xlu0 %v10228_v35, %s4768_s10  ;;  %v3207_v5 = vadd.f32 %v10234_v1, %v3167_v20  ;;  %v3329_v13 = vadd.f32 %v8689_v17, %v3289_v34  ;;  %v10242_v35 = vld [vmem:[#allocation173_spill] sm:$0xff]  ;;  %v10248_v34 = vld [vmem:[#allocation175_spill] sm:$0xff] }
 0x6bb   :  { %v3290_v28 = vadd.f32 %v8647_v45, %v3250_v41  ;;  %v10237_v45 = vld [vmem:[#allocation200_spill] sm:$0xff]  ;;  %v3991_v4 = vrot.slane %v3976_v47, 1  ;;  %v10243_v53 = vrot.slane %v10242_v35, 1  ;;  %v4013_v41 = vmul.f32 %v8171_v3, %v10241_v9  ;;  %v10262_v35 = vld [vmem:[#allocation183_spill] sm:$0xff] }
 0x6bc   :  { %3933 = vrot.lane.b32.xlu1 %v3926_v31, %s4768_s10  ;;  %v3400_v22 = vpop.permute.xlu0 %3399  ;;  %v3247_v11 = vadd.f32 %v8609_v52, %v3207_v5  ;;  %v3947_v60 = vmul.f32 %v10237_v45, %v3944_v0  ;;  %v3369_v59 = vadd.f32 %v3360_v14, %v3329_v13  ;;  %v3328_v52 = vadd.f32 %v8707_v2, %v3288_v24  ;;  %v10240_v31 = vld [vmem:[#allocation201_spill] sm:$0xff]  ;;  %v10251_v13 = vld [vmem:[#allocation84_spill] sm:$0xff] }
 0x6bd   :  { %v3330_v26 = vadd.f32 %v8687_v63, %v3290_v28  ;;  %v3945_v32 = vmul.f32 %v10240_v31, %v3944_v0  ;;  %v10247_v0 = vld [vmem:[#allocation83_spill] sm:$0xff]  ;;  %v4026_v1 = vrot.slane %v4013_v41, 2  ;;  %v10258_v31 = vld [vmem:[#allocation85_spill] sm:$0xff] }
 0x6be   :  { %v3402_v39 = vpop.permute.xlu1 %3401  ;;  %3927 = vrot.lane.b32.xlu0 %v10235_v19, %s4768_s10  ;;  %v3287_v30 = vadd.f32 %v8669_v12, %v3247_v11  ;;  %v3409_v61 = vadd.f32 %v3400_v22, %v3369_v59  ;;  %v3973_v12 = vmul.f32 %v8171_v3, %v10238_v23  ;;  %v10245_v22 = vld [vmem:[#allocation174_spill] sm:$0xff]  ;;  %v10249_v19 = vrot.slane %v10248_v34, 2  ;;  %v10250_v11 = vld [vmem:[#allocation53_spill] sm:$0xff] }
 0x6bf   :  { %v3370_v18 = vadd.f32 %v3362_v46, %v3330_v26  ;;  %v3368_v46 = vadd.f32 %v3358_v58, %v3328_v52  ;;  %v3992_v58 = vsel %vm625_vm11, %v10243_v53, %v3991_v4  ;;  %v10246_v15 = vrot.slane %v10245_v22, 1  ;;  %v10255_v52 = vld [vmem:[#allocation54_spill] sm:$0xff] }
 0x6c0   :  { %3929 = vrot.lane.b32.xlu1 %v3921_v56, %s4768_s10  ;;  %v3396_v6 = vpop.permute.xlu0 %3395  ;;  %v3327_v63 = vadd.f32 %v8709_v36, %v3287_v30  ;;  %v4031_v56 = vrot.slane %v4016_v42, 2  ;;  %v4056_v26 = vmul.f32 %v8179_v40, %v10250_v11  ;;  %v4053_v50 = vmul.f32 %v8171_v3, %v10250_v11  ;;  %v10254_v30 = vld [vmem:[#allocation185_spill] sm:$0xff]  ;;  %s10286_s10 = smov 112  }
 0x6c1   :  { %v3410_v17 = vadd.f32 %v3402_v39, %v3370_v18  ;;  %v10263_v53 = vrot.slane %v10262_v35, 4 }
 0x6c2   :  { %v3398_v62 = vpop.permute.xlu1 %3397  ;;  %3957 = vrot.lane.b32.xlu0 %v3947_v60, %s4769_s22  ;;  %v3367_v14 = vadd.f32 %v3356_v16, %v3327_v63  ;;  %v3986_v16 = vrot.slane %v3973_v12, 1  ;;  %v4032_v37 = vsel %vm658_vm6, %v10249_v19, %v4031_v56  ;;  %v10252_v60 = vld [vmem:[#allocation176_spill] sm:$0xff]  ;;  %v4071_v24 = vrot.slane %v4056_v26, 3 }
 0x6c3   :  { %v3408_v2 = vadd.f32 %v3398_v62, %v3368_v46  ;;  %v10253_v23 = vrot.slane %v10252_v60, 2  ;;  %v4096_v63 = vmul.f32 %v8179_v40, %v10255_v52  ;;  %v4093_v12 = vmul.f32 %v8171_v3, %v10255_v52 }
 0x6c4   :  { %3959 = vrot.lane.b32.xlu1 %v3948_v51, %s4769_s22  ;;  %v3426_v38 = vpop.permute.xlu0 %3425  ;;  %v3407_v36 = vadd.f32 %v3396_v6, %v3367_v14  ;;  %v3987_v27 = vsel %vm625_vm11, %v10246_v15, %v3986_v16  ;;  %v10264_v16 = vld [vmem:[#allocation55_spill] sm:$0xff]  ;;  %v10266_v15 = vld [vmem:[#allocation184_spill] sm:$0xff] }
 0x6c5   :  { %v3435_v7 = vadd.f32 %v3426_v38, %v3409_v61  ;;  %v4027_v47 = vsel %vm658_vm6, %v10253_v23, %v4026_v1  ;;  %v4106_v42 = vrot.slane %v4093_v12, 4  ;;  %v10279_v12 = vld [vmem:[#allocation189_spill] sm:$0xff]  ;;  %vm4331_vm6 = vcmask 911104  }
 0x6c6   :  { %v3428_v44 = vpop.permute.xlu1 %3427  ;;  %3953 = vrot.lane.b32.xlu0 %v3945_v32, %s4769_s22 }
 0x6c7   :  { %v3436_v54 = vadd.f32 %v3428_v44, %v3410_v17  ;;  %v10256_v44 = vld [vmem:[#allocation180_spill] sm:$0xff] }
 0x6c8   :  { %3955 = vrot.lane.b32.xlu1 %v3946_v48, %s4769_s22  ;;  %v3422_v29 = vpop.permute.xlu0 %3421  ;;  %v10257_v38 = vrot.slane %v10256_v44, 3  ;;  %v4066_v48 = vrot.slane %v4053_v50, 3  ;;  %v4689_v50 = vld [vmem:[#allocation2 + $0x40] sm:$0x3f] }
 0x6c9   :  { %v3433_v43 = vadd.f32 %v3422_v29, %v3407_v36  ;;  %v4111_v36 = vrot.slane %v4096_v63, 4 }
 0x6ca   :  { %v3424_v10 = vpop.permute.xlu1 %3423  ;;  %3997 = vrot.lane.b32.xlu0 %v10244_v33, %s4769_s22  ;;  %v4072_v25 = vsel %vm691_vm7, %v10257_v38, %v4071_v24  ;;  %v4136_v33 = vmul.f32 %v8179_v40, %v10264_v16 }
 0x6cb   :  { %v3434_v57 = vadd.f32 %v3424_v10, %v3408_v2  ;;  %v10261_v10 = vld [vmem:[#allocation190_spill] sm:$0xff] }
 0x6cc   :  { %3999 = vrot.lane.b32.xlu1 %v3992_v58, %s4769_s22  ;;  %v3466_v20 = vpop.permute.xlu0 %3465  ;;  %v4112_v58 = vsel %vm724_vm8, %v10263_v53, %v4111_v36 }
 0x6cd   :  { %v3475_v39 = vadd.f32 %v3466_v20, %v3435_v7 }
 0x6ce   :  { %v3468_v49 = vpop.permute.xlu1 %3467  ;;  %3993 = vrot.lane.b32.xlu0 %v10247_v0, %s4769_s22  ;;  %v4151_v0 = vrot.slane %v4136_v33, 5 }
 0x6cf   :  { %v3476_v55 = vadd.f32 %v3468_v49, %v3436_v54  ;;  %v10259_v54 = vld [vmem:[#allocation182_spill] sm:$0xff]  ;;  %v10265_v49 = vld [vmem:[#allocation191_spill] sm:$0xff] }
 0x6d0   :  { %3995 = vrot.lane.b32.xlu1 %v3987_v27, %s4769_s22  ;;  %v3462_v8 = vpop.permute.xlu0 %3461  ;;  %v10260_v7 = vrot.slane %v10259_v54, 3  ;;  %v10267_v27 = vrot.slane %v10266_v15, 4  ;;  %v10281_v54 = vld [vmem:[#allocation196_spill] sm:$0xff] }
 0x6d1   :  { %v3473_v28 = vadd.f32 %v3462_v8, %v3433_v43 }
 0x6d2   :  { %v3464_v21 = vpop.permute.xlu1 %3463  ;;  %4037 = vrot.lane.b32.xlu0 %v10251_v13, %s4769_s22  ;;  %v4067_v2 = vsel %vm691_vm7, %v10260_v7, %v4066_v48  ;;  %v4107_v56 = vsel %vm724_vm8, %v10267_v27, %v4106_v42  ;;  %v10272_v13 = vld [vmem:[#allocation193_spill] sm:$0xff]  ;;  %vm4343_vm7 = vcmask 1042304  }
 0x6d3   :  { %v3474_v5 = vadd.f32 %v3464_v21, %v3434_v57  ;;  %v10268_v21 = vld [vmem:[#allocation192_spill] sm:$0xff] }
 0x6d4   :  { %4039 = vrot.lane.b32.xlu1 %v4032_v37, %s4769_s22  ;;  %v3506_v6 = vpop.permute.xlu0 %3505 }
 0x6d5   :  { %v3515_v45 = vadd.f32 %v3506_v6, %v3475_v39 }
 0x6d6   :  { %v3508_v62 = vpop.permute.xlu1 %3507  ;;  %4033 = vrot.lane.b32.xlu0 %v10254_v30, %s4769_s22  ;;  %v10275_v30 = vld [vmem:[#allocation194_spill] sm:$0xff] }
 0x6d7   :  { %v3516_v51 = vadd.f32 %v3508_v62, %v3476_v55  ;;  %v4133_v55 = vmul.f32 %v8171_v3, %v10264_v16  ;;  %v10270_v3 = vld [vmem:[#allocation186_spill] sm:$0xff] }
 0x6d8   :  { %4035 = vrot.lane.b32.xlu1 %v4027_v47, %s4769_s22  ;;  %v3502_v59 = vpop.permute.xlu0 %3501  ;;  %v10271_v37 = vrot.slane %v10270_v3, 5 }
 0x6d9   :  { %v3513_v61 = vadd.f32 %v3502_v59, %v3473_v28  ;;  %v4146_v26 = vrot.slane %v4133_v55, 5 }
 0x6da   :  { %v3504_v18 = vpop.permute.xlu1 %3503  ;;  %4077 = vrot.lane.b32.xlu0 %v10258_v31, %s4769_s22  ;;  %v4152_v11 = vsel %vm757_vm9, %v10271_v37, %v4151_v0 }
 0x6db   :  { %v3514_v17 = vadd.f32 %v3504_v18, %v3474_v5  ;;  %v10269_v5 = vld [vmem:[#allocation56_spill] sm:$0xff] }
 0x6dc   :  { %4079 = vrot.lane.b32.xlu1 %v4072_v25, %s4769_s22  ;;  %v3546_v4 = vpop.permute.xlu0 %3545  ;;  %v4176_v28 = vmul.f32 %v8179_v40, %v10269_v5  ;;  %v10273_v40 = vld [vmem:[#allocation187_spill] sm:$0xff] }
 0x6dd   :  { %v3555_v14 = vadd.f32 %v3546_v4, %v3515_v45  ;;  %v10274_v23 = vrot.slane %v10273_v40, 5  ;;  %v10278_v25 = vld [vmem:[#allocation195_spill] sm:$0xff] }
 0x6de   :  { %v3548_v32 = vpop.permute.xlu1 %3547  ;;  %4073 = vrot.lane.b32.xlu0 %v10261_v10, %s4769_s22  ;;  %v4191_v24 = vrot.slane %v4176_v28, 6 }
 0x6df   :  { %v3556_v46 = vadd.f32 %v3548_v32, %v3516_v51  ;;  %v4173_v51 = vmul.f32 %v4689_v50, %v10269_v5  ;;  %v4147_v47 = vsel %vm757_vm9, %v10274_v23, %v4146_v26 }
 0x6e0   :  { %4075 = vrot.lane.b32.xlu1 %v4067_v2, %s4769_s22  ;;  %v3542_v9 = vpop.permute.xlu0 %3541 }
 0x6e1   :  { %v3553_v43 = vadd.f32 %v3542_v9, %v3513_v61  ;;  %v4186_v38 = vrot.slane %v4173_v51, 6 }
 0x6e2   :  { %v3544_v29 = vpop.permute.xlu1 %3543  ;;  %4117 = vrot.lane.b32.xlu0 %v10265_v49, %s4769_s22 }
 0x6e3   :  { %v3554_v57 = vadd.f32 %v3544_v29, %v3514_v17  ;;  %v10276_v17 = vld [vmem:[#allocation188_spill] sm:$0xff] }
 0x6e4   :  { %4119 = vrot.lane.b32.xlu1 %v4112_v58, %s4769_s22  ;;  %v3586_v41 = vpop.permute.xlu0 %3585  ;;  %v10277_v61 = vrot.slane %v10276_v17, 6 }
 0x6e5   :  { %v3595_v22 = vadd.f32 %v3586_v41, %v3555_v14 }
 0x6e6   :  { %v3588_v20 = vpop.permute.xlu1 %3587  ;;  %4113 = vrot.lane.b32.xlu0 %v10268_v21, %s4769_s22  ;;  %v4192_v44 = vsel %vm790_vm10, %v10277_v61, %v4191_v24 }
 0x6e7   :  { %v3596_v39 = vadd.f32 %v3588_v20, %v3556_v46  ;;  %v10280_v46 = vrot.slane %v10279_v12, 6 }
 0x6e8   :  { %4115 = vrot.lane.b32.xlu1 %v4107_v56, %s4769_s22  ;;  %v3582_v1 = vpop.permute.xlu0 %3581 }
 0x6e9   :  { %v3593_v19 = vadd.f32 %v3582_v1, %v3553_v43  ;;  %v4187_v14 = vsel %vm790_vm10, %v10280_v46, %v4186_v38 }
 0x6ea   :  { %v3584_v8 = vpop.permute.xlu1 %3583  ;;  %4157 = vrot.lane.b32.xlu0 %v10272_v13, %s4769_s22 }
 0x6eb   :  { %v3594_v34 = vadd.f32 %v3584_v8, %v3554_v57 }
 0x6ec   :  { %4159 = vrot.lane.b32.xlu1 %v4152_v11, %s4769_s22  ;;  %v3626_v6 = vpop.permute.xlu0 %3625 }
 0x6ed   :  { %v3635_v60 = vadd.f32 %v3626_v6, %v3595_v22 }
 0x6ee   :  { %v3628_v62 = vpop.permute.xlu1 %3627  ;;  %4153 = vrot.lane.b32.xlu0 %v10275_v30, %s4769_s22 }
 0x6ef   :  { %v3636_v45 = vadd.f32 %v3628_v62, %v3596_v39 }
 0x6f0   :  { %4155 = vrot.lane.b32.xlu1 %v4147_v47, %s4769_s22  ;;  %v3622_v59 = vpop.permute.xlu0 %3621 }
 0x6f1   :  { %v3633_v63 = vadd.f32 %v3622_v59, %v3593_v19 }
 0x6f2   :  { %v3624_v18 = vpop.permute.xlu1 %3623  ;;  %4197 = vrot.lane.b32.xlu0 %v10278_v25, %s4769_s22 }
 0x6f3   :  { %v3634_v52 = vadd.f32 %v3624_v18, %v3594_v34 }
 0x6f4   :  { %4199 = vrot.lane.b32.xlu1 %v4192_v44, %s4769_s22  ;;  %v3666_v31 = vpop.permute.xlu0 %3665 }
 0x6f5   :  { %v3675_v4 = vadd.f32 %v3666_v31, %v3635_v60 }
 0x6f6   :  { %v3668_v48 = vpop.permute.xlu1 %3667  ;;  %4193 = vrot.lane.b32.xlu0 %v10281_v54, %s4769_s22 }
 0x6f7   :  { %v3676_v32 = vadd.f32 %v3668_v48, %v3636_v45 }
 0x6f8   :  { %4195 = vrot.lane.b32.xlu1 %v4187_v14, %s4769_s22  ;;  %v3662_v2 = vpop.permute.xlu0 %3661 }
 0x6f9   :  { %v3673_v10 = vadd.f32 %v3662_v2, %v3633_v63 }
 0x6fa   :  { %v3664_v7 = vpop.permute.xlu1 %3663 }
 0x6fb   :  { %v3674_v36 = vadd.f32 %v3664_v7, %v3634_v52 }
 0x6fc   :  { %v3692_v9 = vpop.permute.xlu0 %3691 }
 0x6fd   :  { %v3701_v57 = vadd.f32 %v3692_v9, %v3675_v4 }
 0x6fe   :  { %v3694_v29 = vpop.permute.xlu1 %3693 }
 0x6ff   :  { %v3702_v42 = vadd.f32 %v3694_v29, %v3676_v32 }
 0x700   :  { %v3688_v35 = vpop.permute.xlu0 %3687 }
 0x701   :  { %v3699_v58 = vadd.f32 %v3688_v35, %v3673_v10 }
 0x702   :  { %v3690_v43 = vpop.permute.xlu1 %3689 }
 0x703   :  { %v3700_v53 = vadd.f32 %v3690_v43, %v3674_v36 }
 0x704   :  { %v3732_v33 = vpop.permute.xlu0 %3731 }
 0x705   :  { %v3741_v20 = vadd.f32 %v3732_v33, %v3701_v57 }
 0x706   :  { %v3734_v16 = vpop.permute.xlu1 %3733 }
 0x707   :  { %v3742_v49 = vadd.f32 %v3734_v16, %v3702_v42 }
 0x708   :  { %v3728_v55 = vpop.permute.xlu0 %3727 }
 0x709   :  { %v3739_v22 = vadd.f32 %v3728_v55, %v3699_v58 }
 0x70a   :  { %v3730_v41 = vpop.permute.xlu1 %3729 }
 0x70b   :  { %v3740_v39 = vadd.f32 %v3730_v41, %v3700_v53 }
 0x70c   :  { %v3772_v27 = vpop.permute.xlu0 %3771 }
 0x70d   :  { %v3781_v0 = vadd.f32 %v3772_v27, %v3741_v20 }
 0x70e   :  { %v3774_v15 = vpop.permute.xlu1 %3773 }
 0x70f   :  { %v3782_v56 = vadd.f32 %v3774_v15, %v3742_v49 }
 0x710   :  { %v3768_v8 = vpop.permute.xlu0 %3767 }
 0x711   :  { %v3779_v5 = vadd.f32 %v3768_v8, %v3739_v22 }
 0x712   :  { %v3770_v21 = vpop.permute.xlu1 %3769 }
 0x713   :  { %v3780_v1 = vadd.f32 %v3770_v21, %v3740_v39  ;;  %v4770_v39 = vmov 1983009808  }
 0x714   :  { %v3812_v34 = vpop.permute.xlu0 %3811  ;;  %v4212_v22 = vunpack.c.l.s4 %v4770_v39 }
 0x715   :  { %v3821_v3 = vadd.f32 %v3812_v34, %v3781_v0 }
 0x716   :  { %v3814_v28 = vpop.permute.xlu1 %3813 }
 0x717   :  { %v3822_v19 = vadd.f32 %v3814_v28, %v3782_v56 }
 0x718   :  { %v3808_v11 = vpop.permute.xlu0 %3807 }
 0x719   :  { %v3819_v9 = vadd.f32 %v3808_v11, %v3779_v5 }
 0x71a   :  { %v3810_v37 = vpop.permute.xlu1 %3809 }
 0x71b   :  { %v3820_v29 = vadd.f32 %v3810_v37, %v3780_v1 }
 0x71c   :  { %v3852_v13 = vpop.permute.xlu0 %3851 }
 0x71d   :  { %v3861_v54 = vadd.f32 %v3852_v13, %v3821_v3 }
 0x71e   :  { %v3854_v26 = vpop.permute.xlu1 %3853 }
 0x71f   :  { %v3862_v14 = vadd.f32 %v3854_v26, %v3822_v19  ;;  %v4213_v19 = vunpack.c.0.s8 %v4212_v22 }
 0x720   :  { %v3848_v6 = vpop.permute.xlu0 %3847 }
 0x721   :  { %v3859_v35 = vadd.f32 %v3848_v6, %v3819_v9 }
 0x722   :  { %v3850_v62 = vpop.permute.xlu1 %3849 }
 0x723   :  { %v3860_v43 = vadd.f32 %v3850_v62, %v3820_v29 }
 0x724   :  { %v3892_v51 = vpop.permute.xlu0 %3891 }
 0x725   :  { %v3901_v10 = vadd.f32 %v3892_v51, %v3861_v54 }
 0x726   :  { %v3894_v50 = vpop.permute.xlu1 %3893 }
 0x727   :  { %v3902_v36 = vadd.f32 %v3894_v50, %v3862_v14 }
 0x728   :  { %v3888_v60 = vpop.permute.xlu0 %3887 }
 0x729   :  { %v3899_v20 = vadd.f32 %v3888_v60, %v3859_v35  ;;  %v10282_v60 = vld [vmem:[#allocation13_spill] sm:$0xff] }
 0x72a   :  { %v3890_v45 = vpop.permute.xlu1 %3889 }
 0x72b   :  { %v3900_v49 = vadd.f32 %v3890_v45, %v3860_v43 }
 0x72c   :  { %v3932_v23 = vpop.permute.xlu0 %3931 }
 0x72d   :  { %v3941_v57 = vadd.f32 %v3932_v23, %v3901_v10 }
 0x72e   :  { %v3934_v40 = vpop.permute.xlu1 %3933 }
 0x72f   :  { %v3942_v42 = vadd.f32 %v3934_v40, %v3902_v36  ;;  %v4216_v40 = vsub.s32 %v4213_v19, %v10282_v60 }
 0x730   :  { %v3928_v24 = vpop.permute.xlu0 %3927 }
 0x731   :  { %v3939_v27 = vadd.f32 %v3928_v24, %v3899_v20 }
 0x732   :  { %v3930_v47 = vpop.permute.xlu1 %3929 }
 0x733   :  { %v3940_v15 = vadd.f32 %v3930_v47, %v3900_v49 }
 0x734   :  { %v3958_v18 = vpop.permute.xlu0 %3957 }
 0x735   :  { %v3967_v33 = vadd.f32 %v3958_v18, %v3941_v57 }
 0x736   :  { %v3960_v30 = vpop.permute.xlu1 %3959 }
 0x737   :  { %v3968_v16 = vadd.f32 %v3960_v30, %v3942_v42 }
 0x738   :  { %v3954_v52 = vpop.permute.xlu0 %3953 }
 0x739   :  { %v3965_v5 = vadd.f32 %v3954_v52, %v3939_v27 }
 0x73a   :  { %v3956_v59 = vpop.permute.xlu1 %3955 }
 0x73b   :  { %v3966_v1 = vadd.f32 %v3956_v59, %v3940_v15 }
 0x73c   :  { %v3998_v17 = vpop.permute.xlu0 %3997 }
 0x73d   :  { %v4007_v55 = vadd.f32 %v3998_v17, %v3967_v33 }
 0x73e   :  { %v4000_v63 = vpop.permute.xlu1 %3999 }
 0x73f   :  { %v4008_v41 = vadd.f32 %v4000_v63, %v3968_v16 }
 0x740   :  { %v3994_v44 = vpop.permute.xlu0 %3993 }
 0x741   :  { %v4005_v37 = vadd.f32 %v3994_v44, %v3965_v5 }
 0x742   :  { %v3996_v61 = vpop.permute.xlu1 %3995 }
 0x743   :  { %v4006_v3 = vadd.f32 %v3996_v61, %v3966_v1 }
 0x744   :  { %v4038_v25 = vpop.permute.xlu0 %4037 }
 0x745   :  { %v4047_v8 = vadd.f32 %v4038_v25, %v4007_v55 }
 0x746   :  { %v4040_v38 = vpop.permute.xlu1 %4039 }
 0x747   :  { %v4048_v21 = vadd.f32 %v4040_v38, %v4008_v41 }
 0x748   :  { %v4034_v31 = vpop.permute.xlu0 %4033 }
 0x749   :  { %v4045_v50 = vadd.f32 %v4034_v31, %v4005_v37 }
 0x74a   :  { %v4036_v48 = vpop.permute.xlu1 %4035 }
 0x74b   :  { %v4046_v6 = vadd.f32 %v4036_v48, %v4006_v3 }
 0x74c   :  { %v4078_v4 = vpop.permute.xlu0 %4077 }
 0x74d   :  { %v4087_v34 = vadd.f32 %v4078_v4, %v4047_v8 }
 0x74e   :  { %v4080_v32 = vpop.permute.xlu1 %4079 }
 0x74f   :  { %v4088_v28 = vadd.f32 %v4080_v32, %v4048_v21 }
 0x750   :  { %v4074_v46 = vpop.permute.xlu0 %4073 }
 0x751   :  { %v4085_v47 = vadd.f32 %v4074_v46, %v4045_v50 }
 0x752   :  { %v4076_v12 = vpop.permute.xlu1 %4075 }
 0x753   :  { %v4086_v23 = vadd.f32 %v4076_v12, %v4046_v6 }
 0x754   :  { %v4118_v2 = vpop.permute.xlu0 %4117 }
 0x755   :  { %v4127_v62 = vadd.f32 %v4118_v2, %v4087_v34 }
 0x756   :  { %v4120_v7 = vpop.permute.xlu1 %4119 }
 0x757   :  { %v4128_v13 = vadd.f32 %v4120_v7, %v4088_v28 }
 0x758   :  { %v4114_v58 = vpop.permute.xlu0 %4113 }
 0x759   :  { %v4125_v63 = vadd.f32 %v4114_v58, %v4085_v47 }
 0x75a   :  { %v4116_v53 = vpop.permute.xlu1 %4115 }
 0x75b   :  { %v4126_v52 = vadd.f32 %v4116_v53, %v4086_v23 }
 0x75c   :  { %v4158_v0 = vpop.permute.xlu0 %4157 }
 0x75d   :  { %v4167_v45 = vadd.f32 %v4158_v0, %v4127_v62 }
 0x75e   :  { %v4160_v56 = vpop.permute.xlu1 %4159 }
 0x75f   :  { %v4168_v51 = vadd.f32 %v4160_v56, %v4128_v13 }
 0x760   :  { %v4154_v26 = vpop.permute.xlu0 %4153 }
 0x761   :  { %v4165_v48 = vadd.f32 %v4154_v26, %v4125_v63 }
 0x762   :  { %v4156_v11 = vpop.permute.xlu1 %4155 }
 0x763   :  { %v4166_v25 = vadd.f32 %v4156_v11, %v4126_v52 }
 0x764   :  { %v4198_v30 = vpop.permute.xlu0 %4197 }
 0x765   :  { %v4207_v59 = vadd.f32 %v4198_v30, %v4167_v45 }
 0x766   :  { %v4200_v24 = vpop.permute.xlu1 %4199 }
 0x767   :  { %v4208_v18 = vadd.f32 %v4200_v24, %v4168_v51  ;;  %v8879_v44 = vrot.slane %v4207_v59, %v4216_v40  ;;  %v4287_v38 = vcombine.high %v4207_v59, %v4207_v59 }
 0x768   :  { %v4194_v32 = vpop.permute.xlu0 %4193 }
 0x769   :  { %v4360_v17 = vrot.slane %v4208_v18, %v4216_v40  ;;  %v4413_v61 = vcombine.high %v4208_v18, %v4208_v18  ;;  %v8887_v46 = vcombine.high %v8879_v44, %v8879_v44  ;;  %v8889_v14 = vrot.slane %v4287_v38, %v4216_v40 }
 0x76a   :  { %v4196_v31 = vpop.permute.xlu1 %4195  ;;  %v8894_v2 = vrot.slane %v8879_v44, 7  ;;  %v4205_v36 = vadd.f32 %v4194_v32, %v4165_v48 }
 0x76b   :  { %v8881_v4 = vcombine.high %v4360_v17, %v4360_v17  ;;  %v8883_v12 = vrot.slane %v4413_v61, %v4216_v40  ;;  %v8891_v54 = vrot.slane %v4360_v17, 7  ;;  %v4206_v7 = vadd.f32 %v4196_v31, %v4166_v25 }
 0x76c   :  { %v8902_v29 = vcombine.high %v8889_v14, %v8889_v14  ;;  %v8906_v42 = vrot.slane %v8889_v14, 7  ;;  %v4217_v35 = vrot.slane %v4205_v36, %v4216_v40  ;;  %v4279_v53 = vcombine.high %v4205_v36, %v4205_v36 }
 0x76d   :  { %v8898_v10 = vcombine.high %v8883_v12, %v8883_v12  ;;  %v4423_v9 = vrot.slane %v8883_v12, 7  ;;  %v4353_v57 = vrot.slane %v4206_v7, %v4216_v40  ;;  %v4405_v43 = vcombine.high %v4206_v7, %v4206_v7 }
 0x76e   :  { %v4385_v58 = vrot.slane %v8881_v4, 7  ;;  %v4257_v16 = vrot.slane %v8887_v46, 7  ;;  %v8914_v49 = vrot.slane %v8902_v29, 7  ;;  %v4231_v15 = vsel %vm4230_vm12, %v8894_v2, %v4217_v35 }
 0x76f   :  { %v8911_v33 = vrot.slane %v8898_v10, 7  ;;  %v4364_v20 = vsel %vm4230_vm12, %v8891_v54, %v4353_v57  ;;  %v4370_v41 = vrot.slane %v4353_v57, 1  ;;  %v4381_v55 = vcombine.high %v4353_v57, %v4353_v57 }
 0x770   :  { %v4412_v39 = vrot.slane %v4405_v43, %v4216_v40  ;;  %v8920_v22 = vsel %vm4232_vm13, %v8891_v54, %v4364_v20  ;;  %v4241_v27 = vrot.slane %v4217_v35, 1  ;;  %v4253_v56 = vcombine.high %v4217_v35, %v4217_v35 }
 0x771   :  { %v4394_v0 = vrot.slane %v4381_v55, 1  ;;  %v8929_v5 = vsel %vm4232_vm13, %v8894_v2, %v4231_v15  ;;  %v4286_v34 = vrot.slane %v4279_v53, %v4216_v40  ;;  %v4373_v19 = vsel %vm4230_vm12, %v4360_v17, %v4370_v41 }
 0x772   :  { %v4424_v21 = vsel %vm4230_vm12, %v4423_v9, %v4412_v39  ;;  %v4432_v8 = vrot.slane %v4412_v39, 1  ;;  %v8925_v1 = vcombine.high %v4412_v39, %v4412_v39  ;;  %v4267_v28 = vrot.slane %v4253_v56, 1 }
 0x773   :  { %v4374_v37 = vsel %vm4232_vm13, %v4360_v17, %v4373_v19  ;;  %v4244_v11 = vsel %vm4230_vm12, %v8879_v44, %v4241_v27  ;;  %v4386_v26 = vsel %vm4230_vm12, %v4385_v58, %v4381_v55  ;;  %v4298_v13 = vsel %vm4230_vm12, %v8906_v42, %v4286_v34 }
 0x774   :  { %v4456_v3 = vrot.slane %v8925_v1, 1  ;;  %v4307_v62 = vrot.slane %v4286_v34, 1  ;;  %v4319_v6 = vcombine.high %v4286_v34, %v4286_v34  ;;  %v4375_v50 = vsel %vm4234_vm14, %v4360_v17, %v4374_v37 }
 0x775   :  { %v4376_v51 = vsel %vm4236_vm15, %v4360_v17, %v4375_v50  ;;  %v4245_v45 = vsel %vm4232_vm13, %v8879_v44, %v4244_v11  ;;  %v4387_v40 = vsel %vm4232_vm13, %v4385_v58, %v4386_v26  ;;  %v4258_v23 = vsel %vm4230_vm12, %v4257_v16, %v4253_v56 }
 0x776   :  { %v4333_v47 = vrot.slane %v4319_v6, 1  ;;  %4377 = vrot.lane.b32.xlu1 %v4376_v51, %s4763_s0  ;;  %v4246_v24 = vsel %vm4234_vm14, %v8879_v44, %v4245_v45  ;;  %v4388_v30 = vsel %vm4234_vm14, %v4385_v58, %v4387_v40  ;;  %v4259_v18 = vsel %vm4232_vm13, %v4257_v16, %v4258_v23 }
 0x777   :  { %v4247_v59 = vsel %vm4236_vm15, %v8879_v44, %v4246_v24  ;;  %v4389_v52 = vsel %vm4236_vm15, %v4385_v58, %v4388_v30  ;;  %v4260_v63 = vsel %vm4234_vm14, %v4257_v16, %v4259_v18  ;;  %v4397_v17 = vsel %vm4230_vm12, %v8881_v4, %v4394_v0 }
 0x778   :  { %4248 = vrot.lane.b32.xlu0 %v4247_v59, %s4763_s0  ;;  %v4261_v61 = vsel %vm4236_vm15, %v4257_v16, %v4260_v63  ;;  %v4398_v38 = vsel %vm4232_vm13, %v8881_v4, %v4397_v17  ;;  %v4270_v25 = vsel %vm4230_vm12, %v8887_v46, %v4267_v28  ;;  %v4425_v44 = vsel %vm4232_vm13, %v4423_v9, %v4424_v21  ;;  %s10285_s0 = smov 96  }
 0x779   :  { %v4399_v48 = vsel %vm4234_vm14, %v8881_v4, %v4398_v38  ;;  %v4271_v31 = vsel %vm4232_vm13, %v8887_v46, %v4270_v25  ;;  %v4426_v32 = vsel %vm4234_vm14, %v4423_v9, %v4425_v44  ;;  %v4299_v7 = vsel %vm4232_vm13, %v8906_v42, %v4298_v13  ;;  %v4474_v38 = vld [vmem:[#allocation8] ss:$4 sm:$0x3]  ;;  %v4496_v25 = vld [vmem:[#allocation8 + $0x1] ss:$4 sm:$0x3] }
 0x77a   :  { %4390 = vrot.lane.b32.xlu1 %v4389_v52, %s4762_s16  ;;  %v4400_v36 = vsel %vm4236_vm15, %v8881_v4, %v4399_v48  ;;  %v4272_v57 = vsel %vm4234_vm14, %v8887_v46, %v4271_v31  ;;  %v4427_v43 = vsel %vm4236_vm15, %v4423_v9, %v4426_v32  ;;  %v4300_v35 = vsel %vm4234_vm14, %v8906_v42, %v4299_v7  ;;  %v4475_v48 = vld [vmem:[#allocation8 + $0x8] ss:$4 sm:$0x3]  ;;  %v4497_v31 = vld [vmem:[#allocation8 + $0x9] ss:$4 sm:$0x3] }
 0x77b   :  { %v4273_v53 = vsel %vm4236_vm15, %v8887_v46, %v4272_v57  ;;  %v4301_v58 = vsel %vm4236_vm15, %v8906_v42, %v4300_v35  ;;  %v4435_v16 = vsel %vm4230_vm12, %v8883_v12, %v4432_v8  ;;  %v4310_v4 = vsel %vm4230_vm12, %v8889_v14, %v4307_v62  ;;  %v4504_v32 = vld [vmem:[#allocation8 + $0x2] ss:$4 sm:$0x3]  ;;  %v4512_v57 = vld [vmem:[#allocation8 + $0x3] ss:$4 sm:$0x3] }
 0x77c   :  { %4262 = vrot.lane.b32.xlu0 %v4261_v61, %s4762_s16  ;;  %v4436_v9 = vsel %vm4232_vm13, %v8883_v12, %v4435_v16  ;;  %v4311_v20 = vsel %vm4232_vm13, %v8889_v14, %v4310_v4  ;;  %v4448_v46 = vsel %vm4230_vm12, %v8911_v33, %v8925_v1  ;;  %v4324_v42 = vsel %vm4230_vm12, %v8914_v49, %v4319_v6  ;;  %s10284_s16 = smov 80  }
 0x77d   :  { %v4437_v41 = vsel %vm4234_vm14, %v8883_v12, %v4436_v9  ;;  %v4312_v55 = vsel %vm4234_vm14, %v8889_v14, %v4311_v20  ;;  %v4449_v39 = vsel %vm4232_vm13, %v8911_v33, %v4448_v46  ;;  %v4325_v15 = vsel %vm4232_vm13, %v8914_v49, %v4324_v42 }
 0x77e   :  { %4401 = vrot.lane.b32.xlu1 %v4400_v36, %s9409_s15  ;;  %v4438_v27 = vsel %vm4236_vm15, %v8883_v12, %v4437_v41  ;;  %v4313_v56 = vsel %vm4236_vm15, %v8889_v14, %v4312_v55  ;;  %v4450_v0 = vsel %vm4234_vm14, %v8911_v33, %v4449_v39  ;;  %v4326_v21 = vsel %vm4234_vm14, %v8914_v49, %v4325_v15  ;;  %v4505_v36 = vld [vmem:[#allocation8 + $0xa] ss:$4 sm:$0x3] }
 0x77f   :  { %v4451_v8 = vsel %vm4236_vm15, %v8911_v33, %v4450_v0  ;;  %v4327_v1 = vsel %vm4236_vm15, %v8914_v49, %v4326_v21  ;;  %v4459_v28 = vsel %vm4230_vm12, %v8898_v10, %v4456_v3  ;;  %v4336_v12 = vsel %vm4230_vm12, %v8902_v29, %v4333_v47 }
 0x780   :  { %4274 = vrot.lane.b32.xlu0 %v4273_v53, %s9409_s15  ;;  %v4460_v14 = vsel %vm4232_vm13, %v8898_v10, %v4459_v28  ;;  %v4337_v34 = vsel %vm4232_vm13, %v8902_v29, %v4336_v12  ;;  %v4366_v33 = vsel %vm4234_vm14, %v8891_v54, %v8920_v22  ;;  %v4235_v49 = vsel %vm4234_vm14, %v8894_v2, %v8929_v5  ;;  %s10283_s15 = smov 64   ;;  %v4513_v53 = vld [vmem:[#allocation8 + $0xb] ss:$4 sm:$0x3] }
 0x781   :  { %v4461_v19 = vsel %vm4234_vm14, %v8898_v10, %v4460_v14  ;;  %v4338_v3 = vsel %vm4234_vm14, %v8902_v29, %v4337_v34  ;;  %v4367_v37 = vsel %vm4236_vm15, %v8891_v54, %v4366_v33  ;;  %v4237_v11 = vsel %vm4236_vm15, %v8894_v2, %v4235_v49 }
 0x782   :  { %4428 = vrot.lane.b32.xlu1 %v4427_v43, %s10283_s15  ;;  %v4462_v22 = vsel %vm4236_vm15, %v8898_v10, %v4461_v19  ;;  %v4339_v5 = vsel %vm4236_vm15, %v8902_v29, %v4338_v3  ;;  %4369 = vst.msk [vmem:[#allocation3 + $0x2] sm:$0x3] %vm4239_vm0, %v4367_v37  ;;  %4240 = vst.msk [vmem:[#allocation3] sm:$0x3] %vm4239_vm0, %v4237_v11  ;;  %v4771_v52 = vmov 1966171168   ;;  %v10287_v43 = vlaneseq }
 0x783   :  { %v4478_v63 = vunpack.c.l.s4 %v4771_v52 }
 0x784   :  { %4302 = vrot.lane.b32.xlu0 %v4301_v58, %s10283_s15  ;;  %vm9056_vm8 = vcmp.lt.s32.totalorder %v10287_v43, 256 }
 0x785   :  { %v4479_v17 = vunpack.c.0.s8 %v4478_v63 }
 0x786   :  { %4439 = vrot.lane.b32.xlu1 %v4438_v27, %s10284_s16 }
 0x787   :  { %v4482_v61 = vsub.s32 %v4479_v17, %v10282_v60 }
 0x788   :  { %4314 = vrot.lane.b32.xlu0 %v4313_v56, %s10284_s16 }
 0x78a   :  { %4452 = vrot.lane.b32.xlu1 %v4451_v8, %s10285_s0 }
 0x78c   :  { %4328 = vrot.lane.b32.xlu0 %v4327_v1, %s10285_s0 }
 0x78e   :  { %4463 = vrot.lane.b32.xlu1 %v4462_v22, %s10286_s10 }
 0x790   :  { %4340 = vrot.lane.b32.xlu0 %v4339_v5, %s10286_s10 }
 0x7e8   :  { %v4378_v54 = vpop.permute.xlu1 %4377 }
 0x7e9   :  { %4380 = vst.msk [vmem:[#allocation3 + $0x2] sm:$0x3] %vm4251_vm1, %v4378_v54 }
 0x7ea   :  { %v4249_v2 = vpop.permute.xlu0 %4248 }
 0x7eb   :  { %4252 = vst.msk [vmem:[#allocation3] sm:$0x3] %vm4251_vm1, %v4249_v2 }
 0x7ec   :  { %v4391_v10 = vpop.permute.xlu1 %4390 }
 0x7ed   :  { %4393 = vst.msk [vmem:[#allocation3 + $0x2] sm:$0x3] %vm4265_vm2, %v4391_v10 }
 0x7ee   :  { %v4263_v29 = vpop.permute.xlu0 %4262 }
 0x7ef   :  { %4266 = vst.msk [vmem:[#allocation3] sm:$0x3] %vm4265_vm2, %v4263_v29 }
 0x7f0   :  { %v4402_v26 = vpop.permute.xlu1 %4401 }
 0x7f1   :  { %4404 = vst.msk [vmem:[#allocation3 + $0x2] sm:$0x3] %vm4277_vm3, %v4402_v26 }
 0x7f2   :  { %v4275_v13 = vpop.permute.xlu0 %4274 }
 0x7f3   :  { %4278 = vst.msk [vmem:[#allocation3] sm:$0x3] %vm4277_vm3, %v4275_v13 }
 0x7f4   :  { %v4429_v62 = vpop.permute.xlu1 %4428 }
 0x7f5   :  { %4431 = vst.msk [vmem:[#allocation3 + $0x2] sm:$0x3] %vm4305_vm4, %v4429_v62 }
 0x7f6   :  { %v4303_v6 = vpop.permute.xlu0 %4302 }
 0x7f7   :  { %4306 = vst.msk [vmem:[#allocation3] sm:$0x3] %vm4305_vm4, %v4303_v6 }
 0x7f8   :  { %v4440_v50 = vpop.permute.xlu1 %4439 }
 0x7f9   :  { %4442 = vst.msk [vmem:[#allocation3 + $0x2] sm:$0x3] %vm4317_vm5, %v4440_v50 }
 0x7fa   :  { %v4315_v51 = vpop.permute.xlu0 %4314 }
 0x7fb   :  { %4318 = vst.msk [vmem:[#allocation3] sm:$0x3] %vm4317_vm5, %v4315_v51 }
 0x7fc   :  { %v4453_v45 = vpop.permute.xlu1 %4452 }
 0x7fd   :  { %4455 = vst.msk [vmem:[#allocation3 + $0x2] sm:$0x3] %vm4331_vm6, %v4453_v45 }
 0x7fe   :  { %v4329_v40 = vpop.permute.xlu0 %4328 }
 0x7ff   :  { %4332 = vst.msk [vmem:[#allocation3] sm:$0x3] %vm4331_vm6, %v4329_v40 }
 0x800   :  { %v4464_v23 = vpop.permute.xlu1 %4463 }
 0x801   :  { %4466 = vst.msk [vmem:[#allocation3 + $0x2] sm:$0x3] %vm4343_vm7, %v4464_v23 }
 0x802   :  { %v4341_v47 = vpop.permute.xlu0 %4340 }
 0x803   :  { %4344 = vst.msk [vmem:[#allocation3] sm:$0x3] %vm4343_vm7, %v4341_v47 }
 0x80a   :  { %v4467_v24 = vld [vmem:[#allocation3] sm:$0xf] }
 0x80b   :  { %v4635_v30 = vmul.f32 -1.442695, %v4467_v24 }
 0x80d   :  { %4665 = vpow2.f32 %v4635_v30 }
 0x81a   :  { %v4666_v18 = vpop.eup %4665 }
 0x81b   :  { %v4471_v59 = vadd.f32 1.0, %v4666_v18 }
 0x81d   :  { %4667 = vrcp.f32 %v4471_v59 }
 0x82a   :  { %v4668_v44 = vpop.eup %4667 }
 0x82b   :  { %v4483_v7 = vrot.slane %v4668_v44, %v4482_v61 }
 0x82d   :  { %v4484_v58 = vcombine.high %v4483_v7, %v4483_v7  ;;  %v4487_v16 = vmul.f32 %v4483_v7, %v4474_v38  ;;  %v4498_v60 = vmul.f32 %v4496_v25, %v4483_v7  ;;  %v4506_v4 = vmul.f32 %v4504_v32, %v4483_v7 }
 0x82e   :  { %v4514_v9 = vmul.f32 %v4512_v57, %v4483_v7 }
 0x82f   :  { %v4488_v20 = vmul.f32 %v4484_v58, %v4475_v48  ;;  %4493 = vst.msk [vmem:[#allocation9] ss:$4 sm:$0x3] %vm9056_vm8, %v4487_v16  ;;  %v4499_v46 = vmul.f32 %v4497_v31, %v4484_v58  ;;  %4501 = vst.msk [vmem:[#allocation9 + $0x1] ss:$4 sm:$0x3] %vm9056_vm8, %v4498_v60  ;;  %v4507_v42 = vmul.f32 %v4505_v36, %v4484_v58 }
 0x830   :  { %4509 = vst.msk [vmem:[#allocation9 + $0x2] ss:$4 sm:$0x3] %vm9056_vm8, %v4506_v4  ;;  %v4515_v41 = vmul.f32 %v4513_v53, %v4484_v58  ;;  %4517 = vst.msk [vmem:[#allocation9 + $0x3] ss:$4 sm:$0x3] %vm9056_vm8, %v4514_v9 }
 0x831   :  { %4495 = vst.msk [vmem:[#allocation9 + $0x8] ss:$4 sm:$0x3] %vm9056_vm8, %v4488_v20  ;;  %4503 = vst.msk [vmem:[#allocation9 + $0x9] ss:$4 sm:$0x3] %vm9056_vm8, %v4499_v46 }
 0x832   :  { %4511 = vst.msk [vmem:[#allocation9 + $0xa] ss:$4 sm:$0x3] %vm9056_vm8, %v4507_v42  ;;  %4519 = vst.msk [vmem:[#allocation9 + $0xb] ss:$4 sm:$0x3] %vm9056_vm8, %v4515_v41 }
 0x833   :  { %4729 = shalt.err (!%p4726_p9)
}
 0x834   :  { %s10290_s22 = smov 8   ;;  %s10291_s23 = smov 128  }
 0x835   :  { %s10292_s3 = sld [smem:[#allocation308_spill]] }
 0x83b   :  { %4531 = dma.vmem_to_hbm [thread:$0]  %s4526_s19, 256, %s10292_s3, [#allocation6], %s10291_s23, %s10291_s23, %s10290_s22  }
 0x83c   :  { %4742 = dma.done.wait [#allocation6], 256  }
 0x83d   :  { %4743 = vsyncadd [#allocation6], 4294967040 }
 0x83e   :  { %4535 = vsyncpa [#allocation5], 1 }
 0x83f   :  { %4536 = vsyncpa [#allocation6], 1 }
 0x840   :  { %4537 = vsyncpa [#allocation7], 1 }

</bundles_post_ra>
